<compile_context>
chip_gen: v6e
topology: v6e:2x2x1
jax: 0.10.0
libtpu: 0.0.40
codegen_flags: <defaults>
</compile_context>

<pallas_src>
import functools

import jax
import jax.numpy as jnp
from jax.experimental import pallas as pl
from jax.experimental.pallas import tpu as pltpu


# ----------------------------------------------------------------------------
# Fused Conv3x3(stride1,pad1) + ReLU + BatchNorm kernel (single-dot im2col).
# ----------------------------------------------------------------------------
def _conv3x3_relu_bn_kernel(xp_ref, w_ref, b_ref, scale_ref, shift_ref, o_ref):
    # xp_ref  : (1, hw_t, 9*Cin)  lane-dense im2col patch tile
    # w_ref   : (9*Cin, Cout)     3x3 kernel flattened (dy, dx, cin)
    # b/scale/shift : (1, Cout)
    # o_ref   : (1, hw_t, Cout)
    y = jnp.dot(xp_ref[0], w_ref[...], preferred_element_type=jnp.float32)
    y = jnp.maximum(y + b_ref[...], 0.0)             # conv bias + ReLU
    o_ref[0] = y * scale_ref[...] + shift_ref[...]   # folded BatchNorm (eval)


def _im2col_channel_concat(x_nhwc):
    """(N,H,W,C) -> (N, H*W, 9*C): zero-padded 3x3 patches, channel-concat.

    One lane-dense write (last dim 9*C), ordering (dy, dx, cin) matches the
    (3,3,Cin,Cout) -> (9*Cin, Cout) weight reshape.
    """
    n, h, w, c = x_nhwc.shape
    xp = jnp.pad(x_nhwc, ((0, 0), (1, 1), (1, 1), (0, 0)))
    cols = [xp[:, dy:dy + h, dx:dx + w, :] for dy in range(3) for dx in range(3)]
    return jnp.concatenate(cols, axis=-1).reshape(n, h * w, 9 * c)


def _pick_hw_tile(hw, max_tile=512):
    """Largest divisor of hw that is a multiple of 8 and <= max_tile, else hw."""
    cands = [t for t in range(8, hw, 8) if hw % t == 0 and t <= max_tile]
    return max(cands) if cands else hw


def conv3x3_relu_bn(x_nhwc, params):
    w, b, scale, shift = params           # (9*Cin,Cout), (1,Cout) x3
    n, h, wdt, cin = x_nhwc.shape
    kdim, cout = w.shape
    hw = h * wdt
    hw_t = _pick_hw_tile(hw)
    xp = _im2col_channel_concat(x_nhwc)   # (N, hw, 9*Cin)

    out = pl.pallas_call(
        _conv3x3_relu_bn_kernel,
        out_shape=jax.ShapeDtypeStruct((n, hw, cout), jnp.float32),
        grid_spec=pltpu.PrefetchScalarGridSpec(
            num_scalar_prefetch=0,
            grid=(n, hw // hw_t),
            in_specs=[
                pl.BlockSpec((1, hw_t, kdim), lambda i, t: (i, t, 0)),
                pl.BlockSpec((kdim, cout), lambda i, t: (0, 0)),
                pl.BlockSpec((1, cout), lambda i, t: (0, 0)),
                pl.BlockSpec((1, cout), lambda i, t: (0, 0)),
                pl.BlockSpec((1, cout), lambda i, t: (0, 0)),
            ],
            out_specs=pl.BlockSpec((1, hw_t, cout), lambda i, t: (i, t, 0)),
        ),
        compiler_params=pltpu.CompilerParams(
            dimension_semantics=("parallel", "parallel")
        ),
    )(xp, w, b, scale, shift)
    return out.reshape(n, h, wdt, cout)


# ----------------------------------------------------------------------------
# Linear (x @ W + b): bf16 weights, f32 accumulation.
# Grid = (output tiles, K tiles); output axis is "parallel" (megacore on v7x),
# K is the trailing "arbitrary" reduction with a VMEM accumulator.
# ----------------------------------------------------------------------------
def _linear_kernel(x_ref, w_ref, b_ref, o_ref, acc_ref):
    k = pl.program_id(1)

    @pl.when(k == 0)
    def _():
        acc_ref[...] = jnp.zeros_like(acc_ref)

    acc_ref[...] += jnp.dot(
        x_ref[...].astype(jnp.bfloat16), w_ref[...],
        preferred_element_type=jnp.float32,
    )

    @pl.when(k == pl.num_programs(1) - 1)
    def _():
        o_ref[...] = acc_ref[...] + b_ref[...]


def linear(x, w, b, *, tk, tn):
    n, kdim = x.shape
    _, m = w.shape
    assert kdim % tk == 0 and m % tn == 0
    return pl.pallas_call(
        _linear_kernel,
        out_shape=jax.ShapeDtypeStruct((n, m), jnp.float32),
        grid_spec=pltpu.PrefetchScalarGridSpec(
            num_scalar_prefetch=0,
            grid=(m // tn, kdim // tk),
            in_specs=[
                pl.BlockSpec((n, tk), lambda j, k: (0, k)),
                pl.BlockSpec((tk, tn), lambda j, k: (k, j)),
                pl.BlockSpec((1, tn), lambda j, k: (0, j)),
            ],
            out_specs=pl.BlockSpec((n, tn), lambda j, k: (0, j)),
            scratch_shapes=[pltpu.VMEM((n, tn), jnp.float32)],
        ),
        compiler_params=pltpu.CompilerParams(
            dimension_semantics=("parallel", "arbitrary")
        ),
    )(x, w, b)


# ----------------------------------------------------------------------------
# Cheap pooling glue (trivial reshapes / means; not the hot path).
# ----------------------------------------------------------------------------
def max_pool2(x):  # MaxPool2d(2), NHWC
    n, h, w, c = x.shape
    return jnp.max(x.reshape(n, h // 2, 2, w // 2, 2, c), axis=(2, 4))


def adaptive_avg_pool(x, out_size):  # AdaptiveAvgPool2d(out_size), NHWC
    n, h, w, c = x.shape
    if h == out_size and w == out_size:
        return x  # exact identity (28x28 input -> 7x7 here): skip 49 slice/means
    rows = []
    for i in range(out_size):
        hs, he = (i * h) // out_size, -((-(i + 1) * h) // out_size)
        cols = []
        for j in range(out_size):
            ws, we = (j * w) // out_size, -((-(j + 1) * w) // out_size)
            cols.append(jnp.mean(x[:, hs:he, ws:we, :], axis=(1, 2)))
        rows.append(jnp.stack(cols, axis=1))
    return jnp.stack(rows, axis=1)  # (N, out, out, C)


# ----------------------------------------------------------------------------
# Deterministic parameter init (synthetic; matches module shapes).
# ----------------------------------------------------------------------------
def _init_conv_block(key, cin, cout):
    k1, k2, k3, k4, k5 = jax.random.split(key, 5)
    w = jax.random.normal(k1, (3, 3, cin, cout), jnp.float32) * 0.05
    b = jax.random.normal(k2, (cout,), jnp.float32) * 0.05
    gamma = 1.0 + 0.1 * jax.random.normal(k3, (cout,), jnp.float32)
    beta = 0.1 * jax.random.normal(k4, (cout,), jnp.float32)
    run_mean = 0.1 * jax.random.normal(k5, (cout,), jnp.float32)
    run_var = jnp.ones((cout,), jnp.float32)
    eps = 1e-5
    scale = gamma / jnp.sqrt(run_var + eps)
    shift = beta - run_mean * scale
    # weight flattened (dy, dx, cin) -> rows of a single (9*Cin, Cout) matmul
    return (w.reshape(9 * cin, cout), b[None, :], scale[None, :], shift[None, :])


def init_params(key, num_classes):
    keys = jax.random.split(key, 7)
    params = {
        "conv1": _init_conv_block(keys[0], 3, 32),
        "conv2": _init_conv_block(keys[1], 32, 64),
        "conv3": _init_conv_block(keys[2], 64, 64),
        "conv4": _init_conv_block(keys[3], 64, 128),
        "conv5": _init_conv_block(keys[4], 128, 128),
    }
    feat = 7 * 7 * 128
    # FC weights streamed as bf16 (memory-bound matmuls); f32 accumulation.
    params["fc1_w"] = (
        jax.random.normal(keys[5], (feat, 1024), jnp.float32) * 0.02
    ).astype(jnp.bfloat16)
    params["fc1_b"] = jnp.zeros((1, 1024), jnp.float32)
    params["fc2_w"] = (
        jax.random.normal(keys[6], (1024, num_classes), jnp.float32) * 0.02
    ).astype(jnp.bfloat16)
    params["fc2_b"] = jnp.zeros((1, num_classes), jnp.float32)
    return params


# ----------------------------------------------------------------------------
# Full forward pass (inference semantics).
# ----------------------------------------------------------------------------
@functools.partial(jax.jit, static_argnames=())
def forward(params, x_nchw):
    x = jnp.transpose(x_nchw, (0, 2, 3, 1)).astype(jnp.float32)  # NCHW -> NHWC
    x = conv3x3_relu_bn(x, params["conv1"])
    x = max_pool2(x)
    x = conv3x3_relu_bn(x, params["conv2"])
    x = conv3x3_relu_bn(x, params["conv3"])
    x = max_pool2(x)
    x = conv3x3_relu_bn(x, params["conv4"])
    x = conv3x3_relu_bn(x, params["conv5"])
    x = adaptive_avg_pool(x, 7)
    # torch.flatten(x, 1) on NCHW: go back to NCHW order before flattening.
    n = x.shape[0]
    x = jnp.transpose(x, (0, 3, 1, 2)).reshape(n, -1)  # (N, 7*7*128)
    # fc1: 6272 -> 1024, split output into 2 parallel 512-wide tiles, K tiled
    # by 896 (both multiples of 128 -> lane-aligned blocks on all chips).
    x = linear(x, params["fc1_w"], params["fc1_b"], tk=896, tn=512)
    # Dropout: identity at inference.
    x = linear(
        x, params["fc2_w"], params["fc2_b"],
        tk=params["fc2_w"].shape[0], tn=params["fc2_w"].shape[1],
    )
    return x


if __name__ == "__main__":
    num_classes = 10
    key = jax.random.PRNGKey(0)
    pkey, xkey = jax.random.split(key)
    params = init_params(pkey, num_classes)
    # Small input consistent with the module: batch=2, 3 channels, 28x28
    # (two MaxPool2d(2) -> 7x7, AdaptiveAvgPool2d(7) is then exact).
    x = jax.random.normal(xkey, (2, 3, 28, 28), jnp.float32)
    out = forward(params, x)
    out = jax.block_until_ready(out)
    assert out.shape == (2, num_classes), out.shape
    print("KERNEL_OK")
</pallas_src>

<mosaic_0001>
module attributes {stable_mosaic.version = 11 : i64} {
  func.func @_conv3x3_relu_bn_kernel(%arg0: i32, %arg1: i32, %arg2: memref<1x392x27xf32, #tpu.memory_space<vmem>>, %arg3: memref<27x32xf32, #tpu.memory_space<vmem>>, %arg4: memref<1x32xf32, #tpu.memory_space<vmem>>, %arg5: memref<1x32xf32, #tpu.memory_space<vmem>>, %arg6: memref<1x32xf32, #tpu.memory_space<vmem>>, %arg7: memref<1x392x32xf32, #tpu.memory_space<vmem>>) attributes {dimension_semantics = [#tpu.dimension_semantics<parallel>, #tpu.dimension_semantics<parallel>], iteration_bounds = array<i64: 2, 2>, scalar_prefetch = 0 : i64, scratch_operands = 0 : i64, tpu.core_type = #tpu.core_type<tc>, window_params = [{transform_indices = @transform_0, window_bounds = array<i64: 1, 392, 27>}, {pipeline_mode = #tpu.pipeline_mode<synchronous>, transform_indices = @transform_1, window_bounds = array<i64: 27, 32>}, {pipeline_mode = #tpu.pipeline_mode<synchronous>, transform_indices = @transform_2, window_bounds = array<i64: 1, 32>}, {pipeline_mode = #tpu.pipeline_mode<synchronous>, transform_indices = @transform_3, window_bounds = array<i64: 1, 32>}, {pipeline_mode = #tpu.pipeline_mode<synchronous>, transform_indices = @transform_4, window_bounds = array<i64: 1, 32>}, {transform_indices = @transform_5, window_bounds = array<i64: 1, 392, 32>}]} {
    %c0 = arith.constant 0 : index
    %c0_0 = arith.constant 0 : index
    %c0_1 = arith.constant 0 : index
    %0 = vector.load %arg2[%c0, %c0_0, %c0_1] : memref<1x392x27xf32, #tpu.memory_space<vmem>>, vector<1x392x27xf32>
    %1 = vector.shape_cast %0 : vector<1x392x27xf32> to vector<392x27xf32>
    %c0_2 = arith.constant 0 : index
    %c0_3 = arith.constant 0 : index
    %2 = vector.load %arg3[%c0_2, %c0_3] : memref<27x32xf32, #tpu.memory_space<vmem>>, vector<27x32xf32>
    %cst = arith.constant dense<0.000000e+00> : vector<392x32xf32>
    %3 = tpu.matmul %1, %2, %cst {dimension_numbers = #tpu.dot_dimension_numbers<[1], [0], [0], [1], [0, 0, 1, 1], [], []>} : vector<392x27xf32>, vector<27x32xf32>, vector<392x32xf32> -> vector<392x32xf32>
    %c0_4 = arith.constant 0 : index
    %c0_5 = arith.constant 0 : index
    %4 = vector.load %arg4[%c0_4, %c0_5] : memref<1x32xf32, #tpu.memory_space<vmem>>, vector<1x32xf32>
    %5 = vector.broadcast %4 : vector<1x32xf32> to vector<392x32xf32>
    %6 = arith.addf %3, %5 : vector<392x32xf32>
    %cst_6 = arith.constant 0.000000e+00 : f32
    %7 = vector.broadcast %cst_6 : f32 to vector<392x32xf32>
    %8 = arith.maximumf %6, %7 : vector<392x32xf32>
    %c0_7 = arith.constant 0 : index
    %c0_8 = arith.constant 0 : index
    %9 = vector.load %arg5[%c0_7, %c0_8] : memref<1x32xf32, #tpu.memory_space<vmem>>, vector<1x32xf32>
    %10 = vector.broadcast %9 : vector<1x32xf32> to vector<392x32xf32>
    %11 = arith.mulf %8, %10 : vector<392x32xf32>
    %c0_9 = arith.constant 0 : index
    %c0_10 = arith.constant 0 : index
    %12 = vector.load %arg6[%c0_9, %c0_10] : memref<1x32xf32, #tpu.memory_space<vmem>>, vector<1x32xf32>
    %13 = vector.broadcast %12 : vector<1x32xf32> to vector<392x32xf32>
    %14 = arith.addf %11, %13 : vector<392x32xf32>
    %c0_11 = arith.constant 0 : index
    %c0_12 = arith.constant 0 : index
    %c0_13 = arith.constant 0 : index
    %15 = vector.load %arg7[%c0_11, %c0_12, %c0_13] : memref<1x392x32xf32, #tpu.memory_space<vmem>>, vector<1x392x32xf32>
    %16 = vector.shape_cast %15 : vector<1x392x32xf32> to vector<392x32xf32>
    %17 = vector.shape_cast %14 : vector<392x32xf32> to vector<1x392x32xf32>
    tpu.vector_store %arg7[%c0_11, %c0_12, %c0_13], %17 {strides = array<i32>} : memref<1x392x32xf32, #tpu.memory_space<vmem>>, vector<1x392x32xf32>,
    return
  }
  func.func @transform_0(%arg0: i32, %arg1: i32) -> (i32, i32, i32) {
    %c0_i32 = arith.constant 0 : i32
    %c0_i32_0 = arith.constant 0 : i32
    return %arg0, %arg1, %c0_i32 : i32, i32, i32
  }
  func.func @transform_1(%arg0: i32, %arg1: i32) -> (i32, i32) {
    %c0_i32 = arith.constant 0 : i32
    %c0_i32_0 = arith.constant 0 : i32
    %c0_i32_1 = arith.constant 0 : i32
    return %c0_i32, %c0_i32_0 : i32, i32
  }
  func.func @transform_2(%arg0: i32, %arg1: i32) -> (i32, i32) {
    %c0_i32 = arith.constant 0 : i32
    %c0_i32_0 = arith.constant 0 : i32
    %c0_i32_1 = arith.constant 0 : i32
    return %c0_i32, %c0_i32_0 : i32, i32
  }
  func.func @transform_3(%arg0: i32, %arg1: i32) -> (i32, i32) {
    %c0_i32 = arith.constant 0 : i32
    %c0_i32_0 = arith.constant 0 : i32
    %c0_i32_1 = arith.constant 0 : i32
    return %c0_i32, %c0_i32_0 : i32, i32
  }
  func.func @transform_4(%arg0: i32, %arg1: i32) -> (i32, i32) {
    %c0_i32 = arith.constant 0 : i32
    %c0_i32_0 = arith.constant 0 : i32
    %c0_i32_1 = arith.constant 0 : i32
    return %c0_i32, %c0_i32_0 : i32, i32
  }
  func.func @transform_5(%arg0: i32, %arg1: i32) -> (i32, i32, i32) {
    %c0_i32 = arith.constant 0 : i32
    %c0_i32_0 = arith.constant 0 : i32
    return %arg0, %arg1, %c0_i32 : i32, i32, i32
  }
}

module attributes {stable_mosaic.version = 11 : i64} {
  func.func @_conv3x3_relu_bn_kernel(%arg0: i32, %arg1: i32, %arg2: memref<1x196x288xf32, #tpu.memory_space<vmem>>, %arg3: memref<288x64xf32, #tpu.memory_space<vmem>>, %arg4: memref<1x64xf32, #tpu.memory_space<vmem>>, %arg5: memref<1x64xf32, #tpu.memory_space<vmem>>, %arg6: memref<1x64xf32, #tpu.memory_space<vmem>>, %arg7: memref<1x196x64xf32, #tpu.memory_space<vmem>>) attributes {dimension_semantics = [#tpu.dimension_semantics<parallel>, #tpu.dimension_semantics<parallel>], iteration_bounds = array<i64: 2, 1>, scalar_prefetch = 0 : i64, scratch_operands = 0 : i64, tpu.core_type = #tpu.core_type<tc>, window_params = [{transform_indices = @transform_0, window_bounds = array<i64: 1, 196, 288>}, {pipeline_mode = #tpu.pipeline_mode<synchronous>, transform_indices = @transform_1, window_bounds = array<i64: 288, 64>}, {pipeline_mode = #tpu.pipeline_mode<synchronous>, transform_indices = @transform_2, window_bounds = array<i64: 1, 64>}, {pipeline_mode = #tpu.pipeline_mode<synchronous>, transform_indices = @transform_3, window_bounds = array<i64: 1, 64>}, {pipeline_mode = #tpu.pipeline_mode<synchronous>, transform_indices = @transform_4, window_bounds = array<i64: 1, 64>}, {transform_indices = @transform_5, window_bounds = array<i64: 1, 196, 64>}]} {
    %c0 = arith.constant 0 : index
    %c0_0 = arith.constant 0 : index
    %c0_1 = arith.constant 0 : index
    %0 = vector.load %arg2[%c0, %c0_0, %c0_1] : memref<1x196x288xf32, #tpu.memory_space<vmem>>, vector<1x196x288xf32>
    %1 = vector.shape_cast %0 : vector<1x196x288xf32> to vector<196x288xf32>
    %c0_2 = arith.constant 0 : index
    %c0_3 = arith.constant 0 : index
    %2 = vector.load %arg3[%c0_2, %c0_3] : memref<288x64xf32, #tpu.memory_space<vmem>>, vector<288x64xf32>
    %cst = arith.constant dense<0.000000e+00> : vector<196x64xf32>
    %3 = tpu.matmul %1, %2, %cst {dimension_numbers = #tpu.dot_dimension_numbers<[1], [0], [0], [1], [0, 0, 1, 1], [], []>} : vector<196x288xf32>, vector<288x64xf32>, vector<196x64xf32> -> vector<196x64xf32>
    %c0_4 = arith.constant 0 : index
    %c0_5 = arith.constant 0 : index
    %4 = vector.load %arg4[%c0_4, %c0_5] : memref<1x64xf32, #tpu.memory_space<vmem>>, vector<1x64xf32>
    %5 = vector.broadcast %4 : vector<1x64xf32> to vector<196x64xf32>
    %6 = arith.addf %3, %5 : vector<196x64xf32>
    %cst_6 = arith.constant 0.000000e+00 : f32
    %7 = vector.broadcast %cst_6 : f32 to vector<196x64xf32>
    %8 = arith.maximumf %6, %7 : vector<196x64xf32>
    %c0_7 = arith.constant 0 : index
    %c0_8 = arith.constant 0 : index
    %9 = vector.load %arg5[%c0_7, %c0_8] : memref<1x64xf32, #tpu.memory_space<vmem>>, vector<1x64xf32>
    %10 = vector.broadcast %9 : vector<1x64xf32> to vector<196x64xf32>
    %11 = arith.mulf %8, %10 : vector<196x64xf32>
    %c0_9 = arith.constant 0 : index
    %c0_10 = arith.constant 0 : index
    %12 = vector.load %arg6[%c0_9, %c0_10] : memref<1x64xf32, #tpu.memory_space<vmem>>, vector<1x64xf32>
    %13 = vector.broadcast %12 : vector<1x64xf32> to vector<196x64xf32>
    %14 = arith.addf %11, %13 : vector<196x64xf32>
    %c0_11 = arith.constant 0 : index
    %c0_12 = arith.constant 0 : index
    %c0_13 = arith.constant 0 : index
    %15 = vector.load %arg7[%c0_11, %c0_12, %c0_13] : memref<1x196x64xf32, #tpu.memory_space<vmem>>, vector<1x196x64xf32>
    %16 = vector.shape_cast %15 : vector<1x196x64xf32> to vector<196x64xf32>
    %17 = vector.shape_cast %14 : vector<196x64xf32> to vector<1x196x64xf32>
    tpu.vector_store %arg7[%c0_11, %c0_12, %c0_13], %17 {strides = array<i32>} : memref<1x196x64xf32, #tpu.memory_space<vmem>>, vector<1x196x64xf32>,
    return
  }
  func.func @transform_0(%arg0: i32, %arg1: i32) -> (i32, i32, i32) {
    %c0_i32 = arith.constant 0 : i32
    %c0_i32_0 = arith.constant 0 : i32
    return %arg0, %arg1, %c0_i32 : i32, i32, i32
  }
  func.func @transform_1(%arg0: i32, %arg1: i32) -> (i32, i32) {
    %c0_i32 = arith.constant 0 : i32
    %c0_i32_0 = arith.constant 0 : i32
    %c0_i32_1 = arith.constant 0 : i32
    return %c0_i32, %c0_i32_0 : i32, i32
  }
  func.func @transform_2(%arg0: i32, %arg1: i32) -> (i32, i32) {
    %c0_i32 = arith.constant 0 : i32
    %c0_i32_0 = arith.constant 0 : i32
    %c0_i32_1 = arith.constant 0 : i32
    return %c0_i32, %c0_i32_0 : i32, i32
  }
  func.func @transform_3(%arg0: i32, %arg1: i32) -> (i32, i32) {
    %c0_i32 = arith.constant 0 : i32
    %c0_i32_0 = arith.constant 0 : i32
    %c0_i32_1 = arith.constant 0 : i32
    return %c0_i32, %c0_i32_0 : i32, i32
  }
  func.func @transform_4(%arg0: i32, %arg1: i32) -> (i32, i32) {
    %c0_i32 = arith.constant 0 : i32
    %c0_i32_0 = arith.constant 0 : i32
    %c0_i32_1 = arith.constant 0 : i32
    return %c0_i32, %c0_i32_0 : i32, i32
  }
  func.func @transform_5(%arg0: i32, %arg1: i32) -> (i32, i32, i32) {
    %c0_i32 = arith.constant 0 : i32
    %c0_i32_0 = arith.constant 0 : i32
    return %arg0, %arg1, %c0_i32 : i32, i32, i32
  }
}

module attributes {stable_mosaic.version = 11 : i64} {
  func.func @_conv3x3_relu_bn_kernel(%arg0: i32, %arg1: i32, %arg2: memref<1x196x576xf32, #tpu.memory_space<vmem>>, %arg3: memref<576x64xf32, #tpu.memory_space<vmem>>, %arg4: memref<1x64xf32, #tpu.memory_space<vmem>>, %arg5: memref<1x64xf32, #tpu.memory_space<vmem>>, %arg6: memref<1x64xf32, #tpu.memory_space<vmem>>, %arg7: memref<1x196x64xf32, #tpu.memory_space<vmem>>) attributes {dimension_semantics = [#tpu.dimension_semantics<parallel>, #tpu.dimension_semantics<parallel>], iteration_bounds = array<i64: 2, 1>, scalar_prefetch = 0 : i64, scratch_operands = 0 : i64, tpu.core_type = #tpu.core_type<tc>, window_params = [{transform_indices = @transform_0, window_bounds = array<i64: 1, 196, 576>}, {pipeline_mode = #tpu.pipeline_mode<synchronous>, transform_indices = @transform_1, window_bounds = array<i64: 576, 64>}, {pipeline_mode = #tpu.pipeline_mode<synchronous>, transform_indices = @transform_2, window_bounds = array<i64: 1, 64>}, {pipeline_mode = #tpu.pipeline_mode<synchronous>, transform_indices = @transform_3, window_bounds = array<i64: 1, 64>}, {pipeline_mode = #tpu.pipeline_mode<synchronous>, transform_indices = @transform_4, window_bounds = array<i64: 1, 64>}, {transform_indices = @transform_5, window_bounds = array<i64: 1, 196, 64>}]} {
    %c0 = arith.constant 0 : index
    %c0_0 = arith.constant 0 : index
    %c0_1 = arith.constant 0 : index
    %0 = vector.load %arg2[%c0, %c0_0, %c0_1] : memref<1x196x576xf32, #tpu.memory_space<vmem>>, vector<1x196x576xf32>
    %1 = vector.shape_cast %0 : vector<1x196x576xf32> to vector<196x576xf32>
    %c0_2 = arith.constant 0 : index
    %c0_3 = arith.constant 0 : index
    %2 = vector.load %arg3[%c0_2, %c0_3] : memref<576x64xf32, #tpu.memory_space<vmem>>, vector<576x64xf32>
    %cst = arith.constant dense<0.000000e+00> : vector<196x64xf32>
    %3 = tpu.matmul %1, %2, %cst {dimension_numbers = #tpu.dot_dimension_numbers<[1], [0], [0], [1], [0, 0, 1, 1], [], []>} : vector<196x576xf32>, vector<576x64xf32>, vector<196x64xf32> -> vector<196x64xf32>
    %c0_4 = arith.constant 0 : index
    %c0_5 = arith.constant 0 : index
    %4 = vector.load %arg4[%c0_4, %c0_5] : memref<1x64xf32, #tpu.memory_space<vmem>>, vector<1x64xf32>
    %5 = vector.broadcast %4 : vector<1x64xf32> to vector<196x64xf32>
    %6 = arith.addf %3, %5 : vector<196x64xf32>
    %cst_6 = arith.constant 0.000000e+00 : f32
    %7 = vector.broadcast %cst_6 : f32 to vector<196x64xf32>
    %8 = arith.maximumf %6, %7 : vector<196x64xf32>
    %c0_7 = arith.constant 0 : index
    %c0_8 = arith.constant 0 : index
    %9 = vector.load %arg5[%c0_7, %c0_8] : memref<1x64xf32, #tpu.memory_space<vmem>>, vector<1x64xf32>
    %10 = vector.broadcast %9 : vector<1x64xf32> to vector<196x64xf32>
    %11 = arith.mulf %8, %10 : vector<196x64xf32>
    %c0_9 = arith.constant 0 : index
    %c0_10 = arith.constant 0 : index
    %12 = vector.load %arg6[%c0_9, %c0_10] : memref<1x64xf32, #tpu.memory_space<vmem>>, vector<1x64xf32>
    %13 = vector.broadcast %12 : vector<1x64xf32> to vector<196x64xf32>
    %14 = arith.addf %11, %13 : vector<196x64xf32>
    %c0_11 = arith.constant 0 : index
    %c0_12 = arith.constant 0 : index
    %c0_13 = arith.constant 0 : index
    %15 = vector.load %arg7[%c0_11, %c0_12, %c0_13] : memref<1x196x64xf32, #tpu.memory_space<vmem>>, vector<1x196x64xf32>
    %16 = vector.shape_cast %15 : vector<1x196x64xf32> to vector<196x64xf32>
    %17 = vector.shape_cast %14 : vector<196x64xf32> to vector<1x196x64xf32>
    tpu.vector_store %arg7[%c0_11, %c0_12, %c0_13], %17 {strides = array<i32>} : memref<1x196x64xf32, #tpu.memory_space<vmem>>, vector<1x196x64xf32>,
    return
  }
  func.func @transform_0(%arg0: i32, %arg1: i32) -> (i32, i32, i32) {
    %c0_i32 = arith.constant 0 : i32
    %c0_i32_0 = arith.constant 0 : i32
    return %arg0, %arg1, %c0_i32 : i32, i32, i32
  }
  func.func @transform_1(%arg0: i32, %arg1: i32) -> (i32, i32) {
    %c0_i32 = arith.constant 0 : i32
    %c0_i32_0 = arith.constant 0 : i32
    %c0_i32_1 = arith.constant 0 : i32
    return %c0_i32, %c0_i32_0 : i32, i32
  }
  func.func @transform_2(%arg0: i32, %arg1: i32) -> (i32, i32) {
    %c0_i32 = arith.constant 0 : i32
    %c0_i32_0 = arith.constant 0 : i32
    %c0_i32_1 = arith.constant 0 : i32
    return %c0_i32, %c0_i32_0 : i32, i32
  }
  func.func @transform_3(%arg0: i32, %arg1: i32) -> (i32, i32) {
    %c0_i32 = arith.constant 0 : i32
    %c0_i32_0 = arith.constant 0 : i32
    %c0_i32_1 = arith.constant 0 : i32
    return %c0_i32, %c0_i32_0 : i32, i32
  }
  func.func @transform_4(%arg0: i32, %arg1: i32) -> (i32, i32) {
    %c0_i32 = arith.constant 0 : i32
    %c0_i32_0 = arith.constant 0 : i32
    %c0_i32_1 = arith.constant 0 : i32
    return %c0_i32, %c0_i32_0 : i32, i32
  }
  func.func @transform_5(%arg0: i32, %arg1: i32) -> (i32, i32, i32) {
    %c0_i32 = arith.constant 0 : i32
    %c0_i32_0 = arith.constant 0 : i32
    return %arg0, %arg1, %c0_i32 : i32, i32, i32
  }
}

module attributes {stable_mosaic.version = 11 : i64} {
  func.func @_conv3x3_relu_bn_kernel(%arg0: i32, %arg1: i32, %arg2: memref<1x49x576xf32, #tpu.memory_space<vmem>>, %arg3: memref<576x128xf32, #tpu.memory_space<vmem>>, %arg4: memref<1x128xf32, #tpu.memory_space<vmem>>, %arg5: memref<1x128xf32, #tpu.memory_space<vmem>>, %arg6: memref<1x128xf32, #tpu.memory_space<vmem>>, %arg7: memref<1x49x128xf32, #tpu.memory_space<vmem>>) attributes {dimension_semantics = [#tpu.dimension_semantics<parallel>, #tpu.dimension_semantics<parallel>], iteration_bounds = array<i64: 2, 1>, scalar_prefetch = 0 : i64, scratch_operands = 0 : i64, tpu.core_type = #tpu.core_type<tc>, window_params = [{transform_indices = @transform_0, window_bounds = array<i64: 1, 49, 576>}, {pipeline_mode = #tpu.pipeline_mode<synchronous>, transform_indices = @transform_1, window_bounds = array<i64: 576, 128>}, {pipeline_mode = #tpu.pipeline_mode<synchronous>, transform_indices = @transform_2, window_bounds = array<i64: 1, 128>}, {pipeline_mode = #tpu.pipeline_mode<synchronous>, transform_indices = @transform_3, window_bounds = array<i64: 1, 128>}, {pipeline_mode = #tpu.pipeline_mode<synchronous>, transform_indices = @transform_4, window_bounds = array<i64: 1, 128>}, {transform_indices = @transform_5, window_bounds = array<i64: 1, 49, 128>}]} {
    %c0 = arith.constant 0 : index
    %c0_0 = arith.constant 0 : index
    %c0_1 = arith.constant 0 : index
    %0 = vector.load %arg2[%c0, %c0_0, %c0_1] : memref<1x49x576xf32, #tpu.memory_space<vmem>>, vector<1x49x576xf32>
    %1 = vector.shape_cast %0 : vector<1x49x576xf32> to vector<49x576xf32>
    %c0_2 = arith.constant 0 : index
    %c0_3 = arith.constant 0 : index
    %2 = vector.load %arg3[%c0_2, %c0_3] : memref<576x128xf32, #tpu.memory_space<vmem>>, vector<576x128xf32>
    %cst = arith.constant dense<0.000000e+00> : vector<49x128xf32>
    %3 = tpu.matmul %1, %2, %cst {dimension_numbers = #tpu.dot_dimension_numbers<[1], [0], [0], [1], [0, 0, 1, 1], [], []>} : vector<49x576xf32>, vector<576x128xf32>, vector<49x128xf32> -> vector<49x128xf32>
    %c0_4 = arith.constant 0 : index
    %c0_5 = arith.constant 0 : index
    %4 = vector.load %arg4[%c0_4, %c0_5] : memref<1x128xf32, #tpu.memory_space<vmem>>, vector<1x128xf32>
    %5 = vector.broadcast %4 : vector<1x128xf32> to vector<49x128xf32>
    %6 = arith.addf %3, %5 : vector<49x128xf32>
    %cst_6 = arith.constant 0.000000e+00 : f32
    %7 = vector.broadcast %cst_6 : f32 to vector<49x128xf32>
    %8 = arith.maximumf %6, %7 : vector<49x128xf32>
    %c0_7 = arith.constant 0 : index
    %c0_8 = arith.constant 0 : index
    %9 = vector.load %arg5[%c0_7, %c0_8] : memref<1x128xf32, #tpu.memory_space<vmem>>, vector<1x128xf32>
    %10 = vector.broadcast %9 : vector<1x128xf32> to vector<49x128xf32>
    %11 = arith.mulf %8, %10 : vector<49x128xf32>
    %c0_9 = arith.constant 0 : index
    %c0_10 = arith.constant 0 : index
    %12 = vector.load %arg6[%c0_9, %c0_10] : memref<1x128xf32, #tpu.memory_space<vmem>>, vector<1x128xf32>
    %13 = vector.broadcast %12 : vector<1x128xf32> to vector<49x128xf32>
    %14 = arith.addf %11, %13 : vector<49x128xf32>
    %c0_11 = arith.constant 0 : index
    %c0_12 = arith.constant 0 : index
    %c0_13 = arith.constant 0 : index
    %15 = vector.load %arg7[%c0_11, %c0_12, %c0_13] : memref<1x49x128xf32, #tpu.memory_space<vmem>>, vector<1x49x128xf32>
    %16 = vector.shape_cast %15 : vector<1x49x128xf32> to vector<49x128xf32>
    %17 = vector.shape_cast %14 : vector<49x128xf32> to vector<1x49x128xf32>
    tpu.vector_store %arg7[%c0_11, %c0_12, %c0_13], %17 {strides = array<i32>} : memref<1x49x128xf32, #tpu.memory_space<vmem>>, vector<1x49x128xf32>,
    return
  }
  func.func @transform_0(%arg0: i32, %arg1: i32) -> (i32, i32, i32) {
    %c0_i32 = arith.constant 0 : i32
    %c0_i32_0 = arith.constant 0 : i32
    return %arg0, %arg1, %c0_i32 : i32, i32, i32
  }
  func.func @transform_1(%arg0: i32, %arg1: i32) -> (i32, i32) {
    %c0_i32 = arith.constant 0 : i32
    %c0_i32_0 = arith.constant 0 : i32
    %c0_i32_1 = arith.constant 0 : i32
    return %c0_i32, %c0_i32_0 : i32, i32
  }
  func.func @transform_2(%arg0: i32, %arg1: i32) -> (i32, i32) {
    %c0_i32 = arith.constant 0 : i32
    %c0_i32_0 = arith.constant 0 : i32
    %c0_i32_1 = arith.constant 0 : i32
    return %c0_i32, %c0_i32_0 : i32, i32
  }
  func.func @transform_3(%arg0: i32, %arg1: i32) -> (i32, i32) {
    %c0_i32 = arith.constant 0 : i32
    %c0_i32_0 = arith.constant 0 : i32
    %c0_i32_1 = arith.constant 0 : i32
    return %c0_i32, %c0_i32_0 : i32, i32
  }
  func.func @transform_4(%arg0: i32, %arg1: i32) -> (i32, i32) {
    %c0_i32 = arith.constant 0 : i32
    %c0_i32_0 = arith.constant 0 : i32
    %c0_i32_1 = arith.constant 0 : i32
    return %c0_i32, %c0_i32_0 : i32, i32
  }
  func.func @transform_5(%arg0: i32, %arg1: i32) -> (i32, i32, i32) {
    %c0_i32 = arith.constant 0 : i32
    %c0_i32_0 = arith.constant 0 : i32
    return %arg0, %arg1, %c0_i32 : i32, i32, i32
  }
}

module attributes {stable_mosaic.version = 11 : i64} {
  func.func @_conv3x3_relu_bn_kernel(%arg0: i32, %arg1: i32, %arg2: memref<1x49x1152xf32, #tpu.memory_space<vmem>>, %arg3: memref<1152x128xf32, #tpu.memory_space<vmem>>, %arg4: memref<1x128xf32, #tpu.memory_space<vmem>>, %arg5: memref<1x128xf32, #tpu.memory_space<vmem>>, %arg6: memref<1x128xf32, #tpu.memory_space<vmem>>, %arg7: memref<1x49x128xf32, #tpu.memory_space<vmem>>) attributes {dimension_semantics = [#tpu.dimension_semantics<parallel>, #tpu.dimension_semantics<parallel>], iteration_bounds = array<i64: 2, 1>, scalar_prefetch = 0 : i64, scratch_operands = 0 : i64, tpu.core_type = #tpu.core_type<tc>, window_params = [{transform_indices = @transform_0, window_bounds = array<i64: 1, 49, 1152>}, {pipeline_mode = #tpu.pipeline_mode<synchronous>, transform_indices = @transform_1, window_bounds = array<i64: 1152, 128>}, {pipeline_mode = #tpu.pipeline_mode<synchronous>, transform_indices = @transform_2, window_bounds = array<i64: 1, 128>}, {pipeline_mode = #tpu.pipeline_mode<synchronous>, transform_indices = @transform_3, window_bounds = array<i64: 1, 128>}, {pipeline_mode = #tpu.pipeline_mode<synchronous>, transform_indices = @transform_4, window_bounds = array<i64: 1, 128>}, {transform_indices = @transform_5, window_bounds = array<i64: 1, 49, 128>}]} {
    %c0 = arith.constant 0 : index
    %c0_0 = arith.constant 0 : index
    %c0_1 = arith.constant 0 : index
    %0 = vector.load %arg2[%c0, %c0_0, %c0_1] : memref<1x49x1152xf32, #tpu.memory_space<vmem>>, vector<1x49x1152xf32>
    %1 = vector.shape_cast %0 : vector<1x49x1152xf32> to vector<49x1152xf32>
    %c0_2 = arith.constant 0 : index
    %c0_3 = arith.constant 0 : index
    %2 = vector.load %arg3[%c0_2, %c0_3] : memref<1152x128xf32, #tpu.memory_space<vmem>>, vector<1152x128xf32>
    %cst = arith.constant dense<0.000000e+00> : vector<49x128xf32>
    %3 = tpu.matmul %1, %2, %cst {dimension_numbers = #tpu.dot_dimension_numbers<[1], [0], [0], [1], [0, 0, 1, 1], [], []>} : vector<49x1152xf32>, vector<1152x128xf32>, vector<49x128xf32> -> vector<49x128xf32>
    %c0_4 = arith.constant 0 : index
    %c0_5 = arith.constant 0 : index
    %4 = vector.load %arg4[%c0_4, %c0_5] : memref<1x128xf32, #tpu.memory_space<vmem>>, vector<1x128xf32>
    %5 = vector.broadcast %4 : vector<1x128xf32> to vector<49x128xf32>
    %6 = arith.addf %3, %5 : vector<49x128xf32>
    %cst_6 = arith.constant 0.000000e+00 : f32
    %7 = vector.broadcast %cst_6 : f32 to vector<49x128xf32>
    %8 = arith.maximumf %6, %7 : vector<49x128xf32>
    %c0_7 = arith.constant 0 : index
    %c0_8 = arith.constant 0 : index
    %9 = vector.load %arg5[%c0_7, %c0_8] : memref<1x128xf32, #tpu.memory_space<vmem>>, vector<1x128xf32>
    %10 = vector.broadcast %9 : vector<1x128xf32> to vector<49x128xf32>
    %11 = arith.mulf %8, %10 : vector<49x128xf32>
    %c0_9 = arith.constant 0 : index
    %c0_10 = arith.constant 0 : index
    %12 = vector.load %arg6[%c0_9, %c0_10] : memref<1x128xf32, #tpu.memory_space<vmem>>, vector<1x128xf32>
    %13 = vector.broadcast %12 : vector<1x128xf32> to vector<49x128xf32>
    %14 = arith.addf %11, %13 : vector<49x128xf32>
    %c0_11 = arith.constant 0 : index
    %c0_12 = arith.constant 0 : index
    %c0_13 = arith.constant 0 : index
    %15 = vector.load %arg7[%c0_11, %c0_12, %c0_13] : memref<1x49x128xf32, #tpu.memory_space<vmem>>, vector<1x49x128xf32>
    %16 = vector.shape_cast %15 : vector<1x49x128xf32> to vector<49x128xf32>
    %17 = vector.shape_cast %14 : vector<49x128xf32> to vector<1x49x128xf32>
    tpu.vector_store %arg7[%c0_11, %c0_12, %c0_13], %17 {strides = array<i32>} : memref<1x49x128xf32, #tpu.memory_space<vmem>>, vector<1x49x128xf32>,
    return
  }
  func.func @transform_0(%arg0: i32, %arg1: i32) -> (i32, i32, i32) {
    %c0_i32 = arith.constant 0 : i32
    %c0_i32_0 = arith.constant 0 : i32
    return %arg0, %arg1, %c0_i32 : i32, i32, i32
  }
  func.func @transform_1(%arg0: i32, %arg1: i32) -> (i32, i32) {
    %c0_i32 = arith.constant 0 : i32
    %c0_i32_0 = arith.constant 0 : i32
    %c0_i32_1 = arith.constant 0 : i32
    return %c0_i32, %c0_i32_0 : i32, i32
  }
  func.func @transform_2(%arg0: i32, %arg1: i32) -> (i32, i32) {
    %c0_i32 = arith.constant 0 : i32
    %c0_i32_0 = arith.constant 0 : i32
    %c0_i32_1 = arith.constant 0 : i32
    return %c0_i32, %c0_i32_0 : i32, i32
  }
  func.func @transform_3(%arg0: i32, %arg1: i32) -> (i32, i32) {
    %c0_i32 = arith.constant 0 : i32
    %c0_i32_0 = arith.constant 0 : i32
    %c0_i32_1 = arith.constant 0 : i32
    return %c0_i32, %c0_i32_0 : i32, i32
  }
  func.func @transform_4(%arg0: i32, %arg1: i32) -> (i32, i32) {
    %c0_i32 = arith.constant 0 : i32
    %c0_i32_0 = arith.constant 0 : i32
    %c0_i32_1 = arith.constant 0 : i32
    return %c0_i32, %c0_i32_0 : i32, i32
  }
  func.func @transform_5(%arg0: i32, %arg1: i32) -> (i32, i32, i32) {
    %c0_i32 = arith.constant 0 : i32
    %c0_i32_0 = arith.constant 0 : i32
    return %arg0, %arg1, %c0_i32 : i32, i32, i32
  }
}

module attributes {stable_mosaic.version = 11 : i64} {
  func.func @_linear_kernel(%arg0: i32, %arg1: i32, %arg2: memref<2x896xf32, #tpu.memory_space<vmem>>, %arg3: memref<896x512xbf16, #tpu.memory_space<vmem>>, %arg4: memref<1x512xf32, #tpu.memory_space<vmem>>, %arg5: memref<2x512xf32, #tpu.memory_space<vmem>>, %arg6: memref<2x512xf32, #tpu.memory_space<vmem>>) attributes {dimension_semantics = [#tpu.dimension_semantics<parallel>, #tpu.dimension_semantics<arbitrary>], iteration_bounds = array<i64: 2, 7>, scalar_prefetch = 0 : i64, scratch_operands = 1 : i64, tpu.core_type = #tpu.core_type<tc>, window_params = [{transform_indices = @transform_0, window_bounds = array<i64: 2, 896>}, {transform_indices = @transform_1, window_bounds = array<i64: 896, 512>}, {transform_indices = @transform_2, window_bounds = array<i64: 1, 512>}, {transform_indices = @transform_3, window_bounds = array<i64: 2, 512>}]} {
    %c0_i32 = arith.constant 0 : i32
    %0 = arith.cmpi eq, %arg1, %c0_i32 : i32
    %1 = arith.extui %0 : i1 to i32
    %c0_i32_0 = arith.constant 0 : i32
    %2 = arith.cmpi ne, %1, %c0_i32_0 : i32
    scf.if %2 {
      %cst_9 = arith.constant 0.000000e+00 : f32
      %13 = vector.broadcast %cst_9 : f32 to vector<2x512xf32>
      %c0_10 = arith.constant 0 : index
      %c0_11 = arith.constant 0 : index
      %14 = vector.load %arg6[%c0_10, %c0_11] : memref<2x512xf32, #tpu.memory_space<vmem>>, vector<2x512xf32>
      tpu.vector_store %arg6[%c0_10, %c0_11], %13 {strides = array<i32>} : memref<2x512xf32, #tpu.memory_space<vmem>>, vector<2x512xf32>,
    } else {
    }
    %c0 = arith.constant 0 : index
    %c0_1 = arith.constant 0 : index
    %3 = vector.load %arg6[%c0, %c0_1] : memref<2x512xf32, #tpu.memory_space<vmem>>, vector<2x512xf32>
    %c0_2 = arith.constant 0 : index
    %c0_3 = arith.constant 0 : index
    %4 = vector.load %arg2[%c0_2, %c0_3] : memref<2x896xf32, #tpu.memory_space<vmem>>, vector<2x896xf32>
    %5 = arith.truncf %4 : vector<2x896xf32> to vector<2x896xbf16>
    %c0_4 = arith.constant 0 : index
    %c0_5 = arith.constant 0 : index
    %6 = vector.load %arg3[%c0_4, %c0_5] : memref<896x512xbf16, #tpu.memory_space<vmem>>, vector<896x512xbf16>
    %cst = arith.constant dense<0.000000e+00> : vector<2x512xf32>
    %7 = tpu.matmul %5, %6, %cst {dimension_numbers = #tpu.dot_dimension_numbers<[1], [0], [0], [1], [0, 0, 1, 1], [], []>} : vector<2x896xbf16>, vector<896x512xbf16>, vector<2x512xf32> -> vector<2x512xf32>
    %8 = arith.addf %3, %7 : vector<2x512xf32>
    %c0_6 = arith.constant 0 : index
    %c0_7 = arith.constant 0 : index
    %9 = vector.load %arg6[%c0_6, %c0_7] : memref<2x512xf32, #tpu.memory_space<vmem>>, vector<2x512xf32>
    tpu.vector_store %arg6[%c0_6, %c0_7], %8 {strides = array<i32>} : memref<2x512xf32, #tpu.memory_space<vmem>>, vector<2x512xf32>,
    %c6_i32 = arith.constant 6 : i32
    %10 = arith.cmpi eq, %arg1, %c6_i32 : i32
    %11 = arith.extui %10 : i1 to i32
    %c0_i32_8 = arith.constant 0 : i32
    %12 = arith.cmpi ne, %11, %c0_i32_8 : i32
    scf.if %12 {
      %c0_9 = arith.constant 0 : index
      %c0_10 = arith.constant 0 : index
      %13 = vector.load %arg6[%c0_9, %c0_10] : memref<2x512xf32, #tpu.memory_space<vmem>>, vector<2x512xf32>
      %c0_11 = arith.constant 0 : index
      %c0_12 = arith.constant 0 : index
      %14 = vector.load %arg4[%c0_11, %c0_12] : memref<1x512xf32, #tpu.memory_space<vmem>>, vector<1x512xf32>
      %15 = vector.broadcast %14 : vector<1x512xf32> to vector<2x512xf32>
      %16 = arith.addf %13, %15 : vector<2x512xf32>
      %c0_13 = arith.constant 0 : index
      %c0_14 = arith.constant 0 : index
      %17 = vector.load %arg5[%c0_13, %c0_14] : memref<2x512xf32, #tpu.memory_space<vmem>>, vector<2x512xf32>
      tpu.vector_store %arg5[%c0_13, %c0_14], %16 {strides = array<i32>} : memref<2x512xf32, #tpu.memory_space<vmem>>, vector<2x512xf32>,
    } else {
    }
    return
  }
  func.func @transform_0(%arg0: i32, %arg1: i32) -> (i32, i32) {
    %c0_i32 = arith.constant 0 : i32
    %c0_i32_0 = arith.constant 0 : i32
    return %c0_i32, %arg1 : i32, i32
  }
  func.func @transform_1(%arg0: i32, %arg1: i32) -> (i32, i32) {
    %c0_i32 = arith.constant 0 : i32
    return %arg1, %arg0 : i32, i32
  }
  func.func @transform_2(%arg0: i32, %arg1: i32) -> (i32, i32) {
    %c0_i32 = arith.constant 0 : i32
    %c0_i32_0 = arith.constant 0 : i32
    return %c0_i32, %arg0 : i32, i32
  }
  func.func @transform_3(%arg0: i32, %arg1: i32) -> (i32, i32) {
    %c0_i32 = arith.constant 0 : i32
    %c0_i32_0 = arith.constant 0 : i32
    return %c0_i32, %arg0 : i32, i32
  }
}

module attributes {stable_mosaic.version = 11 : i64} {
  func.func @_linear_kernel(%arg0: i32, %arg1: i32, %arg2: memref<2x1024xf32, #tpu.memory_space<vmem>>, %arg3: memref<1024x10xbf16, #tpu.memory_space<vmem>>, %arg4: memref<1x10xf32, #tpu.memory_space<vmem>>, %arg5: memref<2x10xf32, #tpu.memory_space<vmem>>, %arg6: memref<2x10xf32, #tpu.memory_space<vmem>>) attributes {dimension_semantics = [#tpu.dimension_semantics<parallel>, #tpu.dimension_semantics<arbitrary>], iteration_bounds = array<i64: 1, 1>, scalar_prefetch = 0 : i64, scratch_operands = 1 : i64, tpu.core_type = #tpu.core_type<tc>, window_params = [{transform_indices = @transform_0, window_bounds = array<i64: 2, 1024>}, {transform_indices = @transform_1, window_bounds = array<i64: 1024, 10>}, {transform_indices = @transform_2, window_bounds = array<i64: 1, 10>}, {transform_indices = @transform_3, window_bounds = array<i64: 2, 10>}]} {
    %c0_i32 = arith.constant 0 : i32
    %0 = arith.cmpi eq, %arg1, %c0_i32 : i32
    %1 = arith.extui %0 : i1 to i32
    %c0_i32_0 = arith.constant 0 : i32
    %2 = arith.cmpi ne, %1, %c0_i32_0 : i32
    scf.if %2 {
      %cst_10 = arith.constant 0.000000e+00 : f32
      %13 = vector.broadcast %cst_10 : f32 to vector<2x10xf32>
      %c0_11 = arith.constant 0 : index
      %c0_12 = arith.constant 0 : index
      %14 = vector.load %arg6[%c0_11, %c0_12] : memref<2x10xf32, #tpu.memory_space<vmem>>, vector<2x10xf32>
      tpu.vector_store %arg6[%c0_11, %c0_12], %13 {strides = array<i32>} : memref<2x10xf32, #tpu.memory_space<vmem>>, vector<2x10xf32>,
    } else {
    }
    %c0 = arith.constant 0 : index
    %c0_1 = arith.constant 0 : index
    %3 = vector.load %arg6[%c0, %c0_1] : memref<2x10xf32, #tpu.memory_space<vmem>>, vector<2x10xf32>
    %c0_2 = arith.constant 0 : index
    %c0_3 = arith.constant 0 : index
    %4 = vector.load %arg2[%c0_2, %c0_3] : memref<2x1024xf32, #tpu.memory_space<vmem>>, vector<2x1024xf32>
    %5 = arith.truncf %4 : vector<2x1024xf32> to vector<2x1024xbf16>
    %c0_4 = arith.constant 0 : index
    %c0_5 = arith.constant 0 : index
    %6 = vector.load %arg3[%c0_4, %c0_5] : memref<1024x10xbf16, #tpu.memory_space<vmem>>, vector<1024x10xbf16>
    %cst = arith.constant dense<0.000000e+00> : vector<2x10xf32>
    %7 = tpu.matmul %5, %6, %cst {dimension_numbers = #tpu.dot_dimension_numbers<[1], [0], [0], [1], [0, 0, 1, 1], [], []>} : vector<2x1024xbf16>, vector<1024x10xbf16>, vector<2x10xf32> -> vector<2x10xf32>
    %8 = arith.addf %3, %7 : vector<2x10xf32>
    %c0_6 = arith.constant 0 : index
    %c0_7 = arith.constant 0 : index
    %9 = vector.load %arg6[%c0_6, %c0_7] : memref<2x10xf32, #tpu.memory_space<vmem>>, vector<2x10xf32>
    tpu.vector_store %arg6[%c0_6, %c0_7], %8 {strides = array<i32>} : memref<2x10xf32, #tpu.memory_space<vmem>>, vector<2x10xf32>,
    %c0_i32_8 = arith.constant 0 : i32
    %10 = arith.cmpi eq, %arg1, %c0_i32_8 : i32
    %11 = arith.extui %10 : i1 to i32
    %c0_i32_9 = arith.constant 0 : i32
    %12 = arith.cmpi ne, %11, %c0_i32_9 : i32
    scf.if %12 {
      %c0_10 = arith.constant 0 : index
      %c0_11 = arith.constant 0 : index
      %13 = vector.load %arg6[%c0_10, %c0_11] : memref<2x10xf32, #tpu.memory_space<vmem>>, vector<2x10xf32>
      %c0_12 = arith.constant 0 : index
      %c0_13 = arith.constant 0 : index
      %14 = vector.load %arg4[%c0_12, %c0_13] : memref<1x10xf32, #tpu.memory_space<vmem>>, vector<1x10xf32>
      %15 = vector.broadcast %14 : vector<1x10xf32> to vector<2x10xf32>
      %16 = arith.addf %13, %15 : vector<2x10xf32>
      %c0_14 = arith.constant 0 : index
      %c0_15 = arith.constant 0 : index
      %17 = vector.load %arg5[%c0_14, %c0_15] : memref<2x10xf32, #tpu.memory_space<vmem>>, vector<2x10xf32>
      tpu.vector_store %arg5[%c0_14, %c0_15], %16 {strides = array<i32>} : memref<2x10xf32, #tpu.memory_space<vmem>>, vector<2x10xf32>,
    } else {
    }
    return
  }
  func.func @transform_0(%arg0: i32, %arg1: i32) -> (i32, i32) {
    %c0_i32 = arith.constant 0 : i32
    %c0_i32_0 = arith.constant 0 : i32
    return %c0_i32, %arg1 : i32, i32
  }
  func.func @transform_1(%arg0: i32, %arg1: i32) -> (i32, i32) {
    %c0_i32 = arith.constant 0 : i32
    return %arg1, %arg0 : i32, i32
  }
  func.func @transform_2(%arg0: i32, %arg1: i32) -> (i32, i32) {
    %c0_i32 = arith.constant 0 : i32
    %c0_i32_0 = arith.constant 0 : i32
    return %c0_i32, %arg0 : i32, i32
  }
  func.func @transform_3(%arg0: i32, %arg1: i32) -> (i32, i32) {
    %c0_i32 = arith.constant 0 : i32
    %c0_i32_0 = arith.constant 0 : i32
    return %c0_i32, %arg0 : i32, i32
  }
}

</mosaic_0001>

<bundles_post_ra>
// kernel: forward.7
= control target key start
LH: loop header
LB: loop body
LE: loop exit
PB: predicated region body
PF: predicated region fallthrough
CT: control target
= control target key end

     0   :  { %10 = vsyncpa [#allocation3], 0  ;;  %s2344_s0 = inlined_call_operand.vmem [shape: f32[2,784,27], index: 0, kind: input, shape index: {}]   ;;  %s2345_s1 = inlined_call_operand.hbm [shape: f32[27,32], index: 1, kind: input, shape index: {}]   ;;  %s2346_s2 = inlined_call_operand.hbm [shape: f32[1,32], index: 2, kind: input, shape index: {}]   ;;  %s2347_s3 = inlined_call_operand.hbm [shape: f32[1,32], index: 3, kind: input, shape index: {}]   ;;  %s2348_s4 = inlined_call_operand.hbm [shape: f32[1,32], index: 4, kind: input, shape index: {}]   ;;  %s2349_s5 = inlined_call_operand.vmem [shape: f32[2,784,32], index: 5, kind: output, shape index: {}]  }
   0x1   :  { %11 = vsyncpa [#allocation5], 0 }
   0x2   :  { %12 = vsyncpa [#allocation8], 0  ;;  %s1747_s18 = smov 0   ;;  %s1749_s19 = smov 0  }
   0x3   :  { %s1751_s20 = smov 0   ;;  %s1753_s21 = smov 0  }
   0x4   :  { %s1755_s22 = smov 0  }
   0x5 LB: > { %s1709_s23 = smov [#allocation4]   ;;  %s1181_s25 = sadd.s32 4294967295, %s1707_s22   ;;  %s1707_s22 = sphi %s1755_s22, %s18_s22   ;;  %s1703_s21 = sphi %s1753_s21, %s2357_s21   ;;  %s1699_s20 = sphi %s1751_s20, %s2356_s20   ;;  %s1695_s19 = sphi %s1749_s19, %s2355_s19   ;;  %s1691_s18 = sphi %s1747_s18, %s2354_s18  }
   0x6   : > { %s201_s24 = sshll.u32 %s1709_s23, 4  ;;  %p1183_p0 = scmp.ge.s32.totalorder %s1707_s22, 1  ;;  %s202_s24 = int_to_ptr.vmem [resolvable:$true] %s201_s24 }
   0x7   : > { %p175_p1 = scmp.lt.s32.totalorder %s1707_s22, 5  ;;  %p1775_p2 = scmp.eq.s32.totalorder %s1181_s25, 0 }
   0x8   : > { %s27_s29 = sadd.s32 1, %s1699_s20  ;;  %s1564_s6 = scalar_lea.vmem %s202_s24, 16 }
   0x9   : > { %p1779_p3 = pnand %p1183_p0, %p175_p1  ;;  %p1792_p6 = scmp.ge.s32.totalorder %s27_s29, 2 }
   0xa   : > { %p1565_p8 = scmp.ne.s32.totalorder %s202_s24, %s1564_s6  ;;  %s1571_s7 = scalar_lea.vmem %s202_s24, 32 }
   0xb   : > { %p1484_p4 = pneg %p1779_p3  ;;  %p1572_p11 = scmp.lt.s32.totalorder %s202_s24, %s202_s24 }
   0xc   : > { %p1573_p12 = scmp.lt.s32.totalorder %s1571_s7, %s1564_s6 }
   0xd   : > { %p1787_p5 = pnand %p1775_p2, %p1484_p4 }
   0xe   : > { %p1574_p13 = por %p1573_p12, %p1572_p11 }
   0xf   : > { %p1555_p7 = pneg %p1787_p5 }
  0x11   : > { %p1567_p9 = pnand %p1565_p8, %p1555_p7 }
  0x13   : > { %p1568_p10 = pneg %p1567_p9 }
  0x15   : > { %p1575_p0 = pnand %p1574_p13, %p1568_p10 }
  0x17   : > { %1578 = shalt.err (!%p1575_p0)
}
  0x18   : > { %1490 = dma.hbm_to_vmem [thread:$0]  (!%p1787_p5), %s2346_s2, 16, %s202_s24, [#allocation5]  }
  0x19   : > { %s2359_s29 = smov (%p1792_p6, %s27_s29), 0  ;;  %s30_s10 = sadd.s32 1, %s1703_s21 }
  0x1a   : > { %s2361_s10 = smov (!%p1792_p6, %s30_s10), %s1703_s21  ;;  %s1710_s11 = smov [#allocation2]  }
  0x1b   : > { %s187_s12 = sshll.u32 %s1710_s11, 4  ;;  %p32_p1 = scmp.ge.s32.totalorder %s2361_s10, 2  ;;  %s188_s12 = int_to_ptr.vmem [resolvable:$true] %s187_s12 }
  0x1c   : > { %s1590_s13 = scalar_lea.vmem %s188_s12, 512  ;;  %p1598_p10 = scmp.lt.s32.totalorder %s188_s12, %s188_s12 }
  0x1d   : > { %s2363_s10 = smov (%p32_p1, %s2361_s10), 0  ;;  %p1591_p4 = scmp.ne.s32.totalorder %s188_s12, %s1590_s13 }
  0x1e   : > { %p1599_p11 = scmp.lt.s32.totalorder %s1590_s13, %s1590_s13 }
  0x1f   : > { %p1593_p8 = pnand %p1591_p4, %p1555_p7 }
  0x20   : > { %p1600_p12 = por %p1599_p11, %p1598_p10 }
  0x21   : > { %p1594_p9 = pneg %p1593_p8 }
  0x23   : > { %p1601_p13 = pnand %p1600_p12, %p1594_p9 }
  0x25   : > { %1604 = shalt.err (!%p1601_p13)
}
  0x26   : > { %s1711_s14 = smov 128   ;;  %s1712_s15 = smov 8  }
  0x27   : > { %1487 = dma.hbm_to_vmem [thread:$0]  (!%p1787_p5), %s2345_s1, 512, %s188_s12, [#allocation3], %s1711_s14, %s1711_s14, %s1712_s15  }
  0x28   : > { %s1713_s23 = smov [#allocation6]   ;;  %s1714_s25 = smov [#allocation7]  }
  0x29   : > { %s212_s24 = sshll.u32 %s1713_s23, 4  ;;  %s223_s30 = sshll.u32 %s1714_s25, 4  ;;  %s213_s24 = int_to_ptr.vmem [resolvable:$true] %s212_s24  ;;  %s224_s30 = int_to_ptr.vmem [resolvable:$true] %s223_s30 }
  0x2a   : > { %s1616_s6 = scalar_lea.vmem %s213_s24, 16  ;;  %s1623_s7 = scalar_lea.vmem %s213_s24, 32 }
  0x2b   : > { %p1617_p6 = scmp.ne.s32.totalorder %s213_s24, %s1616_s6  ;;  %p1624_p4 = scmp.lt.s32.totalorder %s213_s24, %s213_s24 }
  0x2c   : > { %p1625_p8 = scmp.lt.s32.totalorder %s1623_s7, %s1616_s6 }
  0x2d   : > { %p1619_p0 = pnand %p1617_p6, %p1555_p7 }
  0x2e   : > { %p1626_p9 = por %p1625_p8, %p1624_p4 }
  0x2f   : > { %p1620_p1 = pneg %p1619_p0 }
  0x31   : > { %p1627_p10 = pnand %p1626_p9, %p1620_p1 }
  0x33   : > { %1630 = shalt.err (!%p1627_p10)
}
  0x34   : > { %1493 = dma.hbm_to_vmem [thread:$0]  (!%p1787_p5), %s2347_s3, 16, %s213_s24, [#allocation5]  }
  0x35   : > { %s1642_s11 = scalar_lea.vmem %s224_s30, 16  ;;  %s1649_s12 = scalar_lea.vmem %s224_s30, 32 }
  0x36   : > { %p1643_p11 = scmp.ne.s32.totalorder %s224_s30, %s1642_s11  ;;  %p1650_p6 = scmp.lt.s32.totalorder %s224_s30, %s224_s30 }
  0x37   : > { %p1651_p0 = scmp.lt.s32.totalorder %s1649_s12, %s1642_s11 }
  0x38   : > { %p1645_p12 = pnand %p1643_p11, %p1555_p7 }
  0x39   : > { %p1652_p4 = por %p1651_p0, %p1650_p6 }
  0x3a   : > { %p1646_p13 = pneg %p1645_p12 }
  0x3c   : > { %p1653_p1 = pnand %p1652_p4, %p1646_p13 }
  0x3e   : > { %1656 = shalt.err (!%p1653_p1)
}
  0x3f   : > { %1496 = dma.hbm_to_vmem [thread:$0]  (!%p1787_p5), %s2348_s4, 16, %s224_s30, [#allocation8]  }
  0x40   : > { %249 = sbr.rel (%p1779_p3) target bundleno = 382 (0x17e), region = 40 }
  0x45   : > { %1678 = dma.done.wait (%p1775_p2), [#allocation3], 512  }
  0x46   : > { %1680 = vsyncadd (%p1775_p2), [#allocation3], 4294966784 }
  0x47   : > { %1682 = dma.done.wait (%p1775_p2), [#allocation5], 32  }
  0x48   : > { %1684 = vsyncadd (%p1775_p2), [#allocation5], 4294967264 }
  0x49   : > { %1686 = dma.done.wait (%p1775_p2), [#allocation8], 16  }
  0x4a   : > { %1688 = vsyncadd (%p1775_p2), [#allocation8], 4294967280  ;;  %s297_s27 = smul.u32 49, %s1691_s18  ;;  %v1715_v0 = vmov 0.0   ;;  %p298_p3 = scmp.lt.s32.totalorder %s1695_s19, 1  ;;  %vm1716_vm0 = vmmov 0  }
  0x4b   : > { %1304 = vmatprep.subr.mxu0 %v1715_v0  ;;  %1459 = vmatprep.subr.mxu1 %v1715_v0  ;;  %vm525_vm1 = vcmask 1042432   ;;  %v369_v1 = vld [vmem:[#allocation2 + $0x18] sm:$0x7]  ;;  %v368_v2 = vld [vmem:[#allocation2 + $0x10] sm:$0xff]  ;;  %v367_v3 = vld [vmem:[#allocation2 + $0x8] sm:$0xff]  ;;  %vm377_vm2 = vcmask 220160  }
  0x4c   : > { %1312 = vmatprep.mubr.msk.f32.mxu0 %vm1716_vm0, %v1715_v0  ;;  %p300_p5 = scmp.lt.s32.totalorder %s297_s27, 97  ;;  %1387 = vmatprep.mubr.msk.f32.mxu1 %vm1716_vm0, %v1715_v0  ;;  %s2365_s19 = smov (!%p298_p3, %s1695_s19), 1  ;;  %v366_v4 = vld [vmem:[#allocation2] sm:$0xff]  ;;  %vm1000_vm3 = vcmask 261120  }
  0x4d   : > { %s1467_s26 = smul.u32 98, %s2365_s19  ;;  %1305 = vmatpush3.msk.msra.mxu0 %vm525_vm1, %v369_v1  ;;  %1463 = vmatpush3.msk.msra.mxu1 %vm525_vm1, %v369_v1  ;;  %v2071_v54 = vld [vmem:[#allocation4] ss:$0 sm:$0xff]  ;;  %v2075_v59 = vld [vmem:[#allocation6] ss:$0 sm:$0xff] }
  0x4e   : > { %s2367_s27 = smov (!%p300_p5, %s297_s27), 97  ;;  %1306 = vmatprep.subr.mxu0 %v1715_v0  ;;  %1460 = vmatprep.subr.mxu1 %v1715_v0  ;;  %v2077_v1 = vld [vmem:[#allocation7] ss:$0 sm:$0xff] }
  0x4f   : > { %s1863_s18 = sadd.s32 %s1467_s26, %s2367_s27  ;;  %1307 = vmatpush3.msra.mxu0 %v368_v2  ;;  %1464 = vmatpush3.msra.mxu1 %v368_v2 }
  0x50   : > { %s1194_s28 = sshll.u32 %s1863_s18, 3  ;;  %1308 = vmatprep.subr.mxu0 %v1715_v0  ;;  %1461 = vmatprep.subr.mxu1 %v1715_v0 }
  0x51   : > { %s1873_s17 = scalar_lea.vmem %s2344_s0, %s1194_s28  ;;  %1309 = vmatpush3.msra.mxu0 %v367_v3  ;;  %1465 = vmatpush3.msra.mxu1 %v367_v3  ;;  %s2088_s24 = scalar_lea.vmem %s2349_s5, %s1194_s28 }
  0x52   : > { %v317_v5 = vld [vmem:[%s1873_s17] sm:$0xff]  ;;  %v342_v6 = vld [vmem:[%s1873_s17 + $0xc8] sm:$0xff]  ;;  %1310 = vmatprep.subr.mxu0 %v1715_v0  ;;  %1462 = vmatprep.subr.mxu1 %v1715_v0  ;;  %v343_v8 = vld [vmem:[%s1873_s17 + $0xd0] sm:$0xff] }
  0x53   : > { %1311 = vmatpush3.msra.mxu0 %v366_v4  ;;  %1466 = vmatpush3.msra.mxu1 %v366_v4  ;;  %v318_v7 = vld [vmem:[%s1873_s17 + $0x8] sm:$0xff]  ;;  %v319_v9 = vld [vmem:[%s1873_s17 + $0x10] sm:$0xff]  ;;  %v344_v10 = vld [vmem:[%s1873_s17 + $0xd8] sm:$0xff] }
  0x54   : > { %1313 = vmatmul.mubr.msk.f32.vlgmr.msra.gmra.mxu0 %vm377_vm2, %v317_v5  ;;  %1388 = vmatmul.mubr.msk.f32.vlgmr.msra.gmra.mxu1 %vm377_vm2, %v342_v6  ;;  %v320_v11 = vld [vmem:[%s1873_s17 + $0x18] sm:$0xff]  ;;  %v345_v12 = vld [vmem:[%s1873_s17 + $0xe0] sm:$0xff]  ;;  %v346_v14 = vld [vmem:[%s1873_s17 + $0xe8] sm:$0xff] }
  0x55   : > { %1315 = vmatprep.mubr.msk.f32.mxu0 %vm1716_vm0, %v1715_v0  ;;  %1390 = vmatprep.mubr.msk.f32.mxu1 %vm1716_vm0, %v1715_v0  ;;  %v321_v13 = vld [vmem:[%s1873_s17 + $0x20] sm:$0xff]  ;;  %v322_v15 = vld [vmem:[%s1873_s17 + $0x28] sm:$0xff]  ;;  %v347_v16 = vld [vmem:[%s1873_s17 + $0xf0] sm:$0xff] }
  0x56   : > { %v323_v17 = vld [vmem:[%s1873_s17 + $0x30] sm:$0xff]  ;;  %v348_v18 = vld [vmem:[%s1873_s17 + $0xf8] sm:$0xff]  ;;  %v349_v20 = vld [vmem:[%s1873_s17 + $0x100] sm:$0xff] }
  0x57   : > { %v324_v19 = vld [vmem:[%s1873_s17 + $0x38] sm:$0xff]  ;;  %v325_v21 = vld [vmem:[%s1873_s17 + $0x40] sm:$0xff]  ;;  %v350_v22 = vld [vmem:[%s1873_s17 + $0x108] sm:$0xff] }
  0x58   : > { %1316 = vmatmul.mubr.msk.f32.gmra.mxu0 %vm377_vm2, %v318_v7  ;;  %1391 = vmatmul.mubr.msk.f32.gmra.mxu1 %vm377_vm2, %v343_v8  ;;  %v326_v23 = vld [vmem:[%s1873_s17 + $0x48] sm:$0xff]  ;;  %v351_v24 = vld [vmem:[%s1873_s17 + $0x110] sm:$0xff]  ;;  %v352_v26 = vld [vmem:[%s1873_s17 + $0x118] sm:$0xff] }
  0x59   : > { %1318 = vmatprep.mubr.msk.f32.mxu0 %vm1716_vm0, %v1715_v0  ;;  %1393 = vmatprep.mubr.msk.f32.mxu1 %vm1716_vm0, %v1715_v0  ;;  %v327_v25 = vld [vmem:[%s1873_s17 + $0x50] sm:$0xff]  ;;  %v328_v27 = vld [vmem:[%s1873_s17 + $0x58] sm:$0xff]  ;;  %v353_v28 = vld [vmem:[%s1873_s17 + $0x120] sm:$0xff] }
  0x5a   : > { %v329_v29 = vld [vmem:[%s1873_s17 + $0x60] sm:$0xff]  ;;  %v354_v30 = vld [vmem:[%s1873_s17 + $0x128] sm:$0xff]  ;;  %v355_v32 = vld [vmem:[%s1873_s17 + $0x130] sm:$0xff] }
  0x5b   : > { %v330_v31 = vld [vmem:[%s1873_s17 + $0x68] sm:$0xff]  ;;  %v331_v33 = vld [vmem:[%s1873_s17 + $0x70] sm:$0xff]  ;;  %v356_v34 = vld [vmem:[%s1873_s17 + $0x138] sm:$0xff] }
  0x5c   : > { %1319 = vmatmul.mubr.msk.f32.gmra.mxu0 %vm377_vm2, %v319_v9  ;;  %1394 = vmatmul.mubr.msk.f32.gmra.mxu1 %vm377_vm2, %v344_v10  ;;  %v332_v35 = vld [vmem:[%s1873_s17 + $0x78] sm:$0xff]  ;;  %v357_v36 = vld [vmem:[%s1873_s17 + $0x140] sm:$0xff]  ;;  %v358_v38 = vld [vmem:[%s1873_s17 + $0x148] sm:$0xff] }
  0x5d   : > { %1321 = vmatprep.mubr.msk.f32.mxu0 %vm1716_vm0, %v1715_v0  ;;  %1396 = vmatprep.mubr.msk.f32.mxu1 %vm1716_vm0, %v1715_v0  ;;  %v333_v37 = vld [vmem:[%s1873_s17 + $0x80] sm:$0xff]  ;;  %v334_v39 = vld [vmem:[%s1873_s17 + $0x88] sm:$0xff]  ;;  %v359_v40 = vld [vmem:[%s1873_s17 + $0x150] sm:$0xff] }
  0x5e   : > { %v335_v41 = vld [vmem:[%s1873_s17 + $0x90] sm:$0xff]  ;;  %v360_v42 = vld [vmem:[%s1873_s17 + $0x158] sm:$0xff]  ;;  %v361_v44 = vld [vmem:[%s1873_s17 + $0x160] sm:$0xff] }
  0x5f   : > { %v336_v43 = vld [vmem:[%s1873_s17 + $0x98] sm:$0xff]  ;;  %v337_v45 = vld [vmem:[%s1873_s17 + $0xa0] sm:$0xff]  ;;  %v362_v46 = vld [vmem:[%s1873_s17 + $0x168] sm:$0xff] }
  0x60   : > { %1322 = vmatmul.mubr.msk.f32.gmra.mxu0 %vm377_vm2, %v320_v11  ;;  %1397 = vmatmul.mubr.msk.f32.gmra.mxu1 %vm377_vm2, %v345_v12  ;;  %v338_v47 = vld [vmem:[%s1873_s17 + $0xa8] sm:$0xff]  ;;  %v363_v48 = vld [vmem:[%s1873_s17 + $0x170] sm:$0xff]  ;;  %v364_v50 = vld [vmem:[%s1873_s17 + $0x178] sm:$0xff] }
  0x61   : > { %1324 = vmatprep.mubr.msk.f32.mxu0 %vm1716_vm0, %v1715_v0  ;;  %1399 = vmatprep.mubr.msk.f32.mxu1 %vm1716_vm0, %v1715_v0  ;;  %v339_v49 = vld [vmem:[%s1873_s17 + $0xb0] sm:$0xff]  ;;  %v340_v51 = vld [vmem:[%s1873_s17 + $0xb8] sm:$0xff]  ;;  %v365_v52 = vld [vmem:[%s1873_s17 + $0x180] sm:$0xff] }
  0x62   : > { %v341_v53 = vld [vmem:[%s1873_s17 + $0xc0] sm:$0xff] }
  0x64   : > { %1325 = vmatmul.mubr.msk.f32.gmra.mxu0 %vm377_vm2, %v321_v13  ;;  %1400 = vmatmul.mubr.msk.f32.gmra.mxu1 %vm377_vm2, %v346_v14 }
  0x65   : > { %1327 = vmatprep.mubr.msk.f32.mxu0 %vm1716_vm0, %v1715_v0  ;;  %1402 = vmatprep.mubr.msk.f32.mxu1 %vm1716_vm0, %v1715_v0 }
  0x68   : > { %1328 = vmatmul.mubr.msk.f32.gmra.mxu0 %vm377_vm2, %v322_v15  ;;  %1403 = vmatmul.mubr.msk.f32.gmra.mxu1 %vm377_vm2, %v347_v16 }
  0x69   : > { %1330 = vmatprep.mubr.msk.f32.mxu0 %vm1716_vm0, %v1715_v0  ;;  %1405 = vmatprep.mubr.msk.f32.mxu1 %vm1716_vm0, %v1715_v0 }
  0x6c   : > { %1331 = vmatmul.mubr.msk.f32.gmra.mxu0 %vm377_vm2, %v323_v17  ;;  %1406 = vmatmul.mubr.msk.f32.gmra.mxu1 %vm377_vm2, %v348_v18 }
  0x6d   : > { %1333 = vmatprep.mubr.msk.f32.mxu0 %vm1716_vm0, %v1715_v0  ;;  %1408 = vmatprep.mubr.msk.f32.mxu1 %vm1716_vm0, %v1715_v0 }
  0x70   : > { %1334 = vmatmul.mubr.msk.f32.gmra.mxu0 %vm377_vm2, %v324_v19  ;;  %1409 = vmatmul.mubr.msk.f32.gmra.mxu1 %vm377_vm2, %v349_v20 }
  0x71   : > { %1336 = vmatprep.mubr.msk.f32.mxu0 %vm1716_vm0, %v1715_v0  ;;  %1411 = vmatprep.mubr.msk.f32.mxu1 %vm1716_vm0, %v1715_v0 }
  0x74   : > { %1337 = vmatmul.mubr.msk.f32.gmra.mxu0 %vm377_vm2, %v325_v21  ;;  %1412 = vmatmul.mubr.msk.f32.gmra.mxu1 %vm377_vm2, %v350_v22 }
  0x75   : > { %1339 = vmatprep.mubr.msk.f32.mxu0 %vm1716_vm0, %v1715_v0  ;;  %1414 = vmatprep.mubr.msk.f32.mxu1 %vm1716_vm0, %v1715_v0 }
  0x78   : > { %1340 = vmatmul.mubr.msk.f32.gmra.mxu0 %vm377_vm2, %v326_v23  ;;  %1415 = vmatmul.mubr.msk.f32.gmra.mxu1 %vm377_vm2, %v351_v24 }
  0x79   : > { %1342 = vmatprep.mubr.msk.f32.mxu0 %vm1716_vm0, %v1715_v0  ;;  %1417 = vmatprep.mubr.msk.f32.mxu1 %vm1716_vm0, %v1715_v0 }
  0x7c   : > { %1343 = vmatmul.mubr.msk.f32.gmra.mxu0 %vm377_vm2, %v327_v25  ;;  %1418 = vmatmul.mubr.msk.f32.gmra.mxu1 %vm377_vm2, %v352_v26 }
  0x7d   : > { %1345 = vmatprep.mubr.msk.f32.mxu0 %vm1716_vm0, %v1715_v0  ;;  %1420 = vmatprep.mubr.msk.f32.mxu1 %vm1716_vm0, %v1715_v0 }
  0x80   : > { %1346 = vmatmul.mubr.msk.f32.gmra.mxu0 %vm377_vm2, %v328_v27  ;;  %1421 = vmatmul.mubr.msk.f32.gmra.mxu1 %vm377_vm2, %v353_v28 }
  0x81   : > { %1348 = vmatprep.mubr.msk.f32.mxu0 %vm1716_vm0, %v1715_v0  ;;  %1423 = vmatprep.mubr.msk.f32.mxu1 %vm1716_vm0, %v1715_v0 }
  0x84   : > { %1349 = vmatmul.mubr.msk.f32.gmra.mxu0 %vm377_vm2, %v329_v29  ;;  %1424 = vmatmul.mubr.msk.f32.gmra.mxu1 %vm377_vm2, %v354_v30 }
  0x85   : > { %1351 = vmatprep.mubr.msk.f32.mxu0 %vm1716_vm0, %v1715_v0  ;;  %1426 = vmatprep.mubr.msk.f32.mxu1 %vm1716_vm0, %v1715_v0 }
  0x88   : > { %1352 = vmatmul.mubr.msk.f32.gmra.mxu0 %vm377_vm2, %v330_v31  ;;  %1427 = vmatmul.mubr.msk.f32.gmra.mxu1 %vm377_vm2, %v355_v32 }
  0x89   : > { %1354 = vmatprep.mubr.msk.f32.mxu0 %vm1716_vm0, %v1715_v0  ;;  %1429 = vmatprep.mubr.msk.f32.mxu1 %vm1716_vm0, %v1715_v0 }
  0x8c   : > { %1355 = vmatmul.mubr.msk.f32.gmra.mxu0 %vm377_vm2, %v331_v33  ;;  %1430 = vmatmul.mubr.msk.f32.gmra.mxu1 %vm377_vm2, %v356_v34 }
  0x8d   : > { %1357 = vmatprep.mubr.msk.f32.mxu0 %vm1716_vm0, %v1715_v0  ;;  %1432 = vmatprep.mubr.msk.f32.mxu1 %vm1716_vm0, %v1715_v0 }
  0x90   : > { %1358 = vmatmul.mubr.msk.f32.gmra.mxu0 %vm377_vm2, %v332_v35  ;;  %1433 = vmatmul.mubr.msk.f32.gmra.mxu1 %vm377_vm2, %v357_v36 }
  0x91   : > { %1360 = vmatprep.mubr.msk.f32.mxu0 %vm1716_vm0, %v1715_v0  ;;  %1435 = vmatprep.mubr.msk.f32.mxu1 %vm1716_vm0, %v1715_v0 }
  0x94   : > { %1361 = vmatmul.mubr.msk.f32.gmra.mxu0 %vm377_vm2, %v333_v37  ;;  %1436 = vmatmul.mubr.msk.f32.gmra.mxu1 %vm377_vm2, %v358_v38 }
  0x95   : > { %1363 = vmatprep.mubr.msk.f32.mxu0 %vm1716_vm0, %v1715_v0  ;;  %1438 = vmatprep.mubr.msk.f32.mxu1 %vm1716_vm0, %v1715_v0 }
  0x98   : > { %1364 = vmatmul.mubr.msk.f32.gmra.mxu0 %vm377_vm2, %v334_v39  ;;  %1439 = vmatmul.mubr.msk.f32.gmra.mxu1 %vm377_vm2, %v359_v40 }
  0x99   : > { %1366 = vmatprep.mubr.msk.f32.mxu0 %vm1716_vm0, %v1715_v0  ;;  %1441 = vmatprep.mubr.msk.f32.mxu1 %vm1716_vm0, %v1715_v0 }
  0x9c   : > { %1367 = vmatmul.mubr.msk.f32.gmra.mxu0 %vm377_vm2, %v335_v41  ;;  %1442 = vmatmul.mubr.msk.f32.gmra.mxu1 %vm377_vm2, %v360_v42 }
  0x9d   : > { %1369 = vmatprep.mubr.msk.f32.mxu0 %vm1716_vm0, %v1715_v0  ;;  %1444 = vmatprep.mubr.msk.f32.mxu1 %vm1716_vm0, %v1715_v0 }
  0xa0   : > { %1370 = vmatmul.mubr.msk.f32.gmra.mxu0 %vm377_vm2, %v336_v43  ;;  %1445 = vmatmul.mubr.msk.f32.gmra.mxu1 %vm377_vm2, %v361_v44 }
  0xa1   : > { %1372 = vmatprep.mubr.msk.f32.mxu0 %vm1716_vm0, %v1715_v0  ;;  %1447 = vmatprep.mubr.msk.f32.mxu1 %vm1716_vm0, %v1715_v0 }
  0xa4   : > { %1373 = vmatmul.mubr.msk.f32.gmra.mxu0 %vm377_vm2, %v337_v45  ;;  %1448 = vmatmul.mubr.msk.f32.gmra.mxu1 %vm377_vm2, %v362_v46 }
  0xa5   : > { %1375 = vmatprep.mubr.msk.f32.mxu0 %vm1716_vm0, %v1715_v0  ;;  %1450 = vmatprep.mubr.msk.f32.mxu1 %vm1716_vm0, %v1715_v0 }
  0xa8   : > { %1376 = vmatmul.mubr.msk.f32.gmra.mxu0 %vm377_vm2, %v338_v47  ;;  %1451 = vmatmul.mubr.msk.f32.gmra.mxu1 %vm377_vm2, %v363_v48 }
  0xa9   : > { %1378 = vmatprep.mubr.msk.f32.mxu0 %vm1716_vm0, %v1715_v0  ;;  %1453 = vmatprep.mubr.msk.f32.mxu1 %vm1716_vm0, %v1715_v0 }
  0xac   : > { %1379 = vmatmul.mubr.msk.f32.gmra.mxu0 %vm377_vm2, %v339_v49  ;;  %1454 = vmatmul.mubr.msk.f32.gmra.mxu1 %vm377_vm2, %v364_v50 }
  0xad   : > { %1381 = vmatprep.mubr.msk.f32.mxu0 %vm1716_vm0, %v1715_v0  ;;  %1456 = vmatprep.mubr.msk.f32.mxu1 %vm1716_vm0, %v1715_v0 }
  0xb0   : > { %1382 = vmatmul.mubr.msk.f32.gmra.mxu0 %vm377_vm2, %v340_v51  ;;  %1457 = vmatmul.mubr.msk.f32.gmra.mxu1 %vm377_vm2, %v365_v52 }
  0xb1   : > { %1384 = vmatprep.mubr.msk.f32.mxu0 %vm1716_vm0, %v1715_v0 }
  0xb4   : > { %1385 = vmatmul.mubr.msk.f32.gmra.mxu0 %vm377_vm2, %v341_v53 }
 0x114   : > { %v595_v55 = vpop.f32.mrf.mxu0  ;;  %v720_v56 = vpop.f32.mrf.mxu1 }
 0x115   : > { %v596_v57 = vadd.f32 %v2071_v54, %v595_v55  ;;  %v721_v58 = vadd.f32 %v2071_v54, %v720_v56 }
 0x116   : > { %v1314_v60 = vpop.f32.mrf.mxu0  ;;  %v1389_v61 = vpop.f32.mrf.mxu1 }
 0x117   : > { %v839_v62 = vmax.f32 %v596_v57, 0.0  ;;  %v864_v63 = vmax.f32 %v721_v58, 0.0 }
 0x118   : > { %v600_v0 = vpop.f32.mrf.mxu0  ;;  %v725_v2 = vpop.f32.mrf.mxu1 }
 0x119   : > { %v895_v3 = vmul.f32 %v2075_v59, %v839_v62  ;;  %v920_v4 = vmul.f32 %v2075_v59, %v864_v63  ;;  %v601_v5 = vadd.f32 %v2071_v54, %v600_v0  ;;  %v726_v6 = vadd.f32 %v2071_v54, %v725_v2 }
 0x11a   : > { %v1317_v7 = vpop.f32.mrf.mxu0  ;;  %v1392_v8 = vpop.f32.mrf.mxu1 }
 0x11b   : > { %v951_v9 = vadd.f32 %v2077_v1, %v895_v3  ;;  %v976_v10 = vadd.f32 %v2077_v1, %v920_v4  ;;  %v840_v11 = vmax.f32 %v601_v5, 0.0  ;;  %v865_v12 = vmax.f32 %v726_v6, 0.0 }
 0x11c   : > { %v605_v13 = vpop.f32.mrf.mxu0  ;;  %v730_v14 = vpop.f32.mrf.mxu1 }
 0x11d   : > { %1001 = vst.msk [vmem:[%s2088_s24] sm:$0xff] %vm1000_vm3, %v951_v9  ;;  %1026 = vst.msk [vmem:[%s2088_s24 + $0xc8] sm:$0xff] %vm1000_vm3, %v976_v10  ;;  %v896_v15 = vmul.f32 %v2075_v59, %v840_v11  ;;  %v921_v16 = vmul.f32 %v2075_v59, %v865_v12  ;;  %v606_v17 = vadd.f32 %v2071_v54, %v605_v13 }
 0x11e   : > { %v731_v18 = vadd.f32 %v2071_v54, %v730_v14  ;;  %v1320_v19 = vpop.f32.mrf.mxu0  ;;  %v1395_v20 = vpop.f32.mrf.mxu1 }
 0x11f   : > { %v952_v21 = vadd.f32 %v2077_v1, %v896_v15  ;;  %v977_v22 = vadd.f32 %v2077_v1, %v921_v16  ;;  %v841_v23 = vmax.f32 %v606_v17, 0.0 }
 0x120   : > { %v866_v24 = vmax.f32 %v731_v18, 0.0  ;;  %v610_v25 = vpop.f32.mrf.mxu0  ;;  %v735_v26 = vpop.f32.mrf.mxu1 }
 0x121   : > { %1002 = vst.msk [vmem:[%s2088_s24 + $0x8] sm:$0xff] %vm1000_vm3, %v952_v21  ;;  %1027 = vst.msk [vmem:[%s2088_s24 + $0xd0] sm:$0xff] %vm1000_vm3, %v977_v22  ;;  %v897_v27 = vmul.f32 %v2075_v59, %v841_v23  ;;  %v611_v29 = vadd.f32 %v2071_v54, %v610_v25  ;;  %v736_v30 = vadd.f32 %v2071_v54, %v735_v26 }
 0x122   : > { %v922_v28 = vmul.f32 %v2075_v59, %v866_v24  ;;  %v1323_v31 = vpop.f32.mrf.mxu0  ;;  %v1398_v32 = vpop.f32.mrf.mxu1 }
 0x123   : > { %v953_v33 = vadd.f32 %v2077_v1, %v897_v27  ;;  %v842_v35 = vmax.f32 %v611_v29, 0.0  ;;  %v867_v36 = vmax.f32 %v736_v30, 0.0 }
 0x124   : > { %v978_v34 = vadd.f32 %v2077_v1, %v922_v28  ;;  %v615_v37 = vpop.f32.mrf.mxu0  ;;  %v740_v38 = vpop.f32.mrf.mxu1 }
 0x125   : > { %1003 = vst.msk [vmem:[%s2088_s24 + $0x10] sm:$0xff] %vm1000_vm3, %v953_v33  ;;  %v898_v39 = vmul.f32 %v2075_v59, %v842_v35  ;;  %v923_v40 = vmul.f32 %v2075_v59, %v867_v36  ;;  %v616_v41 = vadd.f32 %v2071_v54, %v615_v37  ;;  %v741_v42 = vadd.f32 %v2071_v54, %v740_v38 }
 0x126   : > { %1028 = vst.msk [vmem:[%s2088_s24 + $0xd8] sm:$0xff] %vm1000_vm3, %v978_v34  ;;  %v1326_v43 = vpop.f32.mrf.mxu0  ;;  %v1401_v44 = vpop.f32.mrf.mxu1 }
 0x127   : > { %v954_v45 = vadd.f32 %v2077_v1, %v898_v39  ;;  %v979_v46 = vadd.f32 %v2077_v1, %v923_v40  ;;  %v843_v47 = vmax.f32 %v616_v41, 0.0  ;;  %v868_v48 = vmax.f32 %v741_v42, 0.0 }
 0x128   : > { %v620_v49 = vpop.f32.mrf.mxu0  ;;  %v745_v50 = vpop.f32.mrf.mxu1 }
 0x129   : > { %1004 = vst.msk [vmem:[%s2088_s24 + $0x18] sm:$0xff] %vm1000_vm3, %v954_v45  ;;  %1029 = vst.msk [vmem:[%s2088_s24 + $0xe0] sm:$0xff] %vm1000_vm3, %v979_v46  ;;  %v899_v51 = vmul.f32 %v2075_v59, %v843_v47  ;;  %v924_v52 = vmul.f32 %v2075_v59, %v868_v48  ;;  %v621_v53 = vadd.f32 %v2071_v54, %v620_v49 }
 0x12a   : > { %v746_v55 = vadd.f32 %v2071_v54, %v745_v50  ;;  %v1329_v56 = vpop.f32.mrf.mxu0  ;;  %v1404_v57 = vpop.f32.mrf.mxu1 }
 0x12b   : > { %v955_v58 = vadd.f32 %v2077_v1, %v899_v51  ;;  %v980_v60 = vadd.f32 %v2077_v1, %v924_v52  ;;  %v844_v61 = vmax.f32 %v621_v53, 0.0 }
 0x12c   : > { %v869_v62 = vmax.f32 %v746_v55, 0.0  ;;  %v625_v63 = vpop.f32.mrf.mxu0  ;;  %v750_v0 = vpop.f32.mrf.mxu1 }
 0x12d   : > { %1005 = vst.msk [vmem:[%s2088_s24 + $0x20] sm:$0xff] %vm1000_vm3, %v955_v58  ;;  %1030 = vst.msk [vmem:[%s2088_s24 + $0xe8] sm:$0xff] %vm1000_vm3, %v980_v60  ;;  %v900_v2 = vmul.f32 %v2075_v59, %v844_v61  ;;  %v626_v4 = vadd.f32 %v2071_v54, %v625_v63  ;;  %v751_v5 = vadd.f32 %v2071_v54, %v750_v0 }
 0x12e   : > { %v925_v3 = vmul.f32 %v2075_v59, %v869_v62  ;;  %v1332_v6 = vpop.f32.mrf.mxu0  ;;  %v1407_v7 = vpop.f32.mrf.mxu1 }
 0x12f   : > { %v956_v8 = vadd.f32 %v2077_v1, %v900_v2  ;;  %v845_v10 = vmax.f32 %v626_v4, 0.0  ;;  %v870_v11 = vmax.f32 %v751_v5, 0.0 }
 0x130   : > { %v981_v9 = vadd.f32 %v2077_v1, %v925_v3  ;;  %v630_v12 = vpop.f32.mrf.mxu0  ;;  %v755_v13 = vpop.f32.mrf.mxu1 }
 0x131   : > { %1006 = vst.msk [vmem:[%s2088_s24 + $0x28] sm:$0xff] %vm1000_vm3, %v956_v8  ;;  %v901_v14 = vmul.f32 %v2075_v59, %v845_v10  ;;  %v926_v15 = vmul.f32 %v2075_v59, %v870_v11  ;;  %v631_v16 = vadd.f32 %v2071_v54, %v630_v12  ;;  %v756_v17 = vadd.f32 %v2071_v54, %v755_v13 }
 0x132   : > { %1031 = vst.msk [vmem:[%s2088_s24 + $0xf0] sm:$0xff] %vm1000_vm3, %v981_v9  ;;  %v1335_v18 = vpop.f32.mrf.mxu0  ;;  %v1410_v19 = vpop.f32.mrf.mxu1 }
 0x133   : > { %v957_v20 = vadd.f32 %v2077_v1, %v901_v14  ;;  %v982_v21 = vadd.f32 %v2077_v1, %v926_v15  ;;  %v846_v22 = vmax.f32 %v631_v16, 0.0  ;;  %v871_v23 = vmax.f32 %v756_v17, 0.0 }
 0x134   : > { %v635_v24 = vpop.f32.mrf.mxu0  ;;  %v760_v25 = vpop.f32.mrf.mxu1 }
 0x135   : > { %1007 = vst.msk [vmem:[%s2088_s24 + $0x30] sm:$0xff] %vm1000_vm3, %v957_v20  ;;  %1032 = vst.msk [vmem:[%s2088_s24 + $0xf8] sm:$0xff] %vm1000_vm3, %v982_v21  ;;  %v902_v26 = vmul.f32 %v2075_v59, %v846_v22  ;;  %v927_v27 = vmul.f32 %v2075_v59, %v871_v23  ;;  %v636_v28 = vadd.f32 %v2071_v54, %v635_v24 }
 0x136   : > { %v761_v29 = vadd.f32 %v2071_v54, %v760_v25  ;;  %v1338_v30 = vpop.f32.mrf.mxu0  ;;  %v1413_v31 = vpop.f32.mrf.mxu1 }
 0x137   : > { %v958_v32 = vadd.f32 %v2077_v1, %v902_v26  ;;  %v983_v33 = vadd.f32 %v2077_v1, %v927_v27  ;;  %v847_v34 = vmax.f32 %v636_v28, 0.0 }
 0x138   : > { %v872_v35 = vmax.f32 %v761_v29, 0.0  ;;  %v640_v36 = vpop.f32.mrf.mxu0  ;;  %v765_v37 = vpop.f32.mrf.mxu1 }
 0x139   : > { %1008 = vst.msk [vmem:[%s2088_s24 + $0x38] sm:$0xff] %vm1000_vm3, %v958_v32  ;;  %1033 = vst.msk [vmem:[%s2088_s24 + $0x100] sm:$0xff] %vm1000_vm3, %v983_v33  ;;  %v903_v38 = vmul.f32 %v2075_v59, %v847_v34  ;;  %v641_v40 = vadd.f32 %v2071_v54, %v640_v36  ;;  %v766_v41 = vadd.f32 %v2071_v54, %v765_v37 }
 0x13a   : > { %v928_v39 = vmul.f32 %v2075_v59, %v872_v35  ;;  %v1341_v42 = vpop.f32.mrf.mxu0  ;;  %v1416_v43 = vpop.f32.mrf.mxu1 }
 0x13b   : > { %v959_v44 = vadd.f32 %v2077_v1, %v903_v38  ;;  %v848_v46 = vmax.f32 %v641_v40, 0.0  ;;  %v873_v47 = vmax.f32 %v766_v41, 0.0 }
 0x13c   : > { %v984_v45 = vadd.f32 %v2077_v1, %v928_v39  ;;  %v645_v48 = vpop.f32.mrf.mxu0  ;;  %v770_v49 = vpop.f32.mrf.mxu1 }
 0x13d   : > { %1009 = vst.msk [vmem:[%s2088_s24 + $0x40] sm:$0xff] %vm1000_vm3, %v959_v44  ;;  %v904_v50 = vmul.f32 %v2075_v59, %v848_v46  ;;  %v929_v51 = vmul.f32 %v2075_v59, %v873_v47  ;;  %v646_v52 = vadd.f32 %v2071_v54, %v645_v48  ;;  %v771_v53 = vadd.f32 %v2071_v54, %v770_v49 }
 0x13e   : > { %1034 = vst.msk [vmem:[%s2088_s24 + $0x108] sm:$0xff] %vm1000_vm3, %v984_v45  ;;  %v1344_v55 = vpop.f32.mrf.mxu0  ;;  %v1419_v56 = vpop.f32.mrf.mxu1 }
 0x13f   : > { %v960_v57 = vadd.f32 %v2077_v1, %v904_v50  ;;  %v985_v58 = vadd.f32 %v2077_v1, %v929_v51  ;;  %v849_v60 = vmax.f32 %v646_v52, 0.0  ;;  %v874_v61 = vmax.f32 %v771_v53, 0.0 }
 0x140   : > { %v650_v62 = vpop.f32.mrf.mxu0  ;;  %v775_v63 = vpop.f32.mrf.mxu1 }
 0x141   : > { %1010 = vst.msk [vmem:[%s2088_s24 + $0x48] sm:$0xff] %vm1000_vm3, %v960_v57  ;;  %1035 = vst.msk [vmem:[%s2088_s24 + $0x110] sm:$0xff] %vm1000_vm3, %v985_v58  ;;  %v905_v0 = vmul.f32 %v2075_v59, %v849_v60  ;;  %v930_v2 = vmul.f32 %v2075_v59, %v874_v61  ;;  %v651_v3 = vadd.f32 %v2071_v54, %v650_v62 }
 0x142   : > { %v776_v4 = vadd.f32 %v2071_v54, %v775_v63  ;;  %v1347_v5 = vpop.f32.mrf.mxu0  ;;  %v1422_v6 = vpop.f32.mrf.mxu1 }
 0x143   : > { %v961_v7 = vadd.f32 %v2077_v1, %v905_v0  ;;  %v986_v8 = vadd.f32 %v2077_v1, %v930_v2  ;;  %v850_v9 = vmax.f32 %v651_v3, 0.0 }
 0x144   : > { %v875_v10 = vmax.f32 %v776_v4, 0.0  ;;  %v655_v11 = vpop.f32.mrf.mxu0  ;;  %v780_v12 = vpop.f32.mrf.mxu1 }
 0x145   : > { %1011 = vst.msk [vmem:[%s2088_s24 + $0x50] sm:$0xff] %vm1000_vm3, %v961_v7  ;;  %1036 = vst.msk [vmem:[%s2088_s24 + $0x118] sm:$0xff] %vm1000_vm3, %v986_v8  ;;  %v906_v13 = vmul.f32 %v2075_v59, %v850_v9  ;;  %v656_v15 = vadd.f32 %v2071_v54, %v655_v11  ;;  %v781_v16 = vadd.f32 %v2071_v54, %v780_v12 }
 0x146   : > { %v931_v14 = vmul.f32 %v2075_v59, %v875_v10  ;;  %v1350_v17 = vpop.f32.mrf.mxu0  ;;  %v1425_v18 = vpop.f32.mrf.mxu1 }
 0x147   : > { %v962_v19 = vadd.f32 %v2077_v1, %v906_v13  ;;  %v851_v21 = vmax.f32 %v656_v15, 0.0  ;;  %v876_v22 = vmax.f32 %v781_v16, 0.0 }
 0x148   : > { %v987_v20 = vadd.f32 %v2077_v1, %v931_v14  ;;  %v660_v23 = vpop.f32.mrf.mxu0  ;;  %v785_v24 = vpop.f32.mrf.mxu1 }
 0x149   : > { %1012 = vst.msk [vmem:[%s2088_s24 + $0x58] sm:$0xff] %vm1000_vm3, %v962_v19  ;;  %v907_v25 = vmul.f32 %v2075_v59, %v851_v21  ;;  %v932_v26 = vmul.f32 %v2075_v59, %v876_v22  ;;  %v661_v27 = vadd.f32 %v2071_v54, %v660_v23  ;;  %v786_v28 = vadd.f32 %v2071_v54, %v785_v24 }
 0x14a   : > { %1037 = vst.msk [vmem:[%s2088_s24 + $0x120] sm:$0xff] %vm1000_vm3, %v987_v20  ;;  %v1353_v29 = vpop.f32.mrf.mxu0  ;;  %v1428_v30 = vpop.f32.mrf.mxu1 }
 0x14b   : > { %v963_v31 = vadd.f32 %v2077_v1, %v907_v25  ;;  %v988_v32 = vadd.f32 %v2077_v1, %v932_v26  ;;  %v852_v33 = vmax.f32 %v661_v27, 0.0  ;;  %v877_v34 = vmax.f32 %v786_v28, 0.0 }
 0x14c   : > { %v665_v35 = vpop.f32.mrf.mxu0  ;;  %v790_v36 = vpop.f32.mrf.mxu1 }
 0x14d   : > { %1013 = vst.msk [vmem:[%s2088_s24 + $0x60] sm:$0xff] %vm1000_vm3, %v963_v31  ;;  %1038 = vst.msk [vmem:[%s2088_s24 + $0x128] sm:$0xff] %vm1000_vm3, %v988_v32  ;;  %v908_v37 = vmul.f32 %v2075_v59, %v852_v33  ;;  %v933_v38 = vmul.f32 %v2075_v59, %v877_v34  ;;  %v666_v39 = vadd.f32 %v2071_v54, %v665_v35 }
 0x14e   : > { %v791_v40 = vadd.f32 %v2071_v54, %v790_v36  ;;  %v1356_v41 = vpop.f32.mrf.mxu0  ;;  %v1431_v42 = vpop.f32.mrf.mxu1 }
 0x14f   : > { %v964_v43 = vadd.f32 %v2077_v1, %v908_v37  ;;  %v989_v44 = vadd.f32 %v2077_v1, %v933_v38  ;;  %v853_v45 = vmax.f32 %v666_v39, 0.0 }
 0x150   : > { %v878_v46 = vmax.f32 %v791_v40, 0.0  ;;  %v670_v47 = vpop.f32.mrf.mxu0  ;;  %v795_v48 = vpop.f32.mrf.mxu1 }
 0x151   : > { %1014 = vst.msk [vmem:[%s2088_s24 + $0x68] sm:$0xff] %vm1000_vm3, %v964_v43  ;;  %1039 = vst.msk [vmem:[%s2088_s24 + $0x130] sm:$0xff] %vm1000_vm3, %v989_v44  ;;  %v909_v49 = vmul.f32 %v2075_v59, %v853_v45  ;;  %v671_v51 = vadd.f32 %v2071_v54, %v670_v47  ;;  %v796_v52 = vadd.f32 %v2071_v54, %v795_v48 }
 0x152   : > { %v934_v50 = vmul.f32 %v2075_v59, %v878_v46  ;;  %v1359_v53 = vpop.f32.mrf.mxu0  ;;  %v1434_v55 = vpop.f32.mrf.mxu1 }
 0x153   : > { %v965_v56 = vadd.f32 %v2077_v1, %v909_v49  ;;  %v854_v58 = vmax.f32 %v671_v51, 0.0  ;;  %v879_v60 = vmax.f32 %v796_v52, 0.0 }
 0x154   : > { %v990_v57 = vadd.f32 %v2077_v1, %v934_v50  ;;  %v675_v61 = vpop.f32.mrf.mxu0  ;;  %v800_v62 = vpop.f32.mrf.mxu1 }
 0x155   : > { %1015 = vst.msk [vmem:[%s2088_s24 + $0x70] sm:$0xff] %vm1000_vm3, %v965_v56  ;;  %v910_v63 = vmul.f32 %v2075_v59, %v854_v58  ;;  %v935_v0 = vmul.f32 %v2075_v59, %v879_v60  ;;  %v676_v2 = vadd.f32 %v2071_v54, %v675_v61  ;;  %v801_v3 = vadd.f32 %v2071_v54, %v800_v62 }
 0x156   : > { %1040 = vst.msk [vmem:[%s2088_s24 + $0x138] sm:$0xff] %vm1000_vm3, %v990_v57  ;;  %v1362_v4 = vpop.f32.mrf.mxu0  ;;  %v1437_v5 = vpop.f32.mrf.mxu1 }
 0x157   : > { %v966_v6 = vadd.f32 %v2077_v1, %v910_v63  ;;  %v991_v7 = vadd.f32 %v2077_v1, %v935_v0  ;;  %v855_v8 = vmax.f32 %v676_v2, 0.0  ;;  %v880_v9 = vmax.f32 %v801_v3, 0.0 }
 0x158   : > { %v680_v10 = vpop.f32.mrf.mxu0  ;;  %v805_v11 = vpop.f32.mrf.mxu1 }
 0x159   : > { %1016 = vst.msk [vmem:[%s2088_s24 + $0x78] sm:$0xff] %vm1000_vm3, %v966_v6  ;;  %1041 = vst.msk [vmem:[%s2088_s24 + $0x140] sm:$0xff] %vm1000_vm3, %v991_v7  ;;  %v911_v12 = vmul.f32 %v2075_v59, %v855_v8  ;;  %v936_v13 = vmul.f32 %v2075_v59, %v880_v9  ;;  %v681_v14 = vadd.f32 %v2071_v54, %v680_v10 }
 0x15a   : > { %v806_v15 = vadd.f32 %v2071_v54, %v805_v11  ;;  %v1365_v16 = vpop.f32.mrf.mxu0  ;;  %v1440_v17 = vpop.f32.mrf.mxu1 }
 0x15b   : > { %v967_v18 = vadd.f32 %v2077_v1, %v911_v12  ;;  %v992_v19 = vadd.f32 %v2077_v1, %v936_v13  ;;  %v856_v20 = vmax.f32 %v681_v14, 0.0 }
 0x15c   : > { %v881_v21 = vmax.f32 %v806_v15, 0.0  ;;  %v685_v22 = vpop.f32.mrf.mxu0  ;;  %v810_v23 = vpop.f32.mrf.mxu1 }
 0x15d   : > { %1017 = vst.msk [vmem:[%s2088_s24 + $0x80] sm:$0xff] %vm1000_vm3, %v967_v18  ;;  %1042 = vst.msk [vmem:[%s2088_s24 + $0x148] sm:$0xff] %vm1000_vm3, %v992_v19  ;;  %v912_v24 = vmul.f32 %v2075_v59, %v856_v20  ;;  %v686_v26 = vadd.f32 %v2071_v54, %v685_v22  ;;  %v811_v27 = vadd.f32 %v2071_v54, %v810_v23 }
 0x15e   : > { %v937_v25 = vmul.f32 %v2075_v59, %v881_v21  ;;  %v1368_v28 = vpop.f32.mrf.mxu0  ;;  %v1443_v29 = vpop.f32.mrf.mxu1 }
 0x15f   : > { %v968_v30 = vadd.f32 %v2077_v1, %v912_v24  ;;  %v857_v32 = vmax.f32 %v686_v26, 0.0  ;;  %v882_v33 = vmax.f32 %v811_v27, 0.0 }
 0x160   : > { %v993_v31 = vadd.f32 %v2077_v1, %v937_v25  ;;  %v690_v34 = vpop.f32.mrf.mxu0  ;;  %v815_v35 = vpop.f32.mrf.mxu1 }
 0x161   : > { %1018 = vst.msk [vmem:[%s2088_s24 + $0x88] sm:$0xff] %vm1000_vm3, %v968_v30  ;;  %v913_v36 = vmul.f32 %v2075_v59, %v857_v32  ;;  %v938_v37 = vmul.f32 %v2075_v59, %v882_v33  ;;  %v691_v38 = vadd.f32 %v2071_v54, %v690_v34  ;;  %v816_v39 = vadd.f32 %v2071_v54, %v815_v35 }
 0x162   : > { %1043 = vst.msk [vmem:[%s2088_s24 + $0x150] sm:$0xff] %vm1000_vm3, %v993_v31  ;;  %v1371_v40 = vpop.f32.mrf.mxu0  ;;  %v1446_v41 = vpop.f32.mrf.mxu1 }
 0x163   : > { %v969_v42 = vadd.f32 %v2077_v1, %v913_v36  ;;  %v994_v43 = vadd.f32 %v2077_v1, %v938_v37  ;;  %v858_v44 = vmax.f32 %v691_v38, 0.0  ;;  %v883_v45 = vmax.f32 %v816_v39, 0.0 }
 0x164   : > { %v695_v46 = vpop.f32.mrf.mxu0  ;;  %v820_v47 = vpop.f32.mrf.mxu1 }
 0x165   : > { %1019 = vst.msk [vmem:[%s2088_s24 + $0x90] sm:$0xff] %vm1000_vm3, %v969_v42  ;;  %1044 = vst.msk [vmem:[%s2088_s24 + $0x158] sm:$0xff] %vm1000_vm3, %v994_v43  ;;  %v914_v48 = vmul.f32 %v2075_v59, %v858_v44  ;;  %v939_v49 = vmul.f32 %v2075_v59, %v883_v45  ;;  %v696_v50 = vadd.f32 %v2071_v54, %v695_v46 }
 0x166   : > { %v821_v51 = vadd.f32 %v2071_v54, %v820_v47  ;;  %v1374_v52 = vpop.f32.mrf.mxu0  ;;  %v1449_v53 = vpop.f32.mrf.mxu1 }
 0x167   : > { %v970_v55 = vadd.f32 %v2077_v1, %v914_v48  ;;  %v995_v56 = vadd.f32 %v2077_v1, %v939_v49  ;;  %v859_v57 = vmax.f32 %v696_v50, 0.0 }
 0x168   : > { %v884_v58 = vmax.f32 %v821_v51, 0.0  ;;  %v700_v60 = vpop.f32.mrf.mxu0  ;;  %v825_v61 = vpop.f32.mrf.mxu1 }
 0x169   : > { %1020 = vst.msk [vmem:[%s2088_s24 + $0x98] sm:$0xff] %vm1000_vm3, %v970_v55  ;;  %1045 = vst.msk [vmem:[%s2088_s24 + $0x160] sm:$0xff] %vm1000_vm3, %v995_v56  ;;  %v915_v62 = vmul.f32 %v2075_v59, %v859_v57  ;;  %v701_v0 = vadd.f32 %v2071_v54, %v700_v60  ;;  %v826_v2 = vadd.f32 %v2071_v54, %v825_v61 }
 0x16a   : > { %v940_v63 = vmul.f32 %v2075_v59, %v884_v58  ;;  %v1377_v3 = vpop.f32.mrf.mxu0  ;;  %v1452_v4 = vpop.f32.mrf.mxu1 }
 0x16b   : > { %v971_v5 = vadd.f32 %v2077_v1, %v915_v62  ;;  %v860_v7 = vmax.f32 %v701_v0, 0.0  ;;  %v885_v8 = vmax.f32 %v826_v2, 0.0 }
 0x16c   : > { %v996_v6 = vadd.f32 %v2077_v1, %v940_v63  ;;  %v705_v9 = vpop.f32.mrf.mxu0  ;;  %v830_v10 = vpop.f32.mrf.mxu1 }
 0x16d   : > { %1021 = vst.msk [vmem:[%s2088_s24 + $0xa0] sm:$0xff] %vm1000_vm3, %v971_v5  ;;  %v916_v11 = vmul.f32 %v2075_v59, %v860_v7  ;;  %v941_v12 = vmul.f32 %v2075_v59, %v885_v8  ;;  %v706_v13 = vadd.f32 %v2071_v54, %v705_v9  ;;  %v831_v14 = vadd.f32 %v2071_v54, %v830_v10 }
 0x16e   : > { %1046 = vst.msk [vmem:[%s2088_s24 + $0x168] sm:$0xff] %vm1000_vm3, %v996_v6  ;;  %v1380_v15 = vpop.f32.mrf.mxu0  ;;  %v1455_v16 = vpop.f32.mrf.mxu1 }
 0x16f   : > { %v972_v17 = vadd.f32 %v2077_v1, %v916_v11  ;;  %v997_v18 = vadd.f32 %v2077_v1, %v941_v12  ;;  %v861_v19 = vmax.f32 %v706_v13, 0.0  ;;  %v886_v20 = vmax.f32 %v831_v14, 0.0 }
 0x170   : > { %v710_v21 = vpop.f32.mrf.mxu0  ;;  %v835_v22 = vpop.f32.mrf.mxu1 }
 0x171   : > { %1022 = vst.msk [vmem:[%s2088_s24 + $0xa8] sm:$0xff] %vm1000_vm3, %v972_v17  ;;  %1047 = vst.msk [vmem:[%s2088_s24 + $0x170] sm:$0xff] %vm1000_vm3, %v997_v18  ;;  %v917_v23 = vmul.f32 %v2075_v59, %v861_v19  ;;  %v942_v24 = vmul.f32 %v2075_v59, %v886_v20  ;;  %v711_v25 = vadd.f32 %v2071_v54, %v710_v21 }
 0x172   : > { %v836_v26 = vadd.f32 %v2071_v54, %v835_v22  ;;  %v1383_v27 = vpop.f32.mrf.mxu0  ;;  %v1458_v28 = vpop.f32.mrf.mxu1 }
 0x173   : > { %v973_v29 = vadd.f32 %v2077_v1, %v917_v23  ;;  %v998_v30 = vadd.f32 %v2077_v1, %v942_v24  ;;  %v862_v31 = vmax.f32 %v711_v25, 0.0 }
 0x174   : > { %v887_v32 = vmax.f32 %v836_v26, 0.0  ;;  %v715_v33 = vpop.f32.mrf.mxu0 }
 0x175   : > { %1023 = vst.msk [vmem:[%s2088_s24 + $0xb0] sm:$0xff] %vm1000_vm3, %v973_v29  ;;  %1048 = vst.msk [vmem:[%s2088_s24 + $0x178] sm:$0xff] %vm1000_vm3, %v998_v30  ;;  %v918_v34 = vmul.f32 %v2075_v59, %v862_v31  ;;  %v716_v36 = vadd.f32 %v2071_v54, %v715_v33 }
 0x176   : > { %v943_v35 = vmul.f32 %v2075_v59, %v887_v32  ;;  %v1386_v37 = vpop.f32.mrf.mxu0 }
 0x177   : > { %v974_v38 = vadd.f32 %v2077_v1, %v918_v34  ;;  %v863_v40 = vmax.f32 %v716_v36, 0.0 }
 0x178   : > { %v999_v39 = vadd.f32 %v2077_v1, %v943_v35 }
 0x179   : > { %1024 = vst.msk [vmem:[%s2088_s24 + $0xb8] sm:$0xff] %vm1000_vm3, %v974_v38  ;;  %v919_v41 = vmul.f32 %v2075_v59, %v863_v40 }
 0x17a   : > { %1049 = vst.msk [vmem:[%s2088_s24 + $0x180] sm:$0xff] %vm1000_vm3, %v999_v39 }
 0x17b   : > { %v975_v42 = vadd.f32 %v2077_v1, %v919_v41 }
 0x17d   : > { %1025 = vst.msk [vmem:[%s2088_s24 + $0xc0] sm:$0xff] %vm1000_vm3, %v975_v42 }
 0x17e PF: > { %s18_s22 = sadd.s32 1, %s1707_s22   ;;  %s2354_s18 = smov %s1699_s20 }
 0x17f   : > { %p15_p2 = scmp.ge.s32.totalorder %s18_s22, 6   ;;  %s2355_s19 = smov %s1703_s21 }
 0x180   : > { %s2356_s20 = smov %s2359_s29  ;;  %s2357_s21 = smov %s2363_s10 }
 0x181   :  { %17 = sbr.rel (!%p15_p2) target bundleno = 5 (0x5), region = 87 }
 0x186   :  { %1080 = vsyncpa [#allocation3], 1 }
 0x187   :  { %1082 = vsyncpa [#allocation3 + $0x1], 1 }
 0x188   :  { %1083 = vsyncpa [#allocation5], 1 }
 0x189   :  { %1084 = vsyncpa [#allocation8], 1 }

// kernel: forward.8
= control target key start
LH: loop header
LB: loop body
LE: loop exit
PB: predicated region body
PF: predicated region fallthrough
CT: control target
= control target key end

     0   :  { %s1280_s18 = smov 0   ;;  %s1282_s19 = smov 0   ;;  %s1817_s0 = inlined_call_operand.vmem [shape: f32[2,196,288], index: 0, kind: input, shape index: {}]   ;;  %s1818_s1 = inlined_call_operand.vmem [shape: f32[288,64], index: 1, kind: input, shape index: {}]   ;;  %s1819_s2 = inlined_call_operand.vmem [shape: f32[1,64], index: 2, kind: input, shape index: {}]   ;;  %s1820_s3 = inlined_call_operand.vmem [shape: f32[1,64], index: 3, kind: input, shape index: {}]   ;;  %s1821_s4 = inlined_call_operand.vmem [shape: f32[1,64], index: 4, kind: input, shape index: {}]   ;;  %s1822_s5 = inlined_call_operand.vmem [shape: f32[2,196,64], index: 5, kind: output, shape index: {}]  }
   0x1   :  { %s1284_s20 = smov 0  }
   0x2 LB: > { %s27_s21 = sadd.s32 1, %s1242_s19  ;;  %p1051_p0 = scmp.ge.s32.totalorder %s1246_s20, 1  ;;  %s1246_s20 = sphi %s1284_s20, %s15_s20   ;;  %s1242_s19 = sphi %s1282_s19, %s1824_s19   ;;  %s1238_s18 = sphi %s1280_s18, %s1823_s18  }
   0x3   : > { %p29_p1 = scmp.ge.s32.totalorder %s27_s21, 2  ;;  %p209_p2 = scmp.lt.s32.totalorder %s1246_s20, 3 }
   0x5   : > { %s1826_s21 = smov (%p29_p1, %s27_s21), 0  ;;  %p210_p3 = pnand %p1051_p0, %p209_p2 }
   0x6   : > { %p247_p4 = scmp.lt.s32.totalorder (!%p210_p3), %s1238_s18, 1 }
   0x7   : > { %213 = sbr.rel (%p210_p3) target bundleno = 377 (0x179), region = 40 }
   0xc   : > { %v357_v0 = vld [vmem:[%s1818_s1 + $0x78] sm:$0xff]  ;;  %v1248_v1 = vmov 0.0   ;;  %v356_v2 = vld [vmem:[%s1818_s1 + $0x70] sm:$0xff]  ;;  %s1828_s18 = smov (!%p247_p4, %s1238_s18), 1  ;;  %vm1249_vm0 = vmmov 0   ;;  %v355_v3 = vld [vmem:[%s1818_s1 + $0x68] sm:$0xff] }
   0xd   : > { %461 = vmatprep.subr.mxu0 %v1248_v1  ;;  %1113 = vmatprep.subr.mxu1 %v1248_v1  ;;  %v354_v4 = vld [vmem:[%s1818_s1 + $0x60] sm:$0xff]  ;;  %s1196_s30 = smul.u32 600, %s1828_s18  ;;  %v353_v5 = vld [vmem:[%s1818_s1 + $0x58] sm:$0xff]  ;;  %v352_v6 = vld [vmem:[%s1818_s1 + $0x50] sm:$0xff]  ;;  %vm385_vm1 = vcmask 261120   ;;  %vm930_vm2 = vcmask 523264  }
   0xe   : > { %462 = vmatpush1.msra.mxu0 %v357_v0  ;;  %1121 = vmatprep.mubr.msk.f32.mxu1 %vm1249_vm0, %v1248_v1  ;;  %v377_v7 = vld [vmem:[%s1818_s1 + $0x118] sm:$0xff]  ;;  %v376_v8 = vld [vmem:[%s1818_s1 + $0x110] sm:$0xff]  ;;  %v351_v9 = vld [vmem:[%s1818_s1 + $0x48] sm:$0xff]  ;;  %s1197_s13 = smul.u32 200, %s1828_s18  ;;  %vm955_vm3 = vcmask 519168  }
   0xf   : > { %463 = vmatprep.subr.mxu0 %v1248_v1  ;;  %1114 = vmatpush3.msra.mxu1 %v377_v7  ;;  %s1336_s16 = scalar_lea.vmem %s1817_s0, %s1196_s30  ;;  %v375_v10 = vld [vmem:[%s1818_s1 + $0x108] sm:$0xff]  ;;  %v350_v11 = vld [vmem:[%s1818_s1 + $0x40] sm:$0xff]  ;;  %v349_v14 = vld [vmem:[%s1818_s1 + $0x38] sm:$0xff] }
  0x10   : > { %464 = vmatpush1.msra.mxu0 %v356_v2  ;;  %1115 = vmatprep.subr.mxu1 %v1248_v1  ;;  %v268_v12 = vld [vmem:[%s1336_s16 + $0x8] sm:$0xff]  ;;  %v374_v13 = vld [vmem:[%s1818_s1 + $0x100] sm:$0xff]  ;;  %v269_v15 = vld [vmem:[%s1336_s16 + $0x10] sm:$0xff]  ;;  %s1642_s24 = scalar_lea.vmem %s1822_s5, %s1197_s13 }
  0x11   : > { %465 = vmatprep.subr.mxu0 %v1248_v1  ;;  %1116 = vmatpush3.msra.mxu1 %v376_v8  ;;  %v348_v16 = vld [vmem:[%s1818_s1 + $0x30] sm:$0xff]  ;;  %v347_v17 = vld [vmem:[%s1818_s1 + $0x28] sm:$0xff]  ;;  %v346_v19 = vld [vmem:[%s1818_s1 + $0x20] sm:$0xff] }
  0x12   : > { %466 = vmatpush1.msra.mxu0 %v355_v3  ;;  %1117 = vmatprep.subr.mxu1 %v1248_v1  ;;  %v272_v18 = vld [vmem:[%s1336_s16 + $0x28] sm:$0xff]  ;;  %v345_v20 = vld [vmem:[%s1818_s1 + $0x18] sm:$0xff]  ;;  %v275_v21 = vld [vmem:[%s1336_s16 + $0x40] sm:$0xff] }
  0x13   : > { %467 = vmatprep.subr.mxu0 %v1248_v1  ;;  %1118 = vmatpush3.msra.mxu1 %v375_v10  ;;  %v344_v22 = vld [vmem:[%s1818_s1 + $0x10] sm:$0xff]  ;;  %v343_v23 = vld [vmem:[%s1818_s1 + $0x8] sm:$0xff]  ;;  %v278_v24 = vld [vmem:[%s1336_s16 + $0x58] sm:$0xff] }
  0x14   : > { %468 = vmatpush1.msra.mxu0 %v354_v4  ;;  %1119 = vmatprep.subr.mxu1 %v1248_v1  ;;  %v342_v25 = vld [vmem:[%s1818_s1] sm:$0xff]  ;;  %v373_v26 = vld [vmem:[%s1818_s1 + $0xf8] sm:$0xff]  ;;  %v281_v27 = vld [vmem:[%s1336_s16 + $0x70] sm:$0xff] }
  0x15   : > { %469 = vmatprep.subr.mxu0 %v1248_v1  ;;  %525 = vmatprep.mubr.f32.mxu0 %v268_v12  ;;  %v372_v28 = vld [vmem:[%s1818_s1 + $0xf0] sm:$0xff]  ;;  %v371_v29 = vld [vmem:[%s1818_s1 + $0xe8] sm:$0xff]  ;;  %v370_v31 = vld [vmem:[%s1818_s1 + $0xe0] sm:$0xff] }
  0x16   : > { %470 = vmatpush1.msra.mxu0 %v353_v5  ;;  %1120 = vmatpush3.msra.mxu1 %v374_v13  ;;  %v284_v30 = vld [vmem:[%s1336_s16 + $0x88] sm:$0xff]  ;;  %v369_v32 = vld [vmem:[%s1818_s1 + $0xd8] sm:$0xff]  ;;  %v287_v33 = vld [vmem:[%s1336_s16 + $0xa0] sm:$0xff] }
  0x17   : > { %471 = vmatprep.subr.mxu0 %v1248_v1  ;;  %1122 = vmatmul.mubr.msk.f32.vlgmr.msra.gmra.mxu1 %vm385_vm1, %v269_v15  ;;  %v368_v34 = vld [vmem:[%s1818_s1 + $0xd0] sm:$0xff]  ;;  %v367_v35 = vld [vmem:[%s1818_s1 + $0xc8] sm:$0xff]  ;;  %v290_v36 = vld [vmem:[%s1336_s16 + $0xb8] sm:$0xff] }
  0x18   : > { %472 = vmatpush1.msra.mxu0 %v352_v6  ;;  %1124 = vmatprep.mubr.msk.f32.mxu1 %vm1249_vm0, %v1248_v1  ;;  %v366_v37 = vld [vmem:[%s1818_s1 + $0xc0] sm:$0xff]  ;;  %v365_v38 = vld [vmem:[%s1818_s1 + $0xb8] sm:$0xff]  ;;  %v293_v39 = vld [vmem:[%s1336_s16 + $0xd0] sm:$0xff] }
  0x19   : > { %473 = vmatprep.subr.mxu0 %v1248_v1  ;;  %v364_v40 = vld [vmem:[%s1818_s1 + $0xb0] sm:$0xff]  ;;  %v363_v41 = vld [vmem:[%s1818_s1 + $0xa8] sm:$0xff]  ;;  %v362_v43 = vld [vmem:[%s1818_s1 + $0xa0] sm:$0xff] }
  0x1a   : > { %474 = vmatpush1.msra.mxu0 %v351_v9  ;;  %v296_v42 = vld [vmem:[%s1336_s16 + $0xe8] sm:$0xff]  ;;  %v361_v44 = vld [vmem:[%s1818_s1 + $0x98] sm:$0xff]  ;;  %v299_v45 = vld [vmem:[%s1336_s16 + $0x100] sm:$0xff] }
  0x1b   : > { %475 = vmatprep.subr.mxu0 %v1248_v1  ;;  %1125 = vmatmul.mubr.msk.f32.gmra.mxu1 %vm385_vm1, %v272_v18  ;;  %v360_v46 = vld [vmem:[%s1818_s1 + $0x90] sm:$0xff]  ;;  %v359_v47 = vld [vmem:[%s1818_s1 + $0x88] sm:$0xff]  ;;  %v302_v48 = vld [vmem:[%s1336_s16 + $0x118] sm:$0xff] }
  0x1c   : > { %476 = vmatpush1.msra.mxu0 %v350_v11  ;;  %1127 = vmatprep.mubr.msk.f32.mxu1 %vm1249_vm0, %v1248_v1  ;;  %v358_v49 = vld [vmem:[%s1818_s1 + $0x80] sm:$0xff]  ;;  %v305_v52 = vld [vmem:[%s1336_s16 + $0x130] sm:$0xff]  ;;  %v270_v53 = vld [vmem:[%s1336_s16 + $0x18] sm:$0xff] }
  0x1d   : > { %477 = vmatprep.subr.mxu0 %v1248_v1  ;;  %v267_v50 = vld [vmem:[%s1336_s16] sm:$0xff]  ;;  %v274_v54 = vld [vmem:[%s1336_s16 + $0x38] sm:$0xff]  ;;  %v308_v55 = vld [vmem:[%s1336_s16 + $0x148] sm:$0xff] }
  0x1e   : > { %478 = vmatpush1.msra.mxu0 %v349_v14  ;;  %v271_v51 = vld [vmem:[%s1336_s16 + $0x20] sm:$0xff]  ;;  %v273_v56 = vld [vmem:[%s1336_s16 + $0x30] sm:$0xff]  ;;  %v276_v59 = vld [vmem:[%s1336_s16 + $0x48] sm:$0xff] }
  0x1f   : > { %479 = vmatprep.subr.mxu0 %v1248_v1  ;;  %1128 = vmatmul.mubr.msk.f32.gmra.mxu1 %vm385_vm1, %v275_v21  ;;  %v277_v57 = vld [vmem:[%s1336_s16 + $0x50] sm:$0xff]  ;;  %v311_v58 = vld [vmem:[%s1336_s16 + $0x160] sm:$0xff]  ;;  %v280_v60 = vld [vmem:[%s1336_s16 + $0x68] sm:$0xff] }
  0x20   : > { %480 = vmatpush1.msra.mxu0 %v348_v16  ;;  %1130 = vmatprep.mubr.msk.f32.mxu1 %vm1249_vm0, %v1248_v1  ;;  %v314_v61 = vld [vmem:[%s1336_s16 + $0x178] sm:$0xff]  ;;  %v279_v62 = vld [vmem:[%s1336_s16 + $0x60] sm:$0xff]  ;;  %v317_v0 = vld [vmem:[%s1336_s16 + $0x190] sm:$0xff] }
  0x21   : > { %481 = vmatprep.subr.mxu0 %v1248_v1  ;;  %v283_v63 = vld [vmem:[%s1336_s16 + $0x80] sm:$0xff]  ;;  %v282_v2 = vld [vmem:[%s1336_s16 + $0x78] sm:$0xff]  ;;  %v320_v4 = vld [vmem:[%s1336_s16 + $0x1a8] sm:$0xff] }
  0x22   : > { %482 = vmatpush1.msra.mxu0 %v347_v17  ;;  %v286_v3 = vld [vmem:[%s1336_s16 + $0x98] sm:$0xff]  ;;  %v285_v5 = vld [vmem:[%s1336_s16 + $0x90] sm:$0xff]  ;;  %v323_v7 = vld [vmem:[%s1336_s16 + $0x1c0] sm:$0xff] }
  0x23   : > { %483 = vmatprep.subr.mxu0 %v1248_v1  ;;  %1131 = vmatmul.mubr.msk.f32.gmra.mxu1 %vm385_vm1, %v278_v24  ;;  %v289_v6 = vld [vmem:[%s1336_s16 + $0xb0] sm:$0xff]  ;;  %v288_v8 = vld [vmem:[%s1336_s16 + $0xa8] sm:$0xff]  ;;  %v326_v10 = vld [vmem:[%s1336_s16 + $0x1d8] sm:$0xff] }
  0x24   : > { %484 = vmatpush1.msra.mxu0 %v346_v19  ;;  %1133 = vmatprep.mubr.msk.f32.mxu1 %vm1249_vm0, %v1248_v1  ;;  %v292_v9 = vld [vmem:[%s1336_s16 + $0xc8] sm:$0xff]  ;;  %v291_v11 = vld [vmem:[%s1336_s16 + $0xc0] sm:$0xff]  ;;  %v329_v13 = vld [vmem:[%s1336_s16 + $0x1f0] sm:$0xff] }
  0x25   : > { %485 = vmatprep.subr.mxu0 %v1248_v1  ;;  %v295_v12 = vld [vmem:[%s1336_s16 + $0xe0] sm:$0xff]  ;;  %v294_v14 = vld [vmem:[%s1336_s16 + $0xd8] sm:$0xff]  ;;  %v332_v16 = vld [vmem:[%s1336_s16 + $0x208] sm:$0xff] }
  0x26   : > { %486 = vmatpush1.msra.mxu0 %v345_v20  ;;  %v298_v15 = vld [vmem:[%s1336_s16 + $0xf8] sm:$0xff]  ;;  %v297_v17 = vld [vmem:[%s1336_s16 + $0xf0] sm:$0xff]  ;;  %v335_v19 = vld [vmem:[%s1336_s16 + $0x220] sm:$0xff] }
  0x27   : > { %487 = vmatprep.subr.mxu0 %v1248_v1  ;;  %1134 = vmatmul.mubr.msk.f32.gmra.mxu1 %vm385_vm1, %v281_v27  ;;  %v301_v18 = vld [vmem:[%s1336_s16 + $0x110] sm:$0xff]  ;;  %v300_v20 = vld [vmem:[%s1336_s16 + $0x108] sm:$0xff]  ;;  %v307_v24 = vld [vmem:[%s1336_s16 + $0x140] sm:$0xff] }
  0x28   : > { %488 = vmatpush1.msra.mxu0 %v344_v22  ;;  %1136 = vmatprep.mubr.msk.f32.mxu1 %vm1249_vm0, %v1248_v1  ;;  %v304_v21 = vld [vmem:[%s1336_s16 + $0x128] sm:$0xff]  ;;  %v338_v22 = vld [vmem:[%s1336_s16 + $0x238] sm:$0xff] }
  0x29   : > { %489 = vmatprep.subr.mxu0 %v1248_v1  ;;  %v310_v27 = vld [vmem:[%s1336_s16 + $0x158] sm:$0xff] }
  0x2a   : > { %490 = vmatpush1.msra.mxu0 %v343_v23  ;;  %v303_v23 = vld [vmem:[%s1336_s16 + $0x120] sm:$0xff] }
  0x2b   : > { %491 = vmatprep.subr.mxu0 %v1248_v1  ;;  %1137 = vmatmul.mubr.msk.f32.gmra.mxu1 %vm385_vm1, %v284_v30  ;;  %v316_v30 = vld [vmem:[%s1336_s16 + $0x188] sm:$0xff] }
  0x2c   : > { %492 = vmatpush1.msra.mxu0 %v342_v25  ;;  %1139 = vmatprep.mubr.msk.f32.mxu1 %vm1249_vm0, %v1248_v1  ;;  %v341_v25 = vld [vmem:[%s1336_s16 + $0x250] sm:$0xf] }
  0x2d   : > { %493 = vmatprep.subr.mxu0 %v1248_v1 }
  0x2e   : > { %494 = vmatpush2.msra.mxu0 %v373_v26  ;;  %v306_v26 = vld [vmem:[%s1336_s16 + $0x138] sm:$0xff] }
  0x2f   : > { %495 = vmatprep.subr.mxu0 %v1248_v1  ;;  %1140 = vmatmul.mubr.msk.f32.gmra.mxu1 %vm385_vm1, %v287_v33  ;;  %v318_v33 = vld [vmem:[%s1336_s16 + $0x198] sm:$0xff] }
  0x30   : > { %496 = vmatpush2.msra.mxu0 %v372_v28  ;;  %1142 = vmatprep.mubr.msk.f32.mxu1 %vm1249_vm0, %v1248_v1  ;;  %v309_v28 = vld [vmem:[%s1336_s16 + $0x150] sm:$0xff] }
  0x31   : > { %497 = vmatprep.subr.mxu0 %v1248_v1 }
  0x32   : > { %498 = vmatpush2.msra.mxu0 %v371_v29  ;;  %v313_v29 = vld [vmem:[%s1336_s16 + $0x170] sm:$0xff] }
  0x33   : > { %499 = vmatprep.subr.mxu0 %v1248_v1  ;;  %1143 = vmatmul.mubr.msk.f32.gmra.mxu1 %vm385_vm1, %v290_v36  ;;  %v325_v36 = vld [vmem:[%s1336_s16 + $0x1d0] sm:$0xff] }
  0x34   : > { %500 = vmatpush2.msra.mxu0 %v370_v31  ;;  %1145 = vmatprep.mubr.msk.f32.mxu1 %vm1249_vm0, %v1248_v1  ;;  %v315_v31 = vld [vmem:[%s1336_s16 + $0x180] sm:$0xff] }
  0x35   : > { %501 = vmatprep.subr.mxu0 %v1248_v1 }
  0x36   : > { %502 = vmatpush2.msra.mxu0 %v369_v32  ;;  %v319_v32 = vld [vmem:[%s1336_s16 + $0x1a0] sm:$0xff] }
  0x37   : > { %503 = vmatprep.subr.mxu0 %v1248_v1  ;;  %1146 = vmatmul.mubr.msk.f32.gmra.mxu1 %vm385_vm1, %v293_v39  ;;  %v327_v39 = vld [vmem:[%s1336_s16 + $0x1e0] sm:$0xff] }
  0x38   : > { %504 = vmatpush2.msra.mxu0 %v368_v34  ;;  %1148 = vmatprep.mubr.msk.f32.mxu1 %vm1249_vm0, %v1248_v1  ;;  %v322_v34 = vld [vmem:[%s1336_s16 + $0x1b8] sm:$0xff] }
  0x39   : > { %505 = vmatprep.subr.mxu0 %v1248_v1 }
  0x3a   : > { %506 = vmatpush2.msra.mxu0 %v367_v35  ;;  %v321_v35 = vld [vmem:[%s1336_s16 + $0x1b0] sm:$0xff] }
  0x3b   : > { %507 = vmatprep.subr.mxu0 %v1248_v1  ;;  %1149 = vmatmul.mubr.msk.f32.gmra.mxu1 %vm385_vm1, %v296_v42  ;;  %v334_v42 = vld [vmem:[%s1336_s16 + $0x218] sm:$0xff] }
  0x3c   : > { %508 = vmatpush2.msra.mxu0 %v366_v37  ;;  %1151 = vmatprep.mubr.msk.f32.mxu1 %vm1249_vm0, %v1248_v1  ;;  %v324_v37 = vld [vmem:[%s1336_s16 + $0x1c8] sm:$0xff] }
  0x3d   : > { %509 = vmatprep.subr.mxu0 %v1248_v1 }
  0x3e   : > { %510 = vmatpush2.msra.mxu0 %v365_v38  ;;  %v328_v38 = vld [vmem:[%s1336_s16 + $0x1e8] sm:$0xff] }
  0x3f   : > { %511 = vmatprep.subr.mxu0 %v1248_v1  ;;  %1152 = vmatmul.mubr.msk.f32.gmra.mxu1 %vm385_vm1, %v299_v45  ;;  %v336_v45 = vld [vmem:[%s1336_s16 + $0x228] sm:$0xff] }
  0x40   : > { %512 = vmatpush2.msra.mxu0 %v364_v40  ;;  %1154 = vmatprep.mubr.msk.f32.mxu1 %vm1249_vm0, %v1248_v1  ;;  %v331_v40 = vld [vmem:[%s1336_s16 + $0x200] sm:$0xff] }
  0x41   : > { %513 = vmatprep.subr.mxu0 %v1248_v1 }
  0x42   : > { %514 = vmatpush2.msra.mxu0 %v363_v41  ;;  %v330_v41 = vld [vmem:[%s1336_s16 + $0x1f8] sm:$0xff] }
  0x43   : > { %515 = vmatprep.subr.mxu0 %v1248_v1  ;;  %1155 = vmatmul.mubr.msk.f32.gmra.mxu1 %vm385_vm1, %v302_v48 }
  0x44   : > { %516 = vmatpush2.msra.mxu0 %v362_v43  ;;  %1157 = vmatprep.mubr.msk.f32.mxu1 %vm1249_vm0, %v1248_v1  ;;  %v333_v43 = vld [vmem:[%s1336_s16 + $0x210] sm:$0xff] }
  0x45   : > { %517 = vmatprep.subr.mxu0 %v1248_v1 }
  0x46   : > { %518 = vmatpush2.msra.mxu0 %v361_v44  ;;  %v337_v44 = vld [vmem:[%s1336_s16 + $0x230] sm:$0xff] }
  0x47   : > { %519 = vmatprep.subr.mxu0 %v1248_v1  ;;  %1158 = vmatmul.mubr.msk.f32.gmra.mxu1 %vm385_vm1, %v305_v52 }
  0x48   : > { %520 = vmatpush2.msra.mxu0 %v360_v46  ;;  %1160 = vmatprep.mubr.msk.f32.mxu1 %vm1249_vm0, %v1248_v1  ;;  %v340_v46 = vld [vmem:[%s1336_s16 + $0x248] sm:$0xf] }
  0x49   : > { %521 = vmatprep.subr.mxu0 %v1248_v1 }
  0x4a   : > { %522 = vmatpush2.msra.mxu0 %v359_v47  ;;  %v339_v47 = vld [vmem:[%s1336_s16 + $0x240] sm:$0xf] }
  0x4b   : > { %523 = vmatprep.subr.mxu0 %v1248_v1  ;;  %1161 = vmatmul.mubr.msk.f32.gmra.mxu1 %vm385_vm1, %v308_v55 }
  0x4c   : > { %524 = vmatpush2.msra.mxu0 %v358_v49  ;;  %1163 = vmatprep.mubr.msk.f32.mxu1 %vm1249_vm0, %v1248_v1 }
  0x4d   : > { %526 = vmatmul.mubr.f32.vlgmr.msra.gmra.mxu0 %v267_v50 }
  0x4e   : > { %530 = vmatprep.mubr.f32.mxu0 %v271_v51 }
  0x4f   : > { %1164 = vmatmul.mubr.msk.f32.gmra.mxu1 %vm385_vm1, %v311_v58 }
  0x50   : > { %1166 = vmatprep.mubr.msk.f32.mxu1 %vm1249_vm0, %v1248_v1 }
  0x51   : > { %531 = vmatmul.mubr.f32.gmra.mxu0 %v270_v53 }
  0x52   : > { %535 = vmatprep.mubr.f32.mxu0 %v274_v54 }
  0x53   : > { %1167 = vmatmul.mubr.msk.f32.gmra.mxu1 %vm385_vm1, %v314_v61 }
  0x54   : > { %1169 = vmatprep.mubr.msk.f32.mxu1 %vm1249_vm0, %v1248_v1 }
  0x55   : > { %536 = vmatmul.mubr.f32.gmra.mxu0 %v273_v56 }
  0x56   : > { %540 = vmatprep.mubr.f32.mxu0 %v277_v57 }
  0x57   : > { %1170 = vmatmul.mubr.msk.f32.gmra.mxu1 %vm385_vm1, %v317_v0 }
  0x58   : > { %1172 = vmatprep.mubr.msk.f32.mxu1 %vm1249_vm0, %v1248_v1 }
  0x59   : > { %541 = vmatmul.mubr.f32.gmra.mxu0 %v276_v59 }
  0x5a   : > { %545 = vmatprep.mubr.f32.mxu0 %v280_v60 }
  0x5b   : > { %1173 = vmatmul.mubr.msk.f32.gmra.mxu1 %vm385_vm1, %v320_v4 }
  0x5c   : > { %1175 = vmatprep.mubr.msk.f32.mxu1 %vm1249_vm0, %v1248_v1 }
  0x5d   : > { %546 = vmatmul.mubr.f32.gmra.mxu0 %v279_v62 }
  0x5e   : > { %550 = vmatprep.mubr.f32.mxu0 %v283_v63 }
  0x5f   : > { %1176 = vmatmul.mubr.msk.f32.gmra.mxu1 %vm385_vm1, %v323_v7 }
  0x60   : > { %1178 = vmatprep.mubr.msk.f32.mxu1 %vm1249_vm0, %v1248_v1 }
  0x61   : > { %551 = vmatmul.mubr.f32.gmra.mxu0 %v282_v2 }
  0x62   : > { %555 = vmatprep.mubr.f32.mxu0 %v286_v3 }
  0x63   : > { %1179 = vmatmul.mubr.msk.f32.gmra.mxu1 %vm385_vm1, %v326_v10 }
  0x64   : > { %1181 = vmatprep.mubr.msk.f32.mxu1 %vm1249_vm0, %v1248_v1 }
  0x65   : > { %556 = vmatmul.mubr.f32.gmra.mxu0 %v285_v5 }
  0x66   : > { %560 = vmatprep.mubr.f32.mxu0 %v289_v6 }
  0x67   : > { %1182 = vmatmul.mubr.msk.f32.gmra.mxu1 %vm385_vm1, %v329_v13 }
  0x68   : > { %1184 = vmatprep.mubr.msk.f32.mxu1 %vm1249_vm0, %v1248_v1 }
  0x69   : > { %561 = vmatmul.mubr.f32.gmra.mxu0 %v288_v8  ;;  %v1619_v8 = vld [vmem:[%s1819_s2] ss:$0 sm:$0xff] }
  0x6a   : > { %565 = vmatprep.mubr.f32.mxu0 %v292_v9 }
  0x6b   : > { %1185 = vmatmul.mubr.msk.f32.gmra.mxu1 %vm385_vm1, %v332_v16  ;;  %v1628_v16 = vld [vmem:[%s1820_s3] ss:$0 sm:$0xff] }
  0x6c   : > { %1187 = vmatprep.mubr.msk.f32.mxu1 %vm1249_vm0, %v1248_v1 }
  0x6d   : > { %566 = vmatmul.mubr.f32.gmra.mxu0 %v291_v11 }
  0x6e   : > { %570 = vmatprep.mubr.f32.mxu0 %v295_v12 }
  0x6f   : > { %1188 = vmatmul.mubr.msk.f32.gmra.mxu1 %vm385_vm1, %v335_v19 }
  0x70   : > { %1190 = vmatprep.mubr.msk.f32.mxu1 %vm1249_vm0, %v1248_v1 }
  0x71   : > { %571 = vmatmul.mubr.f32.gmra.mxu0 %v294_v14 }
  0x72   : > { %575 = vmatprep.mubr.f32.mxu0 %v298_v15 }
  0x73   : > { %1191 = vmatmul.mubr.msk.f32.gmra.mxu1 %vm385_vm1, %v338_v22 }
  0x74   : > { %1193 = vmatprep.mubr.msk.f32.mxu1 %vm1249_vm0, %v1248_v1  ;;  %v312_v1 = vld [vmem:[%s1336_s16 + $0x168] sm:$0xff] }
  0x75   : > { %576 = vmatmul.mubr.f32.gmra.mxu0 %v297_v17 }
  0x76   : > { %580 = vmatprep.mubr.f32.mxu0 %v301_v18 }
  0x77   : > { %1194 = vmatmul.mubr.msk.f32.gmra.mxu1 %vm385_vm1, %v341_v25 }
  0x79   : > { %581 = vmatmul.mubr.f32.gmra.mxu0 %v300_v20 }
  0x7a   : > { %585 = vmatprep.mubr.f32.mxu0 %v304_v21  ;;  %v1636_v21 = vld [vmem:[%s1821_s4] ss:$0 sm:$0xff] }
  0x7d   : > { %586 = vmatmul.mubr.f32.gmra.mxu0 %v303_v23 }
  0x7e   : > { %590 = vmatprep.mubr.f32.mxu0 %v307_v24 }
  0x81   : > { %591 = vmatmul.mubr.f32.gmra.mxu0 %v306_v26 }
  0x82   : > { %595 = vmatprep.mubr.f32.mxu0 %v310_v27 }
  0x85   : > { %596 = vmatmul.mubr.f32.gmra.mxu0 %v309_v28 }
  0x86   : > { %600 = vmatprep.mubr.f32.mxu0 %v313_v29 }
  0x89   : > { %601 = vmatmul.mubr.f32.gmra.mxu0 %v312_v1 }
  0x8a   : > { %605 = vmatprep.mubr.f32.mxu0 %v316_v30 }
  0x8d   : > { %606 = vmatmul.mubr.f32.gmra.mxu0 %v315_v31 }
  0x8e   : > { %610 = vmatprep.mubr.f32.mxu0 %v319_v32 }
  0x91   : > { %611 = vmatmul.mubr.f32.gmra.mxu0 %v318_v33 }
  0x92   : > { %615 = vmatprep.mubr.f32.mxu0 %v322_v34 }
  0x95   : > { %616 = vmatmul.mubr.f32.gmra.mxu0 %v321_v35 }
  0x96   : > { %620 = vmatprep.mubr.f32.mxu0 %v325_v36 }
  0x99   : > { %621 = vmatmul.mubr.f32.gmra.mxu0 %v324_v37 }
  0x9a   : > { %625 = vmatprep.mubr.f32.mxu0 %v328_v38 }
  0x9d   : > { %626 = vmatmul.mubr.f32.gmra.mxu0 %v327_v39 }
  0x9e   : > { %630 = vmatprep.mubr.f32.mxu0 %v331_v40 }
  0xa1   : > { %631 = vmatmul.mubr.f32.gmra.mxu0 %v330_v41 }
  0xa2   : > { %635 = vmatprep.mubr.f32.mxu0 %v334_v42 }
  0xa5   : > { %636 = vmatmul.mubr.f32.gmra.mxu0 %v333_v43 }
  0xa6   : > { %640 = vmatprep.mubr.f32.mxu0 %v337_v44 }
  0xa9   : > { %641 = vmatmul.mubr.f32.gmra.mxu0 %v336_v45 }
  0xaa   : > { %645 = vmatprep.mubr.f32.mxu0 %v340_v46 }
  0xad   : > { %646 = vmatmul.mubr.f32.gmra.mxu0 %v339_v47 }
  0xd7   : > { %v717_v48 = vpop.f32.mrf.mxu1 }
  0xd9   : > { %v1123_v49 = vpop.f32.mrf.mxu1 }
  0xdb   : > { %v722_v50 = vpop.f32.mrf.mxu1 }
  0xdd   : > { %v1126_v51 = vpop.f32.mrf.mxu1 }
  0xdf   : > { %v727_v52 = vpop.f32.mrf.mxu1 }
  0xe1   : > { %v1129_v53 = vpop.f32.mrf.mxu1 }
  0xe3   : > { %v732_v54 = vpop.f32.mrf.mxu1 }
  0xe5   : > { %v1132_v55 = vpop.f32.mrf.mxu1 }
  0xe7   : > { %v1600_v56 = vpop.f32.mrf.mxu1 }
  0xe9   : > { %v1135_v57 = vpop.f32.mrf.mxu1 }
  0xeb   : > { %v1602_v58 = vpop.f32.mrf.mxu1 }
  0xed   : > { %v1138_v59 = vpop.f32.mrf.mxu1 }
  0xef   : > { %v1604_v60 = vpop.f32.mrf.mxu1 }
  0xf1   : > { %v1141_v61 = vpop.f32.mrf.mxu1 }
  0xf3   : > { %v1606_v62 = vpop.f32.mrf.mxu1 }
  0xf5   : > { %v1144_v63 = vpop.f32.mrf.mxu1 }
  0xf7   : > { %v1608_v0 = vpop.f32.mrf.mxu1 }
  0xf9   : > { %v1147_v2 = vpop.f32.mrf.mxu1 }
  0xfb   : > { %v1610_v3 = vpop.f32.mrf.mxu1 }
  0xfd   : > { %v1150_v4 = vpop.f32.mrf.mxu1 }
  0xff   : > { %v1612_v5 = vpop.f32.mrf.mxu1 }
 0x101   : > { %v1153_v6 = vpop.f32.mrf.mxu1 }
 0x103   : > { %v1614_v7 = vpop.f32.mrf.mxu1 }
 0x105   : > { %v1156_v9 = vpop.f32.mrf.mxu1 }
 0x107   : > { %v1622_v12 = vpop.f32.mrf.mxu1 }
 0x109   : > { %v1159_v15 = vpop.f32.mrf.mxu1 }
 0x10b   : > { %v1631_v20 = vpop.f32.mrf.mxu1 }
 0x10d   : > { %v527_v10 = vpop.f32.mrf.mxu0  ;;  %v1162_v25 = vpop.f32.mrf.mxu1 }
 0x10e   : > { %v528_v11 = vadd.f32 %v1619_v8, %v527_v10 }
 0x10f   : > { %v529_v13 = vpop.f32.mrf.mxu0  ;;  %v1646_v1 = vpop.f32.mrf.mxu1 }
 0x110   : > { %v718_v14 = vadd.f32 %v717_v48, %v528_v11 }
 0x111   : > { %v532_v17 = vpop.f32.mrf.mxu0  ;;  %v1165_v33 = vpop.f32.mrf.mxu1 }
 0x112   : > { %v841_v18 = vmax.f32 %v718_v14, 0.0  ;;  %v533_v19 = vadd.f32 %v1619_v8, %v532_v17 }
 0x113   : > { %v534_v22 = vpop.f32.mrf.mxu0  ;;  %v1653_v38 = vpop.f32.mrf.mxu1 }
 0x114   : > { %v873_v23 = vmul.f32 %v1628_v16, %v841_v18  ;;  %v723_v24 = vadd.f32 %v722_v50, %v533_v19 }
 0x115   : > { %v537_v26 = vpop.f32.mrf.mxu0  ;;  %v1168_v42 = vpop.f32.mrf.mxu1 }
 0x116   : > { %v905_v27 = vadd.f32 %v1636_v21, %v873_v23  ;;  %v842_v28 = vmax.f32 %v723_v24, 0.0  ;;  %v538_v29 = vadd.f32 %v1619_v8, %v537_v26 }
 0x117   : > { %v539_v30 = vpop.f32.mrf.mxu0  ;;  %v1660_v47 = vpop.f32.mrf.mxu1 }
 0x118   : > { %931 = vst.msk [vmem:[%s1642_s24] sm:$0xff] %vm930_vm2, %v905_v27  ;;  %v874_v31 = vmul.f32 %v1628_v16, %v842_v28  ;;  %v728_v32 = vadd.f32 %v727_v52, %v538_v29 }
 0x119   : > { %v542_v34 = vpop.f32.mrf.mxu0  ;;  %v1171_v51 = vpop.f32.mrf.mxu1 }
 0x11a   : > { %v906_v35 = vadd.f32 %v1636_v21, %v874_v31  ;;  %v843_v36 = vmax.f32 %v728_v32, 0.0  ;;  %v543_v37 = vadd.f32 %v1619_v8, %v542_v34 }
 0x11b   : > { %v544_v39 = vpop.f32.mrf.mxu0  ;;  %v1668_v57 = vpop.f32.mrf.mxu1 }
 0x11c   : > { %932 = vst.msk [vmem:[%s1642_s24 + $0x8] sm:$0xff] %vm930_vm2, %v906_v35  ;;  %v875_v40 = vmul.f32 %v1628_v16, %v843_v36  ;;  %v733_v41 = vadd.f32 %v732_v54, %v543_v37 }
 0x11d   : > { %v547_v43 = vpop.f32.mrf.mxu0  ;;  %v1174_v2 = vpop.f32.mrf.mxu1 }
 0x11e   : > { %v907_v44 = vadd.f32 %v1636_v21, %v875_v40  ;;  %v844_v45 = vmax.f32 %v733_v41, 0.0  ;;  %v548_v46 = vadd.f32 %v1619_v8, %v547_v43 }
 0x11f   : > { %v549_v48 = vpop.f32.mrf.mxu0  ;;  %v1676_v10 = vpop.f32.mrf.mxu1 }
 0x120   : > { %933 = vst.msk [vmem:[%s1642_s24 + $0x10] sm:$0xff] %vm930_vm2, %v907_v44  ;;  %v876_v49 = vmul.f32 %v1628_v16, %v844_v45  ;;  %v738_v50 = vadd.f32 %v1600_v56, %v548_v46 }
 0x121   : > { %v552_v52 = vpop.f32.mrf.mxu0  ;;  %v1177_v15 = vpop.f32.mrf.mxu1 }
 0x122   : > { %v908_v53 = vadd.f32 %v1636_v21, %v876_v49  ;;  %v845_v54 = vmax.f32 %v738_v50, 0.0  ;;  %v553_v55 = vadd.f32 %v1619_v8, %v552_v52 }
 0x123   : > { %v554_v59 = vpop.f32.mrf.mxu0  ;;  %v1684_v22 = vpop.f32.mrf.mxu1 }
 0x124   : > { %934 = vst.msk [vmem:[%s1642_s24 + $0x18] sm:$0xff] %vm930_vm2, %v908_v53  ;;  %v877_v61 = vmul.f32 %v1628_v16, %v845_v54  ;;  %v743_v63 = vadd.f32 %v1602_v58, %v553_v55 }
 0x125   : > { %v557_v4 = vpop.f32.mrf.mxu0  ;;  %v1180_v26 = vpop.f32.mrf.mxu1 }
 0x126   : > { %v909_v56 = vadd.f32 %v1636_v21, %v877_v61  ;;  %v846_v6 = vmax.f32 %v743_v63, 0.0  ;;  %v558_v9 = vadd.f32 %v1619_v8, %v557_v4 }
 0x127   : > { %v559_v11 = vpop.f32.mrf.mxu0  ;;  %v1692_v30 = vpop.f32.mrf.mxu1 }
 0x128   : > { %935 = vst.msk [vmem:[%s1642_s24 + $0x20] sm:$0xff] %vm930_vm2, %v909_v56  ;;  %v878_v13 = vmul.f32 %v1628_v16, %v846_v6  ;;  %v748_v14 = vadd.f32 %v1604_v60, %v558_v9 }
 0x129   : > { %v562_v17 = vpop.f32.mrf.mxu0  ;;  %v1183_v34 = vpop.f32.mrf.mxu1 }
 0x12a   : > { %v910_v58 = vadd.f32 %v1636_v21, %v878_v13  ;;  %v847_v18 = vmax.f32 %v748_v14, 0.0  ;;  %v563_v19 = vadd.f32 %v1619_v8, %v562_v17 }
 0x12b   : > { %v564_v23 = vpop.f32.mrf.mxu0  ;;  %v1700_v39 = vpop.f32.mrf.mxu1 }
 0x12c   : > { %936 = vst.msk [vmem:[%s1642_s24 + $0x28] sm:$0xff] %vm930_vm2, %v910_v58  ;;  %v879_v24 = vmul.f32 %v1628_v16, %v847_v18  ;;  %v753_v25 = vadd.f32 %v1606_v62, %v563_v19 }
 0x12d   : > { %v567_v27 = vpop.f32.mrf.mxu0  ;;  %v1186_v43 = vpop.f32.mrf.mxu1 }
 0x12e   : > { %v911_v60 = vadd.f32 %v1636_v21, %v879_v24  ;;  %v848_v28 = vmax.f32 %v753_v25, 0.0  ;;  %v568_v29 = vadd.f32 %v1619_v8, %v567_v27 }
 0x12f   : > { %v569_v31 = vpop.f32.mrf.mxu0  ;;  %v1708_v48 = vpop.f32.mrf.mxu1 }
 0x130   : > { %937 = vst.msk [vmem:[%s1642_s24 + $0x30] sm:$0xff] %vm930_vm2, %v911_v60  ;;  %v880_v32 = vmul.f32 %v1628_v16, %v848_v28  ;;  %v758_v33 = vadd.f32 %v1608_v0, %v568_v29 }
 0x131   : > { %v572_v35 = vpop.f32.mrf.mxu0  ;;  %v1189_v52 = vpop.f32.mrf.mxu1 }
 0x132   : > { %v912_v62 = vadd.f32 %v1636_v21, %v880_v32  ;;  %v849_v36 = vmax.f32 %v758_v33, 0.0  ;;  %v573_v37 = vadd.f32 %v1619_v8, %v572_v35 }
 0x133   : > { %v574_v40 = vpop.f32.mrf.mxu0  ;;  %v1716_v59 = vpop.f32.mrf.mxu1 }
 0x134   : > { %938 = vst.msk [vmem:[%s1642_s24 + $0x38] sm:$0xff] %vm930_vm2, %v912_v62  ;;  %v881_v41 = vmul.f32 %v1628_v16, %v849_v36  ;;  %v763_v42 = vadd.f32 %v1610_v3, %v573_v37 }
 0x135   : > { %v577_v44 = vpop.f32.mrf.mxu0  ;;  %v1192_v4 = vpop.f32.mrf.mxu1 }
 0x136   : > { %v913_v0 = vadd.f32 %v1636_v21, %v881_v41  ;;  %v850_v45 = vmax.f32 %v763_v42, 0.0  ;;  %v578_v46 = vadd.f32 %v1619_v8, %v577_v44 }
 0x137   : > { %v579_v49 = vpop.f32.mrf.mxu0  ;;  %v1724_v11 = vpop.f32.mrf.mxu1 }
 0x138   : > { %939 = vst.msk [vmem:[%s1642_s24 + $0x40] sm:$0xff] %vm930_vm2, %v913_v0  ;;  %v882_v50 = vmul.f32 %v1628_v16, %v850_v45  ;;  %v768_v51 = vadd.f32 %v1612_v5, %v578_v46 }
 0x139   : > { %v582_v53 = vpop.f32.mrf.mxu0  ;;  %v1195_v17 = vpop.f32.mrf.mxu1 }
 0x13a   : > { %v914_v3 = vadd.f32 %v1636_v21, %v882_v50  ;;  %v851_v54 = vmax.f32 %v768_v51, 0.0  ;;  %v583_v55 = vadd.f32 %v1619_v8, %v582_v53 }
 0x13b   : > { %v584_v61 = vpop.f32.mrf.mxu0 }
 0x13c   : > { %940 = vst.msk [vmem:[%s1642_s24 + $0x48] sm:$0xff] %vm930_vm2, %v914_v3  ;;  %v883_v63 = vmul.f32 %v1628_v16, %v851_v54  ;;  %v773_v2 = vadd.f32 %v1614_v7, %v583_v55 }
 0x13d   : > { %v587_v5 = vpop.f32.mrf.mxu0 }
 0x13e   : > { %v915_v56 = vadd.f32 %v1636_v21, %v883_v63  ;;  %v852_v6 = vmax.f32 %v773_v2, 0.0  ;;  %v588_v9 = vadd.f32 %v1619_v8, %v587_v5 }
 0x13f   : > { %v589_v13 = vpop.f32.mrf.mxu0 }
 0x140   : > { %941 = vst.msk [vmem:[%s1642_s24 + $0x50] sm:$0xff] %vm930_vm2, %v915_v56  ;;  %v884_v14 = vmul.f32 %v1628_v16, %v852_v6  ;;  %v778_v15 = vadd.f32 %v1622_v12, %v588_v9 }
 0x141   : > { %v592_v7 = vpop.f32.mrf.mxu0 }
 0x142   : > { %v916_v58 = vadd.f32 %v1636_v21, %v884_v14  ;;  %v853_v18 = vmax.f32 %v778_v15, 0.0  ;;  %v593_v19 = vadd.f32 %v1619_v8, %v592_v7 }
 0x143   : > { %v594_v23 = vpop.f32.mrf.mxu0 }
 0x144   : > { %942 = vst.msk [vmem:[%s1642_s24 + $0x58] sm:$0xff] %vm930_vm2, %v916_v58  ;;  %v885_v24 = vmul.f32 %v1628_v16, %v853_v18  ;;  %v783_v25 = vadd.f32 %v1631_v20, %v593_v19 }
 0x145   : > { %v597_v26 = vpop.f32.mrf.mxu0 }
 0x146   : > { %v917_v27 = vadd.f32 %v1636_v21, %v885_v24  ;;  %v854_v60 = vmax.f32 %v783_v25, 0.0  ;;  %v598_v12 = vadd.f32 %v1619_v8, %v597_v26 }
 0x147   : > { %v599_v28 = vpop.f32.mrf.mxu0 }
 0x148   : > { %943 = vst.msk [vmem:[%s1642_s24 + $0x60] sm:$0xff] %vm930_vm2, %v917_v27  ;;  %v886_v29 = vmul.f32 %v1628_v16, %v854_v60  ;;  %v788_v31 = vadd.f32 %v1646_v1, %v598_v12 }
 0x149   : > { %v602_v32 = vpop.f32.mrf.mxu0 }
 0x14a   : > { %v918_v33 = vadd.f32 %v1636_v21, %v886_v29  ;;  %v855_v34 = vmax.f32 %v788_v31, 0.0  ;;  %v603_v20 = vadd.f32 %v1619_v8, %v602_v32 }
 0x14b   : > { %v604_v35 = vpop.f32.mrf.mxu0 }
 0x14c   : > { %944 = vst.msk [vmem:[%s1642_s24 + $0x68] sm:$0xff] %vm930_vm2, %v918_v33  ;;  %v887_v62 = vmul.f32 %v1628_v16, %v855_v34  ;;  %v793_v36 = vadd.f32 %v1653_v38, %v603_v20 }
 0x14d   : > { %v607_v37 = vpop.f32.mrf.mxu0 }
 0x14e   : > { %v919_v40 = vadd.f32 %v1636_v21, %v887_v62  ;;  %v856_v41 = vmax.f32 %v793_v36, 0.0  ;;  %v608_v1 = vadd.f32 %v1619_v8, %v607_v37 }
 0x14f   : > { %v609_v42 = vpop.f32.mrf.mxu0 }
 0x150   : > { %945 = vst.msk [vmem:[%s1642_s24 + $0x70] sm:$0xff] %vm930_vm2, %v919_v40  ;;  %v888_v43 = vmul.f32 %v1628_v16, %v856_v41  ;;  %v798_v44 = vadd.f32 %v1660_v47, %v608_v1 }
 0x151   : > { %v612_v0 = vpop.f32.mrf.mxu0 }
 0x152   : > { %v920_v45 = vadd.f32 %v1636_v21, %v888_v43  ;;  %v857_v46 = vmax.f32 %v798_v44, 0.0  ;;  %v613_v38 = vadd.f32 %v1619_v8, %v612_v0 }
 0x153   : > { %v614_v49 = vpop.f32.mrf.mxu0 }
 0x154   : > { %946 = vst.msk [vmem:[%s1642_s24 + $0x78] sm:$0xff] %vm930_vm2, %v920_v45  ;;  %v889_v50 = vmul.f32 %v1628_v16, %v857_v46  ;;  %v803_v51 = vadd.f32 %v1668_v57, %v613_v38 }
 0x155   : > { %v617_v52 = vpop.f32.mrf.mxu0 }
 0x156   : > { %v921_v53 = vadd.f32 %v1636_v21, %v889_v50  ;;  %v858_v3 = vmax.f32 %v803_v51, 0.0  ;;  %v618_v47 = vadd.f32 %v1619_v8, %v617_v52 }
 0x157   : > { %v619_v54 = vpop.f32.mrf.mxu0 }
 0x158   : > { %947 = vst.msk [vmem:[%s1642_s24 + $0x80] sm:$0xff] %vm930_vm2, %v921_v53  ;;  %v890_v55 = vmul.f32 %v1628_v16, %v858_v3  ;;  %v808_v61 = vadd.f32 %v1676_v10, %v618_v47 }
 0x159   : > { %v622_v63 = vpop.f32.mrf.mxu0 }
 0x15a   : > { %v922_v2 = vadd.f32 %v1636_v21, %v890_v55  ;;  %v859_v4 = vmax.f32 %v808_v61, 0.0  ;;  %v623_v57 = vadd.f32 %v1619_v8, %v622_v63 }
 0x15b   : > { %v624_v5 = vpop.f32.mrf.mxu0 }
 0x15c   : > { %948 = vst.msk [vmem:[%s1642_s24 + $0x88] sm:$0xff] %vm930_vm2, %v922_v2  ;;  %v891_v56 = vmul.f32 %v1628_v16, %v859_v4  ;;  %v813_v6 = vadd.f32 %v1684_v22, %v623_v57 }
 0x15d   : > { %v627_v9 = vpop.f32.mrf.mxu0 }
 0x15e   : > { %v923_v13 = vadd.f32 %v1636_v21, %v891_v56  ;;  %v860_v14 = vmax.f32 %v813_v6, 0.0  ;;  %v628_v10 = vadd.f32 %v1619_v8, %v627_v9 }
 0x15f   : > { %v629_v15 = vpop.f32.mrf.mxu0 }
 0x160   : > { %949 = vst.msk [vmem:[%s1642_s24 + $0x90] sm:$0xff] %vm930_vm2, %v923_v13  ;;  %v892_v17 = vmul.f32 %v1628_v16, %v860_v14  ;;  %v818_v7 = vadd.f32 %v1692_v30, %v628_v10 }
 0x161   : > { %v632_v58 = vpop.f32.mrf.mxu0 }
 0x162   : > { %v924_v18 = vadd.f32 %v1636_v21, %v892_v17  ;;  %v861_v19 = vmax.f32 %v818_v7, 0.0  ;;  %v633_v22 = vadd.f32 %v1619_v8, %v632_v58 }
 0x163   : > { %v634_v23 = vpop.f32.mrf.mxu0 }
 0x164   : > { %950 = vst.msk [vmem:[%s1642_s24 + $0x98] sm:$0xff] %vm930_vm2, %v924_v18  ;;  %v893_v24 = vmul.f32 %v1628_v16, %v861_v19  ;;  %v823_v25 = vadd.f32 %v1700_v39, %v633_v22 }
 0x165   : > { %v637_v26 = vpop.f32.mrf.mxu0 }
 0x166   : > { %v925_v27 = vadd.f32 %v1636_v21, %v893_v24  ;;  %v862_v60 = vmax.f32 %v823_v25, 0.0  ;;  %v638_v30 = vadd.f32 %v1619_v8, %v637_v26 }
 0x167   : > { %v639_v12 = vpop.f32.mrf.mxu0 }
 0x168   : > { %951 = vst.msk [vmem:[%s1642_s24 + $0xa0] sm:$0xff] %vm930_vm2, %v925_v27  ;;  %v894_v28 = vmul.f32 %v1628_v16, %v862_v60  ;;  %v828_v29 = vadd.f32 %v1708_v48, %v638_v30 }
 0x169   : > { %v642_v31 = vpop.f32.mrf.mxu0 }
 0x16a   : > { %v926_v32 = vadd.f32 %v1636_v21, %v894_v28  ;;  %v863_v33 = vmax.f32 %v828_v29, 0.0  ;;  %v643_v39 = vadd.f32 %v1619_v8, %v642_v31 }
 0x16b   : > { %v644_v34 = vpop.f32.mrf.mxu0 }
 0x16c   : > { %952 = vst.msk [vmem:[%s1642_s24 + $0xa8] sm:$0xff] %vm930_vm2, %v926_v32  ;;  %v895_v20 = vmul.f32 %v1628_v16, %v863_v33  ;;  %v833_v35 = vadd.f32 %v1716_v59, %v643_v39 }
 0x16d   : > { %v647_v62 = vpop.f32.mrf.mxu0 }
 0x16e   : > { %v927_v36 = vadd.f32 %v1636_v21, %v895_v20  ;;  %v864_v37 = vmax.f32 %v833_v35, 0.0  ;;  %v648_v48 = vadd.f32 %v1619_v8, %v647_v62 }
 0x16f   : > { %v649_v40 = vpop.f32.mrf.mxu0 }
 0x170   : > { %953 = vst.msk [vmem:[%s1642_s24 + $0xb0] sm:$0xff] %vm930_vm2, %v927_v36  ;;  %v896_v41 = vmul.f32 %v1628_v16, %v864_v37  ;;  %v838_v1 = vadd.f32 %v1724_v11, %v648_v48 }
 0x172   : > { %v928_v42 = vadd.f32 %v1636_v21, %v896_v41  ;;  %v865_v43 = vmax.f32 %v838_v1, 0.0 }
 0x174   : > { %954 = vst.msk [vmem:[%s1642_s24 + $0xb8] sm:$0xff] %vm930_vm2, %v928_v42  ;;  %v897_v59 = vmul.f32 %v1628_v16, %v865_v43 }
 0x176   : > { %v929_v44 = vadd.f32 %v1636_v21, %v897_v59 }
 0x178   : > { %956 = vst.msk [vmem:[%s1642_s24 + $0xc0] sm:$0xf] %vm955_vm3, %v929_v44 }
 0x179 PF: > { %s15_s20 = sadd.s32 1, %s1246_s20   ;;  %s1823_s18 = smov %s1242_s19 }
 0x17a   : > { %p12_p5 = scmp.ge.s32.totalorder %s15_s20, 4   ;;  %s1824_s19 = smov %s1826_s21 }
 0x17c   :  { %14 = sbr.rel (!%p12_p5) target bundleno = 2 (0x2), region = 70 }

// kernel: forward.9
= control target key start
LH: loop header
LB: loop body
LE: loop exit
PB: predicated region body
PF: predicated region fallthrough
CT: control target
= control target key end

     0   :  { %s1583_s18 = smov 0   ;;  %s1585_s19 = smov 0   ;;  %s2353_s0 = inlined_call_operand.vmem [shape: f32[2,196,576], index: 0, kind: input, shape index: {}]   ;;  %s2354_s1 = inlined_call_operand.vmem [shape: f32[576,64], index: 1, kind: input, shape index: {}]   ;;  %s2355_s2 = inlined_call_operand.vmem [shape: f32[1,64], index: 2, kind: input, shape index: {}]   ;;  %s2356_s3 = inlined_call_operand.vmem [shape: f32[1,64], index: 3, kind: input, shape index: {}]   ;;  %s2357_s4 = inlined_call_operand.vmem [shape: f32[1,64], index: 4, kind: input, shape index: {}]   ;;  %s2358_s5 = inlined_call_operand.vmem [shape: f32[2,196,64], index: 5, kind: output, shape index: {}]  }
   0x1   :  { %s1587_s20 = smov 0  }
   0x2 LB: > { %s27_s21 = sadd.s32 1, %s1545_s19  ;;  %p1326_p0 = scmp.ge.s32.totalorder %s1549_s20, 1  ;;  %s1549_s20 = sphi %s1587_s20, %s15_s20   ;;  %s1545_s19 = sphi %s1585_s19, %s2360_s19   ;;  %s1541_s18 = sphi %s1583_s18, %s2359_s18  }
   0x3   : > { %p29_p1 = scmp.ge.s32.totalorder %s27_s21, 2  ;;  %p209_p2 = scmp.lt.s32.totalorder %s1549_s20, 3 }
   0x5   : > { %s2362_s21 = smov (%p29_p1, %s27_s21), 0  ;;  %p210_p3 = pnand %p1326_p0, %p209_p2 }
   0x6   : > { %p247_p4 = scmp.lt.s32.totalorder (!%p210_p3), %s1541_s18, 1 }
   0x7   : > { %213 = sbr.rel (%p210_p3) target bundleno = 428 (0x1ac), region = 40 }
   0xc   : > { %v407_v0 = vld [vmem:[%s2354_s1 + $0x78] sm:$0xff]  ;;  %v1551_v2 = vmov 0.0   ;;  %v406_v3 = vld [vmem:[%s2354_s1 + $0x70] sm:$0xff]  ;;  %v405_v5 = vld [vmem:[%s2354_s1 + $0x68] sm:$0xff]  ;;  %s2364_s18 = smov (!%p247_p4, %s1541_s18), 1  ;;  %vm1552_vm0 = vmmov 0  }
   0xd   : > { %v439_v1 = vld [vmem:[%s2354_s1 + $0x178] sm:$0xff]  ;;  %547 = vmatprep.subr.mxu0 %v1551_v2  ;;  %737 = vmatprep.subr.mxu1 %v1551_v2  ;;  %v438_v4 = vld [vmem:[%s2354_s1 + $0x170] sm:$0xff]  ;;  %v437_v6 = vld [vmem:[%s2354_s1 + $0x168] sm:$0xff]  ;;  %s1499_s29 = smul.u32 1000, %s2364_s18  ;;  %vm471_vm1 = vcmask 523264   ;;  %vm1230_vm2 = vcmask 519168  }
   0xe   : > { %548 = vmatpush1.msra.mxu0 %v407_v0  ;;  %738 = vmatpush1.msra.mxu1 %v439_v1  ;;  %v404_v7 = vld [vmem:[%s2354_s1 + $0x60] sm:$0xff]  ;;  %v403_v9 = vld [vmem:[%s2354_s1 + $0x58] sm:$0xff]  ;;  %v402_v11 = vld [vmem:[%s2354_s1 + $0x50] sm:$0xff] }
   0xf   : > { %549 = vmatprep.subr.mxu0 %v1551_v2  ;;  %739 = vmatprep.subr.mxu1 %v1551_v2  ;;  %v436_v8 = vld [vmem:[%s2354_s1 + $0x160] sm:$0xff]  ;;  %v435_v10 = vld [vmem:[%s2354_s1 + $0x158] sm:$0xff]  ;;  %v434_v12 = vld [vmem:[%s2354_s1 + $0x150] sm:$0xff]  ;;  %s1849_s15 = scalar_lea.vmem %s2353_s0, %s1499_s29 }
  0x10   : > { %550 = vmatpush1.msra.mxu0 %v406_v3  ;;  %740 = vmatpush1.msra.mxu1 %v438_v4  ;;  %v401_v13 = vld [vmem:[%s2354_s1 + $0x48] sm:$0xff]  ;;  %v400_v15 = vld [vmem:[%s2354_s1 + $0x40] sm:$0xff]  ;;  %v399_v17 = vld [vmem:[%s2354_s1 + $0x38] sm:$0xff] }
  0x11   : > { %551 = vmatprep.subr.mxu0 %v1551_v2  ;;  %741 = vmatprep.subr.mxu1 %v1551_v2  ;;  %v433_v14 = vld [vmem:[%s2354_s1 + $0x148] sm:$0xff]  ;;  %v432_v16 = vld [vmem:[%s2354_s1 + $0x140] sm:$0xff]  ;;  %v431_v18 = vld [vmem:[%s2354_s1 + $0x138] sm:$0xff] }
  0x12   : > { %552 = vmatpush1.msra.mxu0 %v405_v5  ;;  %742 = vmatpush1.msra.mxu1 %v437_v6  ;;  %v398_v19 = vld [vmem:[%s2354_s1 + $0x30] sm:$0xff]  ;;  %v397_v21 = vld [vmem:[%s2354_s1 + $0x28] sm:$0xff]  ;;  %v396_v23 = vld [vmem:[%s2354_s1 + $0x20] sm:$0xff] }
  0x13   : > { %553 = vmatprep.subr.mxu0 %v1551_v2  ;;  %743 = vmatprep.subr.mxu1 %v1551_v2  ;;  %v430_v20 = vld [vmem:[%s2354_s1 + $0x130] sm:$0xff]  ;;  %v429_v22 = vld [vmem:[%s2354_s1 + $0x128] sm:$0xff]  ;;  %v428_v24 = vld [vmem:[%s2354_s1 + $0x120] sm:$0xff] }
  0x14   : > { %554 = vmatpush1.msra.mxu0 %v404_v7  ;;  %744 = vmatpush1.msra.mxu1 %v436_v8  ;;  %v395_v25 = vld [vmem:[%s2354_s1 + $0x18] sm:$0xff]  ;;  %v394_v27 = vld [vmem:[%s2354_s1 + $0x10] sm:$0xff]  ;;  %v393_v29 = vld [vmem:[%s2354_s1 + $0x8] sm:$0xff] }
  0x15   : > { %555 = vmatprep.subr.mxu0 %v1551_v2  ;;  %745 = vmatprep.subr.mxu1 %v1551_v2  ;;  %v427_v26 = vld [vmem:[%s2354_s1 + $0x118] sm:$0xff]  ;;  %v426_v28 = vld [vmem:[%s2354_s1 + $0x110] sm:$0xff]  ;;  %v425_v30 = vld [vmem:[%s2354_s1 + $0x108] sm:$0xff] }
  0x16   : > { %556 = vmatpush1.msra.mxu0 %v403_v9  ;;  %746 = vmatpush1.msra.mxu1 %v435_v10  ;;  %v392_v31 = vld [vmem:[%s2354_s1] sm:$0xff]  ;;  %v423_v33 = vld [vmem:[%s2354_s1 + $0xf8] sm:$0xff]  ;;  %v422_v35 = vld [vmem:[%s2354_s1 + $0xf0] sm:$0xff] }
  0x17   : > { %557 = vmatprep.subr.mxu0 %v1551_v2  ;;  %747 = vmatprep.subr.mxu1 %v1551_v2  ;;  %v424_v32 = vld [vmem:[%s2354_s1 + $0x100] sm:$0xff]  ;;  %v455_v34 = vld [vmem:[%s2354_s1 + $0x1f8] sm:$0xff]  ;;  %v454_v36 = vld [vmem:[%s2354_s1 + $0x1f0] sm:$0xff] }
  0x18   : > { %558 = vmatpush1.msra.mxu0 %v402_v11  ;;  %748 = vmatpush1.msra.mxu1 %v434_v12  ;;  %v421_v37 = vld [vmem:[%s2354_s1 + $0xe8] sm:$0xff]  ;;  %v420_v39 = vld [vmem:[%s2354_s1 + $0xe0] sm:$0xff]  ;;  %v419_v41 = vld [vmem:[%s2354_s1 + $0xd8] sm:$0xff] }
  0x19   : > { %559 = vmatprep.subr.mxu0 %v1551_v2  ;;  %749 = vmatprep.subr.mxu1 %v1551_v2  ;;  %v453_v38 = vld [vmem:[%s2354_s1 + $0x1e8] sm:$0xff]  ;;  %v452_v40 = vld [vmem:[%s2354_s1 + $0x1e0] sm:$0xff]  ;;  %v451_v42 = vld [vmem:[%s2354_s1 + $0x1d8] sm:$0xff] }
  0x1a   : > { %560 = vmatpush1.msra.mxu0 %v401_v13  ;;  %750 = vmatpush1.msra.mxu1 %v433_v14  ;;  %v418_v43 = vld [vmem:[%s2354_s1 + $0xd0] sm:$0xff]  ;;  %v417_v45 = vld [vmem:[%s2354_s1 + $0xc8] sm:$0xff]  ;;  %v416_v47 = vld [vmem:[%s2354_s1 + $0xc0] sm:$0xff] }
  0x1b   : > { %561 = vmatprep.subr.mxu0 %v1551_v2  ;;  %751 = vmatprep.subr.mxu1 %v1551_v2  ;;  %v450_v44 = vld [vmem:[%s2354_s1 + $0x1d0] sm:$0xff]  ;;  %v449_v46 = vld [vmem:[%s2354_s1 + $0x1c8] sm:$0xff]  ;;  %v448_v48 = vld [vmem:[%s2354_s1 + $0x1c0] sm:$0xff] }
  0x1c   : > { %562 = vmatpush1.msra.mxu0 %v400_v15  ;;  %752 = vmatpush1.msra.mxu1 %v432_v16  ;;  %v415_v49 = vld [vmem:[%s2354_s1 + $0xb8] sm:$0xff]  ;;  %v414_v51 = vld [vmem:[%s2354_s1 + $0xb0] sm:$0xff]  ;;  %v413_v53 = vld [vmem:[%s2354_s1 + $0xa8] sm:$0xff] }
  0x1d   : > { %563 = vmatprep.subr.mxu0 %v1551_v2  ;;  %753 = vmatprep.subr.mxu1 %v1551_v2  ;;  %v447_v50 = vld [vmem:[%s2354_s1 + $0x1b8] sm:$0xff]  ;;  %v446_v52 = vld [vmem:[%s2354_s1 + $0x1b0] sm:$0xff]  ;;  %v445_v54 = vld [vmem:[%s2354_s1 + $0x1a8] sm:$0xff] }
  0x1e   : > { %564 = vmatpush1.msra.mxu0 %v399_v17  ;;  %754 = vmatpush1.msra.mxu1 %v431_v18  ;;  %v412_v55 = vld [vmem:[%s2354_s1 + $0xa0] sm:$0xff]  ;;  %v411_v57 = vld [vmem:[%s2354_s1 + $0x98] sm:$0xff]  ;;  %v410_v59 = vld [vmem:[%s2354_s1 + $0x90] sm:$0xff] }
  0x1f   : > { %565 = vmatprep.subr.mxu0 %v1551_v2  ;;  %755 = vmatprep.subr.mxu1 %v1551_v2  ;;  %v444_v56 = vld [vmem:[%s2354_s1 + $0x1a0] sm:$0xff]  ;;  %v443_v58 = vld [vmem:[%s2354_s1 + $0x198] sm:$0xff]  ;;  %v442_v60 = vld [vmem:[%s2354_s1 + $0x190] sm:$0xff] }
  0x20   : > { %566 = vmatpush1.msra.mxu0 %v398_v19  ;;  %756 = vmatpush1.msra.mxu1 %v430_v20  ;;  %v409_v61 = vld [vmem:[%s2354_s1 + $0x88] sm:$0xff]  ;;  %v408_v63 = vld [vmem:[%s2354_s1 + $0x80] sm:$0xff]  ;;  %v270_v3 = vld [vmem:[%s1849_s15 + $0x18] sm:$0xff] }
  0x21   : > { %567 = vmatprep.subr.mxu0 %v1551_v2  ;;  %757 = vmatprep.subr.mxu1 %v1551_v2  ;;  %v441_v62 = vld [vmem:[%s2354_s1 + $0x188] sm:$0xff]  ;;  %v440_v1 = vld [vmem:[%s2354_s1 + $0x180] sm:$0xff]  ;;  %v269_v5 = vld [vmem:[%s1849_s15 + $0x10] sm:$0xff] }
  0x22   : > { %568 = vmatpush1.msra.mxu0 %v397_v21  ;;  %758 = vmatpush1.msra.mxu1 %v429_v22  ;;  %v268_v0 = vld [vmem:[%s1849_s15 + $0x8] sm:$0xff]  ;;  %v267_v4 = vld [vmem:[%s1849_s15] sm:$0xff]  ;;  %v273_v6 = vld [vmem:[%s1849_s15 + $0x30] sm:$0xff] }
  0x23   : > { %569 = vmatprep.subr.mxu0 %v1551_v2  ;;  %759 = vmatprep.subr.mxu1 %v1551_v2  ;;  %v463_v7 = vld [vmem:[%s2354_s1 + $0x238] sm:$0xff]  ;;  %v275_v8 = vld [vmem:[%s1849_s15 + $0x40] sm:$0xff]  ;;  %v272_v9 = vld [vmem:[%s1849_s15 + $0x28] sm:$0xff] }
  0x24   : > { %570 = vmatpush1.msra.mxu0 %v396_v23  ;;  %760 = vmatpush1.msra.mxu1 %v428_v24  ;;  %v274_v10 = vld [vmem:[%s1849_s15 + $0x38] sm:$0xff]  ;;  %v280_v12 = vld [vmem:[%s1849_s15 + $0x68] sm:$0xff]  ;;  %v462_v13 = vld [vmem:[%s2354_s1 + $0x230] sm:$0xff] }
  0x25   : > { %571 = vmatprep.subr.mxu0 %v1551_v2  ;;  %761 = vmatprep.subr.mxu1 %v1551_v2  ;;  %v278_v11 = vld [vmem:[%s1849_s15 + $0x58] sm:$0xff]  ;;  %v277_v14 = vld [vmem:[%s1849_s15 + $0x50] sm:$0xff]  ;;  %v279_v15 = vld [vmem:[%s1849_s15 + $0x60] sm:$0xff] }
  0x26   : > { %572 = vmatpush1.msra.mxu0 %v395_v25  ;;  %762 = vmatpush1.msra.mxu1 %v427_v26  ;;  %v283_v16 = vld [vmem:[%s1849_s15 + $0x80] sm:$0xff]  ;;  %v285_v17 = vld [vmem:[%s1849_s15 + $0x90] sm:$0xff]  ;;  %v461_v18 = vld [vmem:[%s2354_s1 + $0x228] sm:$0xff] }
  0x27   : > { %573 = vmatprep.subr.mxu0 %v1551_v2  ;;  %763 = vmatprep.subr.mxu1 %v1551_v2  ;;  %v282_v19 = vld [vmem:[%s1849_s15 + $0x78] sm:$0xff]  ;;  %v284_v20 = vld [vmem:[%s1849_s15 + $0x88] sm:$0xff]  ;;  %v460_v23 = vld [vmem:[%s2354_s1 + $0x220] sm:$0xff] }
  0x28   : > { %574 = vmatpush1.msra.mxu0 %v394_v27  ;;  %764 = vmatpush1.msra.mxu1 %v426_v28  ;;  %v288_v21 = vld [vmem:[%s1849_s15 + $0xa8] sm:$0xff]  ;;  %v290_v22 = vld [vmem:[%s1849_s15 + $0xb8] sm:$0xff]  ;;  %v287_v24 = vld [vmem:[%s1849_s15 + $0xa0] sm:$0xff] }
  0x29   : > { %575 = vmatprep.subr.mxu0 %v1551_v2  ;;  %765 = vmatprep.subr.mxu1 %v1551_v2  ;;  %v289_v25 = vld [vmem:[%s1849_s15 + $0xb0] sm:$0xff]  ;;  %v295_v27 = vld [vmem:[%s1849_s15 + $0xe0] sm:$0xff]  ;;  %v459_v28 = vld [vmem:[%s2354_s1 + $0x218] sm:$0xff] }
  0x2a   : > { %576 = vmatpush1.msra.mxu0 %v393_v29  ;;  %766 = vmatpush1.msra.mxu1 %v425_v30  ;;  %v293_v26 = vld [vmem:[%s1849_s15 + $0xd0] sm:$0xff]  ;;  %v292_v29 = vld [vmem:[%s1849_s15 + $0xc8] sm:$0xff]  ;;  %v294_v30 = vld [vmem:[%s1849_s15 + $0xd8] sm:$0xff] }
  0x2b   : > { %577 = vmatprep.subr.mxu0 %v1551_v2  ;;  %767 = vmatprep.subr.mxu1 %v1551_v2 }
  0x2c   : > { %578 = vmatpush1.msra.mxu0 %v392_v31  ;;  %768 = vmatpush1.msra.mxu1 %v424_v32  ;;  %v298_v31 = vld [vmem:[%s1849_s15 + $0xf8] sm:$0xff]  ;;  %v300_v32 = vld [vmem:[%s1849_s15 + $0x108] sm:$0xff] }
  0x2d   : > { %579 = vmatprep.subr.mxu0 %v1551_v2  ;;  %769 = vmatprep.subr.mxu1 %v1551_v2 }
  0x2e   : > { %580 = vmatpush2.msra.mxu0 %v423_v33  ;;  %770 = vmatpush2.msra.mxu1 %v455_v34  ;;  %v458_v33 = vld [vmem:[%s2354_s1 + $0x210] sm:$0xff] }
  0x2f   : > { %581 = vmatprep.subr.mxu0 %v1551_v2  ;;  %771 = vmatprep.subr.mxu1 %v1551_v2  ;;  %v297_v34 = vld [vmem:[%s1849_s15 + $0xf0] sm:$0xff] }
  0x30   : > { %582 = vmatpush2.msra.mxu0 %v422_v35  ;;  %772 = vmatpush2.msra.mxu1 %v454_v36  ;;  %v299_v35 = vld [vmem:[%s1849_s15 + $0x100] sm:$0xff] }
  0x31   : > { %583 = vmatprep.subr.mxu0 %v1551_v2  ;;  %773 = vmatprep.subr.mxu1 %v1551_v2  ;;  %v303_v36 = vld [vmem:[%s1849_s15 + $0x120] sm:$0xff] }
  0x32   : > { %584 = vmatpush2.msra.mxu0 %v421_v37  ;;  %774 = vmatpush2.msra.mxu1 %v453_v38  ;;  %v305_v37 = vld [vmem:[%s1849_s15 + $0x130] sm:$0xff]  ;;  %v457_v38 = vld [vmem:[%s2354_s1 + $0x208] sm:$0xff] }
  0x33   : > { %585 = vmatprep.subr.mxu0 %v1551_v2  ;;  %775 = vmatprep.subr.mxu1 %v1551_v2 }
  0x34   : > { %586 = vmatpush2.msra.mxu0 %v420_v39  ;;  %776 = vmatpush2.msra.mxu1 %v452_v40  ;;  %v302_v39 = vld [vmem:[%s1849_s15 + $0x118] sm:$0xff]  ;;  %v304_v40 = vld [vmem:[%s1849_s15 + $0x128] sm:$0xff] }
  0x35   : > { %587 = vmatprep.subr.mxu0 %v1551_v2  ;;  %777 = vmatprep.subr.mxu1 %v1551_v2 }
  0x36   : > { %588 = vmatpush2.msra.mxu0 %v419_v41  ;;  %778 = vmatpush2.msra.mxu1 %v451_v42  ;;  %v308_v41 = vld [vmem:[%s1849_s15 + $0x148] sm:$0xff]  ;;  %v310_v42 = vld [vmem:[%s1849_s15 + $0x158] sm:$0xff] }
  0x37   : > { %589 = vmatprep.subr.mxu0 %v1551_v2  ;;  %779 = vmatprep.subr.mxu1 %v1551_v2 }
  0x38   : > { %590 = vmatpush2.msra.mxu0 %v418_v43  ;;  %780 = vmatpush2.msra.mxu1 %v450_v44  ;;  %v456_v43 = vld [vmem:[%s2354_s1 + $0x200] sm:$0xff] }
  0x39   : > { %591 = vmatprep.subr.mxu0 %v1551_v2  ;;  %781 = vmatprep.subr.mxu1 %v1551_v2  ;;  %v307_v44 = vld [vmem:[%s1849_s15 + $0x140] sm:$0xff] }
  0x3a   : > { %592 = vmatpush2.msra.mxu0 %v417_v45  ;;  %782 = vmatpush2.msra.mxu1 %v449_v46  ;;  %v309_v45 = vld [vmem:[%s1849_s15 + $0x150] sm:$0xff] }
  0x3b   : > { %593 = vmatprep.subr.mxu0 %v1551_v2  ;;  %783 = vmatprep.subr.mxu1 %v1551_v2  ;;  %v313_v46 = vld [vmem:[%s1849_s15 + $0x170] sm:$0xff] }
  0x3c   : > { %594 = vmatpush2.msra.mxu0 %v416_v47  ;;  %784 = vmatpush2.msra.mxu1 %v448_v48  ;;  %v315_v47 = vld [vmem:[%s1849_s15 + $0x180] sm:$0xff]  ;;  %v312_v48 = vld [vmem:[%s1849_s15 + $0x168] sm:$0xff] }
  0x3d   : > { %595 = vmatprep.subr.mxu0 %v1551_v2  ;;  %785 = vmatprep.subr.mxu1 %v1551_v2 }
  0x3e   : > { %596 = vmatpush2.msra.mxu0 %v415_v49  ;;  %786 = vmatpush2.msra.mxu1 %v447_v50  ;;  %v314_v49 = vld [vmem:[%s1849_s15 + $0x178] sm:$0xff] }
  0x3f   : > { %597 = vmatprep.subr.mxu0 %v1551_v2  ;;  %787 = vmatprep.subr.mxu1 %v1551_v2  ;;  %v318_v50 = vld [vmem:[%s1849_s15 + $0x198] sm:$0xff] }
  0x40   : > { %598 = vmatpush2.msra.mxu0 %v414_v51  ;;  %788 = vmatpush2.msra.mxu1 %v446_v52  ;;  %v320_v51 = vld [vmem:[%s1849_s15 + $0x1a8] sm:$0xff]  ;;  %v317_v52 = vld [vmem:[%s1849_s15 + $0x190] sm:$0xff] }
  0x41   : > { %599 = vmatprep.subr.mxu0 %v1551_v2  ;;  %789 = vmatprep.subr.mxu1 %v1551_v2 }
  0x42   : > { %600 = vmatpush2.msra.mxu0 %v413_v53  ;;  %790 = vmatpush2.msra.mxu1 %v445_v54  ;;  %v319_v53 = vld [vmem:[%s1849_s15 + $0x1a0] sm:$0xff] }
  0x43   : > { %601 = vmatprep.subr.mxu0 %v1551_v2  ;;  %791 = vmatprep.subr.mxu1 %v1551_v2  ;;  %v323_v54 = vld [vmem:[%s1849_s15 + $0x1c0] sm:$0xff] }
  0x44   : > { %602 = vmatpush2.msra.mxu0 %v412_v55  ;;  %792 = vmatpush2.msra.mxu1 %v444_v56  ;;  %v325_v55 = vld [vmem:[%s1849_s15 + $0x1d0] sm:$0xff]  ;;  %v322_v56 = vld [vmem:[%s1849_s15 + $0x1b8] sm:$0xff] }
  0x45   : > { %603 = vmatprep.subr.mxu0 %v1551_v2  ;;  %793 = vmatprep.subr.mxu1 %v1551_v2 }
  0x46   : > { %604 = vmatpush2.msra.mxu0 %v411_v57  ;;  %794 = vmatpush2.msra.mxu1 %v443_v58  ;;  %v324_v57 = vld [vmem:[%s1849_s15 + $0x1c8] sm:$0xff] }
  0x47   : > { %605 = vmatprep.subr.mxu0 %v1551_v2  ;;  %795 = vmatprep.subr.mxu1 %v1551_v2  ;;  %v328_v58 = vld [vmem:[%s1849_s15 + $0x1e8] sm:$0xff] }
  0x48   : > { %606 = vmatpush2.msra.mxu0 %v410_v59  ;;  %796 = vmatpush2.msra.mxu1 %v442_v60  ;;  %v330_v59 = vld [vmem:[%s1849_s15 + $0x1f8] sm:$0xff]  ;;  %v327_v60 = vld [vmem:[%s1849_s15 + $0x1e0] sm:$0xff] }
  0x49   : > { %607 = vmatprep.subr.mxu0 %v1551_v2  ;;  %797 = vmatprep.subr.mxu1 %v1551_v2 }
  0x4a   : > { %608 = vmatpush2.msra.mxu0 %v409_v61  ;;  %798 = vmatpush2.msra.mxu1 %v441_v62  ;;  %v329_v61 = vld [vmem:[%s1849_s15 + $0x1f0] sm:$0xff] }
  0x4b   : > { %609 = vmatprep.subr.mxu0 %v1551_v2  ;;  %799 = vmatprep.subr.mxu1 %v1551_v2  ;;  %v333_v62 = vld [vmem:[%s1849_s15 + $0x210] sm:$0xff] }
  0x4c   : > { %610 = vmatpush2.msra.mxu0 %v408_v63  ;;  %611 = vmatprep.mubr.f32.mxu0 %v268_v0  ;;  %v335_v63 = vld [vmem:[%s1849_s15 + $0x220] sm:$0xff]  ;;  %v332_v0 = vld [vmem:[%s1849_s15 + $0x208] sm:$0xff] }
  0x4d   : > { %800 = vmatpush2.msra.mxu1 %v440_v1  ;;  %801 = vmatprep.mubr.f32.mxu1 %v270_v3  ;;  %v334_v1 = vld [vmem:[%s1849_s15 + $0x218] sm:$0xff] }
  0x4e   : > { %612 = vmatmul.mubr.f32.vlgmr.msra.gmra.mxu0 %v267_v4  ;;  %802 = vmatmul.mubr.f32.vlgmr.msra.gmra.mxu1 %v269_v5  ;;  %v338_v3 = vld [vmem:[%s1849_s15 + $0x238] sm:$0xff]  ;;  %v340_v4 = vld [vmem:[%s1849_s15 + $0x248] sm:$0xff]  ;;  %v337_v5 = vld [vmem:[%s1849_s15 + $0x230] sm:$0xff] }
  0x4f   : > { %1392 = vmatprep.subr.mxu0 %v1551_v2  ;;  %616 = vmatprep.mubr.f32.mxu0 %v273_v6  ;;  %v339_v6 = vld [vmem:[%s1849_s15 + $0x240] sm:$0xff] }
  0x50   : > { %1393 = vmatpush3.msra.mxu0 %v463_v7  ;;  %806 = vmatprep.mubr.f32.mxu1 %v275_v8  ;;  %v345_v8 = vld [vmem:[%s1849_s15 + $0x270] sm:$0xff] }
  0x51   : > { %1483 = vmatprep.subr.mxu1 %v1551_v2  ;;  %1394 = vmatprep.subr.mxu0 %v1551_v2 }
  0x52   : > { %617 = vmatmul.mubr.f32.gmra.mxu0 %v272_v9  ;;  %807 = vmatmul.mubr.f32.gmra.mxu1 %v274_v10  ;;  %v342_v9 = vld [vmem:[%s1849_s15 + $0x258] sm:$0xff]  ;;  %v344_v10 = vld [vmem:[%s1849_s15 + $0x268] sm:$0xff] }
  0x53   : > { %1491 = vmatpush3.msra.mxu1 %v463_v7  ;;  %621 = vmatprep.mubr.f32.mxu0 %v278_v11  ;;  %v343_v7 = vld [vmem:[%s1849_s15 + $0x260] sm:$0xff]  ;;  %v348_v11 = vld [vmem:[%s1849_s15 + $0x288] sm:$0xff] }
  0x54   : > { %811 = vmatprep.mubr.f32.mxu1 %v280_v12  ;;  %1395 = vmatpush3.msra.mxu0 %v462_v13  ;;  %v350_v12 = vld [vmem:[%s1849_s15 + $0x298] sm:$0xff] }
  0x55   : > { %1484 = vmatprep.subr.mxu1 %v1551_v2  ;;  %1396 = vmatprep.subr.mxu0 %v1551_v2 }
  0x56   : > { %622 = vmatmul.mubr.f32.gmra.mxu0 %v277_v14  ;;  %812 = vmatmul.mubr.f32.gmra.mxu1 %v279_v15  ;;  %v349_v14 = vld [vmem:[%s1849_s15 + $0x290] sm:$0xff] }
  0x57   : > { %626 = vmatprep.mubr.f32.mxu0 %v283_v16  ;;  %816 = vmatprep.mubr.f32.mxu1 %v285_v17  ;;  %v353_v15 = vld [vmem:[%s1849_s15 + $0x2b0] sm:$0xff]  ;;  %v355_v16 = vld [vmem:[%s1849_s15 + $0x2c0] sm:$0xff]  ;;  %v352_v17 = vld [vmem:[%s1849_s15 + $0x2a8] sm:$0xff] }
  0x58   : > { %1492 = vmatpush3.msra.mxu1 %v462_v13  ;;  %1397 = vmatpush3.msra.mxu0 %v461_v18  ;;  %v347_v13 = vld [vmem:[%s1849_s15 + $0x280] sm:$0xff] }
  0x59   : > { %1485 = vmatprep.subr.mxu1 %v1551_v2  ;;  %1398 = vmatprep.subr.mxu0 %v1551_v2 }
  0x5a   : > { %627 = vmatmul.mubr.f32.gmra.mxu0 %v282_v19  ;;  %817 = vmatmul.mubr.f32.gmra.mxu1 %v284_v20  ;;  %v358_v19 = vld [vmem:[%s1849_s15 + $0x2d8] sm:$0xff]  ;;  %v360_v20 = vld [vmem:[%s1849_s15 + $0x2e8] sm:$0xff] }
  0x5b   : > { %631 = vmatprep.mubr.f32.mxu0 %v288_v21  ;;  %821 = vmatprep.mubr.f32.mxu1 %v290_v22  ;;  %v357_v21 = vld [vmem:[%s1849_s15 + $0x2d0] sm:$0xff]  ;;  %v359_v22 = vld [vmem:[%s1849_s15 + $0x2e0] sm:$0xff] }
  0x5c   : > { %1493 = vmatpush3.msra.mxu1 %v461_v18  ;;  %1399 = vmatpush3.msra.mxu0 %v460_v23  ;;  %v354_v18 = vld [vmem:[%s1849_s15 + $0x2b8] sm:$0xff] }
  0x5d   : > { %1486 = vmatprep.subr.mxu1 %v1551_v2  ;;  %1400 = vmatprep.subr.mxu0 %v1551_v2 }
  0x5e   : > { %632 = vmatmul.mubr.f32.gmra.mxu0 %v287_v24  ;;  %822 = vmatmul.mubr.f32.gmra.mxu1 %v289_v25  ;;  %v365_v24 = vld [vmem:[%s1849_s15 + $0x310] sm:$0xff]  ;;  %v362_v25 = vld [vmem:[%s1849_s15 + $0x2f8] sm:$0xff] }
  0x5f   : > { %636 = vmatprep.mubr.f32.mxu0 %v293_v26  ;;  %826 = vmatprep.mubr.f32.mxu1 %v295_v27  ;;  %v364_v26 = vld [vmem:[%s1849_s15 + $0x308] sm:$0xff] }
  0x60   : > { %1494 = vmatpush3.msra.mxu1 %v460_v23  ;;  %1401 = vmatpush3.msra.mxu0 %v459_v28  ;;  %v363_v23 = vld [vmem:[%s1849_s15 + $0x300] sm:$0xff]  ;;  %v368_v27 = vld [vmem:[%s1849_s15 + $0x328] sm:$0xff] }
  0x61   : > { %1487 = vmatprep.subr.mxu1 %v1551_v2  ;;  %1402 = vmatprep.subr.mxu0 %v1551_v2 }
  0x62   : > { %637 = vmatmul.mubr.f32.gmra.mxu0 %v292_v29  ;;  %827 = vmatmul.mubr.f32.gmra.mxu1 %v294_v30  ;;  %v367_v29 = vld [vmem:[%s1849_s15 + $0x320] sm:$0xff]  ;;  %v369_v30 = vld [vmem:[%s1849_s15 + $0x330] sm:$0xff] }
  0x63   : > { %641 = vmatprep.mubr.f32.mxu0 %v298_v31  ;;  %831 = vmatprep.mubr.f32.mxu1 %v300_v32  ;;  %v373_v31 = vld [vmem:[%s1849_s15 + $0x350] sm:$0xff]  ;;  %v375_v32 = vld [vmem:[%s1849_s15 + $0x360] sm:$0xff] }
  0x64   : > { %1495 = vmatpush3.msra.mxu1 %v459_v28  ;;  %1403 = vmatpush3.msra.mxu0 %v458_v33  ;;  %v370_v28 = vld [vmem:[%s1849_s15 + $0x338] sm:$0xff] }
  0x65   : > { %1488 = vmatprep.subr.mxu1 %v1551_v2  ;;  %1404 = vmatprep.subr.mxu0 %v1551_v2 }
  0x66   : > { %642 = vmatmul.mubr.f32.gmra.mxu0 %v297_v34  ;;  %832 = vmatmul.mubr.f32.gmra.mxu1 %v299_v35  ;;  %v374_v34 = vld [vmem:[%s1849_s15 + $0x358] sm:$0xff] }
  0x67   : > { %646 = vmatprep.mubr.f32.mxu0 %v303_v36  ;;  %836 = vmatprep.mubr.f32.mxu1 %v305_v37  ;;  %v378_v35 = vld [vmem:[%s1849_s15 + $0x378] sm:$0xff]  ;;  %v380_v36 = vld [vmem:[%s1849_s15 + $0x388] sm:$0xff]  ;;  %v377_v37 = vld [vmem:[%s1849_s15 + $0x370] sm:$0xff] }
  0x68   : > { %1496 = vmatpush3.msra.mxu1 %v458_v33  ;;  %1405 = vmatpush3.msra.mxu0 %v457_v38  ;;  %v372_v33 = vld [vmem:[%s1849_s15 + $0x348] sm:$0xff] }
  0x69   : > { %1489 = vmatprep.subr.mxu1 %v1551_v2  ;;  %1406 = vmatprep.subr.mxu0 %v1551_v2 }
  0x6a   : > { %647 = vmatmul.mubr.f32.gmra.mxu0 %v302_v39  ;;  %837 = vmatmul.mubr.f32.gmra.mxu1 %v304_v40  ;;  %v383_v39 = vld [vmem:[%s1849_s15 + $0x3a0] sm:$0xff]  ;;  %v385_v40 = vld [vmem:[%s1849_s15 + $0x3b0] sm:$0xff] }
  0x6b   : > { %651 = vmatprep.mubr.f32.mxu0 %v308_v41  ;;  %841 = vmatprep.mubr.f32.mxu1 %v310_v42  ;;  %v382_v41 = vld [vmem:[%s1849_s15 + $0x398] sm:$0xff]  ;;  %v384_v42 = vld [vmem:[%s1849_s15 + $0x3a8] sm:$0xff] }
  0x6c   : > { %1497 = vmatpush3.msra.mxu1 %v457_v38  ;;  %1407 = vmatpush3.msra.mxu0 %v456_v43  ;;  %v379_v38 = vld [vmem:[%s1849_s15 + $0x380] sm:$0xff] }
  0x6d   : > { %1490 = vmatprep.subr.mxu1 %v1551_v2 }
  0x6e   : > { %652 = vmatmul.mubr.f32.gmra.mxu0 %v307_v44  ;;  %842 = vmatmul.mubr.f32.gmra.mxu1 %v309_v45  ;;  %v390_v44 = vld [vmem:[%s1849_s15 + $0x3d8] sm:$0xf]  ;;  %v387_v45 = vld [vmem:[%s1849_s15 + $0x3c0] sm:$0xf] }
  0x6f   : > { %656 = vmatprep.mubr.f32.mxu0 %v313_v46  ;;  %846 = vmatprep.mubr.f32.mxu1 %v315_v47  ;;  %v389_v46 = vld [vmem:[%s1849_s15 + $0x3d0] sm:$0xf]  ;;  %v271_v47 = vld [vmem:[%s1849_s15 + $0x20] sm:$0xff] }
  0x70   : > { %1498 = vmatpush3.msra.mxu1 %v456_v43  ;;  %v388_v43 = vld [vmem:[%s1849_s15 + $0x3c8] sm:$0xf] }
  0x72   : > { %657 = vmatmul.mubr.f32.gmra.mxu0 %v312_v48  ;;  %847 = vmatmul.mubr.f32.gmra.mxu1 %v314_v49  ;;  %v336_v48 = vld [vmem:[%s1849_s15 + $0x228] sm:$0xff] }
  0x73   : > { %661 = vmatprep.mubr.f32.mxu0 %v318_v50  ;;  %851 = vmatprep.mubr.f32.mxu1 %v320_v51  ;;  %v276_v49 = vld [vmem:[%s1849_s15 + $0x48] sm:$0xff]  ;;  %v341_v50 = vld [vmem:[%s1849_s15 + $0x250] sm:$0xff] }
  0x74   : > { %v281_v51 = vld [vmem:[%s1849_s15 + $0x70] sm:$0xff] }
  0x76   : > { %662 = vmatmul.mubr.f32.gmra.mxu0 %v317_v52  ;;  %852 = vmatmul.mubr.f32.gmra.mxu1 %v319_v53  ;;  %v346_v52 = vld [vmem:[%s1849_s15 + $0x278] sm:$0xff] }
  0x77   : > { %666 = vmatprep.mubr.f32.mxu0 %v323_v54  ;;  %856 = vmatprep.mubr.f32.mxu1 %v325_v55  ;;  %v286_v53 = vld [vmem:[%s1849_s15 + $0x98] sm:$0xff]  ;;  %v351_v54 = vld [vmem:[%s1849_s15 + $0x2a0] sm:$0xff] }
  0x78   : > { %v291_v55 = vld [vmem:[%s1849_s15 + $0xc0] sm:$0xff] }
  0x7a   : > { %667 = vmatmul.mubr.f32.gmra.mxu0 %v322_v56  ;;  %857 = vmatmul.mubr.f32.gmra.mxu1 %v324_v57  ;;  %v356_v56 = vld [vmem:[%s1849_s15 + $0x2c8] sm:$0xff] }
  0x7b   : > { %671 = vmatprep.mubr.f32.mxu0 %v328_v58  ;;  %861 = vmatprep.mubr.f32.mxu1 %v330_v59  ;;  %v296_v57 = vld [vmem:[%s1849_s15 + $0xe8] sm:$0xff]  ;;  %v361_v58 = vld [vmem:[%s1849_s15 + $0x2f0] sm:$0xff] }
  0x7c   : > { %v301_v59 = vld [vmem:[%s1849_s15 + $0x110] sm:$0xff] }
  0x7e   : > { %672 = vmatmul.mubr.f32.gmra.mxu0 %v327_v60  ;;  %862 = vmatmul.mubr.f32.gmra.mxu1 %v329_v61  ;;  %v366_v60 = vld [vmem:[%s1849_s15 + $0x318] sm:$0xff] }
  0x7f   : > { %676 = vmatprep.mubr.f32.mxu0 %v333_v62  ;;  %866 = vmatprep.mubr.f32.mxu1 %v335_v63  ;;  %v306_v61 = vld [vmem:[%s1849_s15 + $0x138] sm:$0xff]  ;;  %v371_v62 = vld [vmem:[%s1849_s15 + $0x340] sm:$0xff] }
  0x80   : > { %v311_v63 = vld [vmem:[%s1849_s15 + $0x160] sm:$0xff] }
  0x82   : > { %677 = vmatmul.mubr.f32.gmra.mxu0 %v332_v0  ;;  %867 = vmatmul.mubr.f32.gmra.mxu1 %v334_v1  ;;  %v376_v0 = vld [vmem:[%s1849_s15 + $0x368] sm:$0xff] }
  0x83   : > { %681 = vmatprep.mubr.f32.mxu0 %v338_v3  ;;  %871 = vmatprep.mubr.f32.mxu1 %v340_v4  ;;  %v316_v1 = vld [vmem:[%s1849_s15 + $0x188] sm:$0xff]  ;;  %v381_v3 = vld [vmem:[%s1849_s15 + $0x390] sm:$0xff] }
  0x84   : > { %v321_v4 = vld [vmem:[%s1849_s15 + $0x1b0] sm:$0xff] }
  0x86   : > { %682 = vmatmul.mubr.f32.gmra.mxu0 %v337_v5  ;;  %872 = vmatmul.mubr.f32.gmra.mxu1 %v339_v6  ;;  %v386_v5 = vld [vmem:[%s1849_s15 + $0x3b8] sm:$0xff] }
  0x87   : > { %686 = vmatprep.mubr.f32.mxu0 %v343_v7  ;;  %876 = vmatprep.mubr.f32.mxu1 %v345_v8  ;;  %v326_v6 = vld [vmem:[%s1849_s15 + $0x1d8] sm:$0xff]  ;;  %v391_v7 = vld [vmem:[%s1849_s15 + $0x3e0] sm:$0xf] }
  0x88   : > { %v331_v8 = vld [vmem:[%s1849_s15 + $0x200] sm:$0xff]  ;;  %s1500_s15 = smul.u32 200, %s2364_s18 }
  0x8a   : > { %687 = vmatmul.mubr.f32.gmra.mxu0 %v342_v9  ;;  %877 = vmatmul.mubr.f32.gmra.mxu1 %v344_v10  ;;  %v2112_v9 = vld [vmem:[%s2355_s2] ss:$0 sm:$0xff]  ;;  %s2209_s6 = scalar_lea.vmem %s2358_s5, %s1500_s15 }
  0x8b   : > { %691 = vmatprep.mubr.f32.mxu0 %v348_v11  ;;  %881 = vmatprep.mubr.f32.mxu1 %v350_v12 }
  0x8e   : > { %692 = vmatmul.mubr.f32.gmra.mxu0 %v347_v13  ;;  %882 = vmatmul.mubr.f32.gmra.mxu1 %v349_v14 }
  0x8f   : > { %696 = vmatprep.mubr.f32.mxu0 %v353_v15  ;;  %886 = vmatprep.mubr.f32.mxu1 %v355_v16 }
  0x92   : > { %697 = vmatmul.mubr.f32.gmra.mxu0 %v352_v17  ;;  %887 = vmatmul.mubr.f32.gmra.mxu1 %v354_v18 }
  0x93   : > { %701 = vmatprep.mubr.f32.mxu0 %v358_v19  ;;  %891 = vmatprep.mubr.f32.mxu1 %v360_v20 }
  0x96   : > { %702 = vmatmul.mubr.f32.gmra.mxu0 %v357_v21  ;;  %892 = vmatmul.mubr.f32.gmra.mxu1 %v359_v22 }
  0x97   : > { %706 = vmatprep.mubr.f32.mxu0 %v363_v23  ;;  %896 = vmatprep.mubr.f32.mxu1 %v365_v24 }
  0x9a   : > { %707 = vmatmul.mubr.f32.gmra.mxu0 %v362_v25  ;;  %897 = vmatmul.mubr.f32.gmra.mxu1 %v364_v26 }
  0x9b   : > { %711 = vmatprep.mubr.f32.mxu0 %v368_v27  ;;  %901 = vmatprep.mubr.f32.mxu1 %v370_v28 }
  0x9e   : > { %712 = vmatmul.mubr.f32.gmra.mxu0 %v367_v29  ;;  %902 = vmatmul.mubr.f32.gmra.mxu1 %v369_v30 }
  0x9f   : > { %716 = vmatprep.mubr.f32.mxu0 %v373_v31  ;;  %906 = vmatprep.mubr.f32.mxu1 %v375_v32 }
  0xa2   : > { %717 = vmatmul.mubr.f32.gmra.mxu0 %v372_v33  ;;  %907 = vmatmul.mubr.f32.gmra.mxu1 %v374_v34 }
  0xa3   : > { %721 = vmatprep.mubr.f32.mxu0 %v378_v35  ;;  %911 = vmatprep.mubr.f32.mxu1 %v380_v36 }
  0xa6   : > { %722 = vmatmul.mubr.f32.gmra.mxu0 %v377_v37  ;;  %912 = vmatmul.mubr.f32.gmra.mxu1 %v379_v38 }
  0xa7   : > { %726 = vmatprep.mubr.f32.mxu0 %v383_v39  ;;  %916 = vmatprep.mubr.f32.mxu1 %v385_v40 }
  0xaa   : > { %727 = vmatmul.mubr.f32.gmra.mxu0 %v382_v41  ;;  %917 = vmatmul.mubr.f32.gmra.mxu1 %v384_v42 }
  0xab   : > { %731 = vmatprep.mubr.f32.mxu0 %v388_v43  ;;  %921 = vmatprep.mubr.f32.mxu1 %v390_v44 }
  0xae   : > { %732 = vmatmul.mubr.f32.gmra.mxu0 %v387_v45  ;;  %922 = vmatmul.mubr.f32.gmra.mxu1 %v389_v46 }
  0xaf   : > { %1408 = vmatprep.mubr.msk.f32.mxu0 %vm1552_vm0, %v1551_v2  ;;  %1447 = vmatprep.mubr.msk.f32.mxu1 %vm1552_vm0, %v1551_v2 }
  0xb2   : > { %1409 = vmatmul.mubr.msk.f32.vlgmr.msra.gmra.mxu0 %vm471_vm1, %v271_v47  ;;  %1448 = vmatmul.mubr.msk.f32.vlgmr.msra.gmra.mxu1 %vm471_vm1, %v336_v48 }
  0xb3   : > { %1411 = vmatprep.mubr.msk.f32.mxu0 %vm1552_vm0, %v1551_v2  ;;  %1450 = vmatprep.mubr.msk.f32.mxu1 %vm1552_vm0, %v1551_v2 }
  0xb6   : > { %1412 = vmatmul.mubr.msk.f32.gmra.mxu0 %vm471_vm1, %v276_v49  ;;  %1451 = vmatmul.mubr.msk.f32.gmra.mxu1 %vm471_vm1, %v341_v50 }
  0xb7   : > { %1414 = vmatprep.mubr.msk.f32.mxu0 %vm1552_vm0, %v1551_v2  ;;  %1453 = vmatprep.mubr.msk.f32.mxu1 %vm1552_vm0, %v1551_v2 }
  0xba   : > { %1415 = vmatmul.mubr.msk.f32.gmra.mxu0 %vm471_vm1, %v281_v51  ;;  %1454 = vmatmul.mubr.msk.f32.gmra.mxu1 %vm471_vm1, %v346_v52 }
  0xbb   : > { %1417 = vmatprep.mubr.msk.f32.mxu0 %vm1552_vm0, %v1551_v2  ;;  %1456 = vmatprep.mubr.msk.f32.mxu1 %vm1552_vm0, %v1551_v2 }
  0xbe   : > { %1418 = vmatmul.mubr.msk.f32.gmra.mxu0 %vm471_vm1, %v286_v53  ;;  %1457 = vmatmul.mubr.msk.f32.gmra.mxu1 %vm471_vm1, %v351_v54 }
  0xbf   : > { %1420 = vmatprep.mubr.msk.f32.mxu0 %vm1552_vm0, %v1551_v2  ;;  %1459 = vmatprep.mubr.msk.f32.mxu1 %vm1552_vm0, %v1551_v2 }
  0xc2   : > { %1421 = vmatmul.mubr.msk.f32.gmra.mxu0 %vm471_vm1, %v291_v55  ;;  %1460 = vmatmul.mubr.msk.f32.gmra.mxu1 %vm471_vm1, %v356_v56 }
  0xc3   : > { %1423 = vmatprep.mubr.msk.f32.mxu0 %vm1552_vm0, %v1551_v2  ;;  %1462 = vmatprep.mubr.msk.f32.mxu1 %vm1552_vm0, %v1551_v2 }
  0xc6   : > { %1424 = vmatmul.mubr.msk.f32.gmra.mxu0 %vm471_vm1, %v296_v57  ;;  %1463 = vmatmul.mubr.msk.f32.gmra.mxu1 %vm471_vm1, %v361_v58 }
  0xc7   : > { %1426 = vmatprep.mubr.msk.f32.mxu0 %vm1552_vm0, %v1551_v2  ;;  %1465 = vmatprep.mubr.msk.f32.mxu1 %vm1552_vm0, %v1551_v2 }
  0xca   : > { %1427 = vmatmul.mubr.msk.f32.gmra.mxu0 %vm471_vm1, %v301_v59  ;;  %1466 = vmatmul.mubr.msk.f32.gmra.mxu1 %vm471_vm1, %v366_v60 }
  0xcb   : > { %1429 = vmatprep.mubr.msk.f32.mxu0 %vm1552_vm0, %v1551_v2  ;;  %1468 = vmatprep.mubr.msk.f32.mxu1 %vm1552_vm0, %v1551_v2 }
  0xce   : > { %1430 = vmatmul.mubr.msk.f32.gmra.mxu0 %vm471_vm1, %v306_v61  ;;  %1469 = vmatmul.mubr.msk.f32.gmra.mxu1 %vm471_vm1, %v371_v62 }
  0xcf   : > { %1432 = vmatprep.mubr.msk.f32.mxu0 %vm1552_vm0, %v1551_v2  ;;  %1471 = vmatprep.mubr.msk.f32.mxu1 %vm1552_vm0, %v1551_v2 }
  0xd2   : > { %1433 = vmatmul.mubr.msk.f32.gmra.mxu0 %vm471_vm1, %v311_v63  ;;  %1472 = vmatmul.mubr.msk.f32.gmra.mxu1 %vm471_vm1, %v376_v0 }
  0xd3   : > { %1435 = vmatprep.mubr.msk.f32.mxu0 %vm1552_vm0, %v1551_v2  ;;  %1474 = vmatprep.mubr.msk.f32.mxu1 %vm1552_vm0, %v1551_v2 }
  0xd6   : > { %1436 = vmatmul.mubr.msk.f32.gmra.mxu0 %vm471_vm1, %v316_v1  ;;  %1475 = vmatmul.mubr.msk.f32.gmra.mxu1 %vm471_vm1, %v381_v3 }
  0xd7   : > { %1438 = vmatprep.mubr.msk.f32.mxu0 %vm1552_vm0, %v1551_v2  ;;  %1477 = vmatprep.mubr.msk.f32.mxu1 %vm1552_vm0, %v1551_v2 }
  0xda   : > { %1439 = vmatmul.mubr.msk.f32.gmra.mxu0 %vm471_vm1, %v321_v4  ;;  %1478 = vmatmul.mubr.msk.f32.gmra.mxu1 %vm471_vm1, %v386_v5 }
  0xdb   : > { %1441 = vmatprep.mubr.msk.f32.mxu0 %vm1552_vm0, %v1551_v2  ;;  %1480 = vmatprep.mubr.msk.f32.mxu1 %vm1552_vm0, %v1551_v2 }
  0xde   : > { %1442 = vmatmul.mubr.msk.f32.gmra.mxu0 %vm471_vm1, %v326_v6  ;;  %1481 = vmatmul.mubr.msk.f32.gmra.mxu1 %vm471_vm1, %v391_v7 }
  0xdf   : > { %1444 = vmatprep.mubr.msk.f32.mxu0 %vm1552_vm0, %v1551_v2 }
  0xe2   : > { %1445 = vmatmul.mubr.msk.f32.gmra.mxu0 %vm471_vm1, %v331_v8 }
 0x10e   : > { %v613_v10 = vpop.f32.mrf.mxu0  ;;  %v803_v11 = vpop.f32.mrf.mxu1 }
 0x10f   : > { %v614_v12 = vadd.f32 %v2112_v9, %v613_v10 }
 0x110   : > { %v615_v13 = vpop.f32.mrf.mxu0  ;;  %v805_v14 = vpop.f32.mrf.mxu1 }
 0x111   : > { %v2115_v15 = vadd.f32 %v803_v11, %v614_v12 }
 0x112   : > { %v618_v16 = vpop.f32.mrf.mxu0  ;;  %v808_v17 = vpop.f32.mrf.mxu1 }
 0x113   : > { %v619_v2 = vadd.f32 %v2112_v9, %v618_v16 }
 0x114   : > { %v620_v18 = vpop.f32.mrf.mxu0  ;;  %v810_v19 = vpop.f32.mrf.mxu1 }
 0x115   : > { %v2118_v20 = vadd.f32 %v808_v17, %v619_v2 }
 0x116   : > { %v623_v21 = vpop.f32.mrf.mxu0  ;;  %v813_v22 = vpop.f32.mrf.mxu1 }
 0x117   : > { %v624_v23 = vadd.f32 %v2112_v9, %v623_v21 }
 0x118   : > { %v625_v24 = vpop.f32.mrf.mxu0  ;;  %v815_v25 = vpop.f32.mrf.mxu1 }
 0x119   : > { %v2121_v26 = vadd.f32 %v813_v22, %v624_v23 }
 0x11a   : > { %v628_v27 = vpop.f32.mrf.mxu0  ;;  %v818_v28 = vpop.f32.mrf.mxu1 }
 0x11b   : > { %v629_v29 = vadd.f32 %v2112_v9, %v628_v27 }
 0x11c   : > { %v630_v30 = vpop.f32.mrf.mxu0  ;;  %v820_v31 = vpop.f32.mrf.mxu1 }
 0x11d   : > { %v2124_v32 = vadd.f32 %v818_v28, %v629_v29 }
 0x11e   : > { %v633_v33 = vpop.f32.mrf.mxu0  ;;  %v823_v34 = vpop.f32.mrf.mxu1 }
 0x11f   : > { %v634_v35 = vadd.f32 %v2112_v9, %v633_v33 }
 0x120   : > { %v635_v36 = vpop.f32.mrf.mxu0  ;;  %v825_v37 = vpop.f32.mrf.mxu1 }
 0x121   : > { %v2127_v38 = vadd.f32 %v823_v34, %v634_v35 }
 0x122   : > { %v638_v39 = vpop.f32.mrf.mxu0  ;;  %v828_v40 = vpop.f32.mrf.mxu1 }
 0x123   : > { %v639_v41 = vadd.f32 %v2112_v9, %v638_v39 }
 0x124   : > { %v640_v42 = vpop.f32.mrf.mxu0  ;;  %v830_v43 = vpop.f32.mrf.mxu1 }
 0x125   : > { %v2130_v44 = vadd.f32 %v828_v40, %v639_v41 }
 0x126   : > { %v643_v45 = vpop.f32.mrf.mxu0  ;;  %v833_v46 = vpop.f32.mrf.mxu1 }
 0x127   : > { %v644_v47 = vadd.f32 %v2112_v9, %v643_v45 }
 0x128   : > { %v645_v48 = vpop.f32.mrf.mxu0  ;;  %v835_v49 = vpop.f32.mrf.mxu1 }
 0x129   : > { %v2133_v50 = vadd.f32 %v833_v46, %v644_v47 }
 0x12a   : > { %v648_v51 = vpop.f32.mrf.mxu0  ;;  %v838_v52 = vpop.f32.mrf.mxu1 }
 0x12b   : > { %v649_v53 = vadd.f32 %v2112_v9, %v648_v51 }
 0x12c   : > { %v650_v54 = vpop.f32.mrf.mxu0  ;;  %v840_v55 = vpop.f32.mrf.mxu1 }
 0x12d   : > { %v2136_v56 = vadd.f32 %v838_v52, %v649_v53 }
 0x12e   : > { %v653_v57 = vpop.f32.mrf.mxu0  ;;  %v843_v58 = vpop.f32.mrf.mxu1 }
 0x12f   : > { %v654_v59 = vadd.f32 %v2112_v9, %v653_v57 }
 0x130   : > { %v655_v60 = vpop.f32.mrf.mxu0  ;;  %v845_v61 = vpop.f32.mrf.mxu1 }
 0x131   : > { %v2139_v62 = vadd.f32 %v843_v58, %v654_v59 }
 0x132   : > { %v658_v63 = vpop.f32.mrf.mxu0  ;;  %v848_v0 = vpop.f32.mrf.mxu1 }
 0x133   : > { %v659_v1 = vadd.f32 %v2112_v9, %v658_v63 }
 0x134   : > { %v660_v3 = vpop.f32.mrf.mxu0  ;;  %v850_v4 = vpop.f32.mrf.mxu1 }
 0x135   : > { %v2142_v5 = vadd.f32 %v848_v0, %v659_v1 }
 0x136   : > { %v663_v6 = vpop.f32.mrf.mxu0  ;;  %v853_v7 = vpop.f32.mrf.mxu1 }
 0x137   : > { %v664_v8 = vadd.f32 %v2112_v9, %v663_v6 }
 0x138   : > { %v665_v10 = vpop.f32.mrf.mxu0  ;;  %v855_v11 = vpop.f32.mrf.mxu1 }
 0x139   : > { %v2145_v12 = vadd.f32 %v853_v7, %v664_v8 }
 0x13a   : > { %v668_v13 = vpop.f32.mrf.mxu0  ;;  %v858_v14 = vpop.f32.mrf.mxu1 }
 0x13b   : > { %v669_v16 = vadd.f32 %v2112_v9, %v668_v13 }
 0x13c   : > { %v670_v17 = vpop.f32.mrf.mxu0  ;;  %v860_v2 = vpop.f32.mrf.mxu1 }
 0x13d   : > { %v2148_v18 = vadd.f32 %v858_v14, %v669_v16 }
 0x13e   : > { %v673_v19 = vpop.f32.mrf.mxu0  ;;  %v863_v21 = vpop.f32.mrf.mxu1 }
 0x13f   : > { %v674_v22 = vadd.f32 %v2112_v9, %v673_v19 }
 0x140   : > { %v675_v23 = vpop.f32.mrf.mxu0  ;;  %v865_v24 = vpop.f32.mrf.mxu1 }
 0x141   : > { %v2151_v25 = vadd.f32 %v863_v21, %v674_v22 }
 0x142   : > { %v678_v27 = vpop.f32.mrf.mxu0  ;;  %v868_v28 = vpop.f32.mrf.mxu1 }
 0x143   : > { %v679_v2 = vadd.f32 %v2112_v9, %v678_v27  ;;  %v2195_v27 = vld [vmem:[%s2356_s3] ss:$0 sm:$0xff] }
 0x144   : > { %v680_v29 = vpop.f32.mrf.mxu0  ;;  %v870_v30 = vpop.f32.mrf.mxu1 }
 0x145   : > { %v869_v24 = vadd.f32 %v868_v28, %v679_v2 }
 0x146   : > { %v683_v31 = vpop.f32.mrf.mxu0  ;;  %v873_v33 = vpop.f32.mrf.mxu1 }
 0x147   : > { %v684_v29 = vadd.f32 %v2112_v9, %v683_v31  ;;  %v2200_v31 = vld [vmem:[%s2357_s4] ss:$0 sm:$0xff] }
 0x148   : > { %v685_v34 = vpop.f32.mrf.mxu0  ;;  %v875_v35 = vpop.f32.mrf.mxu1 }
 0x14a   : > { %v688_v36 = vpop.f32.mrf.mxu0  ;;  %v878_v37 = vpop.f32.mrf.mxu1 }
 0x14c   : > { %v690_v39 = vpop.f32.mrf.mxu0  ;;  %v880_v40 = vpop.f32.mrf.mxu1 }
 0x14d   : > { %v689_v40 = vadd.f32 %v2112_v9, %v688_v36 }
 0x14e   : > { %v693_v41 = vpop.f32.mrf.mxu0  ;;  %v2153_v42 = vpop.f32.mrf.mxu1 }
 0x150   : > { %v695_v43 = vpop.f32.mrf.mxu0  ;;  %v885_v45 = vpop.f32.mrf.mxu1 }
 0x152   : > { %v2155_v46 = vpop.f32.mrf.mxu0  ;;  %v2157_v47 = vpop.f32.mrf.mxu1 }
 0x154   : > { %v700_v48 = vpop.f32.mrf.mxu0  ;;  %v890_v49 = vpop.f32.mrf.mxu1 }
 0x155   : > { %v874_v48 = vadd.f32 %v873_v33, %v684_v29 }
 0x156   : > { %v2159_v51 = vpop.f32.mrf.mxu0  ;;  %v2161_v52 = vpop.f32.mrf.mxu1 }
 0x158   : > { %v705_v53 = vpop.f32.mrf.mxu0  ;;  %v895_v54 = vpop.f32.mrf.mxu1 }
 0x15a   : > { %v2163_v55 = vpop.f32.mrf.mxu0  ;;  %v2165_v57 = vpop.f32.mrf.mxu1 }
 0x15c   : > { %v710_v58 = vpop.f32.mrf.mxu0  ;;  %v900_v59 = vpop.f32.mrf.mxu1 }
 0x15e   : > { %v2167_v60 = vpop.f32.mrf.mxu0  ;;  %v2169_v61 = vpop.f32.mrf.mxu1 }
 0x160   : > { %v715_v63 = vpop.f32.mrf.mxu0  ;;  %v905_v0 = vpop.f32.mrf.mxu1 }
 0x161   : > { %v879_v63 = vadd.f32 %v878_v37, %v689_v40  ;;  %v694_v0 = vadd.f32 %v2112_v9, %v693_v41 }
 0x162   : > { %v2171_v1 = vpop.f32.mrf.mxu0  ;;  %v2173_v3 = vpop.f32.mrf.mxu1 }
 0x164   : > { %v720_v4 = vpop.f32.mrf.mxu0  ;;  %v910_v6 = vpop.f32.mrf.mxu1 }
 0x166   : > { %v2175_v7 = vpop.f32.mrf.mxu0  ;;  %v2177_v8 = vpop.f32.mrf.mxu1 }
 0x168   : > { %v725_v10 = vpop.f32.mrf.mxu0  ;;  %v915_v11 = vpop.f32.mrf.mxu1 }
 0x16a   : > { %v2179_v13 = vpop.f32.mrf.mxu0  ;;  %v2181_v14 = vpop.f32.mrf.mxu1 }
 0x16c   : > { %v730_v16 = vpop.f32.mrf.mxu0  ;;  %v920_v17 = vpop.f32.mrf.mxu1 }
 0x16e   : > { %v2184_v19 = vpop.f32.mrf.mxu0  ;;  %v2186_v21 = vpop.f32.mrf.mxu1 }
 0x170   : > { %v735_v22 = vpop.f32.mrf.mxu0  ;;  %v925_v23 = vpop.f32.mrf.mxu1 }
 0x171   : > { %v884_v23 = vadd.f32 %v2153_v42, %v694_v0 }
 0x172   : > { %v993_v30 = vpop.f32.mrf.mxu0  ;;  %v1058_v34 = vpop.f32.mrf.mxu1 }
 0x173   : > { %v994_v35 = vadd.f32 %v993_v30, %v2115_v15  ;;  %v1059_v39 = vadd.f32 %v1058_v34, %v869_v24  ;;  %v699_v24 = vadd.f32 %v2112_v9, %v2155_v46 }
 0x174   : > { %v1410_v43 = vpop.f32.mrf.mxu0  ;;  %v1449_v45 = vpop.f32.mrf.mxu1 }
 0x175   : > { %v1117_v49 = vmax.f32 %v994_v35, 0.0  ;;  %v1130_v28 = vmax.f32 %v1059_v39, 0.0 }
 0x176   : > { %v998_v15 = vpop.f32.mrf.mxu0  ;;  %v1063_v53 = vpop.f32.mrf.mxu1 }
 0x177   : > { %v1149_v36 = vmul.f32 %v2195_v27, %v1117_v49  ;;  %v1162_v54 = vmul.f32 %v2195_v27, %v1130_v28  ;;  %v999_v58 = vadd.f32 %v998_v15, %v2118_v20  ;;  %v1064_v59 = vadd.f32 %v1063_v53, %v874_v48 }
 0x178   : > { %v1413_v33 = vpop.f32.mrf.mxu0  ;;  %v1452_v4 = vpop.f32.mrf.mxu1  ;;  %v889_v49 = vadd.f32 %v2157_v47, %v699_v24  ;;  %v704_v28 = vadd.f32 %v2112_v9, %v2159_v51  ;;  %v714_v24 = vadd.f32 %v2112_v9, %v2167_v60 }
 0x179   : > { %v1181_v6 = vadd.f32 %v2200_v31, %v1149_v36  ;;  %v1194_v10 = vadd.f32 %v2200_v31, %v1162_v54  ;;  %v1118_v11 = vmax.f32 %v999_v58, 0.0  ;;  %v1131_v16 = vmax.f32 %v1064_v59, 0.0 }
 0x17a   : > { %v1003_v20 = vpop.f32.mrf.mxu0  ;;  %v1068_v17 = vpop.f32.mrf.mxu1  ;;  %v894_v4 = vadd.f32 %v2161_v52, %v704_v28 }
 0x17b   : > { %1206 = vst.msk [vmem:[%s2209_s6] sm:$0xff] %vm471_vm1, %v1181_v6  ;;  %1219 = vst.msk [vmem:[%s2209_s6 + $0x68] sm:$0xff] %vm471_vm1, %v1194_v10  ;;  %v1150_v37 = vmul.f32 %v2195_v27, %v1118_v11  ;;  %v1163_v41 = vmul.f32 %v2195_v27, %v1131_v16  ;;  %v1004_v2 = vadd.f32 %v1003_v20, %v2121_v26 }
 0x17c   : > { %v1069_v22 = vadd.f32 %v1068_v17, %v879_v63  ;;  %v1416_v29 = vpop.f32.mrf.mxu0  ;;  %v1455_v30 = vpop.f32.mrf.mxu1  ;;  %v709_v6 = vadd.f32 %v2112_v9, %v2163_v55 }
 0x17d   : > { %v1182_v34 = vadd.f32 %v2200_v31, %v1150_v37  ;;  %v1195_v35 = vadd.f32 %v2200_v31, %v1163_v41  ;;  %v1119_v39 = vmax.f32 %v1004_v2, 0.0 }
 0x17e   : > { %v1132_v40 = vmax.f32 %v1069_v22, 0.0  ;;  %v1008_v43 = vpop.f32.mrf.mxu0  ;;  %v1073_v45 = vpop.f32.mrf.mxu1 }
 0x17f   : > { %1207 = vst.msk [vmem:[%s2209_s6 + $0x8] sm:$0xff] %vm471_vm1, %v1182_v34  ;;  %1220 = vst.msk [vmem:[%s2209_s6 + $0x70] sm:$0xff] %vm471_vm1, %v1195_v35  ;;  %v1151_v26 = vmul.f32 %v2195_v27, %v1119_v39  ;;  %v1009_v46 = vadd.f32 %v1008_v43, %v2124_v32  ;;  %v1074_v48 = vadd.f32 %v1073_v45, %v884_v23 }
 0x180   : > { %v1164_v42 = vmul.f32 %v2195_v27, %v1132_v40  ;;  %v1419_v15 = vpop.f32.mrf.mxu0  ;;  %v1458_v53 = vpop.f32.mrf.mxu1  ;;  %v899_v23 = vadd.f32 %v2165_v57, %v709_v6 }
 0x181   : > { %v1183_v36 = vadd.f32 %v2200_v31, %v1151_v26  ;;  %v1120_v58 = vmax.f32 %v1009_v46, 0.0  ;;  %v1133_v59 = vmax.f32 %v1074_v48, 0.0  ;;  %v719_v46 = vadd.f32 %v2112_v9, %v2171_v1 }
 0x182   : > { %v1196_v54 = vadd.f32 %v2200_v31, %v1164_v42  ;;  %v1013_v63 = vpop.f32.mrf.mxu0  ;;  %v1078_v0 = vpop.f32.mrf.mxu1  ;;  %v904_v42 = vadd.f32 %v2169_v61, %v714_v24 }
 0x183   : > { %1208 = vst.msk [vmem:[%s2209_s6 + $0x10] sm:$0xff] %vm471_vm1, %v1183_v36  ;;  %v1152_v32 = vmul.f32 %v2195_v27, %v1120_v58  ;;  %v1165_v47 = vmul.f32 %v2195_v27, %v1133_v59  ;;  %v1014_v51 = vadd.f32 %v1013_v63, %v2127_v38  ;;  %v1079_v33 = vadd.f32 %v1078_v0, %v889_v49 }
 0x184   : > { %1221 = vst.msk [vmem:[%s2209_s6 + $0x78] sm:$0xff] %vm471_vm1, %v1196_v54  ;;  %v1422_v10 = vpop.f32.mrf.mxu0  ;;  %v1461_v11 = vpop.f32.mrf.mxu1  ;;  %v909_v63 = vadd.f32 %v2173_v3, %v719_v46  ;;  %v724_v0 = vadd.f32 %v2112_v9, %v2175_v7 }
 0x185   : > { %v1184_v16 = vadd.f32 %v2200_v31, %v1152_v32  ;;  %v1197_v20 = vadd.f32 %v2200_v31, %v1165_v47  ;;  %v1121_v17 = vmax.f32 %v1014_v51, 0.0  ;;  %v1134_v37 = vmax.f32 %v1079_v33, 0.0 }
 0x186   : > { %v1018_v41 = vpop.f32.mrf.mxu0  ;;  %v1083_v2 = vpop.f32.mrf.mxu1 }
 0x187   : > { %1209 = vst.msk [vmem:[%s2209_s6 + $0x18] sm:$0xff] %vm471_vm1, %v1184_v16  ;;  %1222 = vst.msk [vmem:[%s2209_s6 + $0x80] sm:$0xff] %vm471_vm1, %v1197_v20  ;;  %v1153_v38 = vmul.f32 %v2195_v27, %v1121_v17  ;;  %v1166_v52 = vmul.f32 %v2195_v27, %v1134_v37  ;;  %v1019_v55 = vadd.f32 %v1018_v41, %v2130_v44 }
 0x188   : > { %v1084_v22 = vadd.f32 %v1083_v2, %v894_v4  ;;  %v1425_v29 = vpop.f32.mrf.mxu0  ;;  %v1464_v30 = vpop.f32.mrf.mxu1  ;;  %v914_v20 = vadd.f32 %v2177_v8, %v724_v0  ;;  %v729_v17 = vadd.f32 %v2112_v9, %v2179_v13 }
 0x189   : > { %v1185_v34 = vadd.f32 %v2200_v31, %v1153_v38  ;;  %v1198_v35 = vadd.f32 %v2200_v31, %v1166_v52  ;;  %v1122_v39 = vmax.f32 %v1019_v55, 0.0  ;;  %v734_v30 = vadd.f32 %v2112_v9, %v2184_v19 }
 0x18a   : > { %v1135_v40 = vmax.f32 %v1084_v22, 0.0  ;;  %v1023_v43 = vpop.f32.mrf.mxu0  ;;  %v1088_v45 = vpop.f32.mrf.mxu1  ;;  %v919_v29 = vadd.f32 %v2181_v14, %v729_v17 }
 0x18b   : > { %1210 = vst.msk [vmem:[%s2209_s6 + $0x20] sm:$0xff] %vm471_vm1, %v1185_v34  ;;  %1223 = vst.msk [vmem:[%s2209_s6 + $0x88] sm:$0xff] %vm471_vm1, %v1198_v35  ;;  %v1154_v44 = vmul.f32 %v2195_v27, %v1122_v39  ;;  %v1024_v60 = vadd.f32 %v1023_v43, %v2133_v50  ;;  %v1089_v26 = vadd.f32 %v1088_v45, %v899_v23 }
 0x18c   : > { %v1167_v57 = vmul.f32 %v2195_v27, %v1135_v40  ;;  %v1428_v48 = vpop.f32.mrf.mxu0  ;;  %v1467_v49 = vpop.f32.mrf.mxu1 }
 0x18d   : > { %v1186_v28 = vadd.f32 %v2200_v31, %v1154_v44  ;;  %v1123_v53 = vmax.f32 %v1024_v60, 0.0  ;;  %v1136_v36 = vmax.f32 %v1089_v26, 0.0  ;;  %v924_v60 = vadd.f32 %v2186_v21, %v734_v30 }
 0x18e   : > { %v1199_v15 = vadd.f32 %v2200_v31, %v1167_v57  ;;  %v1028_v54 = vpop.f32.mrf.mxu0  ;;  %v1093_v58 = vpop.f32.mrf.mxu1 }
 0x18f   : > { %1211 = vst.msk [vmem:[%s2209_s6 + $0x28] sm:$0xff] %vm471_vm1, %v1186_v28  ;;  %v1155_v50 = vmul.f32 %v2195_v27, %v1123_v53  ;;  %v1168_v61 = vmul.f32 %v2195_v27, %v1136_v36  ;;  %v1029_v1 = vadd.f32 %v1028_v54, %v2136_v56  ;;  %v1094_v59 = vadd.f32 %v1093_v58, %v904_v42 }
 0x190   : > { %1224 = vst.msk [vmem:[%s2209_s6 + $0x90] sm:$0xff] %vm471_vm1, %v1199_v15  ;;  %v1431_v32 = vpop.f32.mrf.mxu0  ;;  %v1470_v47 = vpop.f32.mrf.mxu1 }
 0x191   : > { %v1187_v51 = vadd.f32 %v2200_v31, %v1155_v50  ;;  %v1200_v33 = vadd.f32 %v2200_v31, %v1168_v61  ;;  %v1124_v4 = vmax.f32 %v1029_v1, 0.0  ;;  %v1137_v6 = vmax.f32 %v1094_v59, 0.0 }
 0x192   : > { %v1033_v10 = vpop.f32.mrf.mxu0  ;;  %v1098_v11 = vpop.f32.mrf.mxu1 }
 0x193   : > { %1212 = vst.msk [vmem:[%s2209_s6 + $0x30] sm:$0xff] %vm471_vm1, %v1187_v51  ;;  %1225 = vst.msk [vmem:[%s2209_s6 + $0x98] sm:$0xff] %vm471_vm1, %v1200_v33  ;;  %v1156_v56 = vmul.f32 %v2195_v27, %v1124_v4  ;;  %v1169_v3 = vmul.f32 %v2195_v27, %v1137_v6  ;;  %v1034_v7 = vadd.f32 %v1033_v10, %v2139_v62 }
 0x194   : > { %v1099_v16 = vadd.f32 %v1098_v11, %v909_v63  ;;  %v1434_v37 = vpop.f32.mrf.mxu0  ;;  %v1473_v41 = vpop.f32.mrf.mxu1 }
 0x195   : > { %v1188_v2 = vadd.f32 %v2200_v31, %v1156_v56  ;;  %v1201_v38 = vadd.f32 %v2200_v31, %v1169_v3  ;;  %v1125_v52 = vmax.f32 %v1034_v7, 0.0 }
 0x196   : > { %v1138_v55 = vmax.f32 %v1099_v16, 0.0  ;;  %v1038_v22 = vpop.f32.mrf.mxu0  ;;  %v1103_v23 = vpop.f32.mrf.mxu1 }
 0x197   : > { %1213 = vst.msk [vmem:[%s2209_s6 + $0x38] sm:$0xff] %vm471_vm1, %v1188_v2  ;;  %1226 = vst.msk [vmem:[%s2209_s6 + $0xa0] sm:$0xff] %vm471_vm1, %v1201_v38  ;;  %v1157_v62 = vmul.f32 %v2195_v27, %v1125_v52  ;;  %v1039_v13 = vadd.f32 %v1038_v22, %v2142_v5  ;;  %v1104_v24 = vadd.f32 %v1103_v23, %v914_v20 }
 0x198   : > { %v1170_v8 = vmul.f32 %v2195_v27, %v1138_v55  ;;  %v1437_v34 = vpop.f32.mrf.mxu0  ;;  %v1476_v35 = vpop.f32.mrf.mxu1 }
 0x199   : > { %v1189_v39 = vadd.f32 %v2200_v31, %v1157_v62  ;;  %v1126_v43 = vmax.f32 %v1039_v13, 0.0  ;;  %v1139_v45 = vmax.f32 %v1104_v24, 0.0 }
 0x19a   : > { %v1202_v40 = vadd.f32 %v2200_v31, %v1170_v8  ;;  %v1043_v44 = vpop.f32.mrf.mxu0  ;;  %v1108_v57 = vpop.f32.mrf.mxu1 }
 0x19b   : > { %1214 = vst.msk [vmem:[%s2209_s6 + $0x40] sm:$0xff] %vm471_vm1, %v1189_v39  ;;  %v1158_v5 = vmul.f32 %v2195_v27, %v1126_v43  ;;  %v1171_v9 = vmul.f32 %v2195_v27, %v1139_v45  ;;  %v1044_v14 = vadd.f32 %v1043_v44, %v2145_v12  ;;  %v1109_v19 = vadd.f32 %v1108_v57, %v919_v29 }
 0x19c   : > { %1227 = vst.msk [vmem:[%s2209_s6 + $0xa8] sm:$0xff] %vm471_vm1, %v1202_v40  ;;  %v1440_v26 = vpop.f32.mrf.mxu0  ;;  %v1479_v42 = vpop.f32.mrf.mxu1 }
 0x19d   : > { %v1190_v46 = vadd.f32 %v2200_v31, %v1158_v5  ;;  %v1203_v48 = vadd.f32 %v2200_v31, %v1171_v9  ;;  %v1127_v49 = vmax.f32 %v1044_v14, 0.0  ;;  %v1140_v28 = vmax.f32 %v1109_v19, 0.0 }
 0x19e   : > { %v1048_v15 = vpop.f32.mrf.mxu0  ;;  %v1113_v53 = vpop.f32.mrf.mxu1 }
 0x19f   : > { %1215 = vst.msk [vmem:[%s2209_s6 + $0x48] sm:$0xff] %vm471_vm1, %v1190_v46  ;;  %1228 = vst.msk [vmem:[%s2209_s6 + $0xb0] sm:$0xff] %vm471_vm1, %v1203_v48  ;;  %v1159_v12 = vmul.f32 %v2195_v27, %v1127_v49  ;;  %v1172_v21 = vmul.f32 %v2195_v27, %v1140_v28  ;;  %v1049_v36 = vadd.f32 %v1048_v15, %v2148_v18 }
 0x1a0   : > { %v1114_v54 = vadd.f32 %v1113_v53, %v924_v60  ;;  %v1443_v58 = vpop.f32.mrf.mxu0  ;;  %v1482_v50 = vpop.f32.mrf.mxu1 }
 0x1a1   : > { %v1191_v61 = vadd.f32 %v2200_v31, %v1159_v12  ;;  %v1204_v1 = vadd.f32 %v2200_v31, %v1172_v21  ;;  %v1128_v59 = vmax.f32 %v1049_v36, 0.0 }
 0x1a2   : > { %v1141_v63 = vmax.f32 %v1114_v54, 0.0  ;;  %v1053_v0 = vpop.f32.mrf.mxu0 }
 0x1a3   : > { %1216 = vst.msk [vmem:[%s2209_s6 + $0x50] sm:$0xff] %vm471_vm1, %v1191_v61  ;;  %1229 = vst.msk [vmem:[%s2209_s6 + $0xb8] sm:$0xff] %vm471_vm1, %v1204_v1  ;;  %v1160_v32 = vmul.f32 %v2195_v27, %v1128_v59  ;;  %v1054_v47 = vadd.f32 %v1053_v0, %v2151_v25 }
 0x1a4   : > { %v1173_v18 = vmul.f32 %v2195_v27, %v1141_v63  ;;  %v1446_v51 = vpop.f32.mrf.mxu0 }
 0x1a5   : > { %v1192_v33 = vadd.f32 %v2200_v31, %v1160_v32  ;;  %v1129_v6 = vmax.f32 %v1054_v47, 0.0 }
 0x1a6   : > { %v1205_v4 = vadd.f32 %v2200_v31, %v1173_v18 }
 0x1a7   : > { %1217 = vst.msk [vmem:[%s2209_s6 + $0x58] sm:$0xff] %vm471_vm1, %v1192_v33  ;;  %v1161_v10 = vmul.f32 %v2195_v27, %v1129_v6 }
 0x1a8   : > { %1231 = vst.msk [vmem:[%s2209_s6 + $0xc0] sm:$0xf] %vm1230_vm2, %v1205_v4 }
 0x1a9   : > { %v1193_v11 = vadd.f32 %v2200_v31, %v1161_v10 }
 0x1ab   : > { %1218 = vst.msk [vmem:[%s2209_s6 + $0x60] sm:$0xff] %vm471_vm1, %v1193_v11 }
 0x1ac PF: > { %s15_s20 = sadd.s32 1, %s1549_s20   ;;  %s2359_s18 = smov %s1545_s19 }
 0x1ad   : > { %p12_p5 = scmp.ge.s32.totalorder %s15_s20, 4   ;;  %s2360_s19 = smov %s2362_s21 }
 0x1af   :  { %14 = sbr.rel (!%p12_p5) target bundleno = 2 (0x2), region = 70 }

// kernel: forward.10
= control target key start
LH: loop header
LB: loop body
LE: loop exit
PB: predicated region body
PF: predicated region fallthrough
CT: control target
= control target key end

     0   :  { %s1112_s18 = smov 0   ;;  %s1114_s19 = smov 0   ;;  %s1463_s0 = inlined_call_operand.vmem [shape: f32[2,49,576], index: 0, kind: input, shape index: {}]   ;;  %s1464_s1 = inlined_call_operand.vmem [shape: f32[576,128], index: 1, kind: input, shape index: {}]   ;;  %s1465_s2 = inlined_call_operand.vmem [shape: f32[1,128], index: 2, kind: input, shape index: {}]   ;;  %s1466_s3 = inlined_call_operand.vmem [shape: f32[1,128], index: 3, kind: input, shape index: {}]   ;;  %s1467_s4 = inlined_call_operand.vmem [shape: f32[1,128], index: 4, kind: input, shape index: {}]   ;;  %s1468_s5 = inlined_call_operand.vmem [shape: f32[2,49,128], index: 5, kind: output, shape index: {}]  }
   0x1   :  { %s1116_s20 = smov 0  }
   0x2 LB: > { %s27_s21 = sadd.s32 1, %s1074_s19  ;;  %p839_p0 = scmp.ge.s32.totalorder %s1078_s20, 1  ;;  %s1078_s20 = sphi %s1116_s20, %s15_s20   ;;  %s1074_s19 = sphi %s1114_s19, %s1470_s19   ;;  %s1070_s18 = sphi %s1112_s18, %s1469_s18  }
   0x3   : > { %p29_p1 = scmp.ge.s32.totalorder %s27_s21, 2  ;;  %p209_p2 = scmp.lt.s32.totalorder %s1078_s20, 3 }
   0x5   : > { %s1472_s21 = smov (%p29_p1, %s27_s21), 0  ;;  %p210_p3 = pnand %p839_p0, %p209_p2 }
   0x6   : > { %p247_p4 = scmp.lt.s32.totalorder (!%p210_p3), %s1070_s18, 1 }
   0x7   : > { %213 = sbr.rel (%p210_p3) target bundleno = 291 (0x123), region = 40 }
   0xc   : > { %v333_v0 = vld [vmem:[%s1464_s1 + $0xf8] sm:$0xff]  ;;  %v332_v4 = vld [vmem:[%s1464_s1 + $0xf0] sm:$0xff]  ;;  %v331_v8 = vld [vmem:[%s1464_s1 + $0xe8] sm:$0xff]  ;;  %s1474_s18 = smov (!%p247_p4, %s1070_s18), 1  ;;  %vm381_vm0 = vcmask 523264   ;;  %vm1081_vm1 = vmmov 0  }
   0xd   : > { %v365_v1 = vld [vmem:[%s1464_s1 + $0x1f8] sm:$0xff]  ;;  %854 = vmatprep.subr.mxu0 %v333_v0  ;;  %v364_v5 = vld [vmem:[%s1464_s1 + $0x1f0] sm:$0xff]  ;;  %v363_v9 = vld [vmem:[%s1464_s1 + $0x1e8] sm:$0xff]  ;;  %s1028_s13 = smul.u32 280, %s1474_s18 }
   0xe   : > { %v317_v2 = vld [vmem:[%s1464_s1 + $0x78] sm:$0xff]  ;;  %907 = vmatprep.subr.mxu1 %v365_v1  ;;  %v316_v6 = vld [vmem:[%s1464_s1 + $0x70] sm:$0xff]  ;;  %v315_v10 = vld [vmem:[%s1464_s1 + $0x68] sm:$0xff]  ;;  %s1029_s25 = smul.u32 56, %s1474_s18 }
   0xf   : > { %v349_v3 = vld [vmem:[%s1464_s1 + $0x178] sm:$0xff]  ;;  %855 = vmatpush3.msra.mxu0 %v317_v2  ;;  %v348_v7 = vld [vmem:[%s1464_s1 + $0x170] sm:$0xff]  ;;  %v347_v11 = vld [vmem:[%s1464_s1 + $0x168] sm:$0xff]  ;;  %s1316_s11 = scalar_lea.vmem %s1463_s0, %s1028_s13 }
  0x10   : > { %908 = vmatpush3.msra.mxu1 %v349_v3  ;;  %856 = vmatprep.subr.mxu0 %v332_v4  ;;  %v330_v12 = vld [vmem:[%s1464_s1 + $0xe0] sm:$0xff]  ;;  %v329_v16 = vld [vmem:[%s1464_s1 + $0xd8] sm:$0xff]  ;;  %v328_v20 = vld [vmem:[%s1464_s1 + $0xd0] sm:$0xff]  ;;  %s1445_s6 = scalar_lea.vmem %s1468_s5, %s1029_s25 }
  0x11   : > { %909 = vmatprep.subr.mxu1 %v364_v5  ;;  %857 = vmatpush3.msra.mxu0 %v316_v6  ;;  %v362_v13 = vld [vmem:[%s1464_s1 + $0x1e0] sm:$0xff]  ;;  %v361_v17 = vld [vmem:[%s1464_s1 + $0x1d8] sm:$0xff]  ;;  %v360_v21 = vld [vmem:[%s1464_s1 + $0x1d0] sm:$0xff] }
  0x12   : > { %910 = vmatpush3.msra.mxu1 %v348_v7  ;;  %858 = vmatprep.subr.mxu0 %v331_v8  ;;  %v314_v14 = vld [vmem:[%s1464_s1 + $0x60] sm:$0xff]  ;;  %v313_v18 = vld [vmem:[%s1464_s1 + $0x58] sm:$0xff]  ;;  %v312_v22 = vld [vmem:[%s1464_s1 + $0x50] sm:$0xff]  ;;  %v1080_v7 = vmov 0.0  }
  0x13   : > { %911 = vmatprep.subr.mxu1 %v363_v9  ;;  %v346_v15 = vld [vmem:[%s1464_s1 + $0x160] sm:$0xff]  ;;  %859 = vmatpush3.msra.mxu0 %v315_v10  ;;  %v345_v19 = vld [vmem:[%s1464_s1 + $0x158] sm:$0xff]  ;;  %v344_v23 = vld [vmem:[%s1464_s1 + $0x150] sm:$0xff] }
  0x14   : > { %912 = vmatpush3.msra.mxu1 %v347_v11  ;;  %860 = vmatprep.subr.mxu0 %v330_v12  ;;  %v327_v24 = vld [vmem:[%s1464_s1 + $0xc8] sm:$0xff]  ;;  %v326_v28 = vld [vmem:[%s1464_s1 + $0xc0] sm:$0xff]  ;;  %v325_v32 = vld [vmem:[%s1464_s1 + $0xb8] sm:$0xff] }
  0x15   : > { %913 = vmatprep.subr.mxu1 %v362_v13  ;;  %861 = vmatpush3.msra.mxu0 %v314_v14  ;;  %v359_v25 = vld [vmem:[%s1464_s1 + $0x1c8] sm:$0xff]  ;;  %v358_v29 = vld [vmem:[%s1464_s1 + $0x1c0] sm:$0xff]  ;;  %v357_v33 = vld [vmem:[%s1464_s1 + $0x1b8] sm:$0xff] }
  0x16   : > { %914 = vmatpush3.msra.mxu1 %v346_v15  ;;  %862 = vmatprep.subr.mxu0 %v329_v16  ;;  %v311_v26 = vld [vmem:[%s1464_s1 + $0x48] sm:$0xff]  ;;  %v310_v30 = vld [vmem:[%s1464_s1 + $0x40] sm:$0xff]  ;;  %v309_v34 = vld [vmem:[%s1464_s1 + $0x38] sm:$0xff] }
  0x17   : > { %915 = vmatprep.subr.mxu1 %v361_v17  ;;  %863 = vmatpush3.msra.mxu0 %v313_v18  ;;  %v343_v27 = vld [vmem:[%s1464_s1 + $0x148] sm:$0xff]  ;;  %v342_v31 = vld [vmem:[%s1464_s1 + $0x140] sm:$0xff]  ;;  %v341_v35 = vld [vmem:[%s1464_s1 + $0x138] sm:$0xff] }
  0x18   : > { %916 = vmatpush3.msra.mxu1 %v345_v19  ;;  %864 = vmatprep.subr.mxu0 %v328_v20  ;;  %v324_v36 = vld [vmem:[%s1464_s1 + $0xb0] sm:$0xff]  ;;  %v323_v40 = vld [vmem:[%s1464_s1 + $0xa8] sm:$0xff]  ;;  %v322_v44 = vld [vmem:[%s1464_s1 + $0xa0] sm:$0xff] }
  0x19   : > { %917 = vmatprep.subr.mxu1 %v360_v21  ;;  %865 = vmatpush3.msra.mxu0 %v312_v22  ;;  %v356_v37 = vld [vmem:[%s1464_s1 + $0x1b0] sm:$0xff]  ;;  %v355_v41 = vld [vmem:[%s1464_s1 + $0x1a8] sm:$0xff]  ;;  %v354_v45 = vld [vmem:[%s1464_s1 + $0x1a0] sm:$0xff] }
  0x1a   : > { %918 = vmatpush3.msra.mxu1 %v344_v23  ;;  %866 = vmatprep.subr.mxu0 %v327_v24  ;;  %v308_v38 = vld [vmem:[%s1464_s1 + $0x30] sm:$0xff]  ;;  %v307_v42 = vld [vmem:[%s1464_s1 + $0x28] sm:$0xff]  ;;  %v306_v46 = vld [vmem:[%s1464_s1 + $0x20] sm:$0xff] }
  0x1b   : > { %919 = vmatprep.subr.mxu1 %v359_v25  ;;  %867 = vmatpush3.msra.mxu0 %v311_v26  ;;  %v340_v39 = vld [vmem:[%s1464_s1 + $0x130] sm:$0xff]  ;;  %v339_v43 = vld [vmem:[%s1464_s1 + $0x128] sm:$0xff]  ;;  %v338_v47 = vld [vmem:[%s1464_s1 + $0x120] sm:$0xff] }
  0x1c   : > { %920 = vmatpush3.msra.mxu1 %v343_v27  ;;  %868 = vmatprep.subr.mxu0 %v326_v28  ;;  %v321_v48 = vld [vmem:[%s1464_s1 + $0x98] sm:$0xff]  ;;  %v320_v52 = vld [vmem:[%s1464_s1 + $0x90] sm:$0xff]  ;;  %v319_v56 = vld [vmem:[%s1464_s1 + $0x88] sm:$0xff] }
  0x1d   : > { %921 = vmatprep.subr.mxu1 %v358_v29  ;;  %869 = vmatpush3.msra.mxu0 %v310_v30  ;;  %v353_v49 = vld [vmem:[%s1464_s1 + $0x198] sm:$0xff]  ;;  %v352_v53 = vld [vmem:[%s1464_s1 + $0x190] sm:$0xff]  ;;  %v351_v57 = vld [vmem:[%s1464_s1 + $0x188] sm:$0xff] }
  0x1e   : > { %922 = vmatpush3.msra.mxu1 %v342_v31  ;;  %870 = vmatprep.subr.mxu0 %v325_v32  ;;  %v305_v50 = vld [vmem:[%s1464_s1 + $0x18] sm:$0xff]  ;;  %v304_v54 = vld [vmem:[%s1464_s1 + $0x10] sm:$0xff]  ;;  %v303_v58 = vld [vmem:[%s1464_s1 + $0x8] sm:$0xff] }
  0x1f   : > { %923 = vmatprep.subr.mxu1 %v357_v33  ;;  %871 = vmatpush3.msra.mxu0 %v309_v34  ;;  %v337_v51 = vld [vmem:[%s1464_s1 + $0x118] sm:$0xff]  ;;  %v336_v55 = vld [vmem:[%s1464_s1 + $0x110] sm:$0xff]  ;;  %v335_v59 = vld [vmem:[%s1464_s1 + $0x108] sm:$0xff] }
  0x20   : > { %924 = vmatpush3.msra.mxu1 %v341_v35  ;;  %872 = vmatprep.subr.mxu0 %v324_v36  ;;  %v318_v60 = vld [vmem:[%s1464_s1 + $0x80] sm:$0xff]  ;;  %v268_v63 = vld [vmem:[%s1316_s11 + $0x8] sm:$0xff]  ;;  %v270_v1 = vld [vmem:[%s1316_s11 + $0x18] sm:$0xff] }
  0x21   : > { %925 = vmatprep.subr.mxu1 %v356_v37  ;;  %873 = vmatpush3.msra.mxu0 %v308_v38  ;;  %v350_v61 = vld [vmem:[%s1464_s1 + $0x180] sm:$0xff]  ;;  %v269_v3 = vld [vmem:[%s1316_s11 + $0x10] sm:$0xff]  ;;  %v373_v5 = vld [vmem:[%s1464_s1 + $0x238] sm:$0xff] }
  0x22   : > { %926 = vmatpush3.msra.mxu1 %v340_v39  ;;  %874 = vmatprep.subr.mxu0 %v323_v40  ;;  %v302_v62 = vld [vmem:[%s1464_s1] sm:$0xff]  ;;  %v273_v4 = vld [vmem:[%s1316_s11 + $0x30] sm:$0xff]  ;;  %v272_v8 = vld [vmem:[%s1316_s11 + $0x28] sm:$0xff] }
  0x23   : > { %927 = vmatprep.subr.mxu1 %v355_v41  ;;  %875 = vmatpush3.msra.mxu0 %v307_v42  ;;  %v334_v0 = vld [vmem:[%s1464_s1 + $0x100] sm:$0xff]  ;;  %v274_v9 = vld [vmem:[%s1316_s11 + $0x38] sm:$0xff]  ;;  %v372_v10 = vld [vmem:[%s1464_s1 + $0x230] sm:$0xff] }
  0x24   : > { %928 = vmatpush3.msra.mxu1 %v339_v43  ;;  %876 = vmatprep.subr.mxu0 %v322_v44  ;;  %v267_v2 = vld [vmem:[%s1316_s11] sm:$0xff]  ;;  %v278_v11 = vld [vmem:[%s1316_s11 + $0x58] sm:$0xff]  ;;  %v280_v12 = vld [vmem:[%s1316_s11 + $0x68] sm:$0xff] }
  0x25   : > { %929 = vmatprep.subr.mxu1 %v354_v45  ;;  %877 = vmatpush3.msra.mxu0 %v306_v46  ;;  %v275_v6 = vld [vmem:[%s1316_s11 + $0x40] sm:$0xff]  ;;  %v277_v13 = vld [vmem:[%s1316_s11 + $0x50] sm:$0xff]  ;;  %v371_v15 = vld [vmem:[%s1464_s1 + $0x228] sm:$0xff] }
  0x26   : > { %930 = vmatpush3.msra.mxu1 %v338_v47  ;;  %878 = vmatprep.subr.mxu0 %v321_v48  ;;  %v279_v14 = vld [vmem:[%s1316_s11 + $0x60] sm:$0xff]  ;;  %v285_v17 = vld [vmem:[%s1316_s11 + $0x90] sm:$0xff]  ;;  %v282_v18 = vld [vmem:[%s1316_s11 + $0x78] sm:$0xff] }
  0x27   : > { %931 = vmatprep.subr.mxu1 %v353_v49  ;;  %879 = vmatpush3.msra.mxu0 %v305_v50  ;;  %v283_v16 = vld [vmem:[%s1316_s11 + $0x80] sm:$0xff]  ;;  %v284_v19 = vld [vmem:[%s1316_s11 + $0x88] sm:$0xff]  ;;  %v290_v22 = vld [vmem:[%s1316_s11 + $0xb8] sm:$0xff] }
  0x28   : > { %932 = vmatpush3.msra.mxu1 %v337_v51  ;;  %880 = vmatprep.subr.mxu0 %v320_v52  ;;  %v370_v20 = vld [vmem:[%s1464_s1 + $0x220] sm:$0xff]  ;;  %v288_v21 = vld [vmem:[%s1316_s11 + $0xa8] sm:$0xff]  ;;  %v369_v23 = vld [vmem:[%s1464_s1 + $0x218] sm:$0xff] }
  0x29   : > { %933 = vmatprep.subr.mxu1 %v352_v53  ;;  %881 = vmatpush3.msra.mxu0 %v304_v54  ;;  %v289_v24 = vld [vmem:[%s1316_s11 + $0xb0] sm:$0xff]  ;;  %v287_v25 = vld [vmem:[%s1316_s11 + $0xa0] sm:$0xff]  ;;  %v292_v29 = vld [vmem:[%s1316_s11 + $0xc8] sm:$0xff] }
  0x2a   : > { %934 = vmatpush3.msra.mxu1 %v336_v55  ;;  %882 = vmatprep.subr.mxu0 %v319_v56  ;;  %v293_v26 = vld [vmem:[%s1316_s11 + $0xd0] sm:$0xff]  ;;  %v295_v27 = vld [vmem:[%s1316_s11 + $0xe0] sm:$0xff]  ;;  %v294_v30 = vld [vmem:[%s1316_s11 + $0xd8] sm:$0xff] }
  0x2b   : > { %935 = vmatprep.subr.mxu1 %v351_v57  ;;  %883 = vmatpush3.msra.mxu0 %v303_v58  ;;  %v368_v28 = vld [vmem:[%s1464_s1 + $0x210] sm:$0xff]  ;;  %v367_v31 = vld [vmem:[%s1464_s1 + $0x208] sm:$0xff]  ;;  %v298_v32 = vld [vmem:[%s1316_s11 + $0xf8] sm:$0x1] }
  0x2c   : > { %936 = vmatpush3.msra.mxu1 %v335_v59  ;;  %884 = vmatprep.subr.mxu0 %v318_v60  ;;  %v300_v33 = vld [vmem:[%s1316_s11 + $0x108] sm:$0x1]  ;;  %v297_v34 = vld [vmem:[%s1316_s11 + $0xf0] sm:$0x1]  ;;  %v299_v35 = vld [vmem:[%s1316_s11 + $0x100] sm:$0x1] }
  0x2d   : > { %937 = vmatprep.subr.mxu1 %v350_v61  ;;  %885 = vmatpush3.msra.mxu0 %v302_v62  ;;  %v366_v36 = vld [vmem:[%s1464_s1 + $0x200] sm:$0xff]  ;;  %v276_v39 = vld [vmem:[%s1316_s11 + $0x48] sm:$0xff]  ;;  %v281_v41 = vld [vmem:[%s1316_s11 + $0x70] sm:$0xff] }
  0x2e   : > { %467 = vmatprep.mubr.f32.mxu0 %v268_v63  ;;  %938 = vmatpush3.msra.mxu1 %v334_v0  ;;  %v271_v37 = vld [vmem:[%s1316_s11 + $0x20] sm:$0xff]  ;;  %v296_v40 = vld [vmem:[%s1316_s11 + $0xe8] sm:$0xff]  ;;  %v301_v42 = vld [vmem:[%s1316_s11 + $0x110] sm:$0x1] }
  0x2f   : > { %567 = vmatprep.mubr.f32.mxu1 %v270_v1  ;;  %468 = vmatmul.mubr.f32.vlgmr.msra.gmra.mxu0 %v267_v2  ;;  %v291_v38 = vld [vmem:[%s1316_s11 + $0xc0] sm:$0xff]  ;;  %v286_v43 = vld [vmem:[%s1316_s11 + $0x98] sm:$0xff] }
  0x30   : > { %568 = vmatmul.mubr.f32.vlgmr.msra.gmra.mxu1 %v269_v3  ;;  %975 = vmatprep.subr.mxu0 %v1080_v7  ;;  %v842_v1 = vld [vmem:[%s1465_s2] ss:$0 sm:$0xff] }
  0x31   : > { %472 = vmatprep.mubr.f32.mxu0 %v273_v4  ;;  %976 = vmatpush3.msra.mxu0 %v373_v5 }
  0x32   : > { %572 = vmatprep.mubr.f32.mxu1 %v275_v6  ;;  %1012 = vmatprep.subr.mxu1 %v1080_v7 }
  0x33   : > { %977 = vmatprep.subr.mxu0 %v1080_v7  ;;  %473 = vmatmul.mubr.f32.gmra.mxu0 %v272_v8 }
  0x34   : > { %573 = vmatmul.mubr.f32.gmra.mxu1 %v274_v9  ;;  %978 = vmatpush3.msra.mxu0 %v372_v10 }
  0x35   : > { %1020 = vmatpush3.msra.mxu1 %v373_v5  ;;  %477 = vmatprep.mubr.f32.mxu0 %v278_v11 }
  0x36   : > { %577 = vmatprep.mubr.f32.mxu1 %v280_v12  ;;  %979 = vmatprep.subr.mxu0 %v1080_v7 }
  0x37   : > { %1013 = vmatprep.subr.mxu1 %v1080_v7  ;;  %478 = vmatmul.mubr.f32.gmra.mxu0 %v277_v13 }
  0x38   : > { %578 = vmatmul.mubr.f32.gmra.mxu1 %v279_v14  ;;  %980 = vmatpush3.msra.mxu0 %v371_v15 }
  0x39   : > { %1021 = vmatpush3.msra.mxu1 %v372_v10  ;;  %482 = vmatprep.mubr.f32.mxu0 %v283_v16 }
  0x3a   : > { %582 = vmatprep.mubr.f32.mxu1 %v285_v17  ;;  %1014 = vmatprep.subr.mxu1 %v1080_v7 }
  0x3b   : > { %981 = vmatprep.subr.mxu0 %v1080_v7  ;;  %483 = vmatmul.mubr.f32.gmra.mxu0 %v282_v18 }
  0x3c   : > { %583 = vmatmul.mubr.f32.gmra.mxu1 %v284_v19  ;;  %982 = vmatpush3.msra.mxu0 %v370_v20 }
  0x3d   : > { %1022 = vmatpush3.msra.mxu1 %v371_v15  ;;  %983 = vmatprep.subr.mxu0 %v1080_v7 }
  0x3e   : > { %487 = vmatprep.mubr.f32.mxu0 %v288_v21  ;;  %587 = vmatprep.mubr.f32.mxu1 %v290_v22 }
  0x3f   : > { %1015 = vmatprep.subr.mxu1 %v1080_v7  ;;  %984 = vmatpush3.msra.mxu0 %v369_v23 }
  0x40   : > { %588 = vmatmul.mubr.f32.gmra.mxu1 %v289_v24  ;;  %488 = vmatmul.mubr.f32.gmra.mxu0 %v287_v25 }
  0x41   : > { %1023 = vmatpush3.msra.mxu1 %v370_v20  ;;  %985 = vmatprep.subr.mxu0 %v1080_v7 }
  0x42   : > { %1016 = vmatprep.subr.mxu1 %v1080_v7  ;;  %492 = vmatprep.mubr.f32.mxu0 %v293_v26 }
  0x43   : > { %592 = vmatprep.mubr.f32.mxu1 %v295_v27  ;;  %1024 = vmatpush3.msra.mxu1 %v369_v23 }
  0x44   : > { %986 = vmatpush3.msra.mxu0 %v368_v28  ;;  %593 = vmatmul.mubr.f32.gmra.mxu1 %v294_v30 }
  0x45   : > { %493 = vmatmul.mubr.f32.gmra.mxu0 %v292_v29  ;;  %987 = vmatprep.subr.mxu0 %v1080_v7 }
  0x46   : > { %1017 = vmatprep.subr.mxu1 %v1080_v7  ;;  %988 = vmatpush3.msra.mxu0 %v367_v31 }
  0x47   : > { %497 = vmatprep.mubr.f32.mxu0 %v298_v32  ;;  %597 = vmatprep.mubr.f32.mxu1 %v300_v33 }
  0x48   : > { %1025 = vmatpush3.msra.mxu1 %v368_v28  ;;  %989 = vmatprep.subr.mxu0 %v1080_v7 }
  0x49   : > { %498 = vmatmul.mubr.f32.gmra.mxu0 %v297_v34  ;;  %598 = vmatmul.mubr.f32.gmra.mxu1 %v299_v35  ;;  %v850_v34 = vld [vmem:[%s1466_s3] ss:$0 sm:$0xff] }
  0x4a   : > { %1018 = vmatprep.subr.mxu1 %v1080_v7  ;;  %990 = vmatpush3.msra.mxu0 %v366_v36 }
  0x4b   : > { %1026 = vmatpush3.msra.mxu1 %v367_v31  ;;  %991 = vmatprep.mubr.msk.f32.mxu0 %vm1081_vm1, %v1080_v7 }
  0x4c   : > { %1019 = vmatprep.subr.mxu1 %v1080_v7  ;;  %1003 = vmatprep.mubr.msk.f32.mxu1 %vm1081_vm1, %v1080_v7 }
  0x4d   : > { %1027 = vmatpush3.msra.mxu1 %v366_v36  ;;  %992 = vmatmul.mubr.msk.f32.vlgmr.msra.gmra.mxu0 %vm381_vm0, %v271_v37 }
  0x4e   : > { %1004 = vmatmul.mubr.msk.f32.vlgmr.msra.gmra.mxu1 %vm381_vm0, %v291_v38  ;;  %994 = vmatprep.mubr.msk.f32.mxu0 %vm1081_vm1, %v1080_v7 }
  0x4f   : > { %1006 = vmatprep.mubr.msk.f32.mxu1 %vm1081_vm1, %v1080_v7 }
  0x51   : > { %995 = vmatmul.mubr.msk.f32.gmra.mxu0 %vm381_vm0, %v276_v39 }
  0x52   : > { %1007 = vmatmul.mubr.msk.f32.gmra.mxu1 %vm381_vm0, %v296_v40  ;;  %997 = vmatprep.mubr.msk.f32.mxu0 %vm1081_vm1, %v1080_v7 }
  0x53   : > { %1009 = vmatprep.mubr.msk.f32.mxu1 %vm1081_vm1, %v1080_v7 }
  0x55   : > { %998 = vmatmul.mubr.msk.f32.gmra.mxu0 %vm381_vm0, %v281_v41  ;;  %v851_v41 = vld [vmem:[%s1467_s4] ss:$0 sm:$0xff] }
  0x56   : > { %1010 = vmatmul.mubr.msk.f32.gmra.mxu1 %vm381_vm0, %v301_v42  ;;  %1000 = vmatprep.mubr.msk.f32.mxu0 %vm1081_vm1, %v1080_v7 }
  0x59   : > { %1001 = vmatmul.mubr.msk.f32.gmra.mxu0 %vm381_vm0, %v286_v43 }
  0xef   : > { %v886_v44 = vpop.f32.mrf.mxu0 }
  0xf0   : > { %v939_v45 = vpop.f32.mrf.mxu1 }
  0xf1   : > { %v887_v46 = vpop.f32.mrf.mxu0 }
  0xf2   : > { %v940_v47 = vpop.f32.mrf.mxu1  ;;  %v888_v0 = vadd.f32 %v887_v46, %v886_v44 }
  0xf3   : > { %v889_v48 = vpop.f32.mrf.mxu0  ;;  %v941_v8 = vadd.f32 %v940_v47, %v939_v45 }
  0xf4   : > { %v942_v49 = vpop.f32.mrf.mxu1  ;;  %v470_v7 = vadd.f32 %v888_v0, %v842_v1 }
  0xf5   : > { %v890_v50 = vpop.f32.mrf.mxu0 }
  0xf6   : > { %v943_v51 = vpop.f32.mrf.mxu1  ;;  %v891_v9 = vadd.f32 %v890_v50, %v889_v48  ;;  %v570_v20 = vadd.f32 %v941_v8, %v470_v7 }
  0xf7   : > { %v892_v52 = vpop.f32.mrf.mxu0  ;;  %v944_v17 = vadd.f32 %v943_v51, %v942_v49 }
  0xf8   : > { %v945_v53 = vpop.f32.mrf.mxu1  ;;  %v475_v21 = vadd.f32 %v891_v9, %v842_v1 }
  0xf9   : > { %v893_v54 = vpop.f32.mrf.mxu0 }
  0xfa   : > { %v946_v55 = vpop.f32.mrf.mxu1  ;;  %v894_v18 = vadd.f32 %v893_v54, %v892_v52  ;;  %v575_v39 = vadd.f32 %v944_v17, %v475_v21 }
  0xfb   : > { %v895_v56 = vpop.f32.mrf.mxu0  ;;  %v947_v27 = vadd.f32 %v946_v55, %v945_v53 }
  0xfc   : > { %v948_v57 = vpop.f32.mrf.mxu1  ;;  %v480_v30 = vadd.f32 %v894_v18, %v842_v1 }
  0xfd   : > { %v896_v58 = vpop.f32.mrf.mxu0 }
  0xfe   : > { %v949_v59 = vpop.f32.mrf.mxu1  ;;  %v897_v31 = vadd.f32 %v896_v58, %v895_v56  ;;  %v580_v52 = vadd.f32 %v947_v27, %v480_v30 }
  0xff   : > { %v950_v49 = vadd.f32 %v949_v59, %v948_v57 }
 0x100   : > { %v951_v60 = vpop.f32.mrf.mxu1  ;;  %v898_v61 = vpop.f32.mrf.mxu0  ;;  %v485_v48 = vadd.f32 %v897_v31, %v842_v1 }
 0x102   : > { %v952_v62 = vpop.f32.mrf.mxu1  ;;  %v899_v63 = vpop.f32.mrf.mxu0 }
 0x103   : > { %v900_v2 = vadd.f32 %v899_v63, %v898_v61  ;;  %v953_v11 = vadd.f32 %v952_v62, %v951_v60 }
 0x104   : > { %v954_v4 = vpop.f32.mrf.mxu1 }
 0x105   : > { %v901_v3 = vpop.f32.mrf.mxu0  ;;  %v490_v10 = vadd.f32 %v900_v2, %v842_v1 }
 0x106   : > { %v955_v6 = vpop.f32.mrf.mxu1 }
 0x107   : > { %v902_v5 = vpop.f32.mrf.mxu0  ;;  %v956_v23 = vadd.f32 %v955_v6, %v954_v4  ;;  %v590_v24 = vadd.f32 %v953_v11, %v490_v10 }
 0x108   : > { %v903_v12 = vadd.f32 %v902_v5, %v901_v3 }
 0x109   : > { %v904_v13 = vpop.f32.mrf.mxu0  ;;  %v957_v14 = vpop.f32.mrf.mxu1 }
 0x10a   : > { %v495_v22 = vadd.f32 %v903_v12, %v842_v1 }
 0x10b   : > { %v905_v15 = vpop.f32.mrf.mxu0  ;;  %v958_v16 = vpop.f32.mrf.mxu1 }
 0x10c   : > { %v906_v19 = vadd.f32 %v905_v15, %v904_v13  ;;  %v959_v33 = vadd.f32 %v958_v16, %v957_v14  ;;  %v595_v40 = vadd.f32 %v956_v23, %v495_v22 }
 0x10d   : > { %v669_v25 = vpop.f32.mrf.mxu0 }
 0x10e   : > { %v689_v26 = vpop.f32.mrf.mxu1  ;;  %v670_v28 = vadd.f32 %v669_v25, %v570_v20  ;;  %v500_v32 = vadd.f32 %v906_v19, %v842_v1  ;;  %v585_v1 = vadd.f32 %v950_v49, %v485_v48 }
 0x10f   : > { %v690_v29 = vadd.f32 %v689_v26, %v590_v24  ;;  %v993_v35 = vpop.f32.mrf.mxu0 }
 0x110   : > { %v1005_v36 = vpop.f32.mrf.mxu1  ;;  %v703_v37 = vmax.f32 %v670_v28, 0.0  ;;  %v600_v53 = vadd.f32 %v959_v33, %v500_v32 }
 0x111   : > { %v707_v38 = vmax.f32 %v690_v29, 0.0  ;;  %v674_v42 = vpop.f32.mrf.mxu0 }
 0x112   : > { %v694_v43 = vpop.f32.mrf.mxu1  ;;  %v717_v44 = vmul.f32 %v850_v34, %v703_v37  ;;  %v675_v46 = vadd.f32 %v674_v42, %v575_v39 }
 0x113   : > { %v721_v45 = vmul.f32 %v850_v34, %v707_v38  ;;  %v695_v47 = vadd.f32 %v694_v43, %v595_v40  ;;  %v996_v50 = vpop.f32.mrf.mxu0 }
 0x114   : > { %v1008_v51 = vpop.f32.mrf.mxu1  ;;  %v731_v54 = vadd.f32 %v851_v41, %v717_v44  ;;  %v704_v56 = vmax.f32 %v675_v46, 0.0 }
 0x115   : > { %v735_v55 = vadd.f32 %v851_v41, %v721_v45  ;;  %v708_v58 = vmax.f32 %v695_v47, 0.0  ;;  %v679_v60 = vpop.f32.mrf.mxu0 }
 0x116   : > { %v699_v61 = vpop.f32.mrf.mxu1  ;;  %738 = vst [vmem:[%s1445_s6] sm:$0xff] %v731_v54  ;;  %v718_v57 = vmul.f32 %v850_v34, %v704_v56  ;;  %v680_v62 = vadd.f32 %v679_v60, %v580_v52 }
 0x117   : > { %742 = vst [vmem:[%s1445_s6 + $0x20] sm:$0xff] %v735_v55  ;;  %v722_v59 = vmul.f32 %v850_v34, %v708_v58  ;;  %v700_v63 = vadd.f32 %v699_v61, %v600_v53  ;;  %v999_v0 = vpop.f32.mrf.mxu0 }
 0x118   : > { %v1011_v2 = vpop.f32.mrf.mxu1  ;;  %v732_v3 = vadd.f32 %v851_v41, %v718_v57  ;;  %v705_v5 = vmax.f32 %v680_v62, 0.0 }
 0x119   : > { %v736_v4 = vadd.f32 %v851_v41, %v722_v59  ;;  %v709_v6 = vmax.f32 %v700_v63, 0.0  ;;  %v684_v7 = vpop.f32.mrf.mxu0 }
 0x11a   : > { %739 = vst [vmem:[%s1445_s6 + $0x8] sm:$0xff] %v732_v3  ;;  %v719_v8 = vmul.f32 %v850_v34, %v705_v5  ;;  %v685_v10 = vadd.f32 %v684_v7, %v585_v1 }
 0x11b   : > { %743 = vst [vmem:[%s1445_s6 + $0x28] sm:$0xff] %v736_v4  ;;  %v723_v9 = vmul.f32 %v850_v34, %v709_v6  ;;  %v1002_v11 = vpop.f32.mrf.mxu0 }
 0x11c   : > { %v733_v12 = vadd.f32 %v851_v41, %v719_v8  ;;  %v706_v14 = vmax.f32 %v685_v10, 0.0 }
 0x11d   : > { %v737_v13 = vadd.f32 %v851_v41, %v723_v9 }
 0x11e   : > { %740 = vst [vmem:[%s1445_s6 + $0x10] sm:$0xff] %v733_v12  ;;  %v720_v15 = vmul.f32 %v850_v34, %v706_v14 }
 0x11f   : > { %744 = vst [vmem:[%s1445_s6 + $0x30] sm:$0x1] %v737_v13 }
 0x120   : > { %v734_v16 = vadd.f32 %v851_v41, %v720_v15 }
 0x122   : > { %741 = vst [vmem:[%s1445_s6 + $0x18] sm:$0xff] %v734_v16 }
 0x123 PF: > { %s15_s20 = sadd.s32 1, %s1078_s20   ;;  %s1469_s18 = smov %s1074_s19 }
 0x124   : > { %p12_p5 = scmp.ge.s32.totalorder %s15_s20, 4   ;;  %s1470_s19 = smov %s1472_s21 }
 0x126   :  { %14 = sbr.rel (!%p12_p5) target bundleno = 2 (0x2), region = 70 }

// kernel: forward.11
= control target key start
LH: loop header
LB: loop body
LE: loop exit
PB: predicated region body
PF: predicated region fallthrough
CT: control target
= control target key end

     0   :  { %s1529_s18 = smov 0   ;;  %s1531_s19 = smov 0   ;;  %s2166_s0 = inlined_call_operand.vmem [shape: f32[2,49,1152], index: 0, kind: input, shape index: {}]   ;;  %s2167_s1 = inlined_call_operand.vmem [shape: f32[1152,128], index: 1, kind: input, shape index: {}]   ;;  %s2168_s2 = inlined_call_operand.vmem [shape: f32[1,128], index: 2, kind: input, shape index: {}]   ;;  %s2169_s3 = inlined_call_operand.vmem [shape: f32[1,128], index: 3, kind: input, shape index: {}]   ;;  %s2170_s4 = inlined_call_operand.vmem [shape: f32[1,128], index: 4, kind: input, shape index: {}]   ;;  %s2171_s5 = inlined_call_operand.vmem [shape: f32[2,49,128], index: 5, kind: output, shape index: {}]  }
   0x1   :  { %s1533_s20 = smov 0  }
   0x2 LB: > { %s27_s21 = sadd.s32 1, %s1491_s19  ;;  %p1117_p0 = scmp.ge.s32.totalorder %s1495_s20, 1  ;;  %s1495_s20 = sphi %s1533_s20, %s15_s20   ;;  %s1491_s19 = sphi %s1531_s19, %s2183_s19   ;;  %s1487_s18 = sphi %s1529_s18, %s2182_s18  }
   0x3   : > { %p29_p1 = scmp.ge.s32.totalorder %s27_s21, 2  ;;  %p209_p2 = scmp.lt.s32.totalorder %s1495_s20, 3 }
   0x5   : > { %s2185_s21 = smov (%p29_p1, %s27_s21), 0  ;;  %p210_p3 = pnand %p1117_p0, %p209_p2 }
   0x7   : > { %213 = sbr.rel (%p210_p3) target bundleno = 353 (0x161), region = 40 }
   0xc   : > { %v361_v0 = vld [vmem:[%s2167_s1 + $0xf8] sm:$0xff]  ;;  %v360_v4 = vld [vmem:[%s2167_s1 + $0xf0] sm:$0xff]  ;;  %v359_v8 = vld [vmem:[%s2167_s1 + $0xe8] sm:$0xff]  ;;  %p247_p4 = scmp.lt.s32.totalorder %s1487_s18, 1  ;;  %vm1498_vm0 = vmmov 0  }
   0xd   : > { %v393_v1 = vld [vmem:[%s2167_s1 + $0x1f8] sm:$0xff]  ;;  %1125 = vmatprep.subr.mxu0 %v361_v0  ;;  %v392_v5 = vld [vmem:[%s2167_s1 + $0x1f0] sm:$0xff]  ;;  %v391_v9 = vld [vmem:[%s2167_s1 + $0x1e8] sm:$0xff] }
   0xe   : > { %v345_v2 = vld [vmem:[%s2167_s1 + $0x78] sm:$0xff]  ;;  %1178 = vmatprep.subr.mxu1 %v393_v1  ;;  %v344_v6 = vld [vmem:[%s2167_s1 + $0x70] sm:$0xff]  ;;  %v343_v10 = vld [vmem:[%s2167_s1 + $0x68] sm:$0xff]  ;;  %s2187_s18 = smov (!%p247_p4, %s1487_s18), 1 }
   0xf   : > { %v377_v3 = vld [vmem:[%s2167_s1 + $0x178] sm:$0xff]  ;;  %1126 = vmatpush3.msra.mxu0 %v345_v2  ;;  %v376_v7 = vld [vmem:[%s2167_s1 + $0x170] sm:$0xff]  ;;  %v375_v11 = vld [vmem:[%s2167_s1 + $0x168] sm:$0xff]  ;;  %s1445_s13 = smul.u32 504, %s2187_s18 }
  0x10   : > { %1179 = vmatpush3.msra.mxu1 %v377_v3  ;;  %1127 = vmatprep.subr.mxu0 %v360_v4  ;;  %v358_v12 = vld [vmem:[%s2167_s1 + $0xe0] sm:$0xff]  ;;  %v357_v16 = vld [vmem:[%s2167_s1 + $0xd8] sm:$0xff]  ;;  %v356_v20 = vld [vmem:[%s2167_s1 + $0xd0] sm:$0xff]  ;;  %s1446_s29 = smul.u32 56, %s2187_s18 }
  0x11   : > { %1180 = vmatprep.subr.mxu1 %v392_v5  ;;  %1128 = vmatpush3.msra.mxu0 %v344_v6  ;;  %v390_v13 = vld [vmem:[%s2167_s1 + $0x1e0] sm:$0xff]  ;;  %v389_v17 = vld [vmem:[%s2167_s1 + $0x1d8] sm:$0xff]  ;;  %v388_v21 = vld [vmem:[%s2167_s1 + $0x1d0] sm:$0xff]  ;;  %s1733_s11 = scalar_lea.vmem %s2166_s0, %s1445_s13 }
  0x12   : > { %1181 = vmatpush3.msra.mxu1 %v376_v7  ;;  %1129 = vmatprep.subr.mxu0 %v359_v8  ;;  %v342_v14 = vld [vmem:[%s2167_s1 + $0x60] sm:$0xff]  ;;  %v341_v18 = vld [vmem:[%s2167_s1 + $0x58] sm:$0xff]  ;;  %v340_v22 = vld [vmem:[%s2167_s1 + $0x50] sm:$0xff]  ;;  %s2148_s10 = scalar_lea.vmem %s2171_s5, %s1446_s29 }
  0x13   : > { %1182 = vmatprep.subr.mxu1 %v391_v9  ;;  %v374_v15 = vld [vmem:[%s2167_s1 + $0x160] sm:$0xff]  ;;  %1130 = vmatpush3.msra.mxu0 %v343_v10  ;;  %v373_v19 = vld [vmem:[%s2167_s1 + $0x158] sm:$0xff]  ;;  %v372_v23 = vld [vmem:[%s2167_s1 + $0x150] sm:$0xff] }
  0x14   : > { %1183 = vmatpush3.msra.mxu1 %v375_v11  ;;  %1131 = vmatprep.subr.mxu0 %v358_v12  ;;  %v355_v24 = vld [vmem:[%s2167_s1 + $0xc8] sm:$0xff]  ;;  %v354_v28 = vld [vmem:[%s2167_s1 + $0xc0] sm:$0xff]  ;;  %v353_v32 = vld [vmem:[%s2167_s1 + $0xb8] sm:$0xff] }
  0x15   : > { %1184 = vmatprep.subr.mxu1 %v390_v13  ;;  %1132 = vmatpush3.msra.mxu0 %v342_v14  ;;  %v387_v25 = vld [vmem:[%s2167_s1 + $0x1c8] sm:$0xff]  ;;  %v386_v29 = vld [vmem:[%s2167_s1 + $0x1c0] sm:$0xff]  ;;  %v385_v33 = vld [vmem:[%s2167_s1 + $0x1b8] sm:$0xff] }
  0x16   : > { %1185 = vmatpush3.msra.mxu1 %v374_v15  ;;  %1133 = vmatprep.subr.mxu0 %v357_v16  ;;  %v339_v26 = vld [vmem:[%s2167_s1 + $0x48] sm:$0xff]  ;;  %v338_v30 = vld [vmem:[%s2167_s1 + $0x40] sm:$0xff]  ;;  %v337_v34 = vld [vmem:[%s2167_s1 + $0x38] sm:$0xff] }
  0x17   : > { %1186 = vmatprep.subr.mxu1 %v389_v17  ;;  %1134 = vmatpush3.msra.mxu0 %v341_v18  ;;  %v371_v27 = vld [vmem:[%s2167_s1 + $0x148] sm:$0xff]  ;;  %v370_v31 = vld [vmem:[%s2167_s1 + $0x140] sm:$0xff]  ;;  %v369_v35 = vld [vmem:[%s2167_s1 + $0x138] sm:$0xff] }
  0x18   : > { %1187 = vmatpush3.msra.mxu1 %v373_v19  ;;  %1135 = vmatprep.subr.mxu0 %v356_v20  ;;  %v352_v36 = vld [vmem:[%s2167_s1 + $0xb0] sm:$0xff]  ;;  %v351_v40 = vld [vmem:[%s2167_s1 + $0xa8] sm:$0xff]  ;;  %v350_v44 = vld [vmem:[%s2167_s1 + $0xa0] sm:$0xff] }
  0x19   : > { %1188 = vmatprep.subr.mxu1 %v388_v21  ;;  %1136 = vmatpush3.msra.mxu0 %v340_v22  ;;  %v384_v37 = vld [vmem:[%s2167_s1 + $0x1b0] sm:$0xff]  ;;  %v383_v41 = vld [vmem:[%s2167_s1 + $0x1a8] sm:$0xff]  ;;  %v382_v45 = vld [vmem:[%s2167_s1 + $0x1a0] sm:$0xff] }
  0x1a   : > { %1189 = vmatpush3.msra.mxu1 %v372_v23  ;;  %1137 = vmatprep.subr.mxu0 %v355_v24  ;;  %v336_v38 = vld [vmem:[%s2167_s1 + $0x30] sm:$0xff]  ;;  %v335_v42 = vld [vmem:[%s2167_s1 + $0x28] sm:$0xff]  ;;  %v334_v46 = vld [vmem:[%s2167_s1 + $0x20] sm:$0xff] }
  0x1b   : > { %1190 = vmatprep.subr.mxu1 %v387_v25  ;;  %1138 = vmatpush3.msra.mxu0 %v339_v26  ;;  %v368_v39 = vld [vmem:[%s2167_s1 + $0x130] sm:$0xff]  ;;  %v367_v43 = vld [vmem:[%s2167_s1 + $0x128] sm:$0xff]  ;;  %v366_v47 = vld [vmem:[%s2167_s1 + $0x120] sm:$0xff] }
  0x1c   : > { %1191 = vmatpush3.msra.mxu1 %v371_v27  ;;  %1139 = vmatprep.subr.mxu0 %v354_v28  ;;  %v349_v48 = vld [vmem:[%s2167_s1 + $0x98] sm:$0xff]  ;;  %v348_v52 = vld [vmem:[%s2167_s1 + $0x90] sm:$0xff]  ;;  %v347_v56 = vld [vmem:[%s2167_s1 + $0x88] sm:$0xff] }
  0x1d   : > { %1192 = vmatprep.subr.mxu1 %v386_v29  ;;  %1140 = vmatpush3.msra.mxu0 %v338_v30  ;;  %v381_v49 = vld [vmem:[%s2167_s1 + $0x198] sm:$0xff]  ;;  %v380_v53 = vld [vmem:[%s2167_s1 + $0x190] sm:$0xff]  ;;  %v379_v57 = vld [vmem:[%s2167_s1 + $0x188] sm:$0xff] }
  0x1e   : > { %1193 = vmatpush3.msra.mxu1 %v370_v31  ;;  %1141 = vmatprep.subr.mxu0 %v353_v32  ;;  %v333_v50 = vld [vmem:[%s2167_s1 + $0x18] sm:$0xff]  ;;  %v332_v54 = vld [vmem:[%s2167_s1 + $0x10] sm:$0xff]  ;;  %v331_v58 = vld [vmem:[%s2167_s1 + $0x8] sm:$0xff] }
  0x1f   : > { %1194 = vmatprep.subr.mxu1 %v385_v33  ;;  %1142 = vmatpush3.msra.mxu0 %v337_v34  ;;  %v365_v51 = vld [vmem:[%s2167_s1 + $0x118] sm:$0xff]  ;;  %v364_v55 = vld [vmem:[%s2167_s1 + $0x110] sm:$0xff]  ;;  %v363_v59 = vld [vmem:[%s2167_s1 + $0x108] sm:$0xff] }
  0x20   : > { %1195 = vmatpush3.msra.mxu1 %v369_v35  ;;  %1143 = vmatprep.subr.mxu0 %v352_v36  ;;  %v346_v60 = vld [vmem:[%s2167_s1 + $0x80] sm:$0xff]  ;;  %v268_v63 = vld [vmem:[%s1733_s11 + $0x8] sm:$0xff]  ;;  %v270_v2 = vld [vmem:[%s1733_s11 + $0x18] sm:$0xff] }
  0x21   : > { %1196 = vmatprep.subr.mxu1 %v384_v37  ;;  %1144 = vmatpush3.msra.mxu0 %v336_v38  ;;  %v378_v61 = vld [vmem:[%s2167_s1 + $0x180] sm:$0xff]  ;;  %v425_v3 = vld [vmem:[%s2167_s1 + $0x2f8] sm:$0xff]  ;;  %v269_v5 = vld [vmem:[%s1733_s11 + $0x10] sm:$0xff] }
  0x22   : > { %1197 = vmatpush3.msra.mxu1 %v368_v39  ;;  %1145 = vmatprep.subr.mxu0 %v351_v40  ;;  %v330_v62 = vld [vmem:[%s2167_s1] sm:$0xff]  ;;  %v457_v4 = vld [vmem:[%s2167_s1 + $0x3f8] sm:$0xff]  ;;  %v424_v8 = vld [vmem:[%s2167_s1 + $0x2f0] sm:$0xff] }
  0x23   : > { %1198 = vmatprep.subr.mxu1 %v383_v41  ;;  %1146 = vmatpush3.msra.mxu0 %v335_v42  ;;  %v362_v0 = vld [vmem:[%s2167_s1 + $0x100] sm:$0xff]  ;;  %v409_v6 = vld [vmem:[%s2167_s1 + $0x278] sm:$0xff]  ;;  %v456_v9 = vld [vmem:[%s2167_s1 + $0x3f0] sm:$0xff] }
  0x24   : > { %1199 = vmatpush3.msra.mxu1 %v367_v43  ;;  %1147 = vmatprep.subr.mxu0 %v350_v44  ;;  %v267_v1 = vld [vmem:[%s1733_s11] sm:$0xff]  ;;  %v441_v7 = vld [vmem:[%s2167_s1 + $0x378] sm:$0xff]  ;;  %v408_v10 = vld [vmem:[%s2167_s1 + $0x270] sm:$0xff] }
  0x25   : > { %1200 = vmatprep.subr.mxu1 %v382_v45  ;;  %1148 = vmatpush3.msra.mxu0 %v334_v46  ;;  %v440_v11 = vld [vmem:[%s2167_s1 + $0x370] sm:$0xff]  ;;  %v423_v12 = vld [vmem:[%s2167_s1 + $0x2e8] sm:$0xff]  ;;  %v422_v17 = vld [vmem:[%s2167_s1 + $0x2e0] sm:$0xff] }
  0x26   : > { %1201 = vmatpush3.msra.mxu1 %v366_v47  ;;  %1149 = vmatprep.subr.mxu0 %v349_v48  ;;  %v455_v13 = vld [vmem:[%s2167_s1 + $0x3e8] sm:$0xff]  ;;  %v277_v16 = vld [vmem:[%s1733_s11 + $0x50] sm:$0xff]  ;;  %v454_v18 = vld [vmem:[%s2167_s1 + $0x3e0] sm:$0xff] }
  0x27   : > { %1202 = vmatprep.subr.mxu1 %v381_v49  ;;  %1150 = vmatpush3.msra.mxu0 %v333_v50  ;;  %v407_v14 = vld [vmem:[%s2167_s1 + $0x268] sm:$0xff]  ;;  %v406_v20 = vld [vmem:[%s2167_s1 + $0x260] sm:$0xff]  ;;  %v421_v23 = vld [vmem:[%s2167_s1 + $0x2d8] sm:$0xff] }
  0x28   : > { %1203 = vmatpush3.msra.mxu1 %v365_v51  ;;  %1151 = vmatprep.subr.mxu0 %v348_v52  ;;  %v439_v15 = vld [vmem:[%s2167_s1 + $0x368] sm:$0xff]  ;;  %v438_v21 = vld [vmem:[%s2167_s1 + $0x360] sm:$0xff]  ;;  %v453_v24 = vld [vmem:[%s2167_s1 + $0x3d8] sm:$0xff] }
  0x29   : > { %1204 = vmatprep.subr.mxu1 %v380_v53  ;;  %1152 = vmatpush3.msra.mxu0 %v332_v54  ;;  %v276_v19 = vld [vmem:[%s1733_s11 + $0x48] sm:$0xff]  ;;  %v279_v22 = vld [vmem:[%s1733_s11 + $0x60] sm:$0xff]  ;;  %v278_v25 = vld [vmem:[%s1733_s11 + $0x58] sm:$0xff] }
  0x2a   : > { %1205 = vmatpush3.msra.mxu1 %v364_v55  ;;  %1153 = vmatprep.subr.mxu0 %v347_v56  ;;  %v405_v26 = vld [vmem:[%s2167_s1 + $0x258] sm:$0xff]  ;;  %v420_v29 = vld [vmem:[%s2167_s1 + $0x2d0] sm:$0xff]  ;;  %v288_v34 = vld [vmem:[%s1733_s11 + $0xa8] sm:$0xff] }
  0x2b   : > { %1206 = vmatprep.subr.mxu1 %v379_v57  ;;  %1154 = vmatpush3.msra.mxu0 %v331_v58  ;;  %v437_v27 = vld [vmem:[%s2167_s1 + $0x358] sm:$0xff]  ;;  %v452_v30 = vld [vmem:[%s2167_s1 + $0x3d0] sm:$0xff]  ;;  %v419_v35 = vld [vmem:[%s2167_s1 + $0x2c8] sm:$0xff] }
  0x2c   : > { %1207 = vmatpush3.msra.mxu1 %v363_v59  ;;  %1155 = vmatprep.subr.mxu0 %v346_v60  ;;  %v286_v28 = vld [vmem:[%s1733_s11 + $0x98] sm:$0xff]  ;;  %v285_v31 = vld [vmem:[%s1733_s11 + $0x90] sm:$0xff]  ;;  %v451_v36 = vld [vmem:[%s2167_s1 + $0x3c8] sm:$0xff] }
  0x2d   : > { %1208 = vmatprep.subr.mxu1 %v378_v61  ;;  %1156 = vmatpush3.msra.mxu0 %v330_v62  ;;  %v404_v32 = vld [vmem:[%s2167_s1 + $0x250] sm:$0xff]  ;;  %v287_v37 = vld [vmem:[%s1733_s11 + $0xa0] sm:$0xff]  ;;  %v403_v38 = vld [vmem:[%s2167_s1 + $0x248] sm:$0xff] }
  0x2e   : > { %545 = vmatprep.mubr.f32.mxu0 %v268_v63  ;;  %1209 = vmatpush3.msra.mxu1 %v362_v0  ;;  %v436_v33 = vld [vmem:[%s2167_s1 + $0x350] sm:$0xff]  ;;  %v435_v39 = vld [vmem:[%s2167_s1 + $0x348] sm:$0xff]  ;;  %v295_v40 = vld [vmem:[%s1733_s11 + $0xe0] sm:$0xff] }
  0x2f   : > { %546 = vmatmul.mubr.f32.vlgmr.msra.gmra.mxu0 %v267_v1  ;;  %645 = vmatprep.mubr.f32.mxu1 %v270_v2  ;;  %v418_v41 = vld [vmem:[%s2167_s1 + $0x2c0] sm:$0xff]  ;;  %v294_v43 = vld [vmem:[%s1733_s11 + $0xd8] sm:$0xff]  ;;  %v297_v46 = vld [vmem:[%s1733_s11 + $0xf0] sm:$0xff] }
  0x30   : > { %1231 = vmatprep.subr.mxu0 %v425_v3  ;;  %1284 = vmatprep.subr.mxu1 %v457_v4  ;;  %v450_v42 = vld [vmem:[%s2167_s1 + $0x3c0] sm:$0xff]  ;;  %v417_v47 = vld [vmem:[%s2167_s1 + $0x2b8] sm:$0xff]  ;;  %v296_v49 = vld [vmem:[%s1733_s11 + $0xe8] sm:$0xff] }
  0x31   : > { %646 = vmatmul.mubr.f32.vlgmr.msra.gmra.mxu1 %v269_v5  ;;  %1232 = vmatpush3.msra.mxu0 %v409_v6  ;;  %v402_v44 = vld [vmem:[%s2167_s1 + $0x240] sm:$0xff]  ;;  %v449_v48 = vld [vmem:[%s2167_s1 + $0x3b8] sm:$0xff]  ;;  %v304_v52 = vld [vmem:[%s1733_s11 + $0x128] sm:$0xff] }
  0x32   : > { %1285 = vmatpush3.msra.mxu1 %v441_v7  ;;  %1233 = vmatprep.subr.mxu0 %v424_v8  ;;  %v434_v45 = vld [vmem:[%s2167_s1 + $0x340] sm:$0xff]  ;;  %v401_v50 = vld [vmem:[%s2167_s1 + $0x238] sm:$0xff]  ;;  %v416_v53 = vld [vmem:[%s2167_s1 + $0x2b0] sm:$0xff] }
  0x33   : > { %1286 = vmatprep.subr.mxu1 %v456_v9  ;;  %1234 = vmatpush3.msra.mxu0 %v408_v10  ;;  %v433_v51 = vld [vmem:[%s2167_s1 + $0x338] sm:$0xff]  ;;  %v448_v54 = vld [vmem:[%s2167_s1 + $0x3b0] sm:$0xff]  ;;  %v303_v55 = vld [vmem:[%s1733_s11 + $0x120] sm:$0xff] }
  0x34   : > { %1287 = vmatpush3.msra.mxu1 %v440_v11  ;;  %1235 = vmatprep.subr.mxu0 %v423_v12  ;;  %v400_v56 = vld [vmem:[%s2167_s1 + $0x230] sm:$0xff]  ;;  %v306_v58 = vld [vmem:[%s1733_s11 + $0x138] sm:$0xff]  ;;  %v415_v59 = vld [vmem:[%s2167_s1 + $0x2a8] sm:$0xff] }
  0x35   : > { %1288 = vmatprep.subr.mxu1 %v455_v13  ;;  %1236 = vmatpush3.msra.mxu0 %v407_v14  ;;  %v432_v57 = vld [vmem:[%s2167_s1 + $0x330] sm:$0xff]  ;;  %v447_v60 = vld [vmem:[%s2167_s1 + $0x3a8] sm:$0xff]  ;;  %v414_v1 = vld [vmem:[%s2167_s1 + $0x2a0] sm:$0xff] }
  0x36   : > { %1289 = vmatpush3.msra.mxu1 %v439_v15  ;;  %550 = vmatprep.mubr.f32.mxu0 %v277_v16  ;;  %v305_v61 = vld [vmem:[%s1733_s11 + $0x130] sm:$0xff]  ;;  %v399_v62 = vld [vmem:[%s2167_s1 + $0x228] sm:$0xff]  ;;  %v446_v2 = vld [vmem:[%s2167_s1 + $0x3a0] sm:$0xff] }
  0x37   : > { %1237 = vmatprep.subr.mxu0 %v422_v17  ;;  %1290 = vmatprep.subr.mxu1 %v454_v18  ;;  %v431_v63 = vld [vmem:[%s2167_s1 + $0x328] sm:$0xff]  ;;  %v313_v0 = vld [vmem:[%s1733_s11 + $0x170] sm:$0xff]  ;;  %v398_v4 = vld [vmem:[%s2167_s1 + $0x220] sm:$0xff] }
  0x38   : > { %551 = vmatmul.mubr.f32.gmra.mxu0 %v276_v19  ;;  %1291 = vmatpush3.msra.mxu1 %v438_v21  ;;  %v312_v3 = vld [vmem:[%s1733_s11 + $0x168] sm:$0xff]  ;;  %v430_v5 = vld [vmem:[%s2167_s1 + $0x320] sm:$0xff]  ;;  %v413_v7 = vld [vmem:[%s2167_s1 + $0x298] sm:$0xff] }
  0x39   : > { %1238 = vmatpush3.msra.mxu0 %v406_v20  ;;  %650 = vmatprep.mubr.f32.mxu1 %v279_v22  ;;  %v315_v6 = vld [vmem:[%s1733_s11 + $0x180] sm:$0xff]  ;;  %v445_v8 = vld [vmem:[%s2167_s1 + $0x398] sm:$0xff]  ;;  %v412_v13 = vld [vmem:[%s2167_s1 + $0x290] sm:$0xff] }
  0x3a   : > { %1239 = vmatprep.subr.mxu0 %v421_v23  ;;  %1292 = vmatprep.subr.mxu1 %v453_v24  ;;  %v314_v9 = vld [vmem:[%s1733_s11 + $0x178] sm:$0xff]  ;;  %v444_v14 = vld [vmem:[%s2167_s1 + $0x390] sm:$0xff]  ;;  %v324_v18 = vld [vmem:[%s1733_s11 + $0x1c8] sm:$0x1] }
  0x3b   : > { %651 = vmatmul.mubr.f32.gmra.mxu1 %v278_v25  ;;  %1240 = vmatpush3.msra.mxu0 %v405_v26  ;;  %v397_v10 = vld [vmem:[%s2167_s1 + $0x218] sm:$0xff]  ;;  %v321_v15 = vld [vmem:[%s1733_s11 + $0x1b0] sm:$0x1]  ;;  %v411_v19 = vld [vmem:[%s2167_s1 + $0x288] sm:$0xff] }
  0x3c   : > { %1293 = vmatpush3.msra.mxu1 %v437_v27  ;;  %555 = vmatprep.mubr.f32.mxu0 %v286_v28  ;;  %v429_v11 = vld [vmem:[%s2167_s1 + $0x318] sm:$0xff]  ;;  %v396_v16 = vld [vmem:[%s2167_s1 + $0x210] sm:$0xff]  ;;  %v443_v20 = vld [vmem:[%s2167_s1 + $0x388] sm:$0xff] }
  0x3d   : > { %1241 = vmatprep.subr.mxu0 %v420_v29  ;;  %1294 = vmatprep.subr.mxu1 %v452_v30  ;;  %v322_v12 = vld [vmem:[%s1733_s11 + $0x1b8] sm:$0x1]  ;;  %v428_v17 = vld [vmem:[%s2167_s1 + $0x310] sm:$0xff]  ;;  %v323_v21 = vld [vmem:[%s1733_s11 + $0x1c0] sm:$0x1] }
  0x3e   : > { %556 = vmatmul.mubr.f32.gmra.mxu0 %v285_v31  ;;  %1295 = vmatpush3.msra.mxu1 %v436_v33  ;;  %v395_v22 = vld [vmem:[%s2167_s1 + $0x208] sm:$0xff]  ;;  %v410_v24 = vld [vmem:[%s2167_s1 + $0x280] sm:$0xff]  ;;  %v274_v30 = vld [vmem:[%s1733_s11 + $0x38] sm:$0xff]  ;;  %v1497_v33 = vmov 0.0  }
  0x3f   : > { %1242 = vmatpush3.msra.mxu0 %v404_v32  ;;  %655 = vmatprep.mubr.f32.mxu1 %v288_v34  ;;  %v427_v23 = vld [vmem:[%s2167_s1 + $0x308] sm:$0xff]  ;;  %v442_v25 = vld [vmem:[%s2167_s1 + $0x380] sm:$0xff]  ;;  %v273_v31 = vld [vmem:[%s1733_s11 + $0x30] sm:$0xff] }
  0x40   : > { %1243 = vmatprep.subr.mxu0 %v419_v35  ;;  %1296 = vmatprep.subr.mxu1 %v451_v36  ;;  %v394_v26 = vld [vmem:[%s2167_s1 + $0x200] sm:$0xff]  ;;  %v272_v27 = vld [vmem:[%s1733_s11 + $0x28] sm:$0xff]  ;;  %v473_v32 = vld [vmem:[%s2167_s1 + $0x478] sm:$0xff] }
  0x41   : > { %656 = vmatmul.mubr.f32.gmra.mxu1 %v287_v37  ;;  %1244 = vmatpush3.msra.mxu0 %v403_v38  ;;  %v426_v28 = vld [vmem:[%s2167_s1 + $0x300] sm:$0xff]  ;;  %v281_v34 = vld [vmem:[%s1733_s11 + $0x70] sm:$0xff]  ;;  %v280_v36 = vld [vmem:[%s1733_s11 + $0x68] sm:$0xff] }
  0x42   : > { %1297 = vmatpush3.msra.mxu1 %v435_v39  ;;  %560 = vmatprep.mubr.f32.mxu0 %v295_v40  ;;  %v271_v29 = vld [vmem:[%s1733_s11 + $0x20] sm:$0xff]  ;;  %v472_v35 = vld [vmem:[%s2167_s1 + $0x470] sm:$0xff]  ;;  %v471_v38 = vld [vmem:[%s2167_s1 + $0x468] sm:$0xff] }
  0x43   : > { %1245 = vmatprep.subr.mxu0 %v418_v41  ;;  %1298 = vmatprep.subr.mxu1 %v450_v42  ;;  %v283_v37 = vld [vmem:[%s1733_s11 + $0x80] sm:$0xff]  ;;  %v282_v39 = vld [vmem:[%s1733_s11 + $0x78] sm:$0xff]  ;;  %v289_v42 = vld [vmem:[%s1733_s11 + $0xb0] sm:$0xff] }
  0x44   : > { %561 = vmatmul.mubr.f32.gmra.mxu0 %v294_v43  ;;  %1299 = vmatpush3.msra.mxu1 %v434_v45  ;;  %v290_v40 = vld [vmem:[%s1733_s11 + $0xb8] sm:$0xff]  ;;  %v470_v41 = vld [vmem:[%s2167_s1 + $0x460] sm:$0xff]  ;;  %v292_v43 = vld [vmem:[%s1733_s11 + $0xc8] sm:$0xff] }
  0x45   : > { %1246 = vmatpush3.msra.mxu0 %v402_v44  ;;  %660 = vmatprep.mubr.f32.mxu1 %v297_v46  ;;  %v469_v44 = vld [vmem:[%s2167_s1 + $0x458] sm:$0xff]  ;;  %v291_v45 = vld [vmem:[%s1733_s11 + $0xc0] sm:$0xff] }
  0x46   : > { %1247 = vmatprep.subr.mxu0 %v417_v47  ;;  %1300 = vmatprep.subr.mxu1 %v449_v48  ;;  %v299_v46 = vld [vmem:[%s1733_s11 + $0x100] sm:$0xff]  ;;  %v468_v47 = vld [vmem:[%s2167_s1 + $0x450] sm:$0xff]  ;;  %v298_v48 = vld [vmem:[%s1733_s11 + $0xf8] sm:$0xff] }
  0x47   : > { %661 = vmatmul.mubr.f32.gmra.mxu1 %v296_v49  ;;  %1248 = vmatpush3.msra.mxu0 %v401_v50  ;;  %v301_v49 = vld [vmem:[%s1733_s11 + $0x110] sm:$0xff]  ;;  %v467_v50 = vld [vmem:[%s2167_s1 + $0x448] sm:$0xff] }
  0x48   : > { %1301 = vmatpush3.msra.mxu1 %v433_v51  ;;  %565 = vmatprep.mubr.f32.mxu0 %v304_v52  ;;  %v300_v51 = vld [vmem:[%s1733_s11 + $0x108] sm:$0xff] }
  0x49   : > { %1249 = vmatprep.subr.mxu0 %v416_v53  ;;  %1302 = vmatprep.subr.mxu1 %v448_v54  ;;  %v308_v52 = vld [vmem:[%s1733_s11 + $0x148] sm:$0xff]  ;;  %v466_v53 = vld [vmem:[%s2167_s1 + $0x440] sm:$0xff] }
  0x4a   : > { %566 = vmatmul.mubr.f32.gmra.mxu0 %v303_v55  ;;  %1303 = vmatpush3.msra.mxu1 %v432_v57  ;;  %v307_v54 = vld [vmem:[%s1733_s11 + $0x140] sm:$0xff]  ;;  %v310_v55 = vld [vmem:[%s1733_s11 + $0x158] sm:$0xff]  ;;  %v309_v57 = vld [vmem:[%s1733_s11 + $0x150] sm:$0xff] }
  0x4b   : > { %1250 = vmatpush3.msra.mxu0 %v400_v56  ;;  %665 = vmatprep.mubr.f32.mxu1 %v306_v58  ;;  %v465_v56 = vld [vmem:[%s2167_s1 + $0x438] sm:$0xff]  ;;  %v317_v58 = vld [vmem:[%s1733_s11 + $0x190] sm:$0xff] }
  0x4c   : > { %1251 = vmatprep.subr.mxu0 %v415_v59  ;;  %1304 = vmatprep.subr.mxu1 %v447_v60  ;;  %v464_v59 = vld [vmem:[%s2167_s1 + $0x430] sm:$0xff]  ;;  %v316_v60 = vld [vmem:[%s1733_s11 + $0x188] sm:$0xff] }
  0x4d   : > { %666 = vmatmul.mubr.f32.gmra.mxu1 %v305_v61  ;;  %1252 = vmatpush3.msra.mxu0 %v399_v62  ;;  %v319_v61 = vld [vmem:[%s1733_s11 + $0x1a0] sm:$0xff]  ;;  %v463_v62 = vld [vmem:[%s2167_s1 + $0x428] sm:$0xff] }
  0x4e   : > { %1305 = vmatpush3.msra.mxu1 %v431_v63  ;;  %570 = vmatprep.mubr.f32.mxu0 %v313_v0  ;;  %v318_v63 = vld [vmem:[%s1733_s11 + $0x198] sm:$0xff] }
  0x4f   : > { %1253 = vmatprep.subr.mxu0 %v414_v1  ;;  %1306 = vmatprep.subr.mxu1 %v446_v2  ;;  %v326_v0 = vld [vmem:[%s1733_s11 + $0x1d8] sm:$0x1]  ;;  %v462_v1 = vld [vmem:[%s2167_s1 + $0x420] sm:$0xff]  ;;  %v325_v2 = vld [vmem:[%s1733_s11 + $0x1d0] sm:$0x1] }
  0x50   : > { %571 = vmatmul.mubr.f32.gmra.mxu0 %v312_v3  ;;  %1307 = vmatpush3.msra.mxu1 %v430_v5  ;;  %v328_v3 = vld [vmem:[%s1733_s11 + $0x1e8] sm:$0x1]  ;;  %v327_v5 = vld [vmem:[%s1733_s11 + $0x1e0] sm:$0x1] }
  0x51   : > { %1254 = vmatpush3.msra.mxu0 %v398_v4  ;;  %670 = vmatprep.mubr.f32.mxu1 %v315_v6  ;;  %v461_v4 = vld [vmem:[%s2167_s1 + $0x418] sm:$0xff]  ;;  %v460_v6 = vld [vmem:[%s2167_s1 + $0x410] sm:$0xff] }
  0x52   : > { %1255 = vmatprep.subr.mxu0 %v413_v7  ;;  %1308 = vmatprep.subr.mxu1 %v445_v8  ;;  %v459_v7 = vld [vmem:[%s2167_s1 + $0x408] sm:$0xff]  ;;  %v458_v8 = vld [vmem:[%s2167_s1 + $0x400] sm:$0xff] }
  0x53   : > { %671 = vmatmul.mubr.f32.gmra.mxu1 %v314_v9  ;;  %1256 = vmatpush3.msra.mxu0 %v397_v10  ;;  %v275_v9 = vld [vmem:[%s1733_s11 + $0x40] sm:$0xff] }
  0x54   : > { %1309 = vmatpush3.msra.mxu1 %v429_v11  ;;  %575 = vmatprep.mubr.f32.mxu0 %v322_v12  ;;  %v311_v10 = vld [vmem:[%s1733_s11 + $0x160] sm:$0xff]  ;;  %v284_v11 = vld [vmem:[%s1733_s11 + $0x88] sm:$0xff] }
  0x55   : > { %1257 = vmatprep.subr.mxu0 %v412_v13  ;;  %1310 = vmatprep.subr.mxu1 %v444_v14  ;;  %v320_v12 = vld [vmem:[%s1733_s11 + $0x1a8] sm:$0xff]  ;;  %v293_v13 = vld [vmem:[%s1733_s11 + $0xd0] sm:$0xff] }
  0x56   : > { %576 = vmatmul.mubr.f32.gmra.mxu0 %v321_v15  ;;  %1311 = vmatpush3.msra.mxu1 %v428_v17  ;;  %v329_v14 = vld [vmem:[%s1733_s11 + $0x1f0] sm:$0x1]  ;;  %v302_v15 = vld [vmem:[%s1733_s11 + $0x118] sm:$0xff] }
  0x57   : > { %1258 = vmatpush3.msra.mxu0 %v396_v16  ;;  %675 = vmatprep.mubr.f32.mxu1 %v324_v18 }
  0x58   : > { %1259 = vmatprep.subr.mxu0 %v411_v19  ;;  %1312 = vmatprep.subr.mxu1 %v443_v20 }
  0x59   : > { %676 = vmatmul.mubr.f32.gmra.mxu1 %v323_v21  ;;  %1260 = vmatpush3.msra.mxu0 %v395_v22 }
  0x5a   : > { %1313 = vmatpush3.msra.mxu1 %v427_v23  ;;  %1261 = vmatprep.subr.mxu0 %v410_v24 }
  0x5b   : > { %1314 = vmatprep.subr.mxu1 %v442_v25  ;;  %1262 = vmatpush3.msra.mxu0 %v394_v26 }
  0x5c   : > { %745 = vmatprep.mubr.f32.mxu0 %v272_v27  ;;  %1315 = vmatpush3.msra.mxu1 %v426_v28 }
  0x5d   : > { %746 = vmatmul.mubr.f32.vlgmr.msra.gmra.mxu0 %v271_v29  ;;  %845 = vmatprep.mubr.f32.mxu1 %v274_v30 }
  0x5e   : > { %1360 = vmatprep.subr.mxu0 %v1497_v33  ;;  %1413 = vmatprep.subr.mxu1 %v1497_v33 }
  0x5f   : > { %846 = vmatmul.mubr.f32.vlgmr.msra.gmra.mxu1 %v273_v31  ;;  %1361 = vmatpush3.msra.mxu0 %v473_v32 }
  0x60   : > { %1429 = vmatpush3.msra.mxu1 %v473_v32  ;;  %1362 = vmatprep.subr.mxu0 %v1497_v33 }
  0x61   : > { %1414 = vmatprep.subr.mxu1 %v1497_v33  ;;  %750 = vmatprep.mubr.f32.mxu0 %v281_v34 }
  0x62   : > { %1363 = vmatpush3.msra.mxu0 %v472_v35  ;;  %1430 = vmatpush3.msra.mxu1 %v472_v35 }
  0x63   : > { %751 = vmatmul.mubr.f32.gmra.mxu0 %v280_v36  ;;  %1364 = vmatprep.subr.mxu0 %v1497_v33 }
  0x64   : > { %1415 = vmatprep.subr.mxu1 %v1497_v33  ;;  %850 = vmatprep.mubr.f32.mxu1 %v283_v37 }
  0x65   : > { %1365 = vmatpush3.msra.mxu0 %v471_v38  ;;  %1431 = vmatpush3.msra.mxu1 %v471_v38 }
  0x66   : > { %1366 = vmatprep.subr.mxu0 %v1497_v33  ;;  %851 = vmatmul.mubr.f32.gmra.mxu1 %v282_v39 }
  0x67   : > { %1416 = vmatprep.subr.mxu1 %v1497_v33  ;;  %755 = vmatprep.mubr.f32.mxu0 %v290_v40 }
  0x68   : > { %1367 = vmatpush3.msra.mxu0 %v470_v41  ;;  %1432 = vmatpush3.msra.mxu1 %v470_v41 }
  0x69   : > { %756 = vmatmul.mubr.f32.gmra.mxu0 %v289_v42  ;;  %1368 = vmatprep.subr.mxu0 %v1497_v33 }
  0x6a   : > { %1417 = vmatprep.subr.mxu1 %v1497_v33  ;;  %855 = vmatprep.mubr.f32.mxu1 %v292_v43 }
  0x6b   : > { %1369 = vmatpush3.msra.mxu0 %v469_v44  ;;  %1433 = vmatpush3.msra.mxu1 %v469_v44 }
  0x6c   : > { %1370 = vmatprep.subr.mxu0 %v1497_v33  ;;  %856 = vmatmul.mubr.f32.gmra.mxu1 %v291_v45 }
  0x6d   : > { %1418 = vmatprep.subr.mxu1 %v1497_v33  ;;  %760 = vmatprep.mubr.f32.mxu0 %v299_v46 }
  0x6e   : > { %1371 = vmatpush3.msra.mxu0 %v468_v47  ;;  %1434 = vmatpush3.msra.mxu1 %v468_v47 }
  0x6f   : > { %761 = vmatmul.mubr.f32.gmra.mxu0 %v298_v48  ;;  %1372 = vmatprep.subr.mxu0 %v1497_v33 }
  0x70   : > { %1419 = vmatprep.subr.mxu1 %v1497_v33  ;;  %860 = vmatprep.mubr.f32.mxu1 %v301_v49 }
  0x71   : > { %1373 = vmatpush3.msra.mxu0 %v467_v50  ;;  %1435 = vmatpush3.msra.mxu1 %v467_v50 }
  0x72   : > { %1374 = vmatprep.subr.mxu0 %v1497_v33  ;;  %861 = vmatmul.mubr.f32.gmra.mxu1 %v300_v51 }
  0x73   : > { %1420 = vmatprep.subr.mxu1 %v1497_v33  ;;  %765 = vmatprep.mubr.f32.mxu0 %v308_v52 }
  0x74   : > { %1375 = vmatpush3.msra.mxu0 %v466_v53  ;;  %1436 = vmatpush3.msra.mxu1 %v466_v53 }
  0x75   : > { %766 = vmatmul.mubr.f32.gmra.mxu0 %v307_v54  ;;  %1376 = vmatprep.subr.mxu0 %v1497_v33 }
  0x76   : > { %1421 = vmatprep.subr.mxu1 %v1497_v33  ;;  %865 = vmatprep.mubr.f32.mxu1 %v310_v55 }
  0x77   : > { %1377 = vmatpush3.msra.mxu0 %v465_v56  ;;  %1437 = vmatpush3.msra.mxu1 %v465_v56 }
  0x78   : > { %1378 = vmatprep.subr.mxu0 %v1497_v33  ;;  %866 = vmatmul.mubr.f32.gmra.mxu1 %v309_v57 }
  0x79   : > { %1422 = vmatprep.subr.mxu1 %v1497_v33  ;;  %770 = vmatprep.mubr.f32.mxu0 %v317_v58 }
  0x7a   : > { %1379 = vmatpush3.msra.mxu0 %v464_v59  ;;  %1438 = vmatpush3.msra.mxu1 %v464_v59 }
  0x7b   : > { %771 = vmatmul.mubr.f32.gmra.mxu0 %v316_v60  ;;  %1380 = vmatprep.subr.mxu0 %v1497_v33 }
  0x7c   : > { %1423 = vmatprep.subr.mxu1 %v1497_v33  ;;  %870 = vmatprep.mubr.f32.mxu1 %v319_v61 }
  0x7d   : > { %1381 = vmatpush3.msra.mxu0 %v463_v62  ;;  %1439 = vmatpush3.msra.mxu1 %v463_v62 }
  0x7e   : > { %1382 = vmatprep.subr.mxu0 %v1497_v33  ;;  %871 = vmatmul.mubr.f32.gmra.mxu1 %v318_v63 }
  0x7f   : > { %1424 = vmatprep.subr.mxu1 %v1497_v33  ;;  %775 = vmatprep.mubr.f32.mxu0 %v326_v0 }
  0x80   : > { %1383 = vmatpush3.msra.mxu0 %v462_v1  ;;  %1440 = vmatpush3.msra.mxu1 %v462_v1 }
  0x81   : > { %776 = vmatmul.mubr.f32.gmra.mxu0 %v325_v2  ;;  %1384 = vmatprep.subr.mxu0 %v1497_v33  ;;  %v1120_v2 = vld [vmem:[%s2168_s2] ss:$0 sm:$0xff] }
  0x82   : > { %1425 = vmatprep.subr.mxu1 %v1497_v33  ;;  %875 = vmatprep.mubr.f32.mxu1 %v328_v3 }
  0x83   : > { %1385 = vmatpush3.msra.mxu0 %v461_v4  ;;  %1441 = vmatpush3.msra.mxu1 %v461_v4 }
  0x84   : > { %1386 = vmatprep.subr.mxu0 %v1497_v33  ;;  %876 = vmatmul.mubr.f32.gmra.mxu1 %v327_v5 }
  0x85   : > { %1426 = vmatprep.subr.mxu1 %v1497_v33  ;;  %1387 = vmatpush3.msra.mxu0 %v460_v6 }
  0x86   : > { %1442 = vmatpush3.msra.mxu1 %v460_v6  ;;  %1388 = vmatprep.subr.mxu0 %v1497_v33 }
  0x87   : > { %1427 = vmatprep.subr.mxu1 %v1497_v33  ;;  %1389 = vmatpush3.msra.mxu0 %v459_v7 }
  0x88   : > { %1443 = vmatpush3.msra.mxu1 %v459_v7  ;;  %1390 = vmatprep.subr.mxu0 %v1497_v33 }
  0x89   : > { %1428 = vmatprep.subr.mxu1 %v1497_v33  ;;  %1391 = vmatpush3.msra.mxu0 %v458_v8 }
  0x8a   : > { %1444 = vmatpush3.msra.mxu1 %v458_v8  ;;  %1392 = vmatprep.mubr.msk.f32.mxu0 %vm1498_vm0, %v1497_v33 }
  0x8b   : > { %1404 = vmatprep.mubr.msk.f32.mxu1 %vm1498_vm0, %v1497_v33  ;;  %1393 = vmatmul.mubr.f32.vlgmr.msra.gmra.mxu0 %v275_v9 }
  0x8c   : > { %1405 = vmatmul.mubr.f32.vlgmr.msra.gmra.mxu1 %v311_v10  ;;  %1395 = vmatprep.mubr.msk.f32.mxu0 %vm1498_vm0, %v1497_v33 }
  0x8d   : > { %1407 = vmatprep.mubr.msk.f32.mxu1 %vm1498_vm0, %v1497_v33 }
  0x8f   : > { %1396 = vmatmul.mubr.f32.gmra.mxu0 %v284_v11 }
  0x90   : > { %1408 = vmatmul.mubr.f32.gmra.mxu1 %v320_v12  ;;  %1398 = vmatprep.mubr.msk.f32.mxu0 %vm1498_vm0, %v1497_v33 }
  0x91   : > { %1410 = vmatprep.mubr.msk.f32.mxu1 %vm1498_vm0, %v1497_v33 }
  0x93   : > { %1399 = vmatmul.mubr.f32.gmra.mxu0 %v293_v13 }
  0x94   : > { %1411 = vmatmul.mubr.f32.gmra.mxu1 %v329_v14  ;;  %1401 = vmatprep.mubr.msk.f32.mxu0 %vm1498_vm0, %v1497_v33 }
  0x97   : > { %1402 = vmatmul.mubr.f32.gmra.mxu0 %v302_v15 }
  0xef   : > { %v1157_v16 = vpop.f32.mrf.mxu0 }
  0xf1   : > { %v1210_v17 = vpop.f32.mrf.mxu1  ;;  %v1158_v18 = vpop.f32.mrf.mxu0 }
  0xf2   : > { %v1159_v1 = vadd.f32 %v1158_v18, %v1157_v16 }
  0xf3   : > { %v1211_v20 = vpop.f32.mrf.mxu1 }
  0xf4   : > { %v548_v6 = vadd.f32 %v1159_v1, %v1120_v2  ;;  %v1212_v7 = vadd.f32 %v1211_v20, %v1210_v17 }
  0xf8   : > { %v1160_v19 = vpop.f32.mrf.mxu0 }
  0xfa   : > { %v1161_v21 = vpop.f32.mrf.mxu0 }
  0xfb   : > { %v1213_v22 = vpop.f32.mrf.mxu1  ;;  %v1162_v8 = vadd.f32 %v1161_v21, %v1160_v19 }
  0xfd   : > { %v1214_v23 = vpop.f32.mrf.mxu1  ;;  %v553_v16 = vadd.f32 %v1162_v8, %v1120_v2 }
  0xfe   : > { %v1163_v24 = vpop.f32.mrf.mxu0  ;;  %v1215_v18 = vadd.f32 %v1214_v23, %v1213_v22 }
 0x100   : > { %v1164_v25 = vpop.f32.mrf.mxu0 }
 0x101   : > { %v2102_v26 = vpop.f32.mrf.mxu1  ;;  %v1165_v9 = vadd.f32 %v1164_v25, %v1163_v24 }
 0x103   : > { %v1217_v27 = vpop.f32.mrf.mxu1 }
 0x104   : > { %v2104_v28 = vpop.f32.mrf.mxu0  ;;  %v1218_v1 = vadd.f32 %v1217_v27, %v2102_v26 }
 0x106   : > { %v2106_v29 = vpop.f32.mrf.mxu0 }
 0x107   : > { %v2108_v30 = vpop.f32.mrf.mxu1 }
 0x109   : > { %v2110_v31 = vpop.f32.mrf.mxu1 }
 0x10a   : > { %v1169_v32 = vpop.f32.mrf.mxu0 }
 0x10c   : > { %v1170_v33 = vpop.f32.mrf.mxu0 }
 0x10d   : > { %v1222_v34 = vpop.f32.mrf.mxu1  ;;  %v1171_v3 = vadd.f32 %v1170_v33, %v1169_v32 }
 0x10f   : > { %v1223_v35 = vpop.f32.mrf.mxu1  ;;  %v568_v10 = vadd.f32 %v1171_v3, %v1120_v2 }
 0x110   : > { %v1172_v36 = vpop.f32.mrf.mxu0  ;;  %v1224_v11 = vadd.f32 %v1223_v35, %v1222_v34 }
 0x112   : > { %v1173_v37 = vpop.f32.mrf.mxu0 }
 0x113   : > { %v1225_v38 = vpop.f32.mrf.mxu1  ;;  %v1174_v12 = vadd.f32 %v1173_v37, %v1172_v36  ;;  %v653_v36 = vadd.f32 %v1215_v18, %v553_v16  ;;  %v1168_v37 = vadd.f32 %v2106_v29, %v2104_v28 }
 0x115   : > { %v1226_v39 = vpop.f32.mrf.mxu1  ;;  %v573_v32 = vadd.f32 %v1174_v12, %v1120_v2 }
 0x116   : > { %v1175_v40 = vpop.f32.mrf.mxu0  ;;  %v1227_v33 = vadd.f32 %v1226_v39, %v1225_v38 }
 0x118   : > { %v1176_v41 = vpop.f32.mrf.mxu0 }
 0x119   : > { %v1228_v42 = vpop.f32.mrf.mxu1 }
 0x11b   : > { %v1229_v43 = vpop.f32.mrf.mxu1 }
 0x11c   : > { %v1230_v23 = vadd.f32 %v1229_v43, %v1228_v42 }
 0x11d   : > { %v1263_v44 = vpop.f32.mrf.mxu0 }
 0x11f   : > { %v1264_v45 = vpop.f32.mrf.mxu0  ;;  %v1316_v46 = vpop.f32.mrf.mxu1 }
 0x120   : > { %v1265_v13 = vadd.f32 %v1264_v45, %v1263_v44 }
 0x121   : > { %v1317_v48 = vpop.f32.mrf.mxu1 }
 0x122   : > { %v1318_v19 = vadd.f32 %v1317_v48, %v1316_v46 }
 0x123   : > { %v1266_v47 = vpop.f32.mrf.mxu0 }
 0x125   : > { %v1267_v49 = vpop.f32.mrf.mxu0 }
 0x126   : > { %v1319_v50 = vpop.f32.mrf.mxu1  ;;  %v1268_v20 = vadd.f32 %v1267_v49, %v1266_v47  ;;  %v563_v49 = vadd.f32 %v1168_v37, %v1120_v2 }
 0x128   : > { %v1320_v52 = vpop.f32.mrf.mxu1  ;;  %v753_v38 = vadd.f32 %v1268_v20, %v653_v36 }
 0x129   : > { %v1269_v51 = vpop.f32.mrf.mxu0  ;;  %v1321_v45 = vadd.f32 %v1320_v52, %v1319_v50 }
 0x12b   : > { %v1270_v53 = vpop.f32.mrf.mxu0 }
 0x12c   : > { %v2112_v54 = vpop.f32.mrf.mxu1 }
 0x12e   : > { %v2116_v56 = vpop.f32.mrf.mxu1 }
 0x12f   : > { %v2114_v55 = vpop.f32.mrf.mxu0  ;;  %2173 = vst [vmem:[#allocation3_spill] sm:$0xff] %v2116_v56  ;;  %v668_v56 = vadd.f32 %v1224_v11, %v568_v10 }
 0x130   : > { %2172 = vst [vmem:[#allocation2_spill] sm:$0xff] %v2114_v55  ;;  %v558_v55 = vadd.f32 %v1165_v9, %v1120_v2 }
 0x131   : > { %v2118_v57 = vpop.f32.mrf.mxu0 }
 0x132   : > { %2174 = vst [vmem:[#allocation4_spill] sm:$0xff] %v2118_v57  ;;  %v2120_v58 = vpop.f32.mrf.mxu1  ;;  %v1177_v57 = vadd.f32 %v1176_v41, %v1175_v40  ;;  %v673_v40 = vadd.f32 %v1227_v33, %v573_v32  ;;  %v1271_v41 = vadd.f32 %v1270_v53, %v1269_v51  ;;  %v658_v44 = vadd.f32 %v1218_v1, %v558_v55 }
 0x133   : > { %2175 = vst [vmem:[#allocation5_spill] sm:$0xff] %v2120_v58  ;;  %v648_v58 = vadd.f32 %v1212_v7, %v548_v6 }
 0x134   : > { %v2122_v60 = vpop.f32.mrf.mxu1  ;;  %v578_v22 = vadd.f32 %v1177_v57, %v1120_v2  ;;  %v758_v42 = vadd.f32 %v1271_v41, %v658_v44 }
 0x135   : > { %v1275_v59 = vpop.f32.mrf.mxu0  ;;  %2176 = vst [vmem:[#allocation6_spill] sm:$0xff] %v2122_v60  ;;  %v748_v17 = vadd.f32 %v1265_v13, %v648_v58 }
 0x136   : > { %v678_v58 = vadd.f32 %v1230_v23, %v578_v22  ;;  %v2177_v53 = vld [vmem:[#allocation3_spill] sm:$0xff] }
 0x137   : > { %v1276_v61 = vpop.f32.mrf.mxu0  ;;  %v848_v27 = vadd.f32 %v1318_v19, %v748_v17  ;;  %v1324_v55 = vadd.f32 %v2177_v53, %v2112_v54  ;;  %v2178_v57 = vld [vmem:[#allocation2_spill] sm:$0xff] }
 0x138   : > { %v1328_v62 = vpop.f32.mrf.mxu1  ;;  %v1277_v15 = vadd.f32 %v1276_v61, %v1275_v59  ;;  %v1121_v61 = vld [vmem:[%s2169_s3] ss:$0 sm:$0xff] }
 0x139   : > { %v2179_v59 = vld [vmem:[#allocation4_spill] sm:$0xff]  ;;  %v1122_v54 = vld [vmem:[%s2170_s4] ss:$0 sm:$0xff]  ;;  %v858_v16 = vadd.f32 %v1324_v55, %v758_v42 }
 0x13a   : > { %v1329_v0 = vpop.f32.mrf.mxu1  ;;  %v768_v24 = vadd.f32 %v1277_v15, %v668_v56  ;;  %v1221_v56 = vadd.f32 %v2110_v31, %v2108_v30  ;;  %v1274_v50 = vadd.f32 %v2179_v59, %v2178_v57  ;;  %v2180_v11 = vld [vmem:[#allocation5_spill] sm:$0xff] }
 0x13b   : > { %v1278_v63 = vpop.f32.mrf.mxu0  ;;  %v1330_v25 = vadd.f32 %v1329_v0, %v1328_v62  ;;  %v853_v0 = vadd.f32 %v1321_v45, %v753_v38 }
 0x13c   : > { %v663_v3 = vadd.f32 %v1221_v56, %v563_v49  ;;  %v2181_v12 = vld [vmem:[#allocation6_spill] sm:$0xff] }
 0x13d   : > { %v1279_v4 = vpop.f32.mrf.mxu0  ;;  %v868_v48 = vadd.f32 %v1330_v25, %v768_v24  ;;  %v1327_v13 = vadd.f32 %v2181_v12, %v2180_v11 }
 0x13e   : > { %v1331_v5 = vpop.f32.mrf.mxu1  ;;  %v1280_v34 = vadd.f32 %v1279_v4, %v1278_v63  ;;  %v763_v10 = vadd.f32 %v1274_v50, %v663_v3 }
 0x140   : > { %v1332_v14 = vpop.f32.mrf.mxu1  ;;  %v773_v46 = vadd.f32 %v1280_v34, %v673_v40  ;;  %v863_v36 = vadd.f32 %v1327_v13, %v763_v10 }
 0x141   : > { %v1281_v60 = vpop.f32.mrf.mxu0  ;;  %v1333_v47 = vadd.f32 %v1332_v14, %v1331_v5 }
 0x143   : > { %v1282_v35 = vpop.f32.mrf.mxu0  ;;  %v873_v2 = vadd.f32 %v1333_v47, %v773_v46 }
 0x144   : > { %v1334_v21 = vpop.f32.mrf.mxu1  ;;  %v1283_v39 = vadd.f32 %v1282_v35, %v1281_v60 }
 0x146   : > { %v1335_v26 = vpop.f32.mrf.mxu1  ;;  %v778_v52 = vadd.f32 %v1283_v39, %v678_v58 }
 0x147   : > { %v1336_v60 = vadd.f32 %v1335_v26, %v1334_v21 }
 0x149   : > { %v878_v18 = vadd.f32 %v1336_v60, %v778_v52 }
 0x14b   : > { %v947_v28 = vpop.f32.mrf.mxu0 }
 0x14c   : > { %v967_v29 = vpop.f32.mrf.mxu1  ;;  %v948_v43 = vadd.f32 %v947_v28, %v848_v27 }
 0x14d   : > { %v968_v51 = vadd.f32 %v967_v29, %v868_v48  ;;  %v1394_v30 = vpop.f32.mrf.mxu0 }
 0x14e   : > { %v1406_v31 = vpop.f32.mrf.mxu1  ;;  %v981_v62 = vmax.f32 %v948_v43, 0.0 }
 0x14f   : > { %v985_v63 = vmax.f32 %v968_v51, 0.0  ;;  %v952_v4 = vpop.f32.mrf.mxu0 }
 0x150   : > { %v972_v5 = vpop.f32.mrf.mxu1  ;;  %v995_v6 = vmul.f32 %v1121_v61, %v981_v62  ;;  %v953_v8 = vadd.f32 %v952_v4, %v853_v0 }
 0x151   : > { %v999_v7 = vmul.f32 %v1121_v61, %v985_v63  ;;  %v973_v9 = vadd.f32 %v972_v5, %v873_v2  ;;  %v1397_v14 = vpop.f32.mrf.mxu0 }
 0x152   : > { %v1409_v15 = vpop.f32.mrf.mxu1  ;;  %v1009_v32 = vadd.f32 %v1122_v54, %v995_v6  ;;  %v982_v1 = vmax.f32 %v953_v8, 0.0 }
 0x153   : > { %v1013_v33 = vadd.f32 %v1122_v54, %v999_v7  ;;  %v986_v17 = vmax.f32 %v973_v9, 0.0  ;;  %v957_v19 = vpop.f32.mrf.mxu0 }
 0x154   : > { %v977_v20 = vpop.f32.mrf.mxu1  ;;  %1016 = vst [vmem:[%s2148_s10] sm:$0xff] %v1009_v32  ;;  %v996_v21 = vmul.f32 %v1121_v61, %v982_v1  ;;  %v958_v25 = vadd.f32 %v957_v19, %v858_v16 }
 0x155   : > { %1020 = vst [vmem:[%s2148_s10 + $0x20] sm:$0xff] %v1013_v33  ;;  %v1000_v24 = vmul.f32 %v1121_v61, %v986_v17  ;;  %v978_v34 = vadd.f32 %v977_v20, %v878_v18  ;;  %v1400_v35 = vpop.f32.mrf.mxu0 }
 0x156   : > { %v1412_v37 = vpop.f32.mrf.mxu1  ;;  %v1010_v22 = vadd.f32 %v1122_v54, %v996_v21  ;;  %v983_v40 = vmax.f32 %v958_v25, 0.0 }
 0x157   : > { %v1014_v23 = vadd.f32 %v1122_v54, %v1000_v24  ;;  %v987_v41 = vmax.f32 %v978_v34, 0.0  ;;  %v962_v44 = vpop.f32.mrf.mxu0 }
 0x158   : > { %1017 = vst [vmem:[%s2148_s10 + $0x8] sm:$0xff] %v1010_v22  ;;  %v997_v38 = vmul.f32 %v1121_v61, %v983_v40  ;;  %v963_v26 = vadd.f32 %v962_v44, %v863_v36 }
 0x159   : > { %1021 = vst [vmem:[%s2148_s10 + $0x28] sm:$0xff] %v1014_v23  ;;  %v1001_v39 = vmul.f32 %v1121_v61, %v987_v41  ;;  %v1403_v27 = vpop.f32.mrf.mxu0 }
 0x15a   : > { %v1011_v45 = vadd.f32 %v1122_v54, %v997_v38  ;;  %v984_v47 = vmax.f32 %v963_v26, 0.0 }
 0x15b   : > { %v1015_v46 = vadd.f32 %v1122_v54, %v1001_v39 }
 0x15c   : > { %1018 = vst [vmem:[%s2148_s10 + $0x10] sm:$0xff] %v1011_v45  ;;  %v998_v48 = vmul.f32 %v1121_v61, %v984_v47 }
 0x15d   : > { %1022 = vst [vmem:[%s2148_s10 + $0x30] sm:$0x1] %v1015_v46 }
 0x15e   : > { %v1012_v49 = vadd.f32 %v1122_v54, %v998_v48 }
 0x160   : > { %1019 = vst [vmem:[%s2148_s10 + $0x18] sm:$0xff] %v1012_v49 }
 0x161 PF: > { %s15_s20 = sadd.s32 1, %s1495_s20   ;;  %s2182_s18 = smov %s1491_s19 }
 0x162   : > { %p12_p5 = scmp.ge.s32.totalorder %s15_s20, 4   ;;  %s2183_s19 = smov %s2185_s21 }
 0x164   :  { %14 = sbr.rel (!%p12_p5) target bundleno = 2 (0x2), region = 70 }

// kernel: forward.12
= control target key start
LH: loop header
LB: loop body
LE: loop exit
PB: predicated region body
PF: predicated region fallthrough
CT: control target
= control target key end

     0   :  { %s3312_s12 = smov 0   ;;  %s3314_s13 = smov 0   ;;  %s4156_s0 = inlined_call_operand.vmem [shape: f32[2,6272], index: 0, kind: input, shape index: {}]   ;;  %s4157_s1 = inlined_call_operand.vmem [shape: bf16[6272,1024], index: 1, kind: input, shape index: {}]   ;;  %s4158_s2 = inlined_call_operand.vmem [shape: f32[1,1024], index: 2, kind: input, shape index: {}]   ;;  %s4159_s3 = inlined_call_operand.vmem [shape: f32[2,1024], index: 3, kind: output, shape index: {}]  }
   0x1   :  { %s3316_s14 = smov 0   ;;  %s3318_s15 = smov 0  }
   0x2   :  { %s3320_s16 = smov 0   ;;  %s3322_s17 = smov 0  }
   0x3   :  { %s3324_s18 = smov 0  }
   0x4 LB: > { %s22_s19 = sadd.s32 1, %s3279_s16  ;;  %s25_s20 = sadd.s32 1, %s3283_s17  ;;  %s3287_s18 = sphi %s3324_s18, %s13_s18   ;;  %s3283_s17 = sphi %s3322_s17, %s4165_s17   ;;  %s3279_s16 = sphi %s3320_s16, %s4164_s16   ;;  %s3275_s15 = sphi %s3318_s15, %s4163_s15   ;;  %s3271_s14 = sphi %s3316_s14, %s4162_s14   ;;  %s3267_s13 = sphi %s3314_s13, %s4161_s13   ;;  %s3263_s12 = sphi %s3312_s12, %s4160_s12  }
   0x5   : > { %p23_p0 = scmp.ge.s32.totalorder %s22_s19, 7  ;;  %p67_p1 = scmp.ne.s32.totalorder %s3267_s13, %s3263_s12 }
   0x6   : > { %p68_p2 = scmp.eq.s32.totalorder %s3287_s18, 0  ;;  %s60_s24 = sadd.s32 1, %s3267_s13 }
   0x7   : > { %s4167_s19 = smov (%p23_p0, %s22_s19), 0  ;;  %s4169_s20 = smov (!%p23_p0, %s25_s20), %s3283_s17 }
   0x8   : > { %p69_p3 = por %p68_p2, %p67_p1  ;;  %p27_p4 = scmp.ge.s32.totalorder %s4169_s20, 2 }
   0x9   : > { %s55_s21 = ssub.s32 %s3279_s16, %s4167_s19  ;;  %p2596_p6 = scmp.ge.s32.totalorder %s3287_s18, 14 }
   0xa   : > { %s4171_s20 = smov (%p27_p4, %s4169_s20), 0 }
   0xb   : > { %s56_s22 = ssub.s32 %s3283_s17, %s4171_s20  ;;  %145 = sbr.rel (%p2596_p6) target bundleno = 136 (0x88), region = 16 }
   0xc   : > { %s57_s23 = sor.u32 %s56_s22, %s55_s21 }
   0xd   : > { %p58_p5 = scmp.eq.s32.totalorder %s57_s23, 0 }
   0xf   : > { %s3363_s25 = scalar_select %p58_p5, %s3267_s13, %s60_s24  }
  0x10   : > { %157 = sbr.rel (!%p69_p3) target bundleno = 136 (0x88), region = 24  ;;  %s159_s26 = sand.u32 (%p69_p3), 1, %s3267_s13  }
  0x11   : > { %s2834_s27 = smul.u32 (%p69_p3), 1792, %s159_s26  ;;  %s2597_s28 = sshll.u32 (%p69_p3), %s3283_s17, 2 }
  0x12   : > { %s2833_s29 = smul.u32 (%p69_p3), 896, %s3279_s16 }
  0x13   : > { %s3377_s8 = scalar_lea.vmem (%p69_p3), [#allocation3], %s2834_s27 }
  0x14   : > { %s165_s30 = sadd.s32 (%p69_p3), %s2833_s29, %s2597_s28 }
  0x15   : > { %s2599_s4 = sshll.u32 %s165_s30, 2 }
  0x16   : > { %s3372_s7 = scalar_lea.vmem %s4157_s1, %s2599_s4 }
  0x17   : > { %v180_v0 = vld [vmem:[%s3372_s7] sm:$0xff]  ;;  %v182_v1 = vld [vmem:[%s3372_s7 + $0x8] sm:$0xff] }
  0x18   : > { %v184_v2 = vld [vmem:[%s3372_s7 + $0x20] sm:$0xff]  ;;  %181 = vst [vmem:[%s3377_s8] sm:$0xff] %v180_v0  ;;  %183 = vst [vmem:[%s3377_s8 + $0x8] sm:$0xff] %v182_v1  ;;  %v186_v3 = vld [vmem:[%s3372_s7 + $0x28] sm:$0xff] }
  0x19   : > { %185 = vst [vmem:[%s3377_s8 + $0x10] sm:$0xff] %v184_v2  ;;  %v188_v4 = vld [vmem:[%s3372_s7 + $0x40] sm:$0xff]  ;;  %v190_v5 = vld [vmem:[%s3372_s7 + $0x48] sm:$0xff]  ;;  %187 = vst [vmem:[%s3377_s8 + $0x18] sm:$0xff] %v186_v3 }
  0x1a   : > { %189 = vst [vmem:[%s3377_s8 + $0x20] sm:$0xff] %v188_v4  ;;  %191 = vst [vmem:[%s3377_s8 + $0x28] sm:$0xff] %v190_v5  ;;  %v192_v6 = vld [vmem:[%s3372_s7 + $0x60] sm:$0xff]  ;;  %v194_v7 = vld [vmem:[%s3372_s7 + $0x68] sm:$0xff] }
  0x1b   : > { %v196_v8 = vld [vmem:[%s3372_s7 + $0x80] sm:$0xff]  ;;  %193 = vst [vmem:[%s3377_s8 + $0x30] sm:$0xff] %v192_v6  ;;  %195 = vst [vmem:[%s3377_s8 + $0x38] sm:$0xff] %v194_v7  ;;  %v198_v9 = vld [vmem:[%s3372_s7 + $0x88] sm:$0xff] }
  0x1c   : > { %197 = vst [vmem:[%s3377_s8 + $0x40] sm:$0xff] %v196_v8  ;;  %v200_v10 = vld [vmem:[%s3372_s7 + $0xa0] sm:$0xff]  ;;  %v202_v11 = vld [vmem:[%s3372_s7 + $0xa8] sm:$0xff]  ;;  %199 = vst [vmem:[%s3377_s8 + $0x48] sm:$0xff] %v198_v9 }
  0x1d   : > { %201 = vst [vmem:[%s3377_s8 + $0x50] sm:$0xff] %v200_v10  ;;  %203 = vst [vmem:[%s3377_s8 + $0x58] sm:$0xff] %v202_v11  ;;  %v204_v12 = vld [vmem:[%s3372_s7 + $0xc0] sm:$0xff]  ;;  %v206_v13 = vld [vmem:[%s3372_s7 + $0xc8] sm:$0xff] }
  0x1e   : > { %v208_v14 = vld [vmem:[%s3372_s7 + $0xe0] sm:$0xff]  ;;  %205 = vst [vmem:[%s3377_s8 + $0x60] sm:$0xff] %v204_v12  ;;  %207 = vst [vmem:[%s3377_s8 + $0x68] sm:$0xff] %v206_v13  ;;  %v210_v15 = vld [vmem:[%s3372_s7 + $0xe8] sm:$0xff] }
  0x1f   : > { %209 = vst [vmem:[%s3377_s8 + $0x70] sm:$0xff] %v208_v14  ;;  %v212_v16 = vld [vmem:[%s3372_s7 + $0x100] sm:$0xff]  ;;  %v214_v17 = vld [vmem:[%s3372_s7 + $0x108] sm:$0xff]  ;;  %211 = vst [vmem:[%s3377_s8 + $0x78] sm:$0xff] %v210_v15 }
  0x20   : > { %213 = vst [vmem:[%s3377_s8 + $0x80] sm:$0xff] %v212_v16  ;;  %215 = vst [vmem:[%s3377_s8 + $0x88] sm:$0xff] %v214_v17  ;;  %v216_v18 = vld [vmem:[%s3372_s7 + $0x120] sm:$0xff]  ;;  %v218_v19 = vld [vmem:[%s3372_s7 + $0x128] sm:$0xff] }
  0x21   : > { %v220_v20 = vld [vmem:[%s3372_s7 + $0x140] sm:$0xff]  ;;  %217 = vst [vmem:[%s3377_s8 + $0x90] sm:$0xff] %v216_v18  ;;  %219 = vst [vmem:[%s3377_s8 + $0x98] sm:$0xff] %v218_v19  ;;  %v222_v21 = vld [vmem:[%s3372_s7 + $0x148] sm:$0xff] }
  0x22   : > { %221 = vst [vmem:[%s3377_s8 + $0xa0] sm:$0xff] %v220_v20  ;;  %v224_v22 = vld [vmem:[%s3372_s7 + $0x160] sm:$0xff]  ;;  %v226_v23 = vld [vmem:[%s3372_s7 + $0x168] sm:$0xff]  ;;  %223 = vst [vmem:[%s3377_s8 + $0xa8] sm:$0xff] %v222_v21 }
  0x23   : > { %225 = vst [vmem:[%s3377_s8 + $0xb0] sm:$0xff] %v224_v22  ;;  %227 = vst [vmem:[%s3377_s8 + $0xb8] sm:$0xff] %v226_v23  ;;  %v228_v24 = vld [vmem:[%s3372_s7 + $0x180] sm:$0xff]  ;;  %v230_v25 = vld [vmem:[%s3372_s7 + $0x188] sm:$0xff] }
  0x24   : > { %v232_v26 = vld [vmem:[%s3372_s7 + $0x1a0] sm:$0xff]  ;;  %229 = vst [vmem:[%s3377_s8 + $0xc0] sm:$0xff] %v228_v24  ;;  %231 = vst [vmem:[%s3377_s8 + $0xc8] sm:$0xff] %v230_v25  ;;  %v234_v27 = vld [vmem:[%s3372_s7 + $0x1a8] sm:$0xff] }
  0x25   : > { %233 = vst [vmem:[%s3377_s8 + $0xd0] sm:$0xff] %v232_v26  ;;  %v236_v28 = vld [vmem:[%s3372_s7 + $0x1c0] sm:$0xff]  ;;  %v238_v29 = vld [vmem:[%s3372_s7 + $0x1c8] sm:$0xff]  ;;  %235 = vst [vmem:[%s3377_s8 + $0xd8] sm:$0xff] %v234_v27 }
  0x26   : > { %237 = vst [vmem:[%s3377_s8 + $0xe0] sm:$0xff] %v236_v28  ;;  %239 = vst [vmem:[%s3377_s8 + $0xe8] sm:$0xff] %v238_v29  ;;  %v240_v30 = vld [vmem:[%s3372_s7 + $0x1e0] sm:$0xff]  ;;  %v242_v31 = vld [vmem:[%s3372_s7 + $0x1e8] sm:$0xff] }
  0x27   : > { %v244_v32 = vld [vmem:[%s3372_s7 + $0x200] sm:$0xff]  ;;  %241 = vst [vmem:[%s3377_s8 + $0xf0] sm:$0xff] %v240_v30  ;;  %243 = vst [vmem:[%s3377_s8 + $0xf8] sm:$0xff] %v242_v31  ;;  %v246_v33 = vld [vmem:[%s3372_s7 + $0x208] sm:$0xff] }
  0x28   : > { %245 = vst [vmem:[%s3377_s8 + $0x100] sm:$0xff] %v244_v32  ;;  %v248_v34 = vld [vmem:[%s3372_s7 + $0x220] sm:$0xff]  ;;  %v250_v35 = vld [vmem:[%s3372_s7 + $0x228] sm:$0xff]  ;;  %247 = vst [vmem:[%s3377_s8 + $0x108] sm:$0xff] %v246_v33 }
  0x29   : > { %249 = vst [vmem:[%s3377_s8 + $0x110] sm:$0xff] %v248_v34  ;;  %251 = vst [vmem:[%s3377_s8 + $0x118] sm:$0xff] %v250_v35  ;;  %v252_v36 = vld [vmem:[%s3372_s7 + $0x240] sm:$0xff]  ;;  %v254_v37 = vld [vmem:[%s3372_s7 + $0x248] sm:$0xff] }
  0x2a   : > { %v256_v38 = vld [vmem:[%s3372_s7 + $0x260] sm:$0xff]  ;;  %253 = vst [vmem:[%s3377_s8 + $0x120] sm:$0xff] %v252_v36  ;;  %255 = vst [vmem:[%s3377_s8 + $0x128] sm:$0xff] %v254_v37  ;;  %v258_v39 = vld [vmem:[%s3372_s7 + $0x268] sm:$0xff] }
  0x2b   : > { %257 = vst [vmem:[%s3377_s8 + $0x130] sm:$0xff] %v256_v38  ;;  %v260_v40 = vld [vmem:[%s3372_s7 + $0x280] sm:$0xff]  ;;  %v262_v41 = vld [vmem:[%s3372_s7 + $0x288] sm:$0xff]  ;;  %259 = vst [vmem:[%s3377_s8 + $0x138] sm:$0xff] %v258_v39 }
  0x2c   : > { %261 = vst [vmem:[%s3377_s8 + $0x140] sm:$0xff] %v260_v40  ;;  %263 = vst [vmem:[%s3377_s8 + $0x148] sm:$0xff] %v262_v41  ;;  %v264_v42 = vld [vmem:[%s3372_s7 + $0x2a0] sm:$0xff]  ;;  %v266_v43 = vld [vmem:[%s3372_s7 + $0x2a8] sm:$0xff] }
  0x2d   : > { %v268_v44 = vld [vmem:[%s3372_s7 + $0x2c0] sm:$0xff]  ;;  %265 = vst [vmem:[%s3377_s8 + $0x150] sm:$0xff] %v264_v42  ;;  %267 = vst [vmem:[%s3377_s8 + $0x158] sm:$0xff] %v266_v43  ;;  %v270_v45 = vld [vmem:[%s3372_s7 + $0x2c8] sm:$0xff] }
  0x2e   : > { %269 = vst [vmem:[%s3377_s8 + $0x160] sm:$0xff] %v268_v44  ;;  %v272_v46 = vld [vmem:[%s3372_s7 + $0x2e0] sm:$0xff]  ;;  %v274_v47 = vld [vmem:[%s3372_s7 + $0x2e8] sm:$0xff]  ;;  %271 = vst [vmem:[%s3377_s8 + $0x168] sm:$0xff] %v270_v45 }
  0x2f   : > { %273 = vst [vmem:[%s3377_s8 + $0x170] sm:$0xff] %v272_v46  ;;  %275 = vst [vmem:[%s3377_s8 + $0x178] sm:$0xff] %v274_v47  ;;  %v276_v48 = vld [vmem:[%s3372_s7 + $0x300] sm:$0xff]  ;;  %v278_v49 = vld [vmem:[%s3372_s7 + $0x308] sm:$0xff] }
  0x30   : > { %v280_v50 = vld [vmem:[%s3372_s7 + $0x320] sm:$0xff]  ;;  %277 = vst [vmem:[%s3377_s8 + $0x180] sm:$0xff] %v276_v48  ;;  %279 = vst [vmem:[%s3377_s8 + $0x188] sm:$0xff] %v278_v49  ;;  %v282_v51 = vld [vmem:[%s3372_s7 + $0x328] sm:$0xff] }
  0x31   : > { %281 = vst [vmem:[%s3377_s8 + $0x190] sm:$0xff] %v280_v50  ;;  %v284_v52 = vld [vmem:[%s3372_s7 + $0x340] sm:$0xff]  ;;  %v286_v53 = vld [vmem:[%s3372_s7 + $0x348] sm:$0xff]  ;;  %283 = vst [vmem:[%s3377_s8 + $0x198] sm:$0xff] %v282_v51 }
  0x32   : > { %285 = vst [vmem:[%s3377_s8 + $0x1a0] sm:$0xff] %v284_v52  ;;  %287 = vst [vmem:[%s3377_s8 + $0x1a8] sm:$0xff] %v286_v53  ;;  %v288_v54 = vld [vmem:[%s3372_s7 + $0x360] sm:$0xff]  ;;  %v290_v55 = vld [vmem:[%s3372_s7 + $0x368] sm:$0xff] }
  0x33   : > { %v292_v56 = vld [vmem:[%s3372_s7 + $0x380] sm:$0xff]  ;;  %289 = vst [vmem:[%s3377_s8 + $0x1b0] sm:$0xff] %v288_v54  ;;  %291 = vst [vmem:[%s3377_s8 + $0x1b8] sm:$0xff] %v290_v55  ;;  %v294_v57 = vld [vmem:[%s3372_s7 + $0x388] sm:$0xff] }
  0x34   : > { %293 = vst [vmem:[%s3377_s8 + $0x1c0] sm:$0xff] %v292_v56  ;;  %v296_v58 = vld [vmem:[%s3372_s7 + $0x3a0] sm:$0xff]  ;;  %v298_v59 = vld [vmem:[%s3372_s7 + $0x3a8] sm:$0xff]  ;;  %295 = vst [vmem:[%s3377_s8 + $0x1c8] sm:$0xff] %v294_v57 }
  0x35   : > { %297 = vst [vmem:[%s3377_s8 + $0x1d0] sm:$0xff] %v296_v58  ;;  %299 = vst [vmem:[%s3377_s8 + $0x1d8] sm:$0xff] %v298_v59  ;;  %v300_v60 = vld [vmem:[%s3372_s7 + $0x3c0] sm:$0xff]  ;;  %v302_v61 = vld [vmem:[%s3372_s7 + $0x3c8] sm:$0xff] }
  0x36   : > { %v304_v62 = vld [vmem:[%s3372_s7 + $0x3e0] sm:$0xff]  ;;  %301 = vst [vmem:[%s3377_s8 + $0x1e0] sm:$0xff] %v300_v60  ;;  %303 = vst [vmem:[%s3377_s8 + $0x1e8] sm:$0xff] %v302_v61  ;;  %v306_v63 = vld [vmem:[%s3372_s7 + $0x3e8] sm:$0xff] }
  0x37   : > { %305 = vst [vmem:[%s3377_s8 + $0x1f0] sm:$0xff] %v304_v62  ;;  %v308_v0 = vld [vmem:[%s3372_s7 + $0x400] sm:$0xff]  ;;  %v310_v1 = vld [vmem:[%s3372_s7 + $0x408] sm:$0xff]  ;;  %307 = vst [vmem:[%s3377_s8 + $0x1f8] sm:$0xff] %v306_v63 }
  0x38   : > { %309 = vst [vmem:[%s3377_s8 + $0x200] sm:$0xff] %v308_v0  ;;  %311 = vst [vmem:[%s3377_s8 + $0x208] sm:$0xff] %v310_v1  ;;  %v312_v2 = vld [vmem:[%s3372_s7 + $0x420] sm:$0xff]  ;;  %v314_v3 = vld [vmem:[%s3372_s7 + $0x428] sm:$0xff] }
  0x39   : > { %v316_v4 = vld [vmem:[%s3372_s7 + $0x440] sm:$0xff]  ;;  %313 = vst [vmem:[%s3377_s8 + $0x210] sm:$0xff] %v312_v2  ;;  %315 = vst [vmem:[%s3377_s8 + $0x218] sm:$0xff] %v314_v3  ;;  %v318_v5 = vld [vmem:[%s3372_s7 + $0x448] sm:$0xff] }
  0x3a   : > { %317 = vst [vmem:[%s3377_s8 + $0x220] sm:$0xff] %v316_v4  ;;  %v320_v6 = vld [vmem:[%s3372_s7 + $0x460] sm:$0xff]  ;;  %v322_v7 = vld [vmem:[%s3372_s7 + $0x468] sm:$0xff]  ;;  %319 = vst [vmem:[%s3377_s8 + $0x228] sm:$0xff] %v318_v5 }
  0x3b   : > { %321 = vst [vmem:[%s3377_s8 + $0x230] sm:$0xff] %v320_v6  ;;  %323 = vst [vmem:[%s3377_s8 + $0x238] sm:$0xff] %v322_v7  ;;  %v324_v8 = vld [vmem:[%s3372_s7 + $0x480] sm:$0xff]  ;;  %v326_v9 = vld [vmem:[%s3372_s7 + $0x488] sm:$0xff] }
  0x3c   : > { %v328_v10 = vld [vmem:[%s3372_s7 + $0x4a0] sm:$0xff]  ;;  %325 = vst [vmem:[%s3377_s8 + $0x240] sm:$0xff] %v324_v8  ;;  %327 = vst [vmem:[%s3377_s8 + $0x248] sm:$0xff] %v326_v9  ;;  %v330_v11 = vld [vmem:[%s3372_s7 + $0x4a8] sm:$0xff] }
  0x3d   : > { %329 = vst [vmem:[%s3377_s8 + $0x250] sm:$0xff] %v328_v10  ;;  %v332_v12 = vld [vmem:[%s3372_s7 + $0x4c0] sm:$0xff]  ;;  %v334_v13 = vld [vmem:[%s3372_s7 + $0x4c8] sm:$0xff]  ;;  %331 = vst [vmem:[%s3377_s8 + $0x258] sm:$0xff] %v330_v11 }
  0x3e   : > { %333 = vst [vmem:[%s3377_s8 + $0x260] sm:$0xff] %v332_v12  ;;  %335 = vst [vmem:[%s3377_s8 + $0x268] sm:$0xff] %v334_v13  ;;  %v336_v14 = vld [vmem:[%s3372_s7 + $0x4e0] sm:$0xff]  ;;  %v338_v15 = vld [vmem:[%s3372_s7 + $0x4e8] sm:$0xff] }
  0x3f   : > { %v340_v16 = vld [vmem:[%s3372_s7 + $0x500] sm:$0xff]  ;;  %337 = vst [vmem:[%s3377_s8 + $0x270] sm:$0xff] %v336_v14  ;;  %339 = vst [vmem:[%s3377_s8 + $0x278] sm:$0xff] %v338_v15  ;;  %v342_v17 = vld [vmem:[%s3372_s7 + $0x508] sm:$0xff] }
  0x40   : > { %341 = vst [vmem:[%s3377_s8 + $0x280] sm:$0xff] %v340_v16  ;;  %v344_v18 = vld [vmem:[%s3372_s7 + $0x520] sm:$0xff]  ;;  %v346_v19 = vld [vmem:[%s3372_s7 + $0x528] sm:$0xff]  ;;  %343 = vst [vmem:[%s3377_s8 + $0x288] sm:$0xff] %v342_v17 }
  0x41   : > { %345 = vst [vmem:[%s3377_s8 + $0x290] sm:$0xff] %v344_v18  ;;  %347 = vst [vmem:[%s3377_s8 + $0x298] sm:$0xff] %v346_v19  ;;  %v348_v20 = vld [vmem:[%s3372_s7 + $0x540] sm:$0xff]  ;;  %v350_v21 = vld [vmem:[%s3372_s7 + $0x548] sm:$0xff] }
  0x42   : > { %v352_v22 = vld [vmem:[%s3372_s7 + $0x560] sm:$0xff]  ;;  %349 = vst [vmem:[%s3377_s8 + $0x2a0] sm:$0xff] %v348_v20  ;;  %351 = vst [vmem:[%s3377_s8 + $0x2a8] sm:$0xff] %v350_v21  ;;  %v354_v23 = vld [vmem:[%s3372_s7 + $0x568] sm:$0xff] }
  0x43   : > { %353 = vst [vmem:[%s3377_s8 + $0x2b0] sm:$0xff] %v352_v22  ;;  %v356_v24 = vld [vmem:[%s3372_s7 + $0x580] sm:$0xff]  ;;  %v358_v25 = vld [vmem:[%s3372_s7 + $0x588] sm:$0xff]  ;;  %355 = vst [vmem:[%s3377_s8 + $0x2b8] sm:$0xff] %v354_v23 }
  0x44   : > { %357 = vst [vmem:[%s3377_s8 + $0x2c0] sm:$0xff] %v356_v24  ;;  %359 = vst [vmem:[%s3377_s8 + $0x2c8] sm:$0xff] %v358_v25  ;;  %v360_v26 = vld [vmem:[%s3372_s7 + $0x5a0] sm:$0xff]  ;;  %v362_v27 = vld [vmem:[%s3372_s7 + $0x5a8] sm:$0xff] }
  0x45   : > { %v364_v28 = vld [vmem:[%s3372_s7 + $0x5c0] sm:$0xff]  ;;  %361 = vst [vmem:[%s3377_s8 + $0x2d0] sm:$0xff] %v360_v26  ;;  %363 = vst [vmem:[%s3377_s8 + $0x2d8] sm:$0xff] %v362_v27  ;;  %v366_v29 = vld [vmem:[%s3372_s7 + $0x5c8] sm:$0xff] }
  0x46   : > { %365 = vst [vmem:[%s3377_s8 + $0x2e0] sm:$0xff] %v364_v28  ;;  %v368_v30 = vld [vmem:[%s3372_s7 + $0x5e0] sm:$0xff]  ;;  %v370_v31 = vld [vmem:[%s3372_s7 + $0x5e8] sm:$0xff]  ;;  %367 = vst [vmem:[%s3377_s8 + $0x2e8] sm:$0xff] %v366_v29 }
  0x47   : > { %369 = vst [vmem:[%s3377_s8 + $0x2f0] sm:$0xff] %v368_v30  ;;  %371 = vst [vmem:[%s3377_s8 + $0x2f8] sm:$0xff] %v370_v31  ;;  %v372_v32 = vld [vmem:[%s3372_s7 + $0x600] sm:$0xff]  ;;  %v374_v33 = vld [vmem:[%s3372_s7 + $0x608] sm:$0xff] }
  0x48   : > { %v376_v34 = vld [vmem:[%s3372_s7 + $0x620] sm:$0xff]  ;;  %373 = vst [vmem:[%s3377_s8 + $0x300] sm:$0xff] %v372_v32  ;;  %375 = vst [vmem:[%s3377_s8 + $0x308] sm:$0xff] %v374_v33  ;;  %v378_v35 = vld [vmem:[%s3372_s7 + $0x628] sm:$0xff] }
  0x49   : > { %377 = vst [vmem:[%s3377_s8 + $0x310] sm:$0xff] %v376_v34  ;;  %v380_v36 = vld [vmem:[%s3372_s7 + $0x640] sm:$0xff]  ;;  %v382_v37 = vld [vmem:[%s3372_s7 + $0x648] sm:$0xff]  ;;  %379 = vst [vmem:[%s3377_s8 + $0x318] sm:$0xff] %v378_v35 }
  0x4a   : > { %381 = vst [vmem:[%s3377_s8 + $0x320] sm:$0xff] %v380_v36  ;;  %383 = vst [vmem:[%s3377_s8 + $0x328] sm:$0xff] %v382_v37  ;;  %v384_v38 = vld [vmem:[%s3372_s7 + $0x660] sm:$0xff]  ;;  %v386_v39 = vld [vmem:[%s3372_s7 + $0x668] sm:$0xff] }
  0x4b   : > { %v388_v40 = vld [vmem:[%s3372_s7 + $0x680] sm:$0xff]  ;;  %385 = vst [vmem:[%s3377_s8 + $0x330] sm:$0xff] %v384_v38  ;;  %387 = vst [vmem:[%s3377_s8 + $0x338] sm:$0xff] %v386_v39  ;;  %v390_v41 = vld [vmem:[%s3372_s7 + $0x688] sm:$0xff] }
  0x4c   : > { %389 = vst [vmem:[%s3377_s8 + $0x340] sm:$0xff] %v388_v40  ;;  %v392_v42 = vld [vmem:[%s3372_s7 + $0x6a0] sm:$0xff]  ;;  %v394_v43 = vld [vmem:[%s3372_s7 + $0x6a8] sm:$0xff]  ;;  %391 = vst [vmem:[%s3377_s8 + $0x348] sm:$0xff] %v390_v41 }
  0x4d   : > { %393 = vst [vmem:[%s3377_s8 + $0x350] sm:$0xff] %v392_v42  ;;  %395 = vst [vmem:[%s3377_s8 + $0x358] sm:$0xff] %v394_v43  ;;  %v396_v44 = vld [vmem:[%s3372_s7 + $0x6c0] sm:$0xff]  ;;  %v398_v45 = vld [vmem:[%s3372_s7 + $0x6c8] sm:$0xff] }
  0x4e   : > { %v400_v46 = vld [vmem:[%s3372_s7 + $0x6e0] sm:$0xff]  ;;  %397 = vst [vmem:[%s3377_s8 + $0x360] sm:$0xff] %v396_v44  ;;  %399 = vst [vmem:[%s3377_s8 + $0x368] sm:$0xff] %v398_v45  ;;  %v402_v47 = vld [vmem:[%s3372_s7 + $0x6e8] sm:$0xff] }
  0x4f   : > { %401 = vst [vmem:[%s3377_s8 + $0x370] sm:$0xff] %v400_v46  ;;  %v404_v48 = vld [vmem:[%s3372_s7 + $0x700] sm:$0xff]  ;;  %v406_v49 = vld [vmem:[%s3372_s7 + $0x708] sm:$0xff]  ;;  %403 = vst [vmem:[%s3377_s8 + $0x378] sm:$0xff] %v402_v47 }
  0x50   : > { %405 = vst [vmem:[%s3377_s8 + $0x380] sm:$0xff] %v404_v48  ;;  %407 = vst [vmem:[%s3377_s8 + $0x388] sm:$0xff] %v406_v49  ;;  %v408_v50 = vld [vmem:[%s3372_s7 + $0x720] sm:$0xff]  ;;  %v410_v51 = vld [vmem:[%s3372_s7 + $0x728] sm:$0xff] }
  0x51   : > { %v412_v52 = vld [vmem:[%s3372_s7 + $0x740] sm:$0xff]  ;;  %409 = vst [vmem:[%s3377_s8 + $0x390] sm:$0xff] %v408_v50  ;;  %411 = vst [vmem:[%s3377_s8 + $0x398] sm:$0xff] %v410_v51  ;;  %v414_v53 = vld [vmem:[%s3372_s7 + $0x748] sm:$0xff] }
  0x52   : > { %413 = vst [vmem:[%s3377_s8 + $0x3a0] sm:$0xff] %v412_v52  ;;  %v416_v54 = vld [vmem:[%s3372_s7 + $0x760] sm:$0xff]  ;;  %v418_v55 = vld [vmem:[%s3372_s7 + $0x768] sm:$0xff]  ;;  %415 = vst [vmem:[%s3377_s8 + $0x3a8] sm:$0xff] %v414_v53 }
  0x53   : > { %417 = vst [vmem:[%s3377_s8 + $0x3b0] sm:$0xff] %v416_v54  ;;  %419 = vst [vmem:[%s3377_s8 + $0x3b8] sm:$0xff] %v418_v55  ;;  %v420_v56 = vld [vmem:[%s3372_s7 + $0x780] sm:$0xff]  ;;  %v422_v57 = vld [vmem:[%s3372_s7 + $0x788] sm:$0xff] }
  0x54   : > { %v424_v58 = vld [vmem:[%s3372_s7 + $0x7a0] sm:$0xff]  ;;  %421 = vst [vmem:[%s3377_s8 + $0x3c0] sm:$0xff] %v420_v56  ;;  %423 = vst [vmem:[%s3377_s8 + $0x3c8] sm:$0xff] %v422_v57  ;;  %v426_v59 = vld [vmem:[%s3372_s7 + $0x7a8] sm:$0xff] }
  0x55   : > { %425 = vst [vmem:[%s3377_s8 + $0x3d0] sm:$0xff] %v424_v58  ;;  %v428_v60 = vld [vmem:[%s3372_s7 + $0x7c0] sm:$0xff]  ;;  %v430_v61 = vld [vmem:[%s3372_s7 + $0x7c8] sm:$0xff]  ;;  %427 = vst [vmem:[%s3377_s8 + $0x3d8] sm:$0xff] %v426_v59 }
  0x56   : > { %429 = vst [vmem:[%s3377_s8 + $0x3e0] sm:$0xff] %v428_v60  ;;  %431 = vst [vmem:[%s3377_s8 + $0x3e8] sm:$0xff] %v430_v61  ;;  %v432_v62 = vld [vmem:[%s3372_s7 + $0x7e0] sm:$0xff]  ;;  %v434_v63 = vld [vmem:[%s3372_s7 + $0x7e8] sm:$0xff] }
  0x57   : > { %v436_v0 = vld [vmem:[%s3372_s7 + $0x800] sm:$0xff]  ;;  %433 = vst [vmem:[%s3377_s8 + $0x3f0] sm:$0xff] %v432_v62  ;;  %435 = vst [vmem:[%s3377_s8 + $0x3f8] sm:$0xff] %v434_v63  ;;  %v438_v1 = vld [vmem:[%s3372_s7 + $0x808] sm:$0xff] }
  0x58   : > { %437 = vst [vmem:[%s3377_s8 + $0x400] sm:$0xff] %v436_v0  ;;  %v440_v2 = vld [vmem:[%s3372_s7 + $0x820] sm:$0xff]  ;;  %v442_v3 = vld [vmem:[%s3372_s7 + $0x828] sm:$0xff]  ;;  %439 = vst [vmem:[%s3377_s8 + $0x408] sm:$0xff] %v438_v1 }
  0x59   : > { %441 = vst [vmem:[%s3377_s8 + $0x410] sm:$0xff] %v440_v2  ;;  %443 = vst [vmem:[%s3377_s8 + $0x418] sm:$0xff] %v442_v3  ;;  %v444_v4 = vld [vmem:[%s3372_s7 + $0x840] sm:$0xff]  ;;  %v446_v5 = vld [vmem:[%s3372_s7 + $0x848] sm:$0xff] }
  0x5a   : > { %v448_v6 = vld [vmem:[%s3372_s7 + $0x860] sm:$0xff]  ;;  %445 = vst [vmem:[%s3377_s8 + $0x420] sm:$0xff] %v444_v4  ;;  %447 = vst [vmem:[%s3377_s8 + $0x428] sm:$0xff] %v446_v5  ;;  %v450_v7 = vld [vmem:[%s3372_s7 + $0x868] sm:$0xff] }
  0x5b   : > { %449 = vst [vmem:[%s3377_s8 + $0x430] sm:$0xff] %v448_v6  ;;  %v452_v8 = vld [vmem:[%s3372_s7 + $0x880] sm:$0xff]  ;;  %v454_v9 = vld [vmem:[%s3372_s7 + $0x888] sm:$0xff]  ;;  %451 = vst [vmem:[%s3377_s8 + $0x438] sm:$0xff] %v450_v7 }
  0x5c   : > { %453 = vst [vmem:[%s3377_s8 + $0x440] sm:$0xff] %v452_v8  ;;  %455 = vst [vmem:[%s3377_s8 + $0x448] sm:$0xff] %v454_v9  ;;  %v456_v10 = vld [vmem:[%s3372_s7 + $0x8a0] sm:$0xff]  ;;  %v458_v11 = vld [vmem:[%s3372_s7 + $0x8a8] sm:$0xff] }
  0x5d   : > { %v460_v12 = vld [vmem:[%s3372_s7 + $0x8c0] sm:$0xff]  ;;  %457 = vst [vmem:[%s3377_s8 + $0x450] sm:$0xff] %v456_v10  ;;  %459 = vst [vmem:[%s3377_s8 + $0x458] sm:$0xff] %v458_v11  ;;  %v462_v13 = vld [vmem:[%s3372_s7 + $0x8c8] sm:$0xff] }
  0x5e   : > { %461 = vst [vmem:[%s3377_s8 + $0x460] sm:$0xff] %v460_v12  ;;  %v464_v14 = vld [vmem:[%s3372_s7 + $0x8e0] sm:$0xff]  ;;  %v466_v15 = vld [vmem:[%s3372_s7 + $0x8e8] sm:$0xff]  ;;  %463 = vst [vmem:[%s3377_s8 + $0x468] sm:$0xff] %v462_v13 }
  0x5f   : > { %465 = vst [vmem:[%s3377_s8 + $0x470] sm:$0xff] %v464_v14  ;;  %467 = vst [vmem:[%s3377_s8 + $0x478] sm:$0xff] %v466_v15  ;;  %v468_v16 = vld [vmem:[%s3372_s7 + $0x900] sm:$0xff]  ;;  %v470_v17 = vld [vmem:[%s3372_s7 + $0x908] sm:$0xff] }
  0x60   : > { %v472_v18 = vld [vmem:[%s3372_s7 + $0x920] sm:$0xff]  ;;  %469 = vst [vmem:[%s3377_s8 + $0x480] sm:$0xff] %v468_v16  ;;  %471 = vst [vmem:[%s3377_s8 + $0x488] sm:$0xff] %v470_v17  ;;  %v474_v19 = vld [vmem:[%s3372_s7 + $0x928] sm:$0xff] }
  0x61   : > { %473 = vst [vmem:[%s3377_s8 + $0x490] sm:$0xff] %v472_v18  ;;  %v476_v20 = vld [vmem:[%s3372_s7 + $0x940] sm:$0xff]  ;;  %v478_v21 = vld [vmem:[%s3372_s7 + $0x948] sm:$0xff]  ;;  %475 = vst [vmem:[%s3377_s8 + $0x498] sm:$0xff] %v474_v19 }
  0x62   : > { %477 = vst [vmem:[%s3377_s8 + $0x4a0] sm:$0xff] %v476_v20  ;;  %479 = vst [vmem:[%s3377_s8 + $0x4a8] sm:$0xff] %v478_v21  ;;  %v480_v22 = vld [vmem:[%s3372_s7 + $0x960] sm:$0xff]  ;;  %v482_v23 = vld [vmem:[%s3372_s7 + $0x968] sm:$0xff] }
  0x63   : > { %v484_v24 = vld [vmem:[%s3372_s7 + $0x980] sm:$0xff]  ;;  %481 = vst [vmem:[%s3377_s8 + $0x4b0] sm:$0xff] %v480_v22  ;;  %483 = vst [vmem:[%s3377_s8 + $0x4b8] sm:$0xff] %v482_v23  ;;  %v486_v25 = vld [vmem:[%s3372_s7 + $0x988] sm:$0xff] }
  0x64   : > { %485 = vst [vmem:[%s3377_s8 + $0x4c0] sm:$0xff] %v484_v24  ;;  %v488_v26 = vld [vmem:[%s3372_s7 + $0x9a0] sm:$0xff]  ;;  %v490_v27 = vld [vmem:[%s3372_s7 + $0x9a8] sm:$0xff]  ;;  %487 = vst [vmem:[%s3377_s8 + $0x4c8] sm:$0xff] %v486_v25 }
  0x65   : > { %489 = vst [vmem:[%s3377_s8 + $0x4d0] sm:$0xff] %v488_v26  ;;  %491 = vst [vmem:[%s3377_s8 + $0x4d8] sm:$0xff] %v490_v27  ;;  %v492_v28 = vld [vmem:[%s3372_s7 + $0x9c0] sm:$0xff]  ;;  %v494_v29 = vld [vmem:[%s3372_s7 + $0x9c8] sm:$0xff] }
  0x66   : > { %v496_v30 = vld [vmem:[%s3372_s7 + $0x9e0] sm:$0xff]  ;;  %493 = vst [vmem:[%s3377_s8 + $0x4e0] sm:$0xff] %v492_v28  ;;  %495 = vst [vmem:[%s3377_s8 + $0x4e8] sm:$0xff] %v494_v29  ;;  %v498_v31 = vld [vmem:[%s3372_s7 + $0x9e8] sm:$0xff] }
  0x67   : > { %497 = vst [vmem:[%s3377_s8 + $0x4f0] sm:$0xff] %v496_v30  ;;  %v500_v32 = vld [vmem:[%s3372_s7 + $0xa00] sm:$0xff]  ;;  %v502_v33 = vld [vmem:[%s3372_s7 + $0xa08] sm:$0xff]  ;;  %499 = vst [vmem:[%s3377_s8 + $0x4f8] sm:$0xff] %v498_v31 }
  0x68   : > { %501 = vst [vmem:[%s3377_s8 + $0x500] sm:$0xff] %v500_v32  ;;  %503 = vst [vmem:[%s3377_s8 + $0x508] sm:$0xff] %v502_v33  ;;  %v504_v34 = vld [vmem:[%s3372_s7 + $0xa20] sm:$0xff]  ;;  %v506_v35 = vld [vmem:[%s3372_s7 + $0xa28] sm:$0xff] }
  0x69   : > { %v508_v36 = vld [vmem:[%s3372_s7 + $0xa40] sm:$0xff]  ;;  %505 = vst [vmem:[%s3377_s8 + $0x510] sm:$0xff] %v504_v34  ;;  %507 = vst [vmem:[%s3377_s8 + $0x518] sm:$0xff] %v506_v35  ;;  %v510_v37 = vld [vmem:[%s3372_s7 + $0xa48] sm:$0xff] }
  0x6a   : > { %509 = vst [vmem:[%s3377_s8 + $0x520] sm:$0xff] %v508_v36  ;;  %v512_v38 = vld [vmem:[%s3372_s7 + $0xa60] sm:$0xff]  ;;  %v514_v39 = vld [vmem:[%s3372_s7 + $0xa68] sm:$0xff]  ;;  %511 = vst [vmem:[%s3377_s8 + $0x528] sm:$0xff] %v510_v37 }
  0x6b   : > { %513 = vst [vmem:[%s3377_s8 + $0x530] sm:$0xff] %v512_v38  ;;  %515 = vst [vmem:[%s3377_s8 + $0x538] sm:$0xff] %v514_v39  ;;  %v516_v40 = vld [vmem:[%s3372_s7 + $0xa80] sm:$0xff]  ;;  %v518_v41 = vld [vmem:[%s3372_s7 + $0xa88] sm:$0xff] }
  0x6c   : > { %v520_v42 = vld [vmem:[%s3372_s7 + $0xaa0] sm:$0xff]  ;;  %517 = vst [vmem:[%s3377_s8 + $0x540] sm:$0xff] %v516_v40  ;;  %519 = vst [vmem:[%s3377_s8 + $0x548] sm:$0xff] %v518_v41  ;;  %v522_v43 = vld [vmem:[%s3372_s7 + $0xaa8] sm:$0xff] }
  0x6d   : > { %521 = vst [vmem:[%s3377_s8 + $0x550] sm:$0xff] %v520_v42  ;;  %v524_v44 = vld [vmem:[%s3372_s7 + $0xac0] sm:$0xff]  ;;  %v526_v45 = vld [vmem:[%s3372_s7 + $0xac8] sm:$0xff]  ;;  %523 = vst [vmem:[%s3377_s8 + $0x558] sm:$0xff] %v522_v43 }
  0x6e   : > { %525 = vst [vmem:[%s3377_s8 + $0x560] sm:$0xff] %v524_v44  ;;  %527 = vst [vmem:[%s3377_s8 + $0x568] sm:$0xff] %v526_v45  ;;  %v528_v46 = vld [vmem:[%s3372_s7 + $0xae0] sm:$0xff]  ;;  %v530_v47 = vld [vmem:[%s3372_s7 + $0xae8] sm:$0xff] }
  0x6f   : > { %v532_v48 = vld [vmem:[%s3372_s7 + $0xb00] sm:$0xff]  ;;  %529 = vst [vmem:[%s3377_s8 + $0x570] sm:$0xff] %v528_v46  ;;  %531 = vst [vmem:[%s3377_s8 + $0x578] sm:$0xff] %v530_v47  ;;  %v534_v49 = vld [vmem:[%s3372_s7 + $0xb08] sm:$0xff] }
  0x70   : > { %533 = vst [vmem:[%s3377_s8 + $0x580] sm:$0xff] %v532_v48  ;;  %v536_v50 = vld [vmem:[%s3372_s7 + $0xb20] sm:$0xff]  ;;  %v538_v51 = vld [vmem:[%s3372_s7 + $0xb28] sm:$0xff]  ;;  %535 = vst [vmem:[%s3377_s8 + $0x588] sm:$0xff] %v534_v49 }
  0x71   : > { %537 = vst [vmem:[%s3377_s8 + $0x590] sm:$0xff] %v536_v50  ;;  %539 = vst [vmem:[%s3377_s8 + $0x598] sm:$0xff] %v538_v51  ;;  %v540_v52 = vld [vmem:[%s3372_s7 + $0xb40] sm:$0xff]  ;;  %v542_v53 = vld [vmem:[%s3372_s7 + $0xb48] sm:$0xff] }
  0x72   : > { %v544_v54 = vld [vmem:[%s3372_s7 + $0xb60] sm:$0xff]  ;;  %541 = vst [vmem:[%s3377_s8 + $0x5a0] sm:$0xff] %v540_v52  ;;  %543 = vst [vmem:[%s3377_s8 + $0x5a8] sm:$0xff] %v542_v53  ;;  %v546_v55 = vld [vmem:[%s3372_s7 + $0xb68] sm:$0xff] }
  0x73   : > { %545 = vst [vmem:[%s3377_s8 + $0x5b0] sm:$0xff] %v544_v54  ;;  %v548_v56 = vld [vmem:[%s3372_s7 + $0xb80] sm:$0xff]  ;;  %v550_v57 = vld [vmem:[%s3372_s7 + $0xb88] sm:$0xff]  ;;  %547 = vst [vmem:[%s3377_s8 + $0x5b8] sm:$0xff] %v546_v55 }
  0x74   : > { %549 = vst [vmem:[%s3377_s8 + $0x5c0] sm:$0xff] %v548_v56  ;;  %551 = vst [vmem:[%s3377_s8 + $0x5c8] sm:$0xff] %v550_v57  ;;  %v552_v58 = vld [vmem:[%s3372_s7 + $0xba0] sm:$0xff]  ;;  %v554_v59 = vld [vmem:[%s3372_s7 + $0xba8] sm:$0xff] }
  0x75   : > { %v556_v60 = vld [vmem:[%s3372_s7 + $0xbc0] sm:$0xff]  ;;  %553 = vst [vmem:[%s3377_s8 + $0x5d0] sm:$0xff] %v552_v58  ;;  %555 = vst [vmem:[%s3377_s8 + $0x5d8] sm:$0xff] %v554_v59  ;;  %v558_v61 = vld [vmem:[%s3372_s7 + $0xbc8] sm:$0xff] }
  0x76   : > { %557 = vst [vmem:[%s3377_s8 + $0x5e0] sm:$0xff] %v556_v60  ;;  %v560_v62 = vld [vmem:[%s3372_s7 + $0xbe0] sm:$0xff]  ;;  %v562_v63 = vld [vmem:[%s3372_s7 + $0xbe8] sm:$0xff]  ;;  %559 = vst [vmem:[%s3377_s8 + $0x5e8] sm:$0xff] %v558_v61 }
  0x77   : > { %561 = vst [vmem:[%s3377_s8 + $0x5f0] sm:$0xff] %v560_v62  ;;  %563 = vst [vmem:[%s3377_s8 + $0x5f8] sm:$0xff] %v562_v63  ;;  %v564_v0 = vld [vmem:[%s3372_s7 + $0xc00] sm:$0xff]  ;;  %v566_v1 = vld [vmem:[%s3372_s7 + $0xc08] sm:$0xff] }
  0x78   : > { %v568_v2 = vld [vmem:[%s3372_s7 + $0xc20] sm:$0xff]  ;;  %565 = vst [vmem:[%s3377_s8 + $0x600] sm:$0xff] %v564_v0  ;;  %567 = vst [vmem:[%s3377_s8 + $0x608] sm:$0xff] %v566_v1  ;;  %v570_v3 = vld [vmem:[%s3372_s7 + $0xc28] sm:$0xff] }
  0x79   : > { %569 = vst [vmem:[%s3377_s8 + $0x610] sm:$0xff] %v568_v2  ;;  %v572_v4 = vld [vmem:[%s3372_s7 + $0xc40] sm:$0xff]  ;;  %v574_v5 = vld [vmem:[%s3372_s7 + $0xc48] sm:$0xff]  ;;  %571 = vst [vmem:[%s3377_s8 + $0x618] sm:$0xff] %v570_v3 }
  0x7a   : > { %573 = vst [vmem:[%s3377_s8 + $0x620] sm:$0xff] %v572_v4  ;;  %575 = vst [vmem:[%s3377_s8 + $0x628] sm:$0xff] %v574_v5  ;;  %v576_v6 = vld [vmem:[%s3372_s7 + $0xc60] sm:$0xff]  ;;  %v578_v7 = vld [vmem:[%s3372_s7 + $0xc68] sm:$0xff] }
  0x7b   : > { %v580_v8 = vld [vmem:[%s3372_s7 + $0xc80] sm:$0xff]  ;;  %577 = vst [vmem:[%s3377_s8 + $0x630] sm:$0xff] %v576_v6  ;;  %579 = vst [vmem:[%s3377_s8 + $0x638] sm:$0xff] %v578_v7  ;;  %v582_v9 = vld [vmem:[%s3372_s7 + $0xc88] sm:$0xff] }
  0x7c   : > { %581 = vst [vmem:[%s3377_s8 + $0x640] sm:$0xff] %v580_v8  ;;  %v584_v10 = vld [vmem:[%s3372_s7 + $0xca0] sm:$0xff]  ;;  %v586_v11 = vld [vmem:[%s3372_s7 + $0xca8] sm:$0xff]  ;;  %583 = vst [vmem:[%s3377_s8 + $0x648] sm:$0xff] %v582_v9 }
  0x7d   : > { %585 = vst [vmem:[%s3377_s8 + $0x650] sm:$0xff] %v584_v10  ;;  %587 = vst [vmem:[%s3377_s8 + $0x658] sm:$0xff] %v586_v11  ;;  %v588_v12 = vld [vmem:[%s3372_s7 + $0xcc0] sm:$0xff]  ;;  %v590_v13 = vld [vmem:[%s3372_s7 + $0xcc8] sm:$0xff] }
  0x7e   : > { %v592_v14 = vld [vmem:[%s3372_s7 + $0xce0] sm:$0xff]  ;;  %589 = vst [vmem:[%s3377_s8 + $0x660] sm:$0xff] %v588_v12  ;;  %591 = vst [vmem:[%s3377_s8 + $0x668] sm:$0xff] %v590_v13  ;;  %v594_v15 = vld [vmem:[%s3372_s7 + $0xce8] sm:$0xff] }
  0x7f   : > { %593 = vst [vmem:[%s3377_s8 + $0x670] sm:$0xff] %v592_v14  ;;  %v596_v16 = vld [vmem:[%s3372_s7 + $0xd00] sm:$0xff]  ;;  %v598_v17 = vld [vmem:[%s3372_s7 + $0xd08] sm:$0xff]  ;;  %595 = vst [vmem:[%s3377_s8 + $0x678] sm:$0xff] %v594_v15 }
  0x80   : > { %597 = vst [vmem:[%s3377_s8 + $0x680] sm:$0xff] %v596_v16  ;;  %599 = vst [vmem:[%s3377_s8 + $0x688] sm:$0xff] %v598_v17  ;;  %v600_v18 = vld [vmem:[%s3372_s7 + $0xd20] sm:$0xff]  ;;  %v602_v19 = vld [vmem:[%s3372_s7 + $0xd28] sm:$0xff] }
  0x81   : > { %v604_v20 = vld [vmem:[%s3372_s7 + $0xd40] sm:$0xff]  ;;  %601 = vst [vmem:[%s3377_s8 + $0x690] sm:$0xff] %v600_v18  ;;  %603 = vst [vmem:[%s3377_s8 + $0x698] sm:$0xff] %v602_v19  ;;  %v606_v21 = vld [vmem:[%s3372_s7 + $0xd48] sm:$0xff] }
  0x82   : > { %605 = vst [vmem:[%s3377_s8 + $0x6a0] sm:$0xff] %v604_v20  ;;  %v608_v22 = vld [vmem:[%s3372_s7 + $0xd60] sm:$0xff]  ;;  %v610_v23 = vld [vmem:[%s3372_s7 + $0xd68] sm:$0xff]  ;;  %607 = vst [vmem:[%s3377_s8 + $0x6a8] sm:$0xff] %v606_v21 }
  0x83   : > { %609 = vst [vmem:[%s3377_s8 + $0x6b0] sm:$0xff] %v608_v22  ;;  %611 = vst [vmem:[%s3377_s8 + $0x6b8] sm:$0xff] %v610_v23  ;;  %v612_v24 = vld [vmem:[%s3372_s7 + $0xd80] sm:$0xff]  ;;  %v614_v25 = vld [vmem:[%s3372_s7 + $0xd88] sm:$0xff] }
  0x84   : > { %v616_v26 = vld [vmem:[%s3372_s7 + $0xda0] sm:$0xff]  ;;  %613 = vst [vmem:[%s3377_s8 + $0x6c0] sm:$0xff] %v612_v24  ;;  %615 = vst [vmem:[%s3377_s8 + $0x6c8] sm:$0xff] %v614_v25  ;;  %v618_v27 = vld [vmem:[%s3372_s7 + $0xda8] sm:$0xff] }
  0x85   : > { %617 = vst [vmem:[%s3377_s8 + $0x6d0] sm:$0xff] %v616_v26  ;;  %v620_v28 = vld [vmem:[%s3372_s7 + $0xdc0] sm:$0xff]  ;;  %v622_v29 = vld [vmem:[%s3372_s7 + $0xdc8] sm:$0xff]  ;;  %619 = vst [vmem:[%s3377_s8 + $0x6d8] sm:$0xff] %v618_v27 }
  0x86   : > { %621 = vst [vmem:[%s3377_s8 + $0x6e0] sm:$0xff] %v620_v28  ;;  %623 = vst [vmem:[%s3377_s8 + $0x6e8] sm:$0xff] %v622_v29  ;;  %v624_v30 = vld [vmem:[%s3372_s7 + $0xde0] sm:$0xff]  ;;  %v626_v31 = vld [vmem:[%s3372_s7 + $0xde8] sm:$0xff] }
  0x87   : > { %625 = vst [vmem:[%s3377_s8 + $0x6f0] sm:$0xff] %v624_v30  ;;  %627 = vst [vmem:[%s3377_s8 + $0x6f8] sm:$0xff] %v626_v31 }
  0x88 PF: > { %p2600_p7 = scmp.ge.s32.totalorder %s3287_s18, 1  ;;  %p640_p8 = scmp.lt.s32.totalorder %s3287_s18, 15 }
  0x8a   : > { %p641_p9 = pnand %p2600_p7, %p640_p8 }
  0x8b   : > { %s647_s9 = sand.u32 (!%p641_p9), 1, %s3263_s12   ;;  %s679_s10 = smul.u32 (!%p641_p9), 7, %s3271_s14 }
  0x8c   : > { %644 = sbr.rel (%p641_p9) target bundleno = 602 (0x25a), region = 51  ;;  %s2602_s21 = sshll.u32 (!%p641_p9), %s3275_s15, 2 }
  0x8d   : > { %s2835_s11 = smul.u32 (!%p641_p9), 1792, %s647_s9  ;;  %p680_p10 = scmp.lt.s32.totalorder (!%p641_p9), %s679_s10, 48 }
  0x8e   : > { %p688_p11 = scmp.lt.s32.totalorder (!%p641_p9), %s2602_s21, 7  ;;  %p2605_p12 = scmp.ne.s32.totalorder (!%p641_p9), %s3271_s14, 0 }
  0x8f   : > { %s3846_s5 = scalar_lea.vmem (!%p641_p9), [#allocation3], %s2835_s11 }
  0x91   : > { %s4173_s10 = smov (!%p680_p10, %s679_s10), 48  ;;  %s4175_s21 = smov (!%p688_p11, %s2602_s21), 7 }
  0x92   : > { %s2601_s22 = sshll.u32 %s4173_s10, 1  ;;  %s690_s12 = scalar_lea.vmem %s4158_s2, %s4175_s21 }
  0x93   : > { %s3834_s26 = scalar_lea.vmem %s4156_s0, %s2601_s22  ;;  %s2604_s29 = sshll.u32 %s4175_s21, 1 }
  0x94   : > { %s3844_s4 = scalar_lea.vmem %s4159_s3, %s2604_s29  ;;  %702 = sbr.rel (%p2605_p12) target bundleno = 155 (0x9b), region = 59 }
  0x99   : > { %v3289_v32 = vmov 0.0  }
  0x9a   : > { %703 = vst [vmem:[#allocation2] sm:$0xff] %v3289_v32 }
  0x9b PF: > { %v2895_v33 = vld [vmem:[%s3846_s5 + $0xe4] ss:$16 sps:$4 sm:$0xff]   ;;  %v2899_v35 = vld [vmem:[%s3846_s5 + $0xe0] ss:$16 sps:$4 sm:$0xff]   ;;  %v3290_v5 = vmov 1983009808   ;;  %v713_v7 = vlaneseq }
  0x9c   : > { %v2897_v34 = vld [vmem:[%s3846_s5 + $0x2e4] ss:$16 sps:$4 sm:$0xff]   ;;  %2100 = vmatprep.subr.bf16.mxu0 %v2895_v33  ;;  %v2900_v36 = vld [vmem:[%s3846_s5 + $0x2e0] ss:$16 sps:$4 sm:$0xff]   ;;  %v711_v6 = vunpack.c.l.s4 %v3290_v5  ;;  %v705_v21 = vld [vmem:[%s3834_s26] sm:$0xff]  ;;  %p2830_p13 = scmp.ne.s32.totalorder %s3271_s14, 6 }
  0x9d   : > { %2141 = vmatprep.subr.bf16.mxu1 %v2897_v34  ;;  %v2901_v37 = vld [vmem:[%s3846_s5 + $0xc4] ss:$16 sps:$4 sm:$0xff]   ;;  %2101 = vmatpush1.bf16.msra.mxu0 %v2899_v35  ;;  %v2905_v39 = vld [vmem:[%s3846_s5 + $0xc0] ss:$16 sps:$4 sm:$0xff]   ;;  %v3888_v12 = vshrl.u32 %v713_v7, 7  ;;  %v709_v24 = vcombine.high %v705_v21, %v705_v21 }
  0x9e   : > { %2142 = vmatpush1.bf16.msra.mxu1 %v2900_v36  ;;  %v2903_v38 = vld [vmem:[%s3846_s5 + $0x2c4] ss:$16 sps:$4 sm:$0xff]   ;;  %2102 = vmatprep.subr.bf16.mxu0 %v2901_v37  ;;  %v2906_v40 = vld [vmem:[%s3846_s5 + $0x2c0] ss:$16 sps:$4 sm:$0xff]   ;;  %v712_v11 = vunpack.c.0.s8 %v711_v6 }
  0x9f   : > { %2143 = vmatprep.subr.bf16.mxu1 %v2903_v38  ;;  %v2907_v41 = vld [vmem:[%s3846_s5 + $0xa4] ss:$16 sps:$4 sm:$0xff]   ;;  %v2911_v43 = vld [vmem:[%s3846_s5 + $0xa0] ss:$16 sps:$4 sm:$0xff]  }
  0xa0   : > { %v2909_v42 = vld [vmem:[%s3846_s5 + $0x2a4] ss:$16 sps:$4 sm:$0xff]   ;;  %v2912_v44 = vld [vmem:[%s3846_s5 + $0x2a0] ss:$16 sps:$4 sm:$0xff]   ;;  %v3896_v18 = vsub.s32 %v712_v11, %v3888_v12 }
  0xa1   : > { %2103 = vmatpush1.bf16.msra.mxu0 %v2905_v39  ;;  %v2913_v45 = vld [vmem:[%s3846_s5 + $0x84] ss:$16 sps:$4 sm:$0xff]   ;;  %v2917_v47 = vld [vmem:[%s3846_s5 + $0x80] ss:$16 sps:$4 sm:$0xff]  }
  0xa2   : > { %2144 = vmatpush1.bf16.msra.mxu1 %v2906_v40  ;;  %2104 = vmatprep.subr.bf16.mxu0 %v2907_v41  ;;  %v2915_v46 = vld [vmem:[%s3846_s5 + $0x284] ss:$16 sps:$4 sm:$0xff]   ;;  %v2918_v48 = vld [vmem:[%s3846_s5 + $0x280] ss:$16 sps:$4 sm:$0xff]   ;;  %v716_v23 = vrot.slane %v705_v21, %v3896_v18  ;;  %v723_v29 = vrot.slane %v709_v24, %v3896_v18 }
  0xa3   : > { %2145 = vmatprep.subr.bf16.mxu1 %v2909_v42  ;;  %v2919_v49 = vld [vmem:[%s3846_s5 + $0x64] ss:$16 sps:$4 sm:$0xff]   ;;  %v2923_v51 = vld [vmem:[%s3846_s5 + $0x60] ss:$16 sps:$4 sm:$0xff]  }
  0xa4   : > { %v2921_v50 = vld [vmem:[%s3846_s5 + $0x264] ss:$16 sps:$4 sm:$0xff]   ;;  %v2924_v52 = vld [vmem:[%s3846_s5 + $0x260] ss:$16 sps:$4 sm:$0xff]   ;;  %v724_v28 = vcombine.high %v716_v23, %v716_v23  ;;  %v725_v32 = vcombine.high %v723_v29, %v723_v29 }
  0xa5   : > { %2105 = vmatpush1.bf16.msra.mxu0 %v2911_v43  ;;  %v2925_v53 = vld [vmem:[%s3846_s5 + $0x44] ss:$16 sps:$4 sm:$0xff]   ;;  %v2929_v55 = vld [vmem:[%s3846_s5 + $0x40] ss:$16 sps:$4 sm:$0xff]  }
  0xa6   : > { %2146 = vmatpush1.bf16.msra.mxu1 %v2912_v44  ;;  %2106 = vmatprep.subr.bf16.mxu0 %v2913_v45  ;;  %v2927_v54 = vld [vmem:[%s3846_s5 + $0x244] ss:$16 sps:$4 sm:$0xff]   ;;  %v2930_v56 = vld [vmem:[%s3846_s5 + $0x240] ss:$16 sps:$4 sm:$0xff]   ;;  %v3908_v31 = vpack.c.bf16 %v724_v28, %v724_v28  ;;  %v3913_v36 = vpack.c.bf16 %v725_v32, %v725_v32 }
  0xa7   : > { %2147 = vmatprep.subr.bf16.mxu1 %v2915_v46  ;;  %v2931_v57 = vld [vmem:[%s3846_s5 + $0x24] ss:$16 sps:$4 sm:$0xff]   ;;  %v2935_v59 = vld [vmem:[%s3846_s5 + $0x20] ss:$16 sps:$4 sm:$0xff]  }
  0xa8   : > { %v2933_v58 = vld [vmem:[%s3846_s5 + $0x224] ss:$16 sps:$4 sm:$0xff]   ;;  %v2936_v60 = vld [vmem:[%s3846_s5 + $0x220] ss:$16 sps:$4 sm:$0xff]   ;;  %2132 = vmatprep.mubr.bf16.mxu0 %v3908_v31  ;;  %2173 = vmatprep.mubr.bf16.mxu1 %v3913_v36 }
  0xa9   : > { %2107 = vmatpush1.bf16.msra.mxu0 %v2917_v47  ;;  %v2937_v61 = vld [vmem:[%s3846_s5 + $0x4] ss:$16 sps:$4 sm:$0xff]   ;;  %v2941_v63 = vld [vmem:[%s3846_s5] ss:$16 sps:$4 sm:$0xff]  }
  0xaa   : > { %2148 = vmatpush1.bf16.msra.mxu1 %v2918_v48  ;;  %2108 = vmatprep.subr.bf16.mxu0 %v2919_v49  ;;  %v2939_v62 = vld [vmem:[%s3846_s5 + $0x204] ss:$16 sps:$4 sm:$0xff]   ;;  %v2942_v0 = vld [vmem:[%s3846_s5 + $0x200] ss:$16 sps:$4 sm:$0xff]   ;;  %v3929_v49 = vpack.c.bf16 %v716_v23, %v716_v23 }
  0xab   : > { %2149 = vmatprep.subr.bf16.mxu1 %v2921_v50  ;;  %v2943_v1 = vld [vmem:[%s3846_s5 + $0x1e4] ss:$16 sps:$4 sm:$0xff]   ;;  %v2947_v3 = vld [vmem:[%s3846_s5 + $0x1e0] ss:$16 sps:$4 sm:$0xff]   ;;  %v3931_v50 = vpack.c.bf16 %v723_v29, %v723_v29 }
  0xac   : > { %v2945_v2 = vld [vmem:[%s3846_s5 + $0x3e4] ss:$16 sps:$4 sm:$0xff]   ;;  %v2948_v4 = vld [vmem:[%s3846_s5 + $0x3e0] ss:$16 sps:$4 sm:$0xff]  }
  0xad   : > { %2109 = vmatpush1.bf16.msra.mxu0 %v2923_v51  ;;  %v2949_v8 = vld [vmem:[%s3846_s5 + $0x1c4] ss:$16 sps:$4 sm:$0xff]   ;;  %v2953_v10 = vld [vmem:[%s3846_s5 + $0x1c0] ss:$16 sps:$4 sm:$0xff]  }
  0xae   : > { %2150 = vmatpush1.bf16.msra.mxu1 %v2924_v52  ;;  %2110 = vmatprep.subr.bf16.mxu0 %v2925_v53  ;;  %v2951_v9 = vld [vmem:[%s3846_s5 + $0x3c4] ss:$16 sps:$4 sm:$0xff]   ;;  %v2954_v13 = vld [vmem:[%s3846_s5 + $0x3c0] ss:$16 sps:$4 sm:$0xff]  }
  0xaf   : > { %2151 = vmatprep.subr.bf16.mxu1 %v2927_v54  ;;  %v2955_v14 = vld [vmem:[%s3846_s5 + $0x1a4] ss:$16 sps:$4 sm:$0xff]   ;;  %v2959_v16 = vld [vmem:[%s3846_s5 + $0x1a0] ss:$16 sps:$4 sm:$0xff]  }
  0xb0   : > { %v2957_v15 = vld [vmem:[%s3846_s5 + $0x3a4] ss:$16 sps:$4 sm:$0xff]   ;;  %v2960_v17 = vld [vmem:[%s3846_s5 + $0x3a0] ss:$16 sps:$4 sm:$0xff]  }
  0xb1   : > { %2111 = vmatpush1.bf16.msra.mxu0 %v2929_v55  ;;  %v2961_v19 = vld [vmem:[%s3846_s5 + $0x184] ss:$16 sps:$4 sm:$0xff]   ;;  %v2965_v22 = vld [vmem:[%s3846_s5 + $0x180] ss:$16 sps:$4 sm:$0xff]  }
  0xb2   : > { %2152 = vmatpush1.bf16.msra.mxu1 %v2930_v56  ;;  %2112 = vmatprep.subr.bf16.mxu0 %v2931_v57  ;;  %v2963_v20 = vld [vmem:[%s3846_s5 + $0x384] ss:$16 sps:$4 sm:$0xff]   ;;  %v2966_v25 = vld [vmem:[%s3846_s5 + $0x380] ss:$16 sps:$4 sm:$0xff]  }
  0xb3   : > { %2153 = vmatprep.subr.bf16.mxu1 %v2933_v58  ;;  %v2967_v26 = vld [vmem:[%s3846_s5 + $0x164] ss:$16 sps:$4 sm:$0xff]   ;;  %v2971_v30 = vld [vmem:[%s3846_s5 + $0x160] ss:$16 sps:$4 sm:$0xff]  }
  0xb4   : > { %v2969_v27 = vld [vmem:[%s3846_s5 + $0x364] ss:$16 sps:$4 sm:$0xff]   ;;  %v2972_v33 = vld [vmem:[%s3846_s5 + $0x360] ss:$16 sps:$4 sm:$0xff]  }
  0xb5   : > { %2113 = vmatpush1.bf16.msra.mxu0 %v2935_v59  ;;  %v2973_v34 = vld [vmem:[%s3846_s5 + $0x144] ss:$16 sps:$4 sm:$0xff]   ;;  %v2977_v37 = vld [vmem:[%s3846_s5 + $0x140] ss:$16 sps:$4 sm:$0xff]  }
  0xb6   : > { %2154 = vmatpush1.bf16.msra.mxu1 %v2936_v60  ;;  %2114 = vmatprep.subr.bf16.mxu0 %v2937_v61  ;;  %v2975_v35 = vld [vmem:[%s3846_s5 + $0x344] ss:$16 sps:$4 sm:$0xff]   ;;  %v2978_v38 = vld [vmem:[%s3846_s5 + $0x340] ss:$16 sps:$4 sm:$0xff]  }
  0xb7   : > { %2155 = vmatprep.subr.bf16.mxu1 %v2939_v62  ;;  %v2979_v39 = vld [vmem:[%s3846_s5 + $0x124] ss:$16 sps:$4 sm:$0xff]   ;;  %v2983_v41 = vld [vmem:[%s3846_s5 + $0x120] ss:$16 sps:$4 sm:$0xff]   ;;  %v3291_v62 = vmov 0  }
  0xb8   : > { %v2981_v40 = vld [vmem:[%s3846_s5 + $0x324] ss:$16 sps:$4 sm:$0xff]   ;;  %v2984_v42 = vld [vmem:[%s3846_s5 + $0x320] ss:$16 sps:$4 sm:$0xff]  }
  0xb9   : > { %2115 = vmatpush1.bf16.msra.mxu0 %v2941_v63  ;;  %v2985_v43 = vld [vmem:[%s3846_s5 + $0x104] ss:$16 sps:$4 sm:$0xff]   ;;  %v2989_v45 = vld [vmem:[%s3846_s5 + $0x100] ss:$16 sps:$4 sm:$0xff]  }
  0xba   : > { %2156 = vmatpush1.bf16.msra.mxu1 %v2942_v0  ;;  %2116 = vmatprep.subr.bf16.mxu0 %v2943_v1  ;;  %v2987_v44 = vld [vmem:[%s3846_s5 + $0x304] ss:$16 sps:$4 sm:$0xff]   ;;  %v2990_v46 = vld [vmem:[%s3846_s5 + $0x300] ss:$16 sps:$4 sm:$0xff]  }
  0xbb   : > { %2157 = vmatprep.subr.bf16.mxu1 %v2945_v2  ;;  %v2994_v47 = vld [vmem:[%s3846_s5 + $0x4e4] ss:$16 sps:$4 sm:$0xff]   ;;  %v2992_v51 = vld [vmem:[%s3846_s5 + $0x4e0] ss:$16 sps:$4 sm:$0xff]  }
  0xbc   : > { %v2997_v48 = vld [vmem:[%s3846_s5 + $0x6e4] ss:$16 sps:$4 sm:$0xff]   ;;  %v2995_v52 = vld [vmem:[%s3846_s5 + $0x6e0] ss:$16 sps:$4 sm:$0xff]  }
  0xbd   : > { %2117 = vmatpush2.bf16.msra.mxu0 %v2947_v3  ;;  %v3000_v53 = vld [vmem:[%s3846_s5 + $0x4c4] ss:$16 sps:$4 sm:$0xff]   ;;  %v2998_v57 = vld [vmem:[%s3846_s5 + $0x4c0] ss:$16 sps:$4 sm:$0xff]  }
  0xbe   : > { %2158 = vmatpush2.bf16.msra.mxu1 %v2948_v4  ;;  %2118 = vmatprep.subr.bf16.mxu0 %v2949_v8  ;;  %v3003_v54 = vld [vmem:[%s3846_s5 + $0x6c4] ss:$16 sps:$4 sm:$0xff]   ;;  %v3001_v58 = vld [vmem:[%s3846_s5 + $0x6c0] ss:$16 sps:$4 sm:$0xff]  }
  0xbf   : > { %2159 = vmatprep.subr.bf16.mxu1 %v2951_v9  ;;  %v706_v55 = vld [vmem:[%s3834_s26 + $0x8] sm:$0x3f] }
  0xc0   : > { %v3939_v56 = vrot.slane %v706_v55, %v3896_v18  ;;  %v3006_v60 = vld [vmem:[%s3846_s5 + $0x4a4] ss:$16 sps:$4 sm:$0xff]   ;;  %v3004_v0 = vld [vmem:[%s3846_s5 + $0x4a0] ss:$16 sps:$4 sm:$0xff]  }
  0xc1   : > { %2119 = vmatpush2.bf16.msra.mxu0 %v2953_v10  ;;  %v3009_v61 = vld [vmem:[%s3846_s5 + $0x6a4] ss:$16 sps:$4 sm:$0xff]   ;;  %v3007_v1 = vld [vmem:[%s3846_s5 + $0x6a0] ss:$16 sps:$4 sm:$0xff]  }
  0xc2   : > { %2160 = vmatpush2.bf16.msra.mxu1 %v2954_v13  ;;  %2120 = vmatprep.subr.bf16.mxu0 %v2955_v14  ;;  %v741_v59 = vcombine.high %v3939_v56, %v3939_v56  ;;  %v3012_v2 = vld [vmem:[%s3846_s5 + $0x484] ss:$16 sps:$4 sm:$0xff]   ;;  %v3010_v4 = vld [vmem:[%s3846_s5 + $0x480] ss:$16 sps:$4 sm:$0xff]  }
  0xc3   : > { %2161 = vmatprep.subr.bf16.mxu1 %v2957_v15  ;;  %v3015_v3 = vld [vmem:[%s3846_s5 + $0x684] ss:$16 sps:$4 sm:$0xff]   ;;  %v3013_v5 = vld [vmem:[%s3846_s5 + $0x680] ss:$16 sps:$4 sm:$0xff]  }
  0xc4   : > { %v3950_v63 = vpack.c.bf16 %v741_v59, %v741_v59  ;;  %v3018_v6 = vld [vmem:[%s3846_s5 + $0x464] ss:$16 sps:$4 sm:$0xff]   ;;  %v3016_v8 = vld [vmem:[%s3846_s5 + $0x460] ss:$16 sps:$4 sm:$0xff]  }
  0xc5   : > { %2121 = vmatpush2.bf16.msra.mxu0 %v2959_v16  ;;  %v3021_v7 = vld [vmem:[%s3846_s5 + $0x664] ss:$16 sps:$4 sm:$0xff]   ;;  %v3019_v9 = vld [vmem:[%s3846_s5 + $0x660] ss:$16 sps:$4 sm:$0xff]  }
  0xc6   : > { %2162 = vmatpush2.bf16.msra.mxu1 %v2960_v17  ;;  %2122 = vmatprep.subr.bf16.mxu0 %v2961_v19  ;;  %v3024_v10 = vld [vmem:[%s3846_s5 + $0x444] ss:$16 sps:$4 sm:$0xff]   ;;  %v3022_v13 = vld [vmem:[%s3846_s5 + $0x440] ss:$16 sps:$4 sm:$0xff]   ;;  %v726_v17 = vcombine.high %v706_v55, %v706_v55  ;;  %v3082_v55 = vld [vmem:[%s3846_s5 + $0x2c] ss:$16 sps:$4 sm:$0xff]  }
  0xc7   : > { %2163 = vmatprep.subr.bf16.mxu1 %v2963_v20  ;;  %v3027_v11 = vld [vmem:[%s3846_s5 + $0x644] ss:$16 sps:$4 sm:$0xff]   ;;  %v3025_v14 = vld [vmem:[%s3846_s5 + $0x640] ss:$16 sps:$4 sm:$0xff]  }
  0xc8   : > { %v3030_v15 = vld [vmem:[%s3846_s5 + $0x424] ss:$16 sps:$4 sm:$0xff]   ;;  %v3028_v19 = vld [vmem:[%s3846_s5 + $0x420] ss:$16 sps:$4 sm:$0xff]   ;;  %v740_v23 = vrot.slane %v726_v17, %v3896_v18  ;;  %v3110_v17 = vld [vmem:[%s3846_s5 + $0x288] ss:$16 sps:$4 sm:$0xff]  }
  0xc9   : > { %2123 = vmatpush2.bf16.msra.mxu0 %v2965_v22  ;;  %v3033_v16 = vld [vmem:[%s3846_s5 + $0x624] ss:$16 sps:$4 sm:$0xff]   ;;  %v3031_v20 = vld [vmem:[%s3846_s5 + $0x620] ss:$16 sps:$4 sm:$0xff]  }
  0xca   : > { %2164 = vmatpush2.bf16.msra.mxu1 %v2966_v25  ;;  %2124 = vmatprep.subr.bf16.mxu0 %v2967_v26  ;;  %v3036_v21 = vld [vmem:[%s3846_s5 + $0x404] ss:$16 sps:$4 sm:$0xff]   ;;  %v3034_v24 = vld [vmem:[%s3846_s5 + $0x400] ss:$16 sps:$4 sm:$0xff]   ;;  %v3978_v28 = vpack.c.bf16 %v740_v23, %v740_v23  ;;  %v3124_v23 = vld [vmem:[%s3846_s5 + $0x24c] ss:$16 sps:$4 sm:$0xff]  }
  0xcb   : > { %2165 = vmatprep.subr.bf16.mxu1 %v2969_v27  ;;  %v3039_v22 = vld [vmem:[%s3846_s5 + $0x604] ss:$16 sps:$4 sm:$0xff]   ;;  %v3037_v25 = vld [vmem:[%s3846_s5 + $0x600] ss:$16 sps:$4 sm:$0xff]   ;;  %v3046_v27 = vld [vmem:[%s3846_s5 + $0xec] ss:$16 sps:$4 sm:$0xff]  }
  0xcc   : > { %v3042_v26 = vld [vmem:[%s3846_s5 + $0x5e4] ss:$16 sps:$4 sm:$0xff]   ;;  %v3040_v29 = vld [vmem:[%s3846_s5 + $0x5e0] ss:$16 sps:$4 sm:$0xff]  }
  0xcd   : > { %2125 = vmatpush2.bf16.msra.mxu0 %v2971_v30  ;;  %v3044_v30 = vld [vmem:[%s3846_s5 + $0xe8] ss:$16 sps:$4 sm:$0xff]   ;;  %v3049_v32 = vld [vmem:[%s3846_s5 + $0x5c4] ss:$16 sps:$4 sm:$0xff]  }
  0xce   : > { %2166 = vmatpush2.bf16.msra.mxu1 %v2972_v33  ;;  %2126 = vmatprep.subr.bf16.mxu0 %v2973_v34  ;;  %v3052_v33 = vld [vmem:[%s3846_s5 + $0xcc] ss:$16 sps:$4 sm:$0xff]   ;;  %v3047_v34 = vld [vmem:[%s3846_s5 + $0x5c0] ss:$16 sps:$4 sm:$0xff]   ;;  %v3085_v59 = vld [vmem:[%s3846_s5 + $0x504] ss:$16 sps:$4 sm:$0xff]  }
  0xcf   : > { %2167 = vmatprep.subr.bf16.mxu1 %v2975_v35  ;;  %v3050_v35 = vld [vmem:[%s3846_s5 + $0xc8] ss:$16 sps:$4 sm:$0xff]  }
  0xd1   : > { %2127 = vmatpush2.bf16.msra.mxu0 %v2977_v37  ;;  %v3055_v37 = vld [vmem:[%s3846_s5 + $0x5a4] ss:$16 sps:$4 sm:$0xff]  }
  0xd2   : > { %2168 = vmatpush2.bf16.msra.mxu1 %v2978_v38  ;;  %2128 = vmatprep.subr.bf16.mxu0 %v2979_v39  ;;  %v3058_v38 = vld [vmem:[%s3846_s5 + $0xac] ss:$16 sps:$4 sm:$0xff]   ;;  %v3053_v39 = vld [vmem:[%s3846_s5 + $0x5a0] ss:$16 sps:$4 sm:$0xff]  }
  0xd3   : > { %2169 = vmatprep.subr.bf16.mxu1 %v2981_v40  ;;  %v3056_v40 = vld [vmem:[%s3846_s5 + $0xa8] ss:$16 sps:$4 sm:$0xff]  }
  0xd5   : > { %2129 = vmatpush2.bf16.msra.mxu0 %v2983_v41  ;;  %v3061_v41 = vld [vmem:[%s3846_s5 + $0x584] ss:$16 sps:$4 sm:$0xff]  }
  0xd6   : > { %2170 = vmatpush2.bf16.msra.mxu1 %v2984_v42  ;;  %2130 = vmatprep.subr.bf16.mxu0 %v2985_v43  ;;  %v3064_v42 = vld [vmem:[%s3846_s5 + $0x8c] ss:$16 sps:$4 sm:$0xff]   ;;  %v3059_v43 = vld [vmem:[%s3846_s5 + $0x580] ss:$16 sps:$4 sm:$0xff]  }
  0xd7   : > { %2171 = vmatprep.subr.bf16.mxu1 %v2987_v44  ;;  %v3062_v44 = vld [vmem:[%s3846_s5 + $0x88] ss:$16 sps:$4 sm:$0xff]  }
  0xd9   : > { %2131 = vmatpush2.bf16.msra.mxu0 %v2989_v45  ;;  %v3070_v45 = vld [vmem:[%s3846_s5 + $0x6c] ss:$16 sps:$4 sm:$0xff]  }
  0xda   : > { %2172 = vmatpush2.bf16.msra.mxu1 %v2990_v46  ;;  %2182 = vmatprep.subr.bf16.mxu0 %v2994_v47  ;;  %v3065_v46 = vld [vmem:[%s3846_s5 + $0x560] ss:$16 sps:$4 sm:$0xff]   ;;  %v3068_v47 = vld [vmem:[%s3846_s5 + $0x68] ss:$16 sps:$4 sm:$0xff]  }
  0xdb   : > { %2223 = vmatprep.subr.bf16.mxu1 %v2997_v48  ;;  %v3073_v48 = vld [vmem:[%s3846_s5 + $0x544] ss:$16 sps:$4 sm:$0xff]  }
  0xdc   : > { %2133 = vmatmul.mubr.bf16.vlgmr.msra.gmra.mxu0 %v3929_v49 }
  0xdd   : > { %2174 = vmatmul.mubr.bf16.vlgmr.msra.gmra.mxu1 %v3931_v50  ;;  %2183 = vmatpush1.bf16.msra.mxu0 %v2992_v51  ;;  %v3076_v51 = vld [vmem:[%s3846_s5 + $0x4c] ss:$16 sps:$4 sm:$0xff]  }
  0xde   : > { %2224 = vmatpush1.bf16.msra.mxu1 %v2995_v52  ;;  %2184 = vmatprep.subr.bf16.mxu0 %v3000_v53  ;;  %v3071_v52 = vld [vmem:[%s3846_s5 + $0x540] ss:$16 sps:$4 sm:$0xff]   ;;  %v3074_v53 = vld [vmem:[%s3846_s5 + $0x48] ss:$16 sps:$4 sm:$0xff]  }
  0xdf   : > { %2225 = vmatprep.subr.bf16.mxu1 %v3003_v54  ;;  %2255 = vmatprep.mubr.bf16.mxu1 %v3291_v62  ;;  %v3079_v54 = vld [vmem:[%s3846_s5 + $0x524] ss:$16 sps:$4 sm:$0xff]  }
  0xe0   : > { %2214 = vmatprep.mubr.bf16.mxu0 %v3950_v63 }
  0xe1   : > { %2185 = vmatpush1.bf16.msra.mxu0 %v2998_v57  ;;  %v3077_v57 = vld [vmem:[%s3846_s5 + $0x520] ss:$16 sps:$4 sm:$0xff]  }
  0xe2   : > { %2226 = vmatpush1.bf16.msra.mxu1 %v3001_v58  ;;  %2186 = vmatprep.subr.bf16.mxu0 %v3006_v60  ;;  %v3080_v58 = vld [vmem:[%s3846_s5 + $0x28] ss:$16 sps:$4 sm:$0xff]   ;;  %v3088_v60 = vld [vmem:[%s3846_s5 + $0xc] ss:$16 sps:$4 sm:$0xff]  }
  0xe3   : > { %2227 = vmatprep.subr.bf16.mxu1 %v3009_v61  ;;  %v3083_v61 = vld [vmem:[%s3846_s5 + $0x500] ss:$16 sps:$4 sm:$0xff]  }
  0xe5   : > { %2187 = vmatpush1.bf16.msra.mxu0 %v3004_v0  ;;  %v3086_v0 = vld [vmem:[%s3846_s5 + $0x8] ss:$16 sps:$4 sm:$0xff]  }
  0xe6   : > { %2228 = vmatpush1.bf16.msra.mxu1 %v3007_v1  ;;  %2188 = vmatprep.subr.bf16.mxu0 %v3012_v2  ;;  %v3091_v1 = vld [vmem:[%s3846_s5 + $0x1ec] ss:$16 sps:$4 sm:$0xff]  }
  0xe7   : > { %2229 = vmatprep.subr.bf16.mxu1 %v3015_v3  ;;  %v3094_v2 = vld [vmem:[%s3846_s5 + $0x2ec] ss:$16 sps:$4 sm:$0xff]   ;;  %v4016_v3 = vpack.c.bf16 %v3939_v56, %v3939_v56  ;;  %v3095_v56 = vld [vmem:[%s3846_s5 + $0x1c8] ss:$16 sps:$4 sm:$0xff]  }
  0xe9   : > { %2189 = vmatpush1.bf16.msra.mxu0 %v3010_v4  ;;  %v3089_v4 = vld [vmem:[%s3846_s5 + $0x1e8] ss:$16 sps:$4 sm:$0xff]  }
  0xea   : > { %2230 = vmatpush1.bf16.msra.mxu1 %v3013_v5  ;;  %2190 = vmatprep.subr.bf16.mxu0 %v3018_v6  ;;  %v3092_v5 = vld [vmem:[%s3846_s5 + $0x2e8] ss:$16 sps:$4 sm:$0xff]   ;;  %v3097_v6 = vld [vmem:[%s3846_s5 + $0x1cc] ss:$16 sps:$4 sm:$0xff]  }
  0xeb   : > { %2231 = vmatprep.subr.bf16.mxu1 %v3021_v7  ;;  %v3100_v7 = vld [vmem:[%s3846_s5 + $0x2cc] ss:$16 sps:$4 sm:$0xff]  }
  0xed   : > { %2191 = vmatpush1.bf16.msra.mxu0 %v3016_v8  ;;  %v3098_v8 = vld [vmem:[%s3846_s5 + $0x2c8] ss:$16 sps:$4 sm:$0xff]  }
  0xee   : > { %2232 = vmatpush1.bf16.msra.mxu1 %v3019_v9  ;;  %2192 = vmatprep.subr.bf16.mxu0 %v3024_v10  ;;  %v3103_v9 = vld [vmem:[%s3846_s5 + $0x1ac] ss:$16 sps:$4 sm:$0xff]  }
  0xef   : > { %2233 = vmatprep.subr.bf16.mxu1 %v3027_v11  ;;  %v3106_v10 = vld [vmem:[%s3846_s5 + $0x2ac] ss:$16 sps:$4 sm:$0xff]   ;;  %v3101_v11 = vld [vmem:[%s3846_s5 + $0x1a8] ss:$16 sps:$4 sm:$0xff]  }
  0xf1   : > { %2193 = vmatpush1.bf16.msra.mxu0 %v3022_v13  ;;  %v3104_v13 = vld [vmem:[%s3846_s5 + $0x2a8] ss:$16 sps:$4 sm:$0xff]  }
  0xf2   : > { %2234 = vmatpush1.bf16.msra.mxu1 %v3025_v14  ;;  %2194 = vmatprep.subr.bf16.mxu0 %v3030_v15  ;;  %v3109_v14 = vld [vmem:[%s3846_s5 + $0x18c] ss:$16 sps:$4 sm:$0xff]  }
  0xf3   : > { %2235 = vmatprep.subr.bf16.mxu1 %v3033_v16  ;;  %v3112_v15 = vld [vmem:[%s3846_s5 + $0x28c] ss:$16 sps:$4 sm:$0xff]   ;;  %v3107_v16 = vld [vmem:[%s3846_s5 + $0x188] ss:$16 sps:$4 sm:$0xff]  }
  0xf5   : > { %2195 = vmatpush1.bf16.msra.mxu0 %v3028_v19  ;;  %v3118_v19 = vld [vmem:[%s3846_s5 + $0x26c] ss:$16 sps:$4 sm:$0xff]  }
  0xf6   : > { %2236 = vmatpush1.bf16.msra.mxu1 %v3031_v20  ;;  %2196 = vmatprep.subr.bf16.mxu0 %v3036_v21  ;;  %v3113_v20 = vld [vmem:[%s3846_s5 + $0x168] ss:$16 sps:$4 sm:$0xff]  }
  0xf7   : > { %2237 = vmatprep.subr.bf16.mxu1 %v3039_v22  ;;  %v3116_v21 = vld [vmem:[%s3846_s5 + $0x268] ss:$16 sps:$4 sm:$0xff]   ;;  %v3121_v22 = vld [vmem:[%s3846_s5 + $0x14c] ss:$16 sps:$4 sm:$0xff]  }
  0xf9   : > { %2197 = vmatpush1.bf16.msra.mxu0 %v3034_v24  ;;  %v3119_v24 = vld [vmem:[%s3846_s5 + $0x148] ss:$16 sps:$4 sm:$0xff]  }
  0xfa   : > { %2238 = vmatpush1.bf16.msra.mxu1 %v3037_v25  ;;  %2198 = vmatprep.subr.bf16.mxu0 %v3042_v26  ;;  %v3122_v25 = vld [vmem:[%s3846_s5 + $0x248] ss:$16 sps:$4 sm:$0xff]   ;;  %v3127_v26 = vld [vmem:[%s3846_s5 + $0x12c] ss:$16 sps:$4 sm:$0xff]  }
  0xfb   : > { %2264 = vmatprep.subr.bf16.mxu1 %v3046_v27  ;;  %v3130_v27 = vld [vmem:[%s3846_s5 + $0x22c] ss:$16 sps:$4 sm:$0xff]  }
  0xfd   : > { %2256 = vmatmul.mubr.bf16.vlgmr.msra.gmra.mxu1 %v3978_v28  ;;  %2199 = vmatpush2.bf16.msra.mxu0 %v3040_v29  ;;  %v3125_v29 = vld [vmem:[%s3846_s5 + $0x128] ss:$16 sps:$4 sm:$0xff]  }
  0xfe   : > { %2265 = vmatpush1.bf16.msra.mxu1 %v3044_v30  ;;  %2200 = vmatprep.subr.bf16.mxu0 %v3049_v32  ;;  %v3128_v30 = vld [vmem:[%s3846_s5 + $0x228] ss:$16 sps:$4 sm:$0xff]   ;;  %v3133_v32 = vld [vmem:[%s3846_s5 + $0x10c] ss:$16 sps:$4 sm:$0xff]  }
  0xff   : > { %2266 = vmatprep.subr.bf16.mxu1 %v3052_v33  ;;  %2296 = vmatprep.mubr.bf16.mxu1 %v3908_v31  ;;  %v3067_v31 = vld [vmem:[%s3846_s5 + $0x564] ss:$16 sps:$4 sm:$0xff]   ;;  %v3136_v33 = vld [vmem:[%s3846_s5 + $0x20c] ss:$16 sps:$4 sm:$0xff]  }
 0x101   : > { %2201 = vmatpush2.bf16.msra.mxu0 %v3047_v34  ;;  %v3131_v34 = vld [vmem:[%s3846_s5 + $0x108] ss:$16 sps:$4 sm:$0xff]  }
 0x102   : > { %2267 = vmatpush1.bf16.msra.mxu1 %v3050_v35  ;;  %2202 = vmatprep.subr.bf16.mxu0 %v3055_v37  ;;  %v3134_v35 = vld [vmem:[%s3846_s5 + $0x208] ss:$16 sps:$4 sm:$0xff]   ;;  %v3139_v37 = vld [vmem:[%s3846_s5 + $0x3ec] ss:$16 sps:$4 sm:$0xff]  }
 0x103   : > { %2268 = vmatprep.subr.bf16.mxu1 %v3058_v38  ;;  %v3142_v38 = vld [vmem:[%s3846_s5 + $0x4ec] ss:$16 sps:$4 sm:$0xff]  }
 0x105   : > { %2203 = vmatpush2.bf16.msra.mxu0 %v3053_v39  ;;  %v3137_v39 = vld [vmem:[%s3846_s5 + $0x3e8] ss:$16 sps:$4 sm:$0xff]  }
 0x106   : > { %2269 = vmatpush1.bf16.msra.mxu1 %v3056_v40  ;;  %2204 = vmatprep.subr.bf16.mxu0 %v3061_v41  ;;  %v3140_v40 = vld [vmem:[%s3846_s5 + $0x4e8] ss:$16 sps:$4 sm:$0xff]   ;;  %v3145_v41 = vld [vmem:[%s3846_s5 + $0x3cc] ss:$16 sps:$4 sm:$0xff]  }
 0x107   : > { %2270 = vmatprep.subr.bf16.mxu1 %v3064_v42  ;;  %v3148_v42 = vld [vmem:[%s3846_s5 + $0x4cc] ss:$16 sps:$4 sm:$0xff]  }
 0x109   : > { %2205 = vmatpush2.bf16.msra.mxu0 %v3059_v43  ;;  %v3143_v43 = vld [vmem:[%s3846_s5 + $0x3c8] ss:$16 sps:$4 sm:$0xff]  }
 0x10a   : > { %2271 = vmatpush1.bf16.msra.mxu1 %v3062_v44  ;;  %2206 = vmatprep.subr.bf16.mxu0 %v3067_v31  ;;  %v3146_v44 = vld [vmem:[%s3846_s5 + $0x4c8] ss:$16 sps:$4 sm:$0xff]   ;;  %v3151_v31 = vld [vmem:[%s3846_s5 + $0x3ac] ss:$16 sps:$4 sm:$0xff]  }
 0x10b   : > { %2272 = vmatprep.subr.bf16.mxu1 %v3070_v45  ;;  %v3154_v45 = vld [vmem:[%s3846_s5 + $0x4ac] ss:$16 sps:$4 sm:$0xff]  }
 0x10d   : > { %2207 = vmatpush2.bf16.msra.mxu0 %v3065_v46  ;;  %v3149_v46 = vld [vmem:[%s3846_s5 + $0x3a8] ss:$16 sps:$4 sm:$0xff]  }
 0x10e   : > { %2273 = vmatpush1.bf16.msra.mxu1 %v3068_v47  ;;  %2208 = vmatprep.subr.bf16.mxu0 %v3073_v48  ;;  %v3157_v47 = vld [vmem:[%s3846_s5 + $0x38c] ss:$16 sps:$4 sm:$0xff]  }
 0x10f   : > { %2274 = vmatprep.subr.bf16.mxu1 %v3076_v51  ;;  %v3160_v48 = vld [vmem:[%s3846_s5 + $0x48c] ss:$16 sps:$4 sm:$0xff]   ;;  %v3155_v51 = vld [vmem:[%s3846_s5 + $0x388] ss:$16 sps:$4 sm:$0xff]  }
 0x111   : > { %2209 = vmatpush2.bf16.msra.mxu0 %v3071_v52  ;;  %v3158_v52 = vld [vmem:[%s3846_s5 + $0x488] ss:$16 sps:$4 sm:$0xff]  }
 0x112   : > { %2275 = vmatpush1.bf16.msra.mxu1 %v3074_v53  ;;  %2210 = vmatprep.subr.bf16.mxu0 %v3079_v54  ;;  %v3166_v53 = vld [vmem:[%s3846_s5 + $0x46c] ss:$16 sps:$4 sm:$0xff]   ;;  %v3161_v54 = vld [vmem:[%s3846_s5 + $0x368] ss:$16 sps:$4 sm:$0xff]  }
 0x113   : > { %2276 = vmatprep.subr.bf16.mxu1 %v3082_v55  ;;  %v3164_v55 = vld [vmem:[%s3846_s5 + $0x468] ss:$16 sps:$4 sm:$0xff]  }
 0x115   : > { %2211 = vmatpush2.bf16.msra.mxu0 %v3077_v57  ;;  %v3169_v57 = vld [vmem:[%s3846_s5 + $0x34c] ss:$16 sps:$4 sm:$0xff]  }
 0x116   : > { %2277 = vmatpush1.bf16.msra.mxu1 %v3080_v58  ;;  %2212 = vmatprep.subr.bf16.mxu0 %v3085_v59  ;;  %v3172_v58 = vld [vmem:[%s3846_s5 + $0x44c] ss:$16 sps:$4 sm:$0xff]   ;;  %v3167_v59 = vld [vmem:[%s3846_s5 + $0x348] ss:$16 sps:$4 sm:$0xff]  }
 0x117   : > { %2278 = vmatprep.subr.bf16.mxu1 %v3088_v60  ;;  %v3170_v60 = vld [vmem:[%s3846_s5 + $0x448] ss:$16 sps:$4 sm:$0xff]  }
 0x119   : > { %2213 = vmatpush2.bf16.msra.mxu0 %v3083_v61  ;;  %v3175_v61 = vld [vmem:[%s3846_s5 + $0x32c] ss:$16 sps:$4 sm:$0xff]  }
 0x11a   : > { %2279 = vmatpush1.bf16.msra.mxu1 %v3086_v0  ;;  %2305 = vmatprep.subr.bf16.mxu0 %v3094_v2  ;;  %v3178_v0 = vld [vmem:[%s3846_s5 + $0x42c] ss:$16 sps:$4 sm:$0xff]   ;;  %v3176_v2 = vld [vmem:[%s3846_s5 + $0x428] ss:$16 sps:$4 sm:$0xff]  }
 0x11b   : > { %2280 = vmatprep.subr.bf16.mxu1 %v3091_v1  ;;  %v3173_v1 = vld [vmem:[%s3846_s5 + $0x328] ss:$16 sps:$4 sm:$0xff]  }
 0x11c   : > { %2215 = vmatmul.mubr.bf16.vlgmr.msra.gmra.mxu0 %v4016_v3 }
 0x11d   : > { %2306 = vmatpush1.bf16.msra.mxu0 %v3092_v5  ;;  %2337 = vmatprep.mubr.bf16.mxu0 %v3913_v36  ;;  %v3115_v36 = vld [vmem:[%s3846_s5 + $0x16c] ss:$16 sps:$4 sm:$0xff]  }
 0x11e   : > { %2281 = vmatpush2.bf16.msra.mxu1 %v3089_v4  ;;  %2307 = vmatprep.subr.bf16.mxu0 %v3100_v7  ;;  %v3181_v4 = vld [vmem:[%s3846_s5 + $0x30c] ss:$16 sps:$4 sm:$0xff]   ;;  %v3182_v7 = vld [vmem:[%s3846_s5 + $0x408] ss:$16 sps:$4 sm:$0xff]  }
 0x11f   : > { %2282 = vmatprep.subr.bf16.mxu1 %v3097_v6  ;;  %v3184_v5 = vld [vmem:[%s3846_s5 + $0x40c] ss:$16 sps:$4 sm:$0xff]   ;;  %v3179_v6 = vld [vmem:[%s3846_s5 + $0x308] ss:$16 sps:$4 sm:$0xff]  }
 0x121   : > { %2308 = vmatpush1.bf16.msra.mxu0 %v3098_v8  ;;  %v3190_v8 = vld [vmem:[%s3846_s5 + $0x6ec] ss:$16 sps:$4 sm:$0xff]  }
 0x122   : > { %2283 = vmatpush2.bf16.msra.mxu1 %v3095_v56  ;;  %2309 = vmatprep.subr.bf16.mxu0 %v3106_v10  ;;  %v3187_v56 = vld [vmem:[%s3846_s5 + $0x5ec] ss:$16 sps:$4 sm:$0xff]   ;;  %v3188_v10 = vld [vmem:[%s3846_s5 + $0x6e8] ss:$16 sps:$4 sm:$0xff]  }
 0x123   : > { %2284 = vmatprep.subr.bf16.mxu1 %v3103_v9  ;;  %v3185_v9 = vld [vmem:[%s3846_s5 + $0x5e8] ss:$16 sps:$4 sm:$0xff]  }
 0x125   : > { %2310 = vmatpush1.bf16.msra.mxu0 %v3104_v13  ;;  %v3196_v13 = vld [vmem:[%s3846_s5 + $0x6cc] ss:$16 sps:$4 sm:$0xff]  }
 0x126   : > { %2285 = vmatpush2.bf16.msra.mxu1 %v3101_v11  ;;  %2311 = vmatprep.subr.bf16.mxu0 %v3112_v15  ;;  %v3193_v11 = vld [vmem:[%s3846_s5 + $0x5cc] ss:$16 sps:$4 sm:$0xff]   ;;  %v3194_v15 = vld [vmem:[%s3846_s5 + $0x6c8] ss:$16 sps:$4 sm:$0xff]  }
 0x127   : > { %2286 = vmatprep.subr.bf16.mxu1 %v3109_v14  ;;  %v3191_v14 = vld [vmem:[%s3846_s5 + $0x5c8] ss:$16 sps:$4 sm:$0xff]  }
 0x129   : > { %2312 = vmatpush1.bf16.msra.mxu0 %v3110_v17  ;;  %v3202_v17 = vld [vmem:[%s3846_s5 + $0x6ac] ss:$16 sps:$4 sm:$0xff]  }
 0x12a   : > { %2287 = vmatpush2.bf16.msra.mxu1 %v3107_v16  ;;  %2313 = vmatprep.subr.bf16.mxu0 %v3118_v19  ;;  %v3199_v16 = vld [vmem:[%s3846_s5 + $0x5ac] ss:$16 sps:$4 sm:$0xff]  }
 0x12b   : > { %2288 = vmatprep.subr.bf16.mxu1 %v3115_v36  ;;  %v3197_v36 = vld [vmem:[%s3846_s5 + $0x5a8] ss:$16 sps:$4 sm:$0xff]   ;;  %v3205_v19 = vld [vmem:[%s3846_s5 + $0x58c] ss:$16 sps:$4 sm:$0xff]  }
 0x12d   : > { %2314 = vmatpush1.bf16.msra.mxu0 %v3116_v21  ;;  %v3203_v21 = vld [vmem:[%s3846_s5 + $0x588] ss:$16 sps:$4 sm:$0xff]  }
 0x12e   : > { %2289 = vmatpush2.bf16.msra.mxu1 %v3113_v20  ;;  %2315 = vmatprep.subr.bf16.mxu0 %v3124_v23  ;;  %v3208_v20 = vld [vmem:[%s3846_s5 + $0x68c] ss:$16 sps:$4 sm:$0xff]  }
 0x12f   : > { %2290 = vmatprep.subr.bf16.mxu1 %v3121_v22  ;;  %v3206_v22 = vld [vmem:[%s3846_s5 + $0x688] ss:$16 sps:$4 sm:$0xff]   ;;  %v3214_v23 = vld [vmem:[%s3846_s5 + $0x66c] ss:$16 sps:$4 sm:$0xff]  }
 0x131   : > { %2316 = vmatpush1.bf16.msra.mxu0 %v3122_v25  ;;  %v3212_v25 = vld [vmem:[%s3846_s5 + $0x668] ss:$16 sps:$4 sm:$0xff]  }
 0x132   : > { %2291 = vmatpush2.bf16.msra.mxu1 %v3119_v24  ;;  %2317 = vmatprep.subr.bf16.mxu0 %v3130_v27  ;;  %v3209_v24 = vld [vmem:[%s3846_s5 + $0x568] ss:$16 sps:$4 sm:$0xff]   ;;  %v3220_v27 = vld [vmem:[%s3846_s5 + $0x64c] ss:$16 sps:$4 sm:$0xff]  }
 0x133   : > { %2292 = vmatprep.subr.bf16.mxu1 %v3127_v26  ;;  %v3217_v26 = vld [vmem:[%s3846_s5 + $0x54c] ss:$16 sps:$4 sm:$0xff]  }
 0x135   : > { %2318 = vmatpush1.bf16.msra.mxu0 %v3128_v30  ;;  %v3218_v30 = vld [vmem:[%s3846_s5 + $0x648] ss:$16 sps:$4 sm:$0xff]  }
 0x136   : > { %2293 = vmatpush2.bf16.msra.mxu1 %v3125_v29  ;;  %2319 = vmatprep.subr.bf16.mxu0 %v3136_v33  ;;  %v3215_v29 = vld [vmem:[%s3846_s5 + $0x548] ss:$16 sps:$4 sm:$0xff]   ;;  %v3226_v33 = vld [vmem:[%s3846_s5 + $0x62c] ss:$16 sps:$4 sm:$0xff]  }
 0x137   : > { %2294 = vmatprep.subr.bf16.mxu1 %v3133_v32  ;;  %v3223_v32 = vld [vmem:[%s3846_s5 + $0x52c] ss:$16 sps:$4 sm:$0xff]  }
 0x139   : > { %2320 = vmatpush1.bf16.msra.mxu0 %v3134_v35  ;;  %v3224_v35 = vld [vmem:[%s3846_s5 + $0x628] ss:$16 sps:$4 sm:$0xff]  }
 0x13a   : > { %2295 = vmatpush2.bf16.msra.mxu1 %v3131_v34  ;;  %2321 = vmatprep.subr.bf16.mxu0 %v3139_v37  ;;  %v3221_v34 = vld [vmem:[%s3846_s5 + $0x528] ss:$16 sps:$4 sm:$0xff]   ;;  %v3229_v37 = vld [vmem:[%s3846_s5 + $0x50c] ss:$16 sps:$4 sm:$0xff]  }
 0x13b   : > { %2346 = vmatprep.subr.bf16.mxu1 %v3142_v38  ;;  %v3232_v38 = vld [vmem:[%s3846_s5 + $0x60c] ss:$16 sps:$4 sm:$0xff]  }
 0x13d   : > { %2297 = vmatmul.mubr.bf16.vlgmr.msra.gmra.mxu1 %v3929_v49  ;;  %2322 = vmatpush2.bf16.msra.mxu0 %v3137_v39  ;;  %v3152_v49 = vld [vmem:[%s3846_s5 + $0x4a8] ss:$16 sps:$4 sm:$0xff]  }
 0x13e   : > { %2347 = vmatpush1.bf16.msra.mxu1 %v3140_v40  ;;  %2323 = vmatprep.subr.bf16.mxu0 %v3145_v41  ;;  %v3227_v39 = vld [vmem:[%s3846_s5 + $0x508] ss:$16 sps:$4 sm:$0xff]  }
 0x13f   : > { %2348 = vmatprep.subr.bf16.mxu1 %v3148_v42  ;;  %2378 = vmatprep.mubr.bf16.mxu1 %v3950_v63  ;;  %v3163_v63 = vld [vmem:[%s3846_s5 + $0x36c] ss:$16 sps:$4 sm:$0xff]   ;;  %v3230_v40 = vld [vmem:[%s3846_s5 + $0x608] ss:$16 sps:$4 sm:$0xff]  }
 0x141   : > { %2324 = vmatpush2.bf16.msra.mxu0 %v3143_v43 }
 0x142   : > { %2349 = vmatpush1.bf16.msra.mxu1 %v3146_v44  ;;  %2325 = vmatprep.subr.bf16.mxu0 %v3151_v31 }
 0x143   : > { %2350 = vmatprep.subr.bf16.mxu1 %v3154_v45 }
 0x145   : > { %2326 = vmatpush2.bf16.msra.mxu0 %v3149_v46 }
 0x146   : > { %2351 = vmatpush1.bf16.msra.mxu1 %v3152_v49  ;;  %2327 = vmatprep.subr.bf16.mxu0 %v3157_v47 }
 0x147   : > { %2352 = vmatprep.subr.bf16.mxu1 %v3160_v48 }
 0x149   : > { %2328 = vmatpush2.bf16.msra.mxu0 %v3155_v51 }
 0x14a   : > { %2353 = vmatpush1.bf16.msra.mxu1 %v3158_v52  ;;  %2329 = vmatprep.subr.bf16.mxu0 %v3163_v63 }
 0x14b   : > { %2354 = vmatprep.subr.bf16.mxu1 %v3166_v53 }
 0x14d   : > { %2330 = vmatpush2.bf16.msra.mxu0 %v3161_v54 }
 0x14e   : > { %2355 = vmatpush1.bf16.msra.mxu1 %v3164_v55  ;;  %2331 = vmatprep.subr.bf16.mxu0 %v3169_v57 }
 0x14f   : > { %2356 = vmatprep.subr.bf16.mxu1 %v3172_v58 }
 0x151   : > { %2332 = vmatpush2.bf16.msra.mxu0 %v3167_v59 }
 0x152   : > { %2357 = vmatpush1.bf16.msra.mxu1 %v3170_v60  ;;  %2333 = vmatprep.subr.bf16.mxu0 %v3175_v61 }
 0x153   : > { %2358 = vmatprep.subr.bf16.mxu1 %v3178_v0 }
 0x155   : > { %2334 = vmatpush2.bf16.msra.mxu0 %v3173_v1 }
 0x156   : > { %2359 = vmatpush1.bf16.msra.mxu1 %v3176_v2  ;;  %2335 = vmatprep.subr.bf16.mxu0 %v3181_v4 }
 0x157   : > { %2360 = vmatprep.subr.bf16.mxu1 %v3184_v5 }
 0x159   : > { %2336 = vmatpush2.bf16.msra.mxu0 %v3179_v6 }
 0x15a   : > { %2361 = vmatpush1.bf16.msra.mxu1 %v3182_v7  ;;  %2387 = vmatprep.subr.bf16.mxu0 %v3190_v8 }
 0x15b   : > { %2362 = vmatprep.subr.bf16.mxu1 %v3187_v56 }
 0x15c   : > { %2338 = vmatmul.mubr.bf16.vlgmr.msra.gmra.mxu0 %v3931_v50  ;;  %v3200_v50 = vld [vmem:[%s3846_s5 + $0x6a8] ss:$16 sps:$4 sm:$0xff]  }
 0x15d   : > { %2388 = vmatpush1.bf16.msra.mxu0 %v3188_v10  ;;  %2419 = vmatprep.mubr.bf16.mxu0 %v3291_v62  ;;  %v3211_v62 = vld [vmem:[%s3846_s5 + $0x56c] ss:$16 sps:$4 sm:$0xff]  }
 0x15e   : > { %2363 = vmatpush2.bf16.msra.mxu1 %v3185_v9  ;;  %2389 = vmatprep.subr.bf16.mxu0 %v3196_v13 }
 0x15f   : > { %2364 = vmatprep.subr.bf16.mxu1 %v3193_v11 }
 0x161   : > { %2390 = vmatpush1.bf16.msra.mxu0 %v3194_v15 }
 0x162   : > { %2365 = vmatpush2.bf16.msra.mxu1 %v3191_v14  ;;  %2391 = vmatprep.subr.bf16.mxu0 %v3202_v17 }
 0x163   : > { %2366 = vmatprep.subr.bf16.mxu1 %v3199_v16 }
 0x165   : > { %2392 = vmatpush1.bf16.msra.mxu0 %v3200_v50 }
 0x166   : > { %2367 = vmatpush2.bf16.msra.mxu1 %v3197_v36  ;;  %2393 = vmatprep.subr.bf16.mxu0 %v3208_v20 }
 0x167   : > { %2368 = vmatprep.subr.bf16.mxu1 %v3205_v19 }
 0x169   : > { %2394 = vmatpush1.bf16.msra.mxu0 %v3206_v22 }
 0x16a   : > { %2369 = vmatpush2.bf16.msra.mxu1 %v3203_v21  ;;  %2395 = vmatprep.subr.bf16.mxu0 %v3214_v23 }
 0x16b   : > { %2370 = vmatprep.subr.bf16.mxu1 %v3211_v62 }
 0x16d   : > { %2396 = vmatpush1.bf16.msra.mxu0 %v3212_v25 }
 0x16e   : > { %2371 = vmatpush2.bf16.msra.mxu1 %v3209_v24  ;;  %2397 = vmatprep.subr.bf16.mxu0 %v3220_v27  ;;  %v704_v24 = vld [vmem:[#allocation2] sm:$0xff] }
 0x16f   : > { %2372 = vmatprep.subr.bf16.mxu1 %v3217_v26 }
 0x171   : > { %2398 = vmatpush1.bf16.msra.mxu0 %v3218_v30 }
 0x172   : > { %2373 = vmatpush2.bf16.msra.mxu1 %v3215_v29  ;;  %2399 = vmatprep.subr.bf16.mxu0 %v3226_v33 }
 0x173   : > { %2374 = vmatprep.subr.bf16.mxu1 %v3223_v32 }
 0x175   : > { %2400 = vmatpush1.bf16.msra.mxu0 %v3224_v35 }
 0x176   : > { %2375 = vmatpush2.bf16.msra.mxu1 %v3221_v34  ;;  %2401 = vmatprep.subr.bf16.mxu0 %v3232_v38 }
 0x177   : > { %2376 = vmatprep.subr.bf16.mxu1 %v3229_v37 }
 0x179   : > { %2402 = vmatpush1.bf16.msra.mxu0 %v3230_v40 }
 0x17a   : > { %2377 = vmatpush2.bf16.msra.mxu1 %v3227_v39 }
 0x17c   : > { %2420 = vmatmul.mubr.bf16.vlgmr.msra.gmra.mxu0 %v3978_v28 }
 0x17d   : > { %2379 = vmatmul.mubr.bf16.vlgmr.msra.gmra.mxu1 %v4016_v3 }
 0x19c   : > { %v2134_v41 = vpop.f32.mrf.mxu0 }
 0x19d   : > { %v2175_v42 = vpop.f32.mrf.mxu1 }
 0x19e   : > { %v2176_v43 = vadd.f32 %v2175_v42, %v2134_v41  ;;  %v2136_v44 = vpop.f32.mrf.mxu0 }
 0x19f   : > { %v2177_v31 = vpop.f32.mrf.mxu1 }
 0x1a0   : > { %v2178_v45 = vadd.f32 %v2177_v31, %v2136_v44  ;;  %v2138_v46 = vpop.f32.mrf.mxu0 }
 0x1a1   : > { %v2179_v49 = vpop.f32.mrf.mxu1 }
 0x1a2   : > { %v2139_v47 = vpop.f32.mrf.mxu0 }
 0x1a3   : > { %v2180_v48 = vpop.f32.mrf.mxu1 }
 0x1bd   : > { %v2257_v51 = vpop.f32.mrf.mxu1 }
 0x1bf   : > { %v2259_v52 = vpop.f32.mrf.mxu1 }
 0x1c1   : > { %v2261_v63 = vpop.f32.mrf.mxu1 }
 0x1c3   : > { %v2262_v53 = vpop.f32.mrf.mxu1 }
 0x1dc   : > { %v2216_v54 = vpop.f32.mrf.mxu0 }
 0x1dd   : > { %v2217_v55 = vadd.f32 %v2216_v54, %v2176_v43 }
 0x1de   : > { %v2218_v57 = vpop.f32.mrf.mxu0 }
 0x1df   : > { %v2258_v3 = vadd.f32 %v2257_v51, %v2217_v55  ;;  %v2219_v58 = vadd.f32 %v2218_v57, %v2178_v45 }
 0x1e0   : > { %v2220_v28 = vpop.f32.mrf.mxu0 }
 0x1e1   : > { %v2260_v59 = vadd.f32 %v2259_v52, %v2219_v58 }
 0x1e2   : > { %v2221_v60 = vpop.f32.mrf.mxu0 }
 0x1e3   : > { %v2432_v61 = vcombine.low %v2258_v3, %v2260_v59 }
 0x1e5   : > { %v2440_v62 = vrot.slane %v2432_v61, %v3896_v18 }
 0x1fd   : > { %v2298_v0 = vpop.f32.mrf.mxu1 }
 0x1ff   : > { %v2300_v1 = vpop.f32.mrf.mxu1 }
 0x201   : > { %v2302_v2 = vpop.f32.mrf.mxu1 }
 0x203   : > { %v2303_v4 = vpop.f32.mrf.mxu1 }
 0x21c   : > { %v2339_v5 = vpop.f32.mrf.mxu0 }
 0x21d   : > { %v2340_v8 = vadd.f32 %v2339_v5, %v2298_v0 }
 0x21e   : > { %v2341_v6 = vpop.f32.mrf.mxu0 }
 0x21f   : > { %v2342_v11 = vadd.f32 %v2341_v6, %v2300_v1 }
 0x220   : > { %v2343_v7 = vpop.f32.mrf.mxu0 }
 0x222   : > { %v2344_v56 = vpop.f32.mrf.mxu0 }
 0x23c   : > { %v2421_v10 = vpop.f32.mrf.mxu0 }
 0x23d   : > { %v2380_v9 = vpop.f32.mrf.mxu1 }
 0x23e   : > { %v2381_v13 = vadd.f32 %v2380_v9, %v2340_v8  ;;  %v2423_v15 = vpop.f32.mrf.mxu0 }
 0x23f   : > { %v2382_v14 = vpop.f32.mrf.mxu1 }
 0x240   : > { %v2383_v16 = vadd.f32 %v2382_v14, %v2342_v11  ;;  %v2425_v36 = vpop.f32.mrf.mxu0  ;;  %v2422_v50 = vadd.f32 %v2421_v10, %v2381_v13 }
 0x241   : > { %v2384_v17 = vpop.f32.mrf.mxu1 }
 0x242   : > { %v2424_v19 = vadd.f32 %v2423_v15, %v2383_v16  ;;  %v2426_v21 = vpop.f32.mrf.mxu0 }
 0x243   : > { %v2385_v20 = vpop.f32.mrf.mxu1 }
 0x244   : > { %v2433_v22 = vcombine.low %v2422_v50, %v2424_v19 }
 0x246   : > { %v2447_v23 = vrot.slane %v2433_v22, %v3896_v18 }
 0x248   : > { %v2448_v25 = vcombine.low %v2440_v62, %v2447_v23  ;;  %2455 = sbr.rel (%p2830_p13) target bundleno = 602 (0x25a), region = 63 }
 0x24a   : > { %v2450_v26 = vadd.f32 %v2448_v25, %v704_v24 }
 0x24c   : > { %2451 = vst [vmem:[#allocation2] sm:$0xff] %v2450_v26 }
 0x24d   : > { %v2457_v27 = vld [vmem:[%s690_s12] sm:$0xf]  ;;  %v2461_v29 = vsub.s32 0, %v3888_v12  ;;  %v2465_v30 = vsub.s32 1, %v3888_v12  ;;  %v2469_v32 = vsub.s32 2, %v3888_v12  ;;  %v2473_v33 = vsub.s32 3, %v3888_v12 }
 0x24f   : > { %v2462_v34 = vrot.slane %v2457_v27, %v2461_v29  ;;  %v2466_v35 = vrot.slane %v2457_v27, %v2465_v30  ;;  %v2470_v37 = vrot.slane %v2457_v27, %v2469_v32  ;;  %v2474_v38 = vrot.slane %v2457_v27, %v2473_v33 }
 0x251   : > { %v2475_v39 = vcombine.low %v2462_v34, %v2466_v35  ;;  %v2476_v40 = vcombine.low %v2470_v37, %v2474_v38 }
 0x253   : > { %v2483_v41 = vrot.slane %v2475_v39, %v3896_v18  ;;  %v2490_v42 = vrot.slane %v2476_v40, %v3896_v18  ;;  %v2456_v43 = vld [vmem:[#allocation2] sm:$0xff] }
 0x255   : > { %v2491_v44 = vcombine.low %v2483_v41, %v2490_v42 }
 0x257   : > { %v2493_v31 = vadd.f32 %v2491_v44, %v2456_v43 }
 0x259   : > { %2494 = vst [vmem:[%s3844_s4] sm:$0xff] %v2493_v31 }
 0x25a PF: > { %s13_s18 = sadd.s32 1, %s3287_s18   ;;  %s4160_s12 = smov %s3267_s13 }
 0x25b   : > { %p10_p0 = scmp.ge.s32.totalorder %s13_s18, 16   ;;  %s4161_s13 = smov %s3363_s25 }
 0x25c   : > { %s4162_s14 = smov %s3279_s16  ;;  %s4163_s15 = smov %s3283_s17 }
 0x25d   : > { %s4164_s16 = smov %s4167_s19  ;;  %s4165_s17 = smov %s4171_s20 }
 0x25e   :  { %12 = sbr.rel (!%p10_p0) target bundleno = 4 (0x4), region = 104 }

// kernel: forward.13
= control target key start
LH: loop header
LB: loop body
LE: loop exit
PB: predicated region body
PF: predicated region fallthrough
CT: control target
= control target key end

     0   :  { %v31_v28 = vlaneseq  ;;  %v1023_v36 = vmov 1983009808   ;;  %s1259_s0 = inlined_call_operand.vmem [shape: f32[2,1024], index: 0, kind: input, shape index: {}]   ;;  %s1260_s1 = inlined_call_operand.vmem [shape: bf16[1024,10], index: 1, kind: input, shape index: {}]   ;;  %s1261_s2 = inlined_call_operand.vmem [shape: f32[1,10], index: 2, kind: input, shape index: {}]   ;;  %s1262_s3 = inlined_call_operand.hbm [shape: f32[2,10], index: 3, kind: output, shape index: {}]  }
   0x1   :  { %v935_v0 = vld [vmem:[%s1260_s1 + $0x78] sm:$0xff]   ;;  %v939_v4 = vld [vmem:[%s1260_s1 + $0x70] sm:$0xff]   ;;  %v943_v8 = vld [vmem:[%s1260_s1 + $0x68] sm:$0xff]   ;;  %v29_v37 = vunpack.c.l.s4 %v1023_v36 }
   0x2   :  { %v936_v1 = vld [vmem:[%s1260_s1 + $0xf8] sm:$0xff]   ;;  %844 = vmatprep.subr.bf16.mxu0 %v935_v0  ;;  %v940_v5 = vld [vmem:[%s1260_s1 + $0xf0] sm:$0xff]   ;;  %v944_v9 = vld [vmem:[%s1260_s1 + $0xe8] sm:$0xff]   ;;  %v32_v33 = vshrl.u32 %v31_v28, 7 }
   0x3   :  { %v937_v2 = vld [vmem:[%s1260_s1 + $0x38] sm:$0xff]   ;;  %866 = vmatprep.subr.bf16.mxu1 %v936_v1  ;;  %v941_v6 = vld [vmem:[%s1260_s1 + $0x30] sm:$0xff]   ;;  %v945_v10 = vld [vmem:[%s1260_s1 + $0x28] sm:$0xff]   ;;  %v30_v39 = vunpack.c.0.s8 %v29_v37 }
   0x4   :  { %v938_v3 = vld [vmem:[%s1260_s1 + $0xb8] sm:$0xff]   ;;  %845 = vmatpush3.bf16.msra.mxu0 %v937_v2  ;;  %v942_v7 = vld [vmem:[%s1260_s1 + $0xb0] sm:$0xff]   ;;  %v946_v11 = vld [vmem:[%s1260_s1 + $0xa8] sm:$0xff]  }
   0x5   :  { %867 = vmatpush3.bf16.msra.mxu1 %v938_v3  ;;  %846 = vmatprep.subr.bf16.mxu0 %v939_v4  ;;  %v947_v12 = vld [vmem:[%s1260_s1 + $0x60] sm:$0xff]   ;;  %v951_v16 = vld [vmem:[%s1260_s1 + $0x58] sm:$0xff]   ;;  %v955_v20 = vld [vmem:[%s1260_s1 + $0x50] sm:$0xff]   ;;  %v1151_v41 = vsub.s32 %v30_v39, %v32_v33 }
   0x6   :  { %868 = vmatprep.subr.bf16.mxu1 %v940_v5  ;;  %v948_v13 = vld [vmem:[%s1260_s1 + $0xe0] sm:$0xff]   ;;  %v952_v17 = vld [vmem:[%s1260_s1 + $0xd8] sm:$0xff]   ;;  %v956_v21 = vld [vmem:[%s1260_s1 + $0xd0] sm:$0xff]  }
   0x7   :  { %v949_v14 = vld [vmem:[%s1260_s1 + $0x20] sm:$0xff]   ;;  %v953_v18 = vld [vmem:[%s1260_s1 + $0x18] sm:$0xff]   ;;  %v957_v22 = vld [vmem:[%s1260_s1 + $0x10] sm:$0xff]  }
   0x8   :  { %847 = vmatpush3.bf16.msra.mxu0 %v941_v6  ;;  %v950_v15 = vld [vmem:[%s1260_s1 + $0xa0] sm:$0xff]   ;;  %v954_v19 = vld [vmem:[%s1260_s1 + $0x98] sm:$0xff]   ;;  %v958_v23 = vld [vmem:[%s1260_s1 + $0x90] sm:$0xff]  }
   0x9   :  { %869 = vmatpush3.bf16.msra.mxu1 %v942_v7  ;;  %848 = vmatprep.subr.bf16.mxu0 %v943_v8  ;;  %v959_v24 = vld [vmem:[%s1260_s1 + $0x48] sm:$0xff]   ;;  %v963_v29 = vld [vmem:[%s1260_s1 + $0x40] sm:$0xff]   ;;  %v968_v35 = vld [vmem:[%s1260_s1 + $0x178] sm:$0xff]  }
   0xa   :  { %870 = vmatprep.subr.bf16.mxu1 %v944_v9  ;;  %v960_v25 = vld [vmem:[%s1260_s1 + $0xc8] sm:$0xff]   ;;  %v964_v30 = vld [vmem:[%s1260_s1 + $0xc0] sm:$0xff]   ;;  %v969_v38 = vld [vmem:[%s1260_s1 + $0x1f8] sm:$0xff]  }
   0xb   :  { %v961_v26 = vld [vmem:[%s1260_s1 + $0x8] sm:$0xff]   ;;  %v965_v31 = vld [vmem:[%s1260_s1] sm:$0xff]   ;;  %v970_v46 = vld [vmem:[%s1260_s1 + $0x138] sm:$0xff]  }
   0xc   :  { %849 = vmatpush3.bf16.msra.mxu0 %v945_v10  ;;  %v962_v27 = vld [vmem:[%s1260_s1 + $0x88] sm:$0xff]   ;;  %v966_v32 = vld [vmem:[%s1260_s1 + $0x80] sm:$0xff]   ;;  %v971_v49 = vld [vmem:[%s1260_s1 + $0x1b8] sm:$0xff]  }
   0xd   :  { %871 = vmatpush3.bf16.msra.mxu1 %v946_v11  ;;  %850 = vmatprep.subr.bf16.mxu0 %v947_v12  ;;  %v23_v34 = vld [vmem:[%s1259_s0] sm:$0xff]  ;;  %v972_v52 = vld [vmem:[%s1260_s1 + $0x170] sm:$0xff]   ;;  %v976_v56 = vld [vmem:[%s1260_s1 + $0x168] sm:$0xff]  }
   0xe   :  { %872 = vmatprep.subr.bf16.mxu1 %v948_v13  ;;  %v27_v40 = vcombine.high %v23_v34, %v23_v34  ;;  %v34_v42 = vrot.slane %v23_v34, %v1151_v41  ;;  %v973_v53 = vld [vmem:[%s1260_s1 + $0x1f0] sm:$0xff]   ;;  %v977_v57 = vld [vmem:[%s1260_s1 + $0x1e8] sm:$0xff]   ;;  %v980_v60 = vld [vmem:[%s1260_s1 + $0x160] sm:$0xff]  }
   0xf   :  { %v974_v54 = vld [vmem:[%s1260_s1 + $0x130] sm:$0xff]   ;;  %v978_v58 = vld [vmem:[%s1260_s1 + $0x128] sm:$0xff]   ;;  %v981_v61 = vld [vmem:[%s1260_s1 + $0x1e0] sm:$0xff]  }
  0x10   :  { %851 = vmatpush3.bf16.msra.mxu0 %v949_v14  ;;  %v41_v43 = vrot.slane %v27_v40, %v1151_v41  ;;  %v42_v44 = vcombine.high %v34_v42, %v34_v42  ;;  %v69_v47 = vpack.c.bf16 %v34_v42, %v34_v42  ;;  %v975_v55 = vld [vmem:[%s1260_s1 + $0x1b0] sm:$0xff]   ;;  %v979_v59 = vld [vmem:[%s1260_s1 + $0x1a8] sm:$0xff]   ;;  %v982_v62 = vld [vmem:[%s1260_s1 + $0x120] sm:$0xff]  }
  0x11   :  { %873 = vmatpush3.bf16.msra.mxu1 %v950_v15  ;;  %852 = vmatprep.subr.bf16.mxu0 %v951_v16  ;;  %v983_v63 = vld [vmem:[%s1260_s1 + $0x1a0] sm:$0xff]   ;;  %v984_v0 = vld [vmem:[%s1260_s1 + $0x158] sm:$0xff]   ;;  %v988_v4 = vld [vmem:[%s1260_s1 + $0x150] sm:$0xff]  }
  0x12   :  { %874 = vmatprep.subr.bf16.mxu1 %v952_v17  ;;  %v43_v45 = vcombine.high %v41_v43, %v41_v43  ;;  %v71_v48 = vpack.c.bf16 %v41_v43, %v41_v43  ;;  %v70_v50 = vpack.c.bf16 %v42_v44, %v42_v44  ;;  %v985_v1 = vld [vmem:[%s1260_s1 + $0x1d8] sm:$0xff]   ;;  %v989_v5 = vld [vmem:[%s1260_s1 + $0x1d0] sm:$0xff]   ;;  %v992_v8 = vld [vmem:[%s1260_s1 + $0x148] sm:$0xff]  }
  0x13   :  { %v986_v2 = vld [vmem:[%s1260_s1 + $0x118] sm:$0xff]   ;;  %v990_v6 = vld [vmem:[%s1260_s1 + $0x110] sm:$0xff]   ;;  %v993_v9 = vld [vmem:[%s1260_s1 + $0x1c8] sm:$0xff]  }
  0x14   :  { %853 = vmatpush3.bf16.msra.mxu0 %v953_v18  ;;  %v72_v51 = vpack.c.bf16 %v43_v45, %v43_v45  ;;  %621 = vmatprep.mubr.bf16.mxu0 %v70_v50  ;;  %v987_v3 = vld [vmem:[%s1260_s1 + $0x198] sm:$0xff]   ;;  %v991_v7 = vld [vmem:[%s1260_s1 + $0x190] sm:$0xff]   ;;  %v24_v10 = vld [vmem:[%s1259_s0 + $0x8] sm:$0xff] }
  0x15   :  { %875 = vmatpush3.bf16.msra.mxu1 %v954_v19  ;;  %854 = vmatprep.subr.bf16.mxu0 %v955_v20 }
  0x16   :  { %876 = vmatprep.subr.bf16.mxu1 %v956_v21  ;;  %661 = vmatprep.mubr.bf16.mxu1 %v72_v51 }
  0x18   :  { %855 = vmatpush3.bf16.msra.mxu0 %v957_v22 }
  0x19   :  { %877 = vmatpush3.bf16.msra.mxu1 %v958_v23  ;;  %856 = vmatprep.subr.bf16.mxu0 %v959_v24 }
  0x1a   :  { %878 = vmatprep.subr.bf16.mxu1 %v960_v25 }
  0x1c   :  { %857 = vmatpush3.bf16.msra.mxu0 %v961_v26 }
  0x1d   :  { %879 = vmatpush3.bf16.msra.mxu1 %v962_v27  ;;  %858 = vmatprep.subr.bf16.mxu0 %v963_v29 }
  0x1e   :  { %880 = vmatprep.subr.bf16.mxu1 %v964_v30 }
  0x20   :  { %859 = vmatpush3.bf16.msra.mxu0 %v965_v31 }
  0x21   :  { %881 = vmatpush3.bf16.msra.mxu1 %v966_v32  ;;  %888 = vmatprep.subr.bf16.mxu0 %v968_v35 }
  0x22   :  { %910 = vmatprep.subr.bf16.mxu1 %v969_v38 }
  0x23   :  { %622 = vmatmul.mubr.bf16.vlgmr.msra.gmra.mxu0 %v69_v47 }
  0x24   :  { %662 = vmatmul.mubr.bf16.vlgmr.msra.gmra.mxu1 %v71_v48  ;;  %889 = vmatpush3.bf16.msra.mxu0 %v970_v46 }
  0x25   :  { %911 = vmatpush3.bf16.msra.mxu1 %v971_v49  ;;  %890 = vmatprep.subr.bf16.mxu0 %v972_v52 }
  0x26   :  { %912 = vmatprep.subr.bf16.mxu1 %v973_v53 }
  0x28   :  { %891 = vmatpush3.bf16.msra.mxu0 %v974_v54 }
  0x29   :  { %913 = vmatpush3.bf16.msra.mxu1 %v975_v55  ;;  %892 = vmatprep.subr.bf16.mxu0 %v976_v56 }
  0x2a   :  { %914 = vmatprep.subr.bf16.mxu1 %v977_v57 }
  0x2c   :  { %893 = vmatpush3.bf16.msra.mxu0 %v978_v58 }
  0x2d   :  { %915 = vmatpush3.bf16.msra.mxu1 %v979_v59  ;;  %894 = vmatprep.subr.bf16.mxu0 %v980_v60 }
  0x2e   :  { %916 = vmatprep.subr.bf16.mxu1 %v981_v61 }
  0x30   :  { %895 = vmatpush3.bf16.msra.mxu0 %v982_v62 }
  0x31   :  { %917 = vmatpush3.bf16.msra.mxu1 %v983_v63  ;;  %896 = vmatprep.subr.bf16.mxu0 %v984_v0 }
  0x32   :  { %918 = vmatprep.subr.bf16.mxu1 %v985_v1 }
  0x34   :  { %897 = vmatpush3.bf16.msra.mxu0 %v986_v2 }
  0x35   :  { %919 = vmatpush3.bf16.msra.mxu1 %v987_v3  ;;  %898 = vmatprep.subr.bf16.mxu0 %v988_v4 }
  0x36   :  { %920 = vmatprep.subr.bf16.mxu1 %v989_v5 }
  0x37   :  { %8 = vsyncpa [#allocation4], 0  ;;  %v51_v11 = vrot.slane %v24_v10, %v1151_v41  ;;  %v44_v12 = vcombine.high %v24_v10, %v24_v10  ;;  %v994_v13 = vld [vmem:[%s1260_s1 + $0x108] sm:$0xff]   ;;  %v996_v17 = vld [vmem:[%s1260_s1 + $0x140] sm:$0xff]   ;;  %vm20_vm0 = vcmask 74752   ;;  %v1024_v26 = vmov 0.0  }
  0x38   :  { %899 = vmatpush3.bf16.msra.mxu0 %v990_v6  ;;  %v995_v14 = vld [vmem:[%s1260_s1 + $0x188] sm:$0xff]   ;;  %v997_v18 = vld [vmem:[%s1260_s1 + $0x1c0] sm:$0xff]   ;;  %21 = vst.msk [vmem:[#allocation2] sm:$0x3] %vm20_vm0, %v1024_v26  ;;  %s1025_s9 = smov [#allocation3]  }
  0x39   :  { %921 = vmatpush3.bf16.msra.mxu1 %v991_v7  ;;  %v59_v15 = vcombine.high %v51_v11, %v51_v11  ;;  %v58_v16 = vrot.slane %v44_v12, %v1151_v41  ;;  %900 = vmatprep.subr.bf16.mxu0 %v992_v8  ;;  %v998_v21 = vld [vmem:[%s1260_s1 + $0x100] sm:$0xff]   ;;  %v73_v24 = vpack.c.bf16 %v51_v11, %v51_v11  ;;  %s771_s10 = sshll.u32 %s1025_s9, 4  ;;  %s772_s10 = int_to_ptr.vmem [resolvable:$true] %s771_s10 }
  0x3a   :  { %922 = vmatprep.subr.bf16.mxu1 %v993_v9  ;;  %v999_v22 = vld [vmem:[%s1260_s1 + $0x180] sm:$0xff]   ;;  %s1001_s11 = scalar_lea.vmem %s772_s10, 32  ;;  %p1006_p1 = scmp.lt.s32.totalorder %s772_s10, %s772_s10 }
  0x3b   :  { %v74_v19 = vpack.c.bf16 %v59_v15, %v59_v15  ;;  %v60_v20 = vcombine.high %v58_v16, %v58_v16  ;;  %v75_v25 = vpack.c.bf16 %v58_v16, %v58_v16  ;;  %v843_v52 = vld [vmem:[%s1261_s2] ss:$0 sm:$0xff]  ;;  %p1002_p0 = scmp.ne.s32.totalorder %s772_s10, %s1001_s11  ;;  %p1007_p2 = scmp.lt.s32.totalorder %s1001_s11, %s1001_s11 }
  0x3c   :  { %901 = vmatpush3.bf16.msra.mxu0 %v994_v13 }
  0x3d   :  { %923 = vmatpush3.bf16.msra.mxu1 %v995_v14  ;;  %v76_v23 = vpack.c.bf16 %v60_v20, %v60_v20  ;;  %902 = vmatprep.subr.bf16.mxu0 %v996_v17  ;;  %p1008_p3 = por %p1007_p2, %p1006_p1 }
  0x3e   :  { %924 = vmatprep.subr.bf16.mxu1 %v997_v18  ;;  %701 = vmatprep.mubr.bf16.mxu0 %v74_v19 }
  0x3f   :  { %741 = vmatprep.mubr.bf16.mxu1 %v76_v23  ;;  %v22_v49 = vld [vmem:[#allocation2] sm:$0x3]  ;;  %p1009_p4 = pnand %p1008_p3, %p1002_p0 }
  0x40   :  { %903 = vmatpush3.bf16.msra.mxu0 %v998_v21 }
  0x41   :  { %925 = vmatpush3.bf16.msra.mxu1 %v999_v22 }
  0x43   :  { %702 = vmatmul.mubr.bf16.vlgmr.msra.gmra.mxu0 %v73_v24 }
  0x44   :  { %742 = vmatmul.mubr.bf16.vlgmr.msra.gmra.mxu1 %v75_v25 }
  0xe3   :  { %v860_v27 = vpop.f32.mrf.mxu0 }
  0xe4   :  { %v882_v28 = vpop.f32.mrf.mxu1 }
  0xe5   :  { %v861_v29 = vpop.f32.mrf.mxu0 }
  0xe6   :  { %v883_v30 = vpop.f32.mrf.mxu1  ;;  %v862_v35 = vadd.f32 %v861_v29, %v860_v27 }
  0xe7   :  { %v863_v31 = vpop.f32.mrf.mxu0  ;;  %v884_v36 = vadd.f32 %v883_v30, %v882_v28 }
  0xe8   :  { %v885_v32 = vpop.f32.mrf.mxu1 }
  0xe9   :  { %v864_v33 = vpop.f32.mrf.mxu0  ;;  %v664_v41 = vadd.f32 %v884_v36, %v862_v35 }
  0xea   :  { %v886_v34 = vpop.f32.mrf.mxu1 }
 0x103   :  { %v904_v37 = vpop.f32.mrf.mxu0 }
 0x104   :  { %v926_v38 = vpop.f32.mrf.mxu1 }
 0x105   :  { %v905_v39 = vpop.f32.mrf.mxu0 }
 0x106   :  { %v927_v40 = vpop.f32.mrf.mxu1  ;;  %v906_v42 = vadd.f32 %v905_v39, %v904_v37 }
 0x107   :  { %v907_v43 = vpop.f32.mrf.mxu0  ;;  %v928_v46 = vadd.f32 %v927_v40, %v926_v38 }
 0x108   :  { %v929_v44 = vpop.f32.mrf.mxu1  ;;  %v704_v45 = vadd.f32 %v906_v42, %v664_v41 }
 0x109   :  { %v908_v47 = vpop.f32.mrf.mxu0 }
 0x10a   :  { %v930_v48 = vpop.f32.mrf.mxu1  ;;  %v744_v50 = vadd.f32 %v928_v46, %v704_v45 }
 0x10c   :  { %v749_v51 = vadd.f32 %v744_v50, %v22_v49 }
 0x10e   :  { %751 = vst.msk [vmem:[#allocation2] sm:$0x3] %vm20_vm0, %v749_v51 }
 0x115   :  { %v755_v53 = vld [vmem:[#allocation2] sm:$0x3] }
 0x116   :  { %v763_v54 = vadd.f32 %v843_v52, %v755_v53 }
 0x118   :  { %764 = vst.msk [vmem:[#allocation3] sm:$0x3] %vm20_vm0, %v763_v54 }
 0x119   :  { %1012 = shalt.err (!%p1009_p4)
}
 0x11a   :  { %774 = dma.vmem_to_hbm [thread:$0]  %s772_s10, 32, %s1262_s3, [#allocation4]  }
 0x11b   :  { %1021 = dma.done.wait [#allocation4], 32  }
 0x11c   :  { %1022 = vsyncadd [#allocation4], 4294967264 }
 0x11d   :  { %778 = vsyncpa [#allocation4], 1 }

</bundles_post_ra>
